<compile_context>
chip_gen: v7x
topology: tpu7x:2x2x1
jax: 0.10.0
libtpu: 0.0.40
codegen_flags: <defaults>
</compile_context>

<pallas_src>
import functools

import jax
import jax.numpy as jnp
from jax.experimental import pallas as pl
from jax.experimental.pallas import tpu as pltpu


# Lane-dense / MXU-friendly padded channel widths.
_C1 = 256      # conv1 / conv2 outputs: 192 -> 256
_C3 = 128      # conv3 output:          96  -> 128
_C4 = 128      # conv4 output:          48  -> 128
_K1 = 128      # conv1 im2col contraction: 27 -> 128


def _pick_chunk(n, candidates):
    for c in candidates:
        if n % c == 0:
            return c
    return n


# ----------------------------------------------------------------------------
# Fused ESPCN kernel: one batch element per grid step.
# ----------------------------------------------------------------------------
def _espcn_kernel(x1_ref, w1_ref, b1_ref, w2_ref, b2_ref, w3_ref, b3_ref,
                  w4_ref, b4_ref, masks_ref, o_ref,
                  p_ref, rp_ref, acc_ref, *, H, W, MC, EC):
    # x1_ref    : (1, H*W, 128)   bf16 im2col'd conv1 input
    # w*_ref    : bf16 weights, b*_ref : f32 biases (padded, see wrapper)
    # masks_ref : (2, (H+2)*W, 256) f32 multiplicative x-edge masks (host-built)
    # o_ref     : (1, H*W, 128)   bf16 output (sigmoid(conv4), padded channels)
    # p_ref     : ((H+2)*W, 256)  f32  padded/flattened activation scratch
    # rp_ref    : ((H+2)*W, 768)  bf16 row-patch [left|center|right] scratch
    # acc_ref   : (MC, 256)       f32  matmul accumulator scratch
    HW = H * W
    NP = (H + 2) * W            # padded rows: one zero image-row above/below
    nck = HW // MC
    mm_dt = rp_ref.dtype        # bfloat16

    # Zero the top/bottom conv-padding image rows once (full channel width).
    # Interior rows are fully written by conv1, so p_ref is never read stale.
    zrow = jnp.zeros((W, _C1), p_ref.dtype)
    p_ref[pl.ds(0, W), :] = zrow
    p_ref[pl.ds((H + 1) * W, W), :] = zrow

    # ---- conv1: single K=128 lane-dense matmul per row chunk + tanh --------
    w1 = w1_ref[...]
    b1 = b1_ref[...]
    for e0 in range(0, HW, EC):
        acc = jnp.dot(x1_ref[0, pl.ds(e0, EC), :], w1,
                      preferred_element_type=jnp.float32)
        p_ref[pl.ds(W + e0, EC), :] = jnp.tanh(acc + b1)

    # ---- conv2..conv4: shared 3x3 conv body ---------------------------------
    def conv3x3(cin, w_ref, store_fn):
        # rp[r] = [x(y, x-1) | x(y, x) | x(y, x+1)] (each `cin` wide) for every
        # padded row r.  Left/right neighbours come from XLU sublane rolls of
        # the single aligned center load (no misaligned loads); the rolled
        # rows that cross an image-row boundary are zeroed by the host-built
        # multiplicative masks.  The roll wrap rows (r=0 / r=NP-1) hit zeroed
        # pad rows and are also masked, so nothing uninitialized is read.
        ctr = p_ref[:, 0:cin]
        lm = masks_ref[0, :, 0:cin]
        rm = masks_ref[1, :, 0:cin]
        lft = pltpu.roll(ctr, 1, axis=0) * lm          # lft[r] = ctr[r-1]
        rgt = pltpu.roll(ctr, NP - 1, axis=0) * rm     # rgt[r] = ctr[r+1]
        rp_ref[:, 0:cin] = lft.astype(mm_dt)
        rp_ref[:, cin:2 * cin] = ctr.astype(mm_dt)
        rp_ref[:, 2 * cin:3 * cin] = rgt.astype(mm_dt)

        cout = w_ref.shape[2]
        # Accumulate over the 3 vertical taps into a VMEM f32 scratch so the
        # M streamed per MXU weight stage is MC (up to 256) without needing a
        # 64-vreg register accumulator.
        # TODO(synk): switch to lax.fori_loop(unroll=True) once nck > 4
        # (larger images / band-grid), per the vreg-pressure review item.
        for ci in range(nck):
            m0 = ci * MC
            acc_ref[:, 0:cout] = jnp.dot(
                rp_ref[pl.ds(m0, MC), 0:3 * cin], w_ref[0],
                preferred_element_type=jnp.float32)
            for dy in (1, 2):
                acc_ref[:, 0:cout] += jnp.dot(
                    rp_ref[pl.ds(dy * W + m0, MC), 0:3 * cin], w_ref[dy],
                    preferred_element_type=jnp.float32)
            store_fn(m0, cout)

    def hidden_store(b_ref):
        bias = b_ref[...]
        def _s(m0, cout):
            # Epilogue in EC-row passes to bound live vreg pressure.
            for e0 in range(0, MC, EC):
                pre = acc_ref[pl.ds(e0, EC), 0:cout] + bias
                p_ref[pl.ds(W + m0 + e0, EC), 0:cout] = jnp.tanh(pre)
        return _s

    b4 = b4_ref[...]

    def final_store(m0, cout):
        for e0 in range(0, MC, EC):
            pre = acc_ref[pl.ds(e0, EC), 0:cout] + b4
            y = jax.nn.sigmoid(pre).astype(o_ref.dtype)   # bf16, 128 lanes
            o_ref[:, pl.ds(m0 + e0, EC), :] = y.reshape(1, EC, cout)

    conv3x3(_C1, w2_ref, hidden_store(b2_ref))
    conv3x3(_C1, w3_ref, hidden_store(b3_ref))
    conv3x3(_C3, w4_ref, final_store)


# ----------------------------------------------------------------------------
# Host-side parameter / input preparation (pure layout, done once per call).
# ----------------------------------------------------------------------------
def _pad_to(x, axis, size):
    pad = [(0, 0)] * x.ndim
    pad[axis] = (0, size - x.shape[axis])
    return jnp.pad(x, pad)


def _prep_params(params):
    # conv1: HWIO (3,3,3,192) -> im2col weight (27,192) -> padded (128,256)
    w1 = params["w1"].reshape(27, 3 * 64)
    w1 = _pad_to(_pad_to(w1, 0, _K1), 1, _C1).astype(jnp.bfloat16)
    b1 = _pad_to(params["b1"], 1, _C1)

    def prep_hidden(w, cin_p, cout_p):
        w = _pad_to(_pad_to(w, 2, cin_p), 3, cout_p)      # (3,3,cin_p,cout_p)
        return w.reshape(3, 3 * cin_p, cout_p).astype(jnp.bfloat16)

    w2 = prep_hidden(params["w2"], _C1, _C1)
    b2 = _pad_to(params["b2"], 1, _C1)
    w3 = prep_hidden(params["w3"], _C1, _C3)
    b3 = _pad_to(params["b3"], 1, _C3)
    w4 = prep_hidden(params["w4"], _C3, _C4)
    b4 = _pad_to(params["b4"], 1, _C4)
    return w1, b1, w2, b2, w3, b3, w4, b4


def _im2col_conv1(x_nhwc):
    # TODO(synk): for large H,W fold conv1 into the kernel (row-patch trick on
    # a channel-padded input) to avoid this ~20x inflated HBM copy; negligible
    # at 16x16.
    N, H, W, _ = x_nhwc.shape
    xp = jnp.pad(x_nhwc, ((0, 0), (1, 1), (1, 1), (0, 0)))
    cols = [xp[:, dy:dy + H, dx:dx + W, :]
            for dy in range(3) for dx in range(3)]          # (dy, dx, ci) order
    x1 = jnp.concatenate(cols, axis=-1)                     # (N, H, W, 27)
    x1 = jnp.pad(x1, ((0, 0), (0, 0), (0, 0), (0, _K1 - 27)))
    return x1.reshape(N, H * W, _K1).astype(jnp.bfloat16)


def pixel_shuffle_nhwc(x, r):
    # Matches torch.nn.PixelShuffle channel ordering, expressed in NHWC.
    N, H, W, Crr = x.shape
    C = Crr // (r * r)
    x = x.reshape(N, H, W, C, r, r)
    x = x.transpose(0, 1, 4, 2, 5, 3)       # (N, H, r, W, r, C)
    return x.reshape(N, H * r, W * r, C)


# ----------------------------------------------------------------------------
# ESPCN forward (NCHW in / NCHW out, like the PyTorch module).
# ----------------------------------------------------------------------------
def espcn_forward(x_nchw, params, upscale=4):
    N, Cin, H, W = x_nchw.shape
    assert Cin == 3 and 3 * upscale ** 2 <= _C4
    assert W % 8 == 0, "W must be a multiple of 8 for aligned row chunks"
    HW = H * W
    NP = (H + 2) * W
    MC = _pick_chunk(HW, (256, 128, 64, 32, 16, 8))   # matmul M chunk
    EC = _pick_chunk(MC, (128, 64, 32, 16, 8))        # epilogue sub-chunk
    # TODO(synk): add a halo'd row-band grid axis before scaling H,W (VMEM
    # bound on v7x, and the parallel axis its two TensorCores need).

    x = jnp.transpose(x_nchw, (0, 2, 3, 1))                 # NCHW -> NHWC
    x1 = _im2col_conv1(x)
    w1, b1, w2, b2, w3, b3, w4, b4 = _prep_params(params)

    # Host-precomputed multiplicative x-edge masks for the rolled neighbours:
    # masks[0] zeroes rows with x == 0 (left tap), masks[1] rows with x == W-1.
    xpos = jnp.arange(NP, dtype=jnp.int32) % W
    lmask = (xpos != 0).astype(jnp.float32)
    rmask = (xpos != W - 1).astype(jnp.float32)
    masks = jnp.broadcast_to(
        jnp.stack([lmask, rmask], axis=0)[:, :, None], (2, NP, _C1))

    flops = 2 * N * HW * (_K1 * _C1 + 9 * _C1 * _C1 + 9 * _C1 * _C3
                          + 9 * _C3 * _C4)
    trans = N * HW * (_C1 + _C1 + _C3 + _C4)
    bytes_acc = (x1.size * 2
                 + (w1.size + w2.size + w3.size + w4.size) * 2
                 + (b1.size + b2.size + b3.size + b4.size) * 4
                 + masks.size * 4
                 + N * HW * _C4 * 2)

    kern = functools.partial(_espcn_kernel, H=H, W=W, MC=MC, EC=EC)
    out_flat = pl.pallas_call(
        kern,
        out_shape=jax.ShapeDtypeStruct((N, HW, _C4), jnp.bfloat16),
        grid_spec=pltpu.PrefetchScalarGridSpec(
            num_scalar_prefetch=0,
            grid=(N,),
            in_specs=[
                pl.BlockSpec((1, HW, _K1), lambda n: (n, 0, 0)),
                pl.BlockSpec((_K1, _C1), lambda n: (0, 0)),
                pl.BlockSpec((1, _C1), lambda n: (0, 0)),
                pl.BlockSpec((3, 3 * _C1, _C1), lambda n: (0, 0, 0)),
                pl.BlockSpec((1, _C1), lambda n: (0, 0)),
                pl.BlockSpec((3, 3 * _C1, _C3), lambda n: (0, 0, 0)),
                pl.BlockSpec((1, _C3), lambda n: (0, 0)),
                pl.BlockSpec((3, 3 * _C3, _C4), lambda n: (0, 0, 0)),
                pl.BlockSpec((1, _C4), lambda n: (0, 0)),
                pl.BlockSpec((2, NP, _C1), lambda n: (0, 0, 0)),
            ],
            out_specs=pl.BlockSpec((1, HW, _C4), lambda n: (n, 0, 0)),
            scratch_shapes=[
                pltpu.VMEM((NP, _C1), jnp.float32),        # padded activations
                pltpu.VMEM((NP, 3 * _C1), jnp.bfloat16),   # row-patch LHS
                pltpu.VMEM((MC, _C1), jnp.float32),        # f32 accumulator
            ],
        ),
        compiler_params=pltpu.CompilerParams(
            dimension_semantics=("parallel",),
            vmem_limit_bytes=32 * 1024 * 1024,
        ),
        cost_estimate=pl.CostEstimate(
            flops=flops, transcendentals=trans, bytes_accessed=bytes_acc),
    )(x1, w1, b1, w2, b2, w3, b3, w4, b4, masks)

    cout = 3 * upscale ** 2
    y = out_flat[:, :, :cout].reshape(N, H, W, cout)
    y = pixel_shuffle_nhwc(y, upscale)
    return jnp.transpose(y, (0, 3, 1, 2)).astype(jnp.float32)  # NHWC -> NCHW


def init_params(key, upscale=4, k=3):
    """Deterministic init matching the PyTorch module's parameter shapes."""
    dims = [
        (3, 3 * 64),                  # conv1
        (3 * 64, 3 * 64),             # conv2
        (3 * 64, 3 * 32),             # conv3
        (3 * 32, 3 * upscale ** 2),   # conv4
    ]
    params = {}
    for idx, (cin, cout) in enumerate(dims, start=1):
        key, kw, kb = jax.random.split(key, 3)
        bound = 1.0 / float(jnp.sqrt(cin * k * k))
        params[f"w{idx}"] = jax.random.uniform(
            kw, (k, k, cin, cout), jnp.float32, -bound, bound)   # HWIO
        params[f"b{idx}"] = jax.random.uniform(
            kb, (1, cout), jnp.float32, -bound, bound)
    return params


# ----------------------------------------------------------------------------
# Pure-JAX reference (lax conv, f32 weights) for correctness.
# ----------------------------------------------------------------------------
def espcn_reference(x_nchw, params, upscale=4):
    x = jnp.transpose(x_nchw, (0, 2, 3, 1))
    dn = ("NHWC", "HWIO", "NHWC")
    for i in (1, 2, 3, 4):
        x = jax.lax.conv_general_dilated(
            x, params[f"w{i}"], (1, 1), "SAME", dimension_numbers=dn)
        x = x + params[f"b{i}"].reshape(1, 1, 1, -1)
        if i < 4:
            x = jnp.tanh(x)
    x = pixel_shuffle_nhwc(x, upscale)
    x = jax.nn.sigmoid(x)
    return jnp.transpose(x, (0, 3, 1, 2))


if __name__ == "__main__":
    key = jax.random.PRNGKey(0)
    key, kx = jax.random.split(key)

    upscale = 4
    x = jax.random.normal(kx, (2, 3, 16, 16), jnp.float32)   # NCHW, like torch
    params = init_params(key, upscale=upscale)

    fwd = jax.jit(functools.partial(espcn_forward, upscale=upscale))
    out = jax.block_until_ready(fwd(x, params))

    assert out.shape == (2, 3, 16 * upscale, 16 * upscale), out.shape

    ref = jax.block_until_ready(espcn_reference(x, params, upscale=upscale))
    max_err = float(jnp.max(jnp.abs(out - ref)))
    assert max_err < 3e-2, f"mismatch vs reference: {max_err}"

    print("KERNEL_OK")
</pallas_src>

<mosaic_0001>
module attributes {stable_mosaic.version = 11 : i64} {
  func.func @_espcn_kernel(%arg0: i32, %arg1: memref<1x256x128xbf16, #tpu.memory_space<vmem>>, %arg2: memref<128x256xbf16, #tpu.memory_space<vmem>>, %arg3: memref<1x256xf32, #tpu.memory_space<vmem>>, %arg4: memref<3x768x256xbf16, #tpu.memory_space<vmem>>, %arg5: memref<1x256xf32, #tpu.memory_space<vmem>>, %arg6: memref<3x768x128xbf16, #tpu.memory_space<vmem>>, %arg7: memref<1x128xf32, #tpu.memory_space<vmem>>, %arg8: memref<3x384x128xbf16, #tpu.memory_space<vmem>>, %arg9: memref<1x128xf32, #tpu.memory_space<vmem>>, %arg10: memref<2x288x256xf32, #tpu.memory_space<vmem>>, %arg11: memref<1x256x128xbf16, #tpu.memory_space<vmem>>, %arg12: memref<288x256xf32, #tpu.memory_space<vmem>>, %arg13: memref<288x768xbf16, #tpu.memory_space<vmem>>, %arg14: memref<256x256xf32, #tpu.memory_space<vmem>>) attributes {dimension_semantics = [#tpu.dimension_semantics<parallel>], iteration_bounds = array<i64: 2>, scalar_prefetch = 0 : i64, scratch_operands = 3 : i64, tpu.core_type = #tpu.core_type<tc>, window_params = [{transform_indices = @transform_0, window_bounds = array<i64: 1, 256, 128>}, {pipeline_mode = #tpu.pipeline_mode<synchronous>, transform_indices = @transform_1, window_bounds = array<i64: 128, 256>}, {pipeline_mode = #tpu.pipeline_mode<synchronous>, transform_indices = @transform_2, window_bounds = array<i64: 1, 256>}, {pipeline_mode = #tpu.pipeline_mode<synchronous>, transform_indices = @transform_3, window_bounds = array<i64: 3, 768, 256>}, {pipeline_mode = #tpu.pipeline_mode<synchronous>, transform_indices = @transform_4, window_bounds = array<i64: 1, 256>}, {pipeline_mode = #tpu.pipeline_mode<synchronous>, transform_indices = @transform_5, window_bounds = array<i64: 3, 768, 128>}, {pipeline_mode = #tpu.pipeline_mode<synchronous>, transform_indices = @transform_6, window_bounds = array<i64: 1, 128>}, {pipeline_mode = #tpu.pipeline_mode<synchronous>, transform_indices = @transform_7, window_bounds = array<i64: 3, 384, 128>}, {pipeline_mode = #tpu.pipeline_mode<synchronous>, transform_indices = @transform_8, window_bounds = array<i64: 1, 128>}, {pipeline_mode = #tpu.pipeline_mode<synchronous>, transform_indices = @transform_9, window_bounds = array<i64: 2, 288, 256>}, {transform_indices = @transform_10, window_bounds = array<i64: 1, 256, 128>}]} {
    %cst = arith.constant 0.000000e+00 : f32
    %0 = vector.broadcast %cst : f32 to vector<16x256xf32>
    %c0 = arith.constant 0 : index
    %c0_0 = arith.constant 0 : index
    %1 = vector.load %arg12[%c0, %c0_0] : memref<288x256xf32, #tpu.memory_space<vmem>>, vector<16x256xf32>
    tpu.vector_store %arg12[%c0, %c0_0], %0 {strides = array<i32>} : memref<288x256xf32, #tpu.memory_space<vmem>>, vector<16x256xf32>,
    %c272 = arith.constant 272 : index
    %c0_1 = arith.constant 0 : index
    %2 = vector.load %arg12[%c272, %c0_1] : memref<288x256xf32, #tpu.memory_space<vmem>>, vector<16x256xf32>
    tpu.vector_store %arg12[%c272, %c0_1], %0 {strides = array<i32>} : memref<288x256xf32, #tpu.memory_space<vmem>>, vector<16x256xf32>,
    %c0_2 = arith.constant 0 : index
    %c0_3 = arith.constant 0 : index
    %3 = vector.load %arg2[%c0_2, %c0_3] : memref<128x256xbf16, #tpu.memory_space<vmem>>, vector<128x256xbf16>
    %c0_4 = arith.constant 0 : index
    %c0_5 = arith.constant 0 : index
    %4 = vector.load %arg3[%c0_4, %c0_5] : memref<1x256xf32, #tpu.memory_space<vmem>>, vector<1x256xf32>
    %c0_6 = arith.constant 0 : index
    %c0_7 = arith.constant 0 : index
    %c0_8 = arith.constant 0 : index
    %5 = vector.load %arg1[%c0_6, %c0_7, %c0_8] : memref<1x256x128xbf16, #tpu.memory_space<vmem>>, vector<1x128x128xbf16>
    %6 = vector.shape_cast %5 : vector<1x128x128xbf16> to vector<128x128xbf16>
    %cst_9 = arith.constant dense<0.000000e+00> : vector<128x256xf32>
    %7 = tpu.matmul %6, %3, %cst_9 {dimension_numbers = #tpu.dot_dimension_numbers<[1], [0], [0], [1], [0, 0, 1, 1], [], []>} : vector<128x128xbf16>, vector<128x256xbf16>, vector<128x256xf32> -> vector<128x256xf32>
    %8 = vector.broadcast %4 : vector<1x256xf32> to vector<128x256xf32>
    %9 = arith.addf %7, %8 : vector<128x256xf32>
    %10 = math.tanh %9 : vector<128x256xf32>
    %c16 = arith.constant 16 : index
    %c0_10 = arith.constant 0 : index
    %11 = vector.load %arg12[%c16, %c0_10] : memref<288x256xf32, #tpu.memory_space<vmem>>, vector<128x256xf32>
    tpu.vector_store %arg12[%c16, %c0_10], %10 {strides = array<i32>} : memref<288x256xf32, #tpu.memory_space<vmem>>, vector<128x256xf32>,
    %c0_11 = arith.constant 0 : index
    %c128 = arith.constant 128 : index
    %c0_12 = arith.constant 0 : index
    %12 = vector.load %arg1[%c0_11, %c128, %c0_12] : memref<1x256x128xbf16, #tpu.memory_space<vmem>>, vector<1x128x128xbf16>
    %13 = vector.shape_cast %12 : vector<1x128x128xbf16> to vector<128x128xbf16>
    %cst_13 = arith.constant dense<0.000000e+00> : vector<128x256xf32>
    %14 = tpu.matmul %13, %3, %cst_13 {dimension_numbers = #tpu.dot_dimension_numbers<[1], [0], [0], [1], [0, 0, 1, 1], [], []>} : vector<128x128xbf16>, vector<128x256xbf16>, vector<128x256xf32> -> vector<128x256xf32>
    %15 = vector.broadcast %4 : vector<1x256xf32> to vector<128x256xf32>
    %16 = arith.addf %14, %15 : vector<128x256xf32>
    %17 = math.tanh %16 : vector<128x256xf32>
    %c144 = arith.constant 144 : index
    %c0_14 = arith.constant 0 : index
    %18 = vector.load %arg12[%c144, %c0_14] : memref<288x256xf32, #tpu.memory_space<vmem>>, vector<128x256xf32>
    tpu.vector_store %arg12[%c144, %c0_14], %17 {strides = array<i32>} : memref<288x256xf32, #tpu.memory_space<vmem>>, vector<128x256xf32>,
    %c0_15 = arith.constant 0 : index
    %c0_16 = arith.constant 0 : index
    %19 = vector.load %arg9[%c0_15, %c0_16] : memref<1x128xf32, #tpu.memory_space<vmem>>, vector<1x128xf32>
    %c0_17 = arith.constant 0 : index
    %c0_18 = arith.constant 0 : index
    %20 = vector.load %arg5[%c0_17, %c0_18] : memref<1x256xf32, #tpu.memory_space<vmem>>, vector<1x256xf32>
    %c0_19 = arith.constant 0 : index
    %c0_20 = arith.constant 0 : index
    %21 = vector.load %arg12[%c0_19, %c0_20] : memref<288x256xf32, #tpu.memory_space<vmem>>, vector<288x256xf32>
    %c0_21 = arith.constant 0 : index
    %c0_22 = arith.constant 0 : index
    %c0_23 = arith.constant 0 : index
    %22 = vector.load %arg10[%c0_21, %c0_22, %c0_23] : memref<2x288x256xf32, #tpu.memory_space<vmem>>, vector<1x288x256xf32>
    %23 = vector.shape_cast %22 : vector<1x288x256xf32> to vector<288x256xf32>
    %c1 = arith.constant 1 : index
    %c0_24 = arith.constant 0 : index
    %c0_25 = arith.constant 0 : index
    %24 = vector.load %arg10[%c1, %c0_24, %c0_25] : memref<2x288x256xf32, #tpu.memory_space<vmem>>, vector<1x288x256xf32>
    %25 = vector.shape_cast %24 : vector<1x288x256xf32> to vector<288x256xf32>
    %c1_i32 = arith.constant 1 : i32
    %26 = tpu.dynamic_rotate %21 by %c1_i32 dim 0 : vector<288x256xf32>, i32 -> vector<288x256xf32>
    %27 = arith.mulf %26, %23 : vector<288x256xf32>
    %c287_i32 = arith.constant 287 : i32
    %28 = tpu.dynamic_rotate %21 by %c287_i32 dim 0 : vector<288x256xf32>, i32 -> vector<288x256xf32>
    %29 = arith.mulf %28, %25 : vector<288x256xf32>
    %30 = arith.truncf %27 : vector<288x256xf32> to vector<288x256xbf16>
    %c0_26 = arith.constant 0 : index
    %c0_27 = arith.constant 0 : index
    %31 = vector.load %arg13[%c0_26, %c0_27] : memref<288x768xbf16, #tpu.memory_space<vmem>>, vector<288x256xbf16>
    tpu.vector_store %arg13[%c0_26, %c0_27], %30 {strides = array<i32>} : memref<288x768xbf16, #tpu.memory_space<vmem>>, vector<288x256xbf16>,
    %32 = arith.truncf %21 : vector<288x256xf32> to vector<288x256xbf16>
    %c0_28 = arith.constant 0 : index
    %c256 = arith.constant 256 : index
    %33 = vector.load %arg13[%c0_28, %c256] : memref<288x768xbf16, #tpu.memory_space<vmem>>, vector<288x256xbf16>
    tpu.vector_store %arg13[%c0_28, %c256], %32 {strides = array<i32>} : memref<288x768xbf16, #tpu.memory_space<vmem>>, vector<288x256xbf16>,
    %34 = arith.truncf %29 : vector<288x256xf32> to vector<288x256xbf16>
    %c0_29 = arith.constant 0 : index
    %c512 = arith.constant 512 : index
    %35 = vector.load %arg13[%c0_29, %c512] : memref<288x768xbf16, #tpu.memory_space<vmem>>, vector<288x256xbf16>
    tpu.vector_store %arg13[%c0_29, %c512], %34 {strides = array<i32>} : memref<288x768xbf16, #tpu.memory_space<vmem>>, vector<288x256xbf16>,
    %c0_30 = arith.constant 0 : index
    %c0_31 = arith.constant 0 : index
    %36 = vector.load %arg13[%c0_30, %c0_31] : memref<288x768xbf16, #tpu.memory_space<vmem>>, vector<256x768xbf16>
    %c0_32 = arith.constant 0 : index
    %c0_33 = arith.constant 0 : index
    %c0_34 = arith.constant 0 : index
    %37 = vector.load %arg4[%c0_32, %c0_33, %c0_34] : memref<3x768x256xbf16, #tpu.memory_space<vmem>>, vector<1x768x256xbf16>
    %38 = vector.shape_cast %37 : vector<1x768x256xbf16> to vector<768x256xbf16>
    %cst_35 = arith.constant dense<0.000000e+00> : vector<256x256xf32>
    %39 = tpu.matmul %36, %38, %cst_35 {dimension_numbers = #tpu.dot_dimension_numbers<[1], [0], [0], [1], [0, 0, 1, 1], [], []>} : vector<256x768xbf16>, vector<768x256xbf16>, vector<256x256xf32> -> vector<256x256xf32>
    %c0_36 = arith.constant 0 : index
    %c0_37 = arith.constant 0 : index
    %40 = vector.load %arg14[%c0_36, %c0_37] : memref<256x256xf32, #tpu.memory_space<vmem>>, vector<256x256xf32>
    tpu.vector_store %arg14[%c0_36, %c0_37], %39 {strides = array<i32>} : memref<256x256xf32, #tpu.memory_space<vmem>>, vector<256x256xf32>,
    %c0_38 = arith.constant 0 : index
    %c0_39 = arith.constant 0 : index
    %41 = vector.load %arg14[%c0_38, %c0_39] : memref<256x256xf32, #tpu.memory_space<vmem>>, vector<256x256xf32>
    %c16_40 = arith.constant 16 : index
    %c0_41 = arith.constant 0 : index
    %42 = vector.load %arg13[%c16_40, %c0_41] : memref<288x768xbf16, #tpu.memory_space<vmem>>, vector<256x768xbf16>
    %c1_42 = arith.constant 1 : index
    %c0_43 = arith.constant 0 : index
    %c0_44 = arith.constant 0 : index
    %43 = vector.load %arg4[%c1_42, %c0_43, %c0_44] : memref<3x768x256xbf16, #tpu.memory_space<vmem>>, vector<1x768x256xbf16>
    %44 = vector.shape_cast %43 : vector<1x768x256xbf16> to vector<768x256xbf16>
    %cst_45 = arith.constant dense<0.000000e+00> : vector<256x256xf32>
    %45 = tpu.matmul %42, %44, %cst_45 {dimension_numbers = #tpu.dot_dimension_numbers<[1], [0], [0], [1], [0, 0, 1, 1], [], []>} : vector<256x768xbf16>, vector<768x256xbf16>, vector<256x256xf32> -> vector<256x256xf32>
    %46 = arith.addf %41, %45 : vector<256x256xf32>
    %c0_46 = arith.constant 0 : index
    %c0_47 = arith.constant 0 : index
    %47 = vector.load %arg14[%c0_46, %c0_47] : memref<256x256xf32, #tpu.memory_space<vmem>>, vector<256x256xf32>
    tpu.vector_store %arg14[%c0_46, %c0_47], %46 {strides = array<i32>} : memref<256x256xf32, #tpu.memory_space<vmem>>, vector<256x256xf32>,
    %c0_48 = arith.constant 0 : index
    %c0_49 = arith.constant 0 : index
    %48 = vector.load %arg14[%c0_48, %c0_49] : memref<256x256xf32, #tpu.memory_space<vmem>>, vector<256x256xf32>
    %c32 = arith.constant 32 : index
    %c0_50 = arith.constant 0 : index
    %49 = vector.load %arg13[%c32, %c0_50] : memref<288x768xbf16, #tpu.memory_space<vmem>>, vector<256x768xbf16>
    %c2 = arith.constant 2 : index
    %c0_51 = arith.constant 0 : index
    %c0_52 = arith.constant 0 : index
    %50 = vector.load %arg4[%c2, %c0_51, %c0_52] : memref<3x768x256xbf16, #tpu.memory_space<vmem>>, vector<1x768x256xbf16>
    %51 = vector.shape_cast %50 : vector<1x768x256xbf16> to vector<768x256xbf16>
    %cst_53 = arith.constant dense<0.000000e+00> : vector<256x256xf32>
    %52 = tpu.matmul %49, %51, %cst_53 {dimension_numbers = #tpu.dot_dimension_numbers<[1], [0], [0], [1], [0, 0, 1, 1], [], []>} : vector<256x768xbf16>, vector<768x256xbf16>, vector<256x256xf32> -> vector<256x256xf32>
    %53 = arith.addf %48, %52 : vector<256x256xf32>
    %c0_54 = arith.constant 0 : index
    %c0_55 = arith.constant 0 : index
    %54 = vector.load %arg14[%c0_54, %c0_55] : memref<256x256xf32, #tpu.memory_space<vmem>>, vector<256x256xf32>
    tpu.vector_store %arg14[%c0_54, %c0_55], %53 {strides = array<i32>} : memref<256x256xf32, #tpu.memory_space<vmem>>, vector<256x256xf32>,
    %c0_56 = arith.constant 0 : index
    %c0_57 = arith.constant 0 : index
    %55 = vector.load %arg14[%c0_56, %c0_57] : memref<256x256xf32, #tpu.memory_space<vmem>>, vector<128x256xf32>
    %56 = vector.broadcast %20 : vector<1x256xf32> to vector<128x256xf32>
    %57 = arith.addf %55, %56 : vector<128x256xf32>
    %58 = math.tanh %57 : vector<128x256xf32>
    %c16_58 = arith.constant 16 : index
    %c0_59 = arith.constant 0 : index
    %59 = vector.load %arg12[%c16_58, %c0_59] : memref<288x256xf32, #tpu.memory_space<vmem>>, vector<128x256xf32>
    tpu.vector_store %arg12[%c16_58, %c0_59], %58 {strides = array<i32>} : memref<288x256xf32, #tpu.memory_space<vmem>>, vector<128x256xf32>,
    %c128_60 = arith.constant 128 : index
    %c0_61 = arith.constant 0 : index
    %60 = vector.load %arg14[%c128_60, %c0_61] : memref<256x256xf32, #tpu.memory_space<vmem>>, vector<128x256xf32>
    %61 = vector.broadcast %20 : vector<1x256xf32> to vector<128x256xf32>
    %62 = arith.addf %60, %61 : vector<128x256xf32>
    %63 = math.tanh %62 : vector<128x256xf32>
    %c144_62 = arith.constant 144 : index
    %c0_63 = arith.constant 0 : index
    %64 = vector.load %arg12[%c144_62, %c0_63] : memref<288x256xf32, #tpu.memory_space<vmem>>, vector<128x256xf32>
    tpu.vector_store %arg12[%c144_62, %c0_63], %63 {strides = array<i32>} : memref<288x256xf32, #tpu.memory_space<vmem>>, vector<128x256xf32>,
    %c0_64 = arith.constant 0 : index
    %c0_65 = arith.constant 0 : index
    %65 = vector.load %arg7[%c0_64, %c0_65] : memref<1x128xf32, #tpu.memory_space<vmem>>, vector<1x128xf32>
    %c0_66 = arith.constant 0 : index
    %c0_67 = arith.constant 0 : index
    %66 = vector.load %arg12[%c0_66, %c0_67] : memref<288x256xf32, #tpu.memory_space<vmem>>, vector<288x256xf32>
    %c0_68 = arith.constant 0 : index
    %c0_69 = arith.constant 0 : index
    %c0_70 = arith.constant 0 : index
    %67 = vector.load %arg10[%c0_68, %c0_69, %c0_70] : memref<2x288x256xf32, #tpu.memory_space<vmem>>, vector<1x288x256xf32>
    %68 = vector.shape_cast %67 : vector<1x288x256xf32> to vector<288x256xf32>
    %c1_71 = arith.constant 1 : index
    %c0_72 = arith.constant 0 : index
    %c0_73 = arith.constant 0 : index
    %69 = vector.load %arg10[%c1_71, %c0_72, %c0_73] : memref<2x288x256xf32, #tpu.memory_space<vmem>>, vector<1x288x256xf32>
    %70 = vector.shape_cast %69 : vector<1x288x256xf32> to vector<288x256xf32>
    %c1_i32_74 = arith.constant 1 : i32
    %71 = tpu.dynamic_rotate %66 by %c1_i32_74 dim 0 : vector<288x256xf32>, i32 -> vector<288x256xf32>
    %72 = arith.mulf %71, %68 : vector<288x256xf32>
    %c287_i32_75 = arith.constant 287 : i32
    %73 = tpu.dynamic_rotate %66 by %c287_i32_75 dim 0 : vector<288x256xf32>, i32 -> vector<288x256xf32>
    %74 = arith.mulf %73, %70 : vector<288x256xf32>
    %75 = arith.truncf %72 : vector<288x256xf32> to vector<288x256xbf16>
    %c0_76 = arith.constant 0 : index
    %c0_77 = arith.constant 0 : index
    %76 = vector.load %arg13[%c0_76, %c0_77] : memref<288x768xbf16, #tpu.memory_space<vmem>>, vector<288x256xbf16>
    tpu.vector_store %arg13[%c0_76, %c0_77], %75 {strides = array<i32>} : memref<288x768xbf16, #tpu.memory_space<vmem>>, vector<288x256xbf16>,
    %77 = arith.truncf %66 : vector<288x256xf32> to vector<288x256xbf16>
    %c0_78 = arith.constant 0 : index
    %c256_79 = arith.constant 256 : index
    %78 = vector.load %arg13[%c0_78, %c256_79] : memref<288x768xbf16, #tpu.memory_space<vmem>>, vector<288x256xbf16>
    tpu.vector_store %arg13[%c0_78, %c256_79], %77 {strides = array<i32>} : memref<288x768xbf16, #tpu.memory_space<vmem>>, vector<288x256xbf16>,
    %79 = arith.truncf %74 : vector<288x256xf32> to vector<288x256xbf16>
    %c0_80 = arith.constant 0 : index
    %c512_81 = arith.constant 512 : index
    %80 = vector.load %arg13[%c0_80, %c512_81] : memref<288x768xbf16, #tpu.memory_space<vmem>>, vector<288x256xbf16>
    tpu.vector_store %arg13[%c0_80, %c512_81], %79 {strides = array<i32>} : memref<288x768xbf16, #tpu.memory_space<vmem>>, vector<288x256xbf16>,
    %c0_82 = arith.constant 0 : index
    %c0_83 = arith.constant 0 : index
    %81 = vector.load %arg13[%c0_82, %c0_83] : memref<288x768xbf16, #tpu.memory_space<vmem>>, vector<256x768xbf16>
    %c0_84 = arith.constant 0 : index
    %c0_85 = arith.constant 0 : index
    %c0_86 = arith.constant 0 : index
    %82 = vector.load %arg6[%c0_84, %c0_85, %c0_86] : memref<3x768x128xbf16, #tpu.memory_space<vmem>>, vector<1x768x128xbf16>
    %83 = vector.shape_cast %82 : vector<1x768x128xbf16> to vector<768x128xbf16>
    %cst_87 = arith.constant dense<0.000000e+00> : vector<256x128xf32>
    %84 = tpu.matmul %81, %83, %cst_87 {dimension_numbers = #tpu.dot_dimension_numbers<[1], [0], [0], [1], [0, 0, 1, 1], [], []>} : vector<256x768xbf16>, vector<768x128xbf16>, vector<256x128xf32> -> vector<256x128xf32>
    %c0_88 = arith.constant 0 : index
    %c0_89 = arith.constant 0 : index
    %85 = vector.load %arg14[%c0_88, %c0_89] : memref<256x256xf32, #tpu.memory_space<vmem>>, vector<256x128xf32>
    tpu.vector_store %arg14[%c0_88, %c0_89], %84 {strides = array<i32>} : memref<256x256xf32, #tpu.memory_space<vmem>>, vector<256x128xf32>,
    %c0_90 = arith.constant 0 : index
    %c0_91 = arith.constant 0 : index
    %86 = vector.load %arg14[%c0_90, %c0_91] : memref<256x256xf32, #tpu.memory_space<vmem>>, vector<256x128xf32>
    %c16_92 = arith.constant 16 : index
    %c0_93 = arith.constant 0 : index
    %87 = vector.load %arg13[%c16_92, %c0_93] : memref<288x768xbf16, #tpu.memory_space<vmem>>, vector<256x768xbf16>
    %c1_94 = arith.constant 1 : index
    %c0_95 = arith.constant 0 : index
    %c0_96 = arith.constant 0 : index
    %88 = vector.load %arg6[%c1_94, %c0_95, %c0_96] : memref<3x768x128xbf16, #tpu.memory_space<vmem>>, vector<1x768x128xbf16>
    %89 = vector.shape_cast %88 : vector<1x768x128xbf16> to vector<768x128xbf16>
    %cst_97 = arith.constant dense<0.000000e+00> : vector<256x128xf32>
    %90 = tpu.matmul %87, %89, %cst_97 {dimension_numbers = #tpu.dot_dimension_numbers<[1], [0], [0], [1], [0, 0, 1, 1], [], []>} : vector<256x768xbf16>, vector<768x128xbf16>, vector<256x128xf32> -> vector<256x128xf32>
    %91 = arith.addf %86, %90 : vector<256x128xf32>
    %c0_98 = arith.constant 0 : index
    %c0_99 = arith.constant 0 : index
    %92 = vector.load %arg14[%c0_98, %c0_99] : memref<256x256xf32, #tpu.memory_space<vmem>>, vector<256x128xf32>
    tpu.vector_store %arg14[%c0_98, %c0_99], %91 {strides = array<i32>} : memref<256x256xf32, #tpu.memory_space<vmem>>, vector<256x128xf32>,
    %c0_100 = arith.constant 0 : index
    %c0_101 = arith.constant 0 : index
    %93 = vector.load %arg14[%c0_100, %c0_101] : memref<256x256xf32, #tpu.memory_space<vmem>>, vector<256x128xf32>
    %c32_102 = arith.constant 32 : index
    %c0_103 = arith.constant 0 : index
    %94 = vector.load %arg13[%c32_102, %c0_103] : memref<288x768xbf16, #tpu.memory_space<vmem>>, vector<256x768xbf16>
    %c2_104 = arith.constant 2 : index
    %c0_105 = arith.constant 0 : index
    %c0_106 = arith.constant 0 : index
    %95 = vector.load %arg6[%c2_104, %c0_105, %c0_106] : memref<3x768x128xbf16, #tpu.memory_space<vmem>>, vector<1x768x128xbf16>
    %96 = vector.shape_cast %95 : vector<1x768x128xbf16> to vector<768x128xbf16>
    %cst_107 = arith.constant dense<0.000000e+00> : vector<256x128xf32>
    %97 = tpu.matmul %94, %96, %cst_107 {dimension_numbers = #tpu.dot_dimension_numbers<[1], [0], [0], [1], [0, 0, 1, 1], [], []>} : vector<256x768xbf16>, vector<768x128xbf16>, vector<256x128xf32> -> vector<256x128xf32>
    %98 = arith.addf %93, %97 : vector<256x128xf32>
    %c0_108 = arith.constant 0 : index
    %c0_109 = arith.constant 0 : index
    %99 = vector.load %arg14[%c0_108, %c0_109] : memref<256x256xf32, #tpu.memory_space<vmem>>, vector<256x128xf32>
    tpu.vector_store %arg14[%c0_108, %c0_109], %98 {strides = array<i32>} : memref<256x256xf32, #tpu.memory_space<vmem>>, vector<256x128xf32>,
    %c0_110 = arith.constant 0 : index
    %c0_111 = arith.constant 0 : index
    %100 = vector.load %arg14[%c0_110, %c0_111] : memref<256x256xf32, #tpu.memory_space<vmem>>, vector<128x128xf32>
    %101 = vector.broadcast %65 : vector<1x128xf32> to vector<128x128xf32>
    %102 = arith.addf %100, %101 : vector<128x128xf32>
    %103 = math.tanh %102 : vector<128x128xf32>
    %c16_112 = arith.constant 16 : index
    %c0_113 = arith.constant 0 : index
    %104 = vector.load %arg12[%c16_112, %c0_113] : memref<288x256xf32, #tpu.memory_space<vmem>>, vector<128x128xf32>
    tpu.vector_store %arg12[%c16_112, %c0_113], %103 {strides = array<i32>} : memref<288x256xf32, #tpu.memory_space<vmem>>, vector<128x128xf32>,
    %c128_114 = arith.constant 128 : index
    %c0_115 = arith.constant 0 : index
    %105 = vector.load %arg14[%c128_114, %c0_115] : memref<256x256xf32, #tpu.memory_space<vmem>>, vector<128x128xf32>
    %106 = vector.broadcast %65 : vector<1x128xf32> to vector<128x128xf32>
    %107 = arith.addf %105, %106 : vector<128x128xf32>
    %108 = math.tanh %107 : vector<128x128xf32>
    %c144_116 = arith.constant 144 : index
    %c0_117 = arith.constant 0 : index
    %109 = vector.load %arg12[%c144_116, %c0_117] : memref<288x256xf32, #tpu.memory_space<vmem>>, vector<128x128xf32>
    tpu.vector_store %arg12[%c144_116, %c0_117], %108 {strides = array<i32>} : memref<288x256xf32, #tpu.memory_space<vmem>>, vector<128x128xf32>,
    %c0_118 = arith.constant 0 : index
    %c0_119 = arith.constant 0 : index
    %110 = vector.load %arg12[%c0_118, %c0_119] : memref<288x256xf32, #tpu.memory_space<vmem>>, vector<288x128xf32>
    %c0_120 = arith.constant 0 : index
    %c0_121 = arith.constant 0 : index
    %c0_122 = arith.constant 0 : index
    %111 = vector.load %arg10[%c0_120, %c0_121, %c0_122] : memref<2x288x256xf32, #tpu.memory_space<vmem>>, vector<1x288x128xf32>
    %112 = vector.shape_cast %111 : vector<1x288x128xf32> to vector<288x128xf32>
    %c1_123 = arith.constant 1 : index
    %c0_124 = arith.constant 0 : index
    %c0_125 = arith.constant 0 : index
    %113 = vector.load %arg10[%c1_123, %c0_124, %c0_125] : memref<2x288x256xf32, #tpu.memory_space<vmem>>, vector<1x288x128xf32>
    %114 = vector.shape_cast %113 : vector<1x288x128xf32> to vector<288x128xf32>
    %c1_i32_126 = arith.constant 1 : i32
    %115 = tpu.dynamic_rotate %110 by %c1_i32_126 dim 0 : vector<288x128xf32>, i32 -> vector<288x128xf32>
    %116 = arith.mulf %115, %112 : vector<288x128xf32>
    %c287_i32_127 = arith.constant 287 : i32
    %117 = tpu.dynamic_rotate %110 by %c287_i32_127 dim 0 : vector<288x128xf32>, i32 -> vector<288x128xf32>
    %118 = arith.mulf %117, %114 : vector<288x128xf32>
    %119 = arith.truncf %116 : vector<288x128xf32> to vector<288x128xbf16>
    %c0_128 = arith.constant 0 : index
    %c0_129 = arith.constant 0 : index
    %120 = vector.load %arg13[%c0_128, %c0_129] : memref<288x768xbf16, #tpu.memory_space<vmem>>, vector<288x128xbf16>
    tpu.vector_store %arg13[%c0_128, %c0_129], %119 {strides = array<i32>} : memref<288x768xbf16, #tpu.memory_space<vmem>>, vector<288x128xbf16>,
    %121 = arith.truncf %110 : vector<288x128xf32> to vector<288x128xbf16>
    %c0_130 = arith.constant 0 : index
    %c128_131 = arith.constant 128 : index
    %122 = vector.load %arg13[%c0_130, %c128_131] : memref<288x768xbf16, #tpu.memory_space<vmem>>, vector<288x128xbf16>
    tpu.vector_store %arg13[%c0_130, %c128_131], %121 {strides = array<i32>} : memref<288x768xbf16, #tpu.memory_space<vmem>>, vector<288x128xbf16>,
    %123 = arith.truncf %118 : vector<288x128xf32> to vector<288x128xbf16>
    %c0_132 = arith.constant 0 : index
    %c256_133 = arith.constant 256 : index
    %124 = vector.load %arg13[%c0_132, %c256_133] : memref<288x768xbf16, #tpu.memory_space<vmem>>, vector<288x128xbf16>
    tpu.vector_store %arg13[%c0_132, %c256_133], %123 {strides = array<i32>} : memref<288x768xbf16, #tpu.memory_space<vmem>>, vector<288x128xbf16>,
    %c0_134 = arith.constant 0 : index
    %c0_135 = arith.constant 0 : index
    %125 = vector.load %arg13[%c0_134, %c0_135] : memref<288x768xbf16, #tpu.memory_space<vmem>>, vector<256x384xbf16>
    %c0_136 = arith.constant 0 : index
    %c0_137 = arith.constant 0 : index
    %c0_138 = arith.constant 0 : index
    %126 = vector.load %arg8[%c0_136, %c0_137, %c0_138] : memref<3x384x128xbf16, #tpu.memory_space<vmem>>, vector<1x384x128xbf16>
    %127 = vector.shape_cast %126 : vector<1x384x128xbf16> to vector<384x128xbf16>
    %cst_139 = arith.constant dense<0.000000e+00> : vector<256x128xf32>
    %128 = tpu.matmul %125, %127, %cst_139 {dimension_numbers = #tpu.dot_dimension_numbers<[1], [0], [0], [1], [0, 0, 1, 1], [], []>} : vector<256x384xbf16>, vector<384x128xbf16>, vector<256x128xf32> -> vector<256x128xf32>
    %c0_140 = arith.constant 0 : index
    %c0_141 = arith.constant 0 : index
    %129 = vector.load %arg14[%c0_140, %c0_141] : memref<256x256xf32, #tpu.memory_space<vmem>>, vector<256x128xf32>
    tpu.vector_store %arg14[%c0_140, %c0_141], %128 {strides = array<i32>} : memref<256x256xf32, #tpu.memory_space<vmem>>, vector<256x128xf32>,
    %c0_142 = arith.constant 0 : index
    %c0_143 = arith.constant 0 : index
    %130 = vector.load %arg14[%c0_142, %c0_143] : memref<256x256xf32, #tpu.memory_space<vmem>>, vector<256x128xf32>
    %c16_144 = arith.constant 16 : index
    %c0_145 = arith.constant 0 : index
    %131 = vector.load %arg13[%c16_144, %c0_145] : memref<288x768xbf16, #tpu.memory_space<vmem>>, vector<256x384xbf16>
    %c1_146 = arith.constant 1 : index
    %c0_147 = arith.constant 0 : index
    %c0_148 = arith.constant 0 : index
    %132 = vector.load %arg8[%c1_146, %c0_147, %c0_148] : memref<3x384x128xbf16, #tpu.memory_space<vmem>>, vector<1x384x128xbf16>
    %133 = vector.shape_cast %132 : vector<1x384x128xbf16> to vector<384x128xbf16>
    %cst_149 = arith.constant dense<0.000000e+00> : vector<256x128xf32>
    %134 = tpu.matmul %131, %133, %cst_149 {dimension_numbers = #tpu.dot_dimension_numbers<[1], [0], [0], [1], [0, 0, 1, 1], [], []>} : vector<256x384xbf16>, vector<384x128xbf16>, vector<256x128xf32> -> vector<256x128xf32>
    %135 = arith.addf %130, %134 : vector<256x128xf32>
    %c0_150 = arith.constant 0 : index
    %c0_151 = arith.constant 0 : index
    %136 = vector.load %arg14[%c0_150, %c0_151] : memref<256x256xf32, #tpu.memory_space<vmem>>, vector<256x128xf32>
    tpu.vector_store %arg14[%c0_150, %c0_151], %135 {strides = array<i32>} : memref<256x256xf32, #tpu.memory_space<vmem>>, vector<256x128xf32>,
    %c0_152 = arith.constant 0 : index
    %c0_153 = arith.constant 0 : index
    %137 = vector.load %arg14[%c0_152, %c0_153] : memref<256x256xf32, #tpu.memory_space<vmem>>, vector<256x128xf32>
    %c32_154 = arith.constant 32 : index
    %c0_155 = arith.constant 0 : index
    %138 = vector.load %arg13[%c32_154, %c0_155] : memref<288x768xbf16, #tpu.memory_space<vmem>>, vector<256x384xbf16>
    %c2_156 = arith.constant 2 : index
    %c0_157 = arith.constant 0 : index
    %c0_158 = arith.constant 0 : index
    %139 = vector.load %arg8[%c2_156, %c0_157, %c0_158] : memref<3x384x128xbf16, #tpu.memory_space<vmem>>, vector<1x384x128xbf16>
    %140 = vector.shape_cast %139 : vector<1x384x128xbf16> to vector<384x128xbf16>
    %cst_159 = arith.constant dense<0.000000e+00> : vector<256x128xf32>
    %141 = tpu.matmul %138, %140, %cst_159 {dimension_numbers = #tpu.dot_dimension_numbers<[1], [0], [0], [1], [0, 0, 1, 1], [], []>} : vector<256x384xbf16>, vector<384x128xbf16>, vector<256x128xf32> -> vector<256x128xf32>
    %142 = arith.addf %137, %141 : vector<256x128xf32>
    %c0_160 = arith.constant 0 : index
    %c0_161 = arith.constant 0 : index
    %143 = vector.load %arg14[%c0_160, %c0_161] : memref<256x256xf32, #tpu.memory_space<vmem>>, vector<256x128xf32>
    tpu.vector_store %arg14[%c0_160, %c0_161], %142 {strides = array<i32>} : memref<256x256xf32, #tpu.memory_space<vmem>>, vector<256x128xf32>,
    %c0_162 = arith.constant 0 : index
    %c0_163 = arith.constant 0 : index
    %144 = vector.load %arg14[%c0_162, %c0_163] : memref<256x256xf32, #tpu.memory_space<vmem>>, vector<128x128xf32>
    %145 = vector.broadcast %19 : vector<1x128xf32> to vector<128x128xf32>
    %146 = arith.addf %144, %145 : vector<128x128xf32>
    %147 = arith.negf %146 : vector<128x128xf32>
    %148 = math.exp %147 : vector<128x128xf32>
    %cst_164 = arith.constant 1.000000e+00 : f32
    %149 = vector.broadcast %cst_164 : f32 to vector<128x128xf32>
    %150 = arith.addf %149, %148 : vector<128x128xf32>
    %151 = arith.divf %149, %150 : vector<128x128xf32>
    %152 = arith.truncf %151 : vector<128x128xf32> to vector<128x128xbf16>
    %153 = vector.shape_cast %152 : vector<128x128xbf16> to vector<1x128x128xbf16>
    %c0_165 = arith.constant 0 : index
    %c0_166 = arith.constant 0 : index
    %c0_167 = arith.constant 0 : index
    %154 = vector.load %arg11[%c0_165, %c0_166, %c0_167] : memref<1x256x128xbf16, #tpu.memory_space<vmem>>, vector<1x128x128xbf16>
    tpu.vector_store %arg11[%c0_165, %c0_166, %c0_167], %153 {strides = array<i32>} : memref<1x256x128xbf16, #tpu.memory_space<vmem>>, vector<1x128x128xbf16>,
    %c128_168 = arith.constant 128 : index
    %c0_169 = arith.constant 0 : index
    %155 = vector.load %arg14[%c128_168, %c0_169] : memref<256x256xf32, #tpu.memory_space<vmem>>, vector<128x128xf32>
    %156 = vector.broadcast %19 : vector<1x128xf32> to vector<128x128xf32>
    %157 = arith.addf %155, %156 : vector<128x128xf32>
    %158 = arith.negf %157 : vector<128x128xf32>
    %159 = math.exp %158 : vector<128x128xf32>
    %cst_170 = arith.constant 1.000000e+00 : f32
    %160 = vector.broadcast %cst_170 : f32 to vector<128x128xf32>
    %161 = arith.addf %160, %159 : vector<128x128xf32>
    %162 = arith.divf %160, %161 : vector<128x128xf32>
    %163 = arith.truncf %162 : vector<128x128xf32> to vector<128x128xbf16>
    %164 = vector.shape_cast %163 : vector<128x128xbf16> to vector<1x128x128xbf16>
    %c0_171 = arith.constant 0 : index
    %c128_172 = arith.constant 128 : index
    %c0_173 = arith.constant 0 : index
    %165 = vector.load %arg11[%c0_171, %c128_172, %c0_173] : memref<1x256x128xbf16, #tpu.memory_space<vmem>>, vector<1x128x128xbf16>
    tpu.vector_store %arg11[%c0_171, %c128_172, %c0_173], %164 {strides = array<i32>} : memref<1x256x128xbf16, #tpu.memory_space<vmem>>, vector<1x128x128xbf16>,
    return
  }
  func.func @transform_0(%arg0: i32) -> (i32, i32, i32) {
    %c0_i32 = arith.constant 0 : i32
    %c0_i32_0 = arith.constant 0 : i32
    %c0_i32_1 = arith.constant 0 : i32
    return %arg0, %c0_i32, %c0_i32_0 : i32, i32, i32
  }
  func.func @transform_1(%arg0: i32) -> (i32, i32) {
    %c0_i32 = arith.constant 0 : i32
    %c0_i32_0 = arith.constant 0 : i32
    %c0_i32_1 = arith.constant 0 : i32
    return %c0_i32, %c0_i32_0 : i32, i32
  }
  func.func @transform_2(%arg0: i32) -> (i32, i32) {
    %c0_i32 = arith.constant 0 : i32
    %c0_i32_0 = arith.constant 0 : i32
    %c0_i32_1 = arith.constant 0 : i32
    return %c0_i32, %c0_i32_0 : i32, i32
  }
  func.func @transform_3(%arg0: i32) -> (i32, i32, i32) {
    %c0_i32 = arith.constant 0 : i32
    %c0_i32_0 = arith.constant 0 : i32
    %c0_i32_1 = arith.constant 0 : i32
    %c0_i32_2 = arith.constant 0 : i32
    return %c0_i32, %c0_i32_0, %c0_i32_1 : i32, i32, i32
  }
  func.func @transform_4(%arg0: i32) -> (i32, i32) {
    %c0_i32 = arith.constant 0 : i32
    %c0_i32_0 = arith.constant 0 : i32
    %c0_i32_1 = arith.constant 0 : i32
    return %c0_i32, %c0_i32_0 : i32, i32
  }
  func.func @transform_5(%arg0: i32) -> (i32, i32, i32) {
    %c0_i32 = arith.constant 0 : i32
    %c0_i32_0 = arith.constant 0 : i32
    %c0_i32_1 = arith.constant 0 : i32
    %c0_i32_2 = arith.constant 0 : i32
    return %c0_i32, %c0_i32_0, %c0_i32_1 : i32, i32, i32
  }
  func.func @transform_6(%arg0: i32) -> (i32, i32) {
    %c0_i32 = arith.constant 0 : i32
    %c0_i32_0 = arith.constant 0 : i32
    %c0_i32_1 = arith.constant 0 : i32
    return %c0_i32, %c0_i32_0 : i32, i32
  }
  func.func @transform_7(%arg0: i32) -> (i32, i32, i32) {
    %c0_i32 = arith.constant 0 : i32
    %c0_i32_0 = arith.constant 0 : i32
    %c0_i32_1 = arith.constant 0 : i32
    %c0_i32_2 = arith.constant 0 : i32
    return %c0_i32, %c0_i32_0, %c0_i32_1 : i32, i32, i32
  }
  func.func @transform_8(%arg0: i32) -> (i32, i32) {
    %c0_i32 = arith.constant 0 : i32
    %c0_i32_0 = arith.constant 0 : i32
    %c0_i32_1 = arith.constant 0 : i32
    return %c0_i32, %c0_i32_0 : i32, i32
  }
  func.func @transform_9(%arg0: i32) -> (i32, i32, i32) {
    %c0_i32 = arith.constant 0 : i32
    %c0_i32_0 = arith.constant 0 : i32
    %c0_i32_1 = arith.constant 0 : i32
    %c0_i32_2 = arith.constant 0 : i32
    return %c0_i32, %c0_i32_0, %c0_i32_1 : i32, i32, i32
  }
  func.func @transform_10(%arg0: i32) -> (i32, i32, i32) {
    %c0_i32 = arith.constant 0 : i32
    %c0_i32_0 = arith.constant 0 : i32
    %c0_i32_1 = arith.constant 0 : i32
    return %arg0, %c0_i32, %c0_i32_0 : i32, i32, i32
  }
}

</mosaic_0001>

<bundles_post_ra>
// kernel: espcn_forward.1
= control target key start
LH: loop header
LB: loop body
LE: loop exit
PB: predicated region body
PF: predicated region fallthrough
CT: control target
= control target key end

     0   :  { %s18099_s13 = smov 0   ;;  %s24879_s0 = inlined_call_operand.vmem [shape: bf16[2,256,128], index: 0, kind: input, shape index: {}]   ;;  %s24880_s1 = inlined_call_operand.vmem [shape: bf16[128,256], index: 1, kind: input, shape index: {}]   ;;  %s24881_s2 = inlined_call_operand.vmem [shape: f32[1,256], index: 2, kind: input, shape index: {}]   ;;  %s24882_s3 = inlined_call_operand.vmem [shape: bf16[3,768,256], index: 3, kind: input, shape index: {}]   ;;  %s24883_s4 = inlined_call_operand.vmem [shape: f32[1,256], index: 4, kind: input, shape index: {}]   ;;  %s24884_s5 = inlined_call_operand.vmem [shape: bf16[3,768,128], index: 5, kind: input, shape index: {}]   ;;  %s24885_s6 = inlined_call_operand.vmem [shape: f32[1,128], index: 6, kind: input, shape index: {}]   ;;  %s24886_s7 = inlined_call_operand.vmem [shape: bf16[3,384,128], index: 7, kind: input, shape index: {}]   ;;  %s24887_s8 = inlined_call_operand.vmem [shape: f32[1,128], index: 8, kind: input, shape index: {}]   ;;  %s24888_s9 = inlined_call_operand.vmem [shape: f32[2,288,256], index: 9, kind: input, shape index: {}]   ;;  %s24889_s10 = inlined_call_operand.vmem [shape: bf16[2,256,128], index: 10, kind: output, shape index: {}]  }
   0x1 LB: > { %s13235_s14 = sadd.s32 4294967295, %s18039_s13   ;;  %p13239_p0 = scmp.ge.s32.totalorder %s18039_s13, 1  ;;  %s18039_s13 = sphi %s18099_s13, %s20_s13  }
   0x2   : > { %p312_p1 = scmp.lt.s32.totalorder %s18039_s13, 3 }
   0x4   : > { %p313_p2 = pnand %p13239_p0, %p312_p1 }
   0x6   : > { %316 = sbr.rel (%p313_p2) target bundleno = 3425 (0xd61), region = 60 }
   0xd   : > { %v16896_v0 = vld [vmem:[%s24880_s1 + $0x4] ss:$8 sps:$4 sm:$0xff]   ;;  %p350_p3 = scmp.lt.s32.totalorder %s13235_s14, 1  ;;  %v16898_v1 = vld [vmem:[%s24880_s1] ss:$8 sps:$4 sm:$0xff]   ;;  %v18041_v2 = vmov 0  }
   0xe   : > { %573 = vmatprep.mubr.bf16.mxu0 %v18041_v2  ;;  %814 = vmatprep.mubr.bf16.mxu1 %v18041_v2  ;;  %v16899_v3 = vld [vmem:[%s24880_s1 + $0x14] ss:$8 sps:$4 sm:$0xff]   ;;  %v16901_v4 = vld [vmem:[%s24880_s1 + $0x10] ss:$8 sps:$4 sm:$0xff]   ;;  %v16902_v5 = vld [vmem:[%s24880_s1 + $0x24] ss:$8 sps:$4 sm:$0xff]  }
   0xf   : > { %541 = vmatprep.subr.bf16.mxu0 %v16896_v0  ;;  %s26003_s14 = smov (!%p350_p3, %s13235_s14), 1  ;;  %782 = vmatprep.subr.bf16.mxu1 %v16896_v0  ;;  %v16904_v6 = vld [vmem:[%s24880_s1 + $0x20] ss:$8 sps:$4 sm:$0xff]   ;;  %v16905_v7 = vld [vmem:[%s24880_s1 + $0x34] ss:$8 sps:$4 sm:$0xff]   ;;  %v24892_v63 = vmov 0.0  }
  0x10   : > { %542 = vmatpush1.bf16.msra.mxu0 %v16898_v1  ;;  %783 = vmatpush1.bf16.msra.mxu1 %v16898_v1  ;;  %s14508_s25 = sshll.u32 %s26003_s14, 7  ;;  %v16907_v8 = vld [vmem:[%s24880_s1 + $0x30] ss:$8 sps:$4 sm:$0xff]   ;;  %v16908_v9 = vld [vmem:[%s24880_s1 + $0x44] ss:$8 sps:$4 sm:$0xff]   ;;  %v18288_v0 = vrot.slane %v24892_v63, 7 }
  0x11   : > { %543 = vmatprep.subr.bf16.mxu0 %v16899_v3  ;;  %784 = vmatprep.subr.bf16.mxu1 %v16899_v3  ;;  %s18138_s12 = scalar_lea.vmem %s24879_s0, %s14508_s25  ;;  %v16910_v10 = vld [vmem:[%s24880_s1 + $0x40] ss:$8 sps:$4 sm:$0xff]   ;;  %v16911_v11 = vld [vmem:[%s24880_s1 + $0x54] ss:$8 sps:$4 sm:$0xff]   ;;  %v16913_v12 = vld [vmem:[%s24880_s1 + $0x50] ss:$8 sps:$4 sm:$0xff]   ;;  %s24826_s26 = scalar_lea.vmem %s24889_s10, %s14508_s25 }
  0x12   : > { %v16914_v13 = vld [vmem:[%s24880_s1 + $0x64] ss:$8 sps:$4 sm:$0xff]   ;;  %v16916_v14 = vld [vmem:[%s24880_s1 + $0x60] ss:$8 sps:$4 sm:$0xff]   ;;  %v16917_v15 = vld [vmem:[%s24880_s1 + $0x74] ss:$8 sps:$4 sm:$0xff]  }
  0x13   : > { %v16919_v16 = vld [vmem:[%s24880_s1 + $0x70] ss:$8 sps:$4 sm:$0xff]   ;;  %v16938_v17 = vld [vmem:[%s24882_s3 + $0x4] ss:$8 sps:$4 sm:$0xff]   ;;  %v16936_v20 = vld [vmem:[%s24882_s3] ss:$8 sps:$4 sm:$0xff]  }
  0x14   : > { %544 = vmatpush1.bf16.msra.mxu0 %v16901_v4  ;;  %785 = vmatpush1.bf16.msra.mxu1 %v16901_v4  ;;  %v16920_v18 = vld [vmem:[%s18138_s12] sm:$0xff]   ;;  %v16941_v21 = vld [vmem:[%s24882_s3 + $0x14] ss:$8 sps:$4 sm:$0xff]   ;;  %v16939_v22 = vld [vmem:[%s24882_s3 + $0x10] ss:$8 sps:$4 sm:$0xff]   ;;  %25262 = vst [vmem:[#allocation5_spill] sm:$0xff] %v18288_v0 }
  0x15   : > { %545 = vmatprep.subr.bf16.mxu0 %v16902_v5  ;;  %786 = vmatprep.subr.bf16.mxu1 %v16902_v5  ;;  %v16927_v19 = vld [vmem:[%s18138_s12 + $0x40] sm:$0xff]   ;;  %v16921_v24 = vld [vmem:[%s18138_s12 + $0x8] sm:$0xff]   ;;  %v16947_v27 = vld [vmem:[%s24882_s3 + $0x34] ss:$8 sps:$4 sm:$0xff]  }
  0x16   : > { %v16944_v23 = vld [vmem:[%s24882_s3 + $0x24] ss:$8 sps:$4 sm:$0xff]   ;;  %v16942_v26 = vld [vmem:[%s24882_s3 + $0x20] ss:$8 sps:$4 sm:$0xff]   ;;  %v16945_v28 = vld [vmem:[%s24882_s3 + $0x30] ss:$8 sps:$4 sm:$0xff]  }
  0x17   : > { %v16929_v25 = vld [vmem:[%s18138_s12 + $0x48] sm:$0xff]   ;;  %v16922_v30 = vld [vmem:[%s18138_s12 + $0x10] sm:$0xff]   ;;  %v16923_v36 = vld [vmem:[%s18138_s12 + $0x18] sm:$0xff]  }
  0x18   : > { %546 = vmatpush1.bf16.msra.mxu0 %v16904_v6  ;;  %787 = vmatpush1.bf16.msra.mxu1 %v16904_v6  ;;  %v16950_v29 = vld [vmem:[%s24882_s3 + $0x44] ss:$8 sps:$4 sm:$0xff]   ;;  %v16930_v31 = vld [vmem:[%s18138_s12 + $0x50] sm:$0xff]   ;;  %v16948_v32 = vld [vmem:[%s24882_s3 + $0x40] ss:$8 sps:$4 sm:$0xff]  }
  0x19   : > { %547 = vmatprep.subr.bf16.mxu0 %v16905_v7  ;;  %788 = vmatprep.subr.bf16.mxu1 %v16905_v7  ;;  %v16953_v33 = vld [vmem:[%s24882_s3 + $0x54] ss:$8 sps:$4 sm:$0xff]   ;;  %v16951_v34 = vld [vmem:[%s24882_s3 + $0x50] ss:$8 sps:$4 sm:$0xff]   ;;  %v16956_v35 = vld [vmem:[%s24882_s3 + $0x64] ss:$8 sps:$4 sm:$0xff]  }
  0x1a   : > { %v16931_v37 = vld [vmem:[%s18138_s12 + $0x58] sm:$0xff]   ;;  %v16954_v38 = vld [vmem:[%s24882_s3 + $0x60] ss:$8 sps:$4 sm:$0xff]   ;;  %v16962_v41 = vld [vmem:[%s24882_s3 + $0x84] ss:$8 sps:$4 sm:$0xff]  }
  0x1b   : > { %v16959_v39 = vld [vmem:[%s24882_s3 + $0x74] ss:$8 sps:$4 sm:$0xff]   ;;  %v16957_v40 = vld [vmem:[%s24882_s3 + $0x70] ss:$8 sps:$4 sm:$0xff]   ;;  %v16924_v42 = vld [vmem:[%s18138_s12 + $0x20] sm:$0xff]  }
  0x1c   : > { %548 = vmatpush1.bf16.msra.mxu0 %v16907_v8  ;;  %789 = vmatpush1.bf16.msra.mxu1 %v16907_v8  ;;  %v16932_v43 = vld [vmem:[%s18138_s12 + $0x60] sm:$0xff]   ;;  %v16965_v45 = vld [vmem:[%s24882_s3 + $0x94] ss:$8 sps:$4 sm:$0xff]   ;;  %v16963_v46 = vld [vmem:[%s24882_s3 + $0x90] ss:$8 sps:$4 sm:$0xff]  }
  0x1d   : > { %549 = vmatprep.subr.bf16.mxu0 %v16908_v9  ;;  %790 = vmatprep.subr.bf16.mxu1 %v16908_v9  ;;  %v16960_v44 = vld [vmem:[%s24882_s3 + $0x80] ss:$8 sps:$4 sm:$0xff]   ;;  %v16968_v47 = vld [vmem:[%s24882_s3 + $0xa4] ss:$8 sps:$4 sm:$0xff]   ;;  %v16971_v51 = vld [vmem:[%s24882_s3 + $0xb4] ss:$8 sps:$4 sm:$0xff]  }
  0x1e   : > { %v16925_v48 = vld [vmem:[%s18138_s12 + $0x28] sm:$0xff]   ;;  %v16969_v52 = vld [vmem:[%s24882_s3 + $0xb0] ss:$8 sps:$4 sm:$0xff]   ;;  %v16977_v59 = vld [vmem:[%s24882_s3 + $0xd4] ss:$8 sps:$4 sm:$0xff]  }
  0x1f   : > { %v16933_v49 = vld [vmem:[%s18138_s12 + $0x68] sm:$0xff]   ;;  %v16926_v53 = vld [vmem:[%s18138_s12 + $0x30] sm:$0xff]   ;;  %v16928_v55 = vld [vmem:[%s18138_s12 + $0x38] sm:$0xff]  }
  0x20   : > { %550 = vmatpush1.bf16.msra.mxu0 %v16910_v10  ;;  %791 = vmatpush1.bf16.msra.mxu1 %v16910_v10  ;;  %v16966_v50 = vld [vmem:[%s24882_s3 + $0xa0] ss:$8 sps:$4 sm:$0xff]   ;;  %v16934_v54 = vld [vmem:[%s18138_s12 + $0x70] sm:$0xff]   ;;  %v16935_v56 = vld [vmem:[%s18138_s12 + $0x78] sm:$0xff]  }
  0x21   : > { %551 = vmatprep.subr.bf16.mxu0 %v16911_v11  ;;  %792 = vmatprep.subr.bf16.mxu1 %v16911_v11  ;;  %v16974_v57 = vld [vmem:[%s24882_s3 + $0xc4] ss:$8 sps:$4 sm:$0xff]   ;;  %v16972_v58 = vld [vmem:[%s24882_s3 + $0xc0] ss:$8 sps:$4 sm:$0xff]   ;;  %v16975_v60 = vld [vmem:[%s24882_s3 + $0xd0] ss:$8 sps:$4 sm:$0xff]  }
  0x22   : > { %v16980_v61 = vld [vmem:[%s24882_s3 + $0xe4] ss:$8 sps:$4 sm:$0xff]   ;;  %v16978_v62 = vld [vmem:[%s24882_s3 + $0xe0] ss:$8 sps:$4 sm:$0xff]   ;;  %v16983_v1 = vld [vmem:[%s24882_s3 + $0xf4] ss:$8 sps:$4 sm:$0xff]  }
  0x23   : > { %v1036_v3 = vld [vmem:[%s24888_s9 + $0x18] sm:$0xff]  ;;  %v1033_v7 = vld [vmem:[%s24888_s9] sm:$0xff]  ;;  %v1035_v8 = vld [vmem:[%s24888_s9 + $0x10] sm:$0xff] }
  0x24   : > { %552 = vmatpush1.bf16.msra.mxu0 %v16913_v12  ;;  %793 = vmatpush1.bf16.msra.mxu1 %v16913_v12  ;;  %v16981_v4 = vld [vmem:[%s24882_s3 + $0xf0] ss:$8 sps:$4 sm:$0xff]   ;;  %v1328_v6 = vmul.f32 %v18288_v0, %v1036_v3  ;;  %v1325_v9 = vmul.f32 %v18288_v0, %v1033_v7  ;;  %v1327_v10 = vmul.f32 %v18288_v0, %v1035_v8 }
  0x25   : > { %553 = vmatprep.subr.bf16.mxu0 %v16914_v13  ;;  %794 = vmatprep.subr.bf16.mxu1 %v16914_v13  ;;  %v16984_v13 = vld [vmem:[%s24882_s3 + $0x100] ss:$8 sps:$4 sm:$0xff]  }
  0x26   : > { %v1614_v12 = vpack.c.bf16 %v1327_v10, %v1325_v9  ;;  %v17034_v10 = vld [vmem:[%s24882_s3 + $0x204] ss:$8 sps:$4 sm:$0xff]  }
  0x28   : > { %554 = vmatpush1.bf16.msra.mxu0 %v16916_v14  ;;  %795 = vmatpush1.bf16.msra.mxu1 %v16916_v14  ;;  %v16986_v14 = vld [vmem:[%s24882_s3 + $0x104] ss:$8 sps:$4 sm:$0xff]  }
  0x29   : > { %555 = vmatprep.subr.bf16.mxu0 %v16917_v15  ;;  %796 = vmatprep.subr.bf16.mxu1 %v16917_v15  ;;  %v16987_v15 = vld [vmem:[%s24882_s3 + $0x110] ss:$8 sps:$4 sm:$0xff]  }
  0x2c   : > { %556 = vmatpush1.bf16.msra.mxu0 %v16919_v16  ;;  %797 = vmatpush1.bf16.msra.mxu1 %v16919_v16  ;;  %v16989_v16 = vld [vmem:[%s24882_s3 + $0x114] ss:$8 sps:$4 sm:$0xff]  }
  0x2d   : > { %2502 = vmatprep.subr.bf16.mxu0 %v16938_v17  ;;  %v16990_v17 = vld [vmem:[%s24882_s3 + $0x120] ss:$8 sps:$4 sm:$0xff]  }
  0x2f   : > { %574 = vmatmul.mubr.bf16.vlgmr.msra.gmra.mrb[0].mxu0 %v16920_v18  ;;  %815 = vmatmul.mubr.bf16.vlgmr.msra.gmra.mrb[0].mxu1 %v16927_v19  ;;  %v16992_v18 = vld [vmem:[%s24882_s3 + $0x124] ss:$8 sps:$4 sm:$0xff]   ;;  %v16993_v19 = vld [vmem:[%s24882_s3 + $0x130] ss:$8 sps:$4 sm:$0xff]  }
  0x30   : > { %583 = vmatprep.mubr.bf16.mxu0 %v18041_v2  ;;  %824 = vmatprep.mubr.bf16.mxu1 %v18041_v2 }
  0x31   : > { %2503 = vmatpush1.bf16.msra.mxu0 %v16936_v20  ;;  %v16995_v20 = vld [vmem:[%s24882_s3 + $0x134] ss:$8 sps:$4 sm:$0xff]  }
  0x32   : > { %2504 = vmatprep.subr.bf16.mxu0 %v16941_v21  ;;  %v16996_v21 = vld [vmem:[%s24882_s3 + $0x140] ss:$8 sps:$4 sm:$0xff]  }
  0x35   : > { %2505 = vmatpush1.bf16.msra.mxu0 %v16939_v22  ;;  %v16998_v22 = vld [vmem:[%s24882_s3 + $0x144] ss:$8 sps:$4 sm:$0xff]  }
  0x36   : > { %2506 = vmatprep.subr.bf16.mxu0 %v16944_v23  ;;  %v16999_v23 = vld [vmem:[%s24882_s3 + $0x150] ss:$8 sps:$4 sm:$0xff]  }
  0x37   : > { %584 = vmatmul.mubr.bf16.gmra.mrb[4].mxu0 %v16921_v24  ;;  %825 = vmatmul.mubr.bf16.gmra.mrb[4].mxu1 %v16929_v25  ;;  %v17001_v24 = vld [vmem:[%s24882_s3 + $0x154] ss:$8 sps:$4 sm:$0xff]   ;;  %v17002_v25 = vld [vmem:[%s24882_s3 + $0x160] ss:$8 sps:$4 sm:$0xff]  }
  0x38   : > { %593 = vmatprep.mubr.bf16.mxu0 %v18041_v2  ;;  %834 = vmatprep.mubr.bf16.mxu1 %v18041_v2 }
  0x39   : > { %2507 = vmatpush1.bf16.msra.mxu0 %v16942_v26  ;;  %v17004_v26 = vld [vmem:[%s24882_s3 + $0x164] ss:$8 sps:$4 sm:$0xff]  }
  0x3a   : > { %2508 = vmatprep.subr.bf16.mxu0 %v16947_v27  ;;  %v17005_v27 = vld [vmem:[%s24882_s3 + $0x170] ss:$8 sps:$4 sm:$0xff]  }
  0x3d   : > { %2509 = vmatpush1.bf16.msra.mxu0 %v16945_v28  ;;  %v17007_v28 = vld [vmem:[%s24882_s3 + $0x174] ss:$8 sps:$4 sm:$0xff]  }
  0x3e   : > { %2510 = vmatprep.subr.bf16.mxu0 %v16950_v29  ;;  %v17008_v29 = vld [vmem:[%s24882_s3 + $0x180] ss:$8 sps:$4 sm:$0xff]  }
  0x3f   : > { %594 = vmatmul.mubr.bf16.gmra.mrb[8].mxu0 %v16922_v30  ;;  %835 = vmatmul.mubr.bf16.gmra.mrb[8].mxu1 %v16930_v31  ;;  %v17010_v30 = vld [vmem:[%s24882_s3 + $0x184] ss:$8 sps:$4 sm:$0xff]   ;;  %v17011_v31 = vld [vmem:[%s24882_s3 + $0x190] ss:$8 sps:$4 sm:$0xff]  }
  0x40   : > { %603 = vmatprep.mubr.bf16.mxu0 %v18041_v2  ;;  %844 = vmatprep.mubr.bf16.mxu1 %v18041_v2 }
  0x41   : > { %2511 = vmatpush1.bf16.msra.mxu0 %v16948_v32  ;;  %v17013_v32 = vld [vmem:[%s24882_s3 + $0x194] ss:$8 sps:$4 sm:$0xff]  }
  0x42   : > { %2512 = vmatprep.subr.bf16.mxu0 %v16953_v33  ;;  %v17014_v33 = vld [vmem:[%s24882_s3 + $0x1a0] ss:$8 sps:$4 sm:$0xff]  }
  0x45   : > { %2513 = vmatpush1.bf16.msra.mxu0 %v16951_v34  ;;  %v17016_v34 = vld [vmem:[%s24882_s3 + $0x1a4] ss:$8 sps:$4 sm:$0xff]  }
  0x46   : > { %2514 = vmatprep.subr.bf16.mxu0 %v16956_v35  ;;  %v17017_v35 = vld [vmem:[%s24882_s3 + $0x1b0] ss:$8 sps:$4 sm:$0xff]  }
  0x47   : > { %604 = vmatmul.mubr.bf16.gmra.mrb[12].mxu0 %v16923_v36  ;;  %845 = vmatmul.mubr.bf16.gmra.mrb[12].mxu1 %v16931_v37  ;;  %v17019_v36 = vld [vmem:[%s24882_s3 + $0x1b4] ss:$8 sps:$4 sm:$0xff]   ;;  %v17020_v37 = vld [vmem:[%s24882_s3 + $0x1c0] ss:$8 sps:$4 sm:$0xff]  }
  0x48   : > { %613 = vmatprep.mubr.bf16.mxu0 %v18041_v2  ;;  %854 = vmatprep.mubr.bf16.mxu1 %v18041_v2 }
  0x49   : > { %2515 = vmatpush1.bf16.msra.mxu0 %v16954_v38  ;;  %v17022_v38 = vld [vmem:[%s24882_s3 + $0x1c4] ss:$8 sps:$4 sm:$0xff]  }
  0x4a   : > { %2516 = vmatprep.subr.bf16.mxu0 %v16959_v39  ;;  %v403_v39 = vlaneseq }
  0x4d   : > { %2517 = vmatpush1.bf16.msra.mxu0 %v16957_v40  ;;  %v18390_v40 = vshrl.u32 %v403_v39, 7 }
  0x4e   : > { %2518 = vmatprep.subr.bf16.mxu0 %v16962_v41  ;;  %v17023_v41 = vld [vmem:[%s24882_s3 + $0x1d0] ss:$8 sps:$4 sm:$0xff]  }
  0x4f   : > { %614 = vmatmul.mubr.bf16.gmra.mrb[16].mxu0 %v16924_v42  ;;  %855 = vmatmul.mubr.bf16.gmra.mrb[16].mxu1 %v16932_v43  ;;  %25263 = vst [vmem:[#allocation6_spill] sm:$0xff] %v18390_v40  ;;  %v17025_v42 = vld [vmem:[%s24882_s3 + $0x1d4] ss:$8 sps:$4 sm:$0xff]   ;;  %v385_v43 = vld [vmem:[%s24881_s2] sm:$0x3]  ;;  %vm1252_vm0 = vcmp.lt.s32.totalorder %v18390_v40, 1 }
  0x50   : > { %623 = vmatprep.mubr.bf16.mxu0 %v18041_v2  ;;  %864 = vmatprep.mubr.bf16.mxu1 %v18041_v2  ;;  %vm1469_vm1 = vcmp.lt.s32.totalorder %v18390_v40, 7 }
  0x51   : > { %2519 = vmatpush1.bf16.msra.mxu0 %v16960_v44  ;;  %v24891_v44 = vsub.s32 0, %v18390_v40 }
  0x52   : > { %2520 = vmatprep.subr.bf16.mxu0 %v16965_v45  ;;  %v24890_v45 = vsub.s32 1, %v18390_v40 }
  0x55   : > { %2521 = vmatpush1.bf16.msra.mxu0 %v16963_v46  ;;  %v17026_v46 = vld [vmem:[%s24882_s3 + $0x1e0] ss:$8 sps:$4 sm:$0xff]  }
  0x56   : > { %2522 = vmatprep.subr.bf16.mxu0 %v16968_v47  ;;  %v17028_v47 = vld [vmem:[%s24882_s3 + $0x1e4] ss:$8 sps:$4 sm:$0xff]  }
  0x57   : > { %624 = vmatmul.mubr.bf16.gmra.mrb[20].mxu0 %v16925_v48  ;;  %865 = vmatmul.mubr.bf16.gmra.mrb[20].mxu1 %v16933_v49  ;;  %v18411_v48 = vrot.slane %v385_v43, %v24891_v44  ;;  %v18415_v49 = vrot.slane %v385_v43, %v24890_v45 }
  0x58   : > { %633 = vmatprep.mubr.bf16.mxu0 %v18041_v2  ;;  %874 = vmatprep.mubr.bf16.mxu1 %v18041_v2 }
  0x59   : > { %2523 = vmatpush1.bf16.msra.mxu0 %v16966_v50  ;;  %25264 = vst [vmem:[#allocation7_spill] sm:$0xff] %v18411_v48  ;;  %25265 = vst [vmem:[#allocation8_spill] sm:$0xff] %v18415_v49 }
  0x5a   : > { %2524 = vmatprep.subr.bf16.mxu0 %v16971_v51 }
  0x5d   : > { %2525 = vmatpush1.bf16.msra.mxu0 %v16969_v52 }
  0x5e   : > { %2526 = vmatprep.subr.bf16.mxu0 %v16974_v57 }
  0x5f   : > { %634 = vmatmul.mubr.bf16.gmra.mrb[24].mxu0 %v16926_v53  ;;  %875 = vmatmul.mubr.bf16.gmra.mrb[24].mxu1 %v16934_v54 }
  0x60   : > { %643 = vmatprep.mubr.bf16.mxu0 %v18041_v2  ;;  %884 = vmatprep.mubr.bf16.mxu1 %v18041_v2  ;;  %v1034_v2 = vld [vmem:[%s24888_s9 + $0x8] sm:$0xff] }
  0x61   : > { %2527 = vmatpush1.bf16.msra.mxu0 %v16972_v58  ;;  %v1326_v5 = vmul.f32 %v18288_v0, %v1034_v2  ;;  %v17029_v58 = vld [vmem:[%s24882_s3 + $0x1f0] ss:$8 sps:$4 sm:$0xff]  }
  0x62   : > { %2528 = vmatprep.subr.bf16.mxu0 %v16977_v59  ;;  %v17031_v59 = vld [vmem:[%s24882_s3 + $0x1f4] ss:$8 sps:$4 sm:$0xff]  }
  0x63   : > { %v1615_v11 = vpack.c.bf16 %v1328_v6, %v1326_v5 }
  0x65   : > { %2529 = vmatpush1.bf16.msra.mxu0 %v16975_v60 }
  0x66   : > { %2530 = vmatprep.subr.bf16.mxu0 %v16980_v61 }
  0x67   : > { %644 = vmatmul.mubr.bf16.gmra.mrb[28].mxu0 %v16928_v55  ;;  %885 = vmatmul.mubr.bf16.gmra.mrb[28].mxu1 %v16935_v56 }
  0x68   : > { %2534 = vmatprep.mubr.bf16.mxu0 %v1615_v11 }
  0x69   : > { %2531 = vmatpush1.bf16.msra.mxu0 %v16978_v62 }
  0x6a   : > { %2532 = vmatprep.subr.bf16.mxu0 %v16983_v1 }
  0x6d   : > { %2533 = vmatpush1.bf16.msra.mxu0 %v16981_v4 }
  0x6e   : > { %2695 = vmatprep.subr.bf16.mxu0 %v16986_v14 }
  0x70   : > { %2535 = vmatmul.mubr.bf16.vlgmr.msra.gmra.mrb[32].mxu0 %v1614_v12 }
  0x71   : > { %2696 = vmatpush1.bf16.msra.mxu0 %v16984_v13 }
  0x72   : > { %2697 = vmatprep.subr.bf16.mxu0 %v16989_v16 }
  0x75   : > { %2698 = vmatpush1.bf16.msra.mxu0 %v16987_v15 }
  0x76   : > { %2699 = vmatprep.subr.bf16.mxu0 %v16992_v18 }
  0x79   : > { %2700 = vmatpush1.bf16.msra.mxu0 %v16990_v17 }
  0x7a   : > { %2701 = vmatprep.subr.bf16.mxu0 %v16995_v20  ;;  %v1038_v20 = vld [vmem:[%s24888_s9 + $0x28] sm:$0xff] }
  0x7d   : > { %2702 = vmatpush1.bf16.msra.mxu0 %v16993_v19 }
  0x7e   : > { %2703 = vmatprep.subr.bf16.mxu0 %v16998_v22 }
  0x81   : > { %2704 = vmatpush1.bf16.msra.mxu0 %v16996_v21 }
  0x82   : > { %2705 = vmatprep.subr.bf16.mxu0 %v17001_v24  ;;  %v1039_v24 = vld [vmem:[%s24888_s9 + $0x30] sm:$0xff] }
  0x85   : > { %2706 = vmatpush1.bf16.msra.mxu0 %v16999_v23 }
  0x86   : > { %2707 = vmatprep.subr.bf16.mxu0 %v17004_v26 }
  0x89   : > { %2708 = vmatpush1.bf16.msra.mxu0 %v17002_v25 }
  0x8a   : > { %2709 = vmatprep.subr.bf16.mxu0 %v17007_v28 }
  0x8d   : > { %2710 = vmatpush1.bf16.msra.mxu0 %v17005_v27 }
  0x8e   : > { %2711 = vmatprep.subr.bf16.mxu0 %v17010_v30  ;;  %v1040_v30 = vld [vmem:[%s24888_s9 + $0x38] sm:$0xff] }
  0x91   : > { %2712 = vmatpush1.bf16.msra.mxu0 %v17008_v29 }
  0x92   : > { %2713 = vmatprep.subr.bf16.mxu0 %v17013_v32 }
  0x95   : > { %2714 = vmatpush1.bf16.msra.mxu0 %v17011_v31 }
  0x96   : > { %2715 = vmatprep.subr.bf16.mxu0 %v17016_v34 }
  0x99   : > { %2716 = vmatpush1.bf16.msra.mxu0 %v17014_v33 }
  0x9a   : > { %2717 = vmatprep.subr.bf16.mxu0 %v17019_v36 }
  0x9d   : > { %2718 = vmatpush1.bf16.msra.mxu0 %v17017_v35 }
  0x9e   : > { %2719 = vmatprep.subr.bf16.mxu0 %v17022_v38 }
  0xa1   : > { %2720 = vmatpush1.bf16.msra.mxu0 %v17020_v37  ;;  %v1037_v37 = vld [vmem:[%s24888_s9 + $0x20] sm:$0xff] }
  0xa2   : > { %2721 = vmatprep.subr.bf16.mxu0 %v17025_v42 }
  0xa5   : > { %2722 = vmatpush1.bf16.msra.mxu0 %v17023_v41 }
  0xa6   : > { %2723 = vmatprep.subr.bf16.mxu0 %v17028_v47 }
  0xa9   : > { %2724 = vmatpush1.bf16.msra.mxu0 %v17026_v46 }
  0xaa   : > { %2725 = vmatprep.subr.bf16.mxu0 %v17031_v59 }
  0xad   : > { %2726 = vmatpush1.bf16.msra.mxu0 %v17029_v58 }
  0xae   : > { %2888 = vmatprep.subr.bf16.mxu0 %v17034_v10 }
 0x102   : > { %v575_v50 = vpop.f32.mrb[0].mxu0  ;;  %v816_v51 = vpop.f32.mrb[0].mxu1 }
 0x103   : > { %v576_v52 = vadd.f32 %v575_v50, %v18411_v48  ;;  %v577_v53 = vpop.f32.mrb[1].mxu0  ;;  %v818_v54 = vpop.f32.mrb[1].mxu1  ;;  %v817_v18 = vadd.f32 %v816_v51, %v18411_v48 }
 0x104   : > { %v578_v55 = vadd.f32 %v577_v53, %v18415_v49  ;;  %v579_v56 = vpop.f32.mrb[2].mxu0  ;;  %v820_v57 = vpop.f32.mrb[2].mxu1  ;;  %v819_v26 = vadd.f32 %v818_v54, %v18415_v49 }
 0x105   : > { %17584 = vtanh.f32 %v576_v52  ;;  %v580_v60 = vadd.f32 %v579_v56, %v18411_v48  ;;  %v581_v61 = vpop.f32.mrb[3].mxu0  ;;  %v18426_v62 = vpop.f32.mrb[3].mxu1  ;;  %v821_v33 = vadd.f32 %v820_v57, %v18411_v48 }
 0x106   : > { %17586 = vtanh.f32 %v578_v55  ;;  %v582_v1 = vadd.f32 %v581_v61, %v18415_v49  ;;  %v823_v56 = vadd.f32 %v18426_v62, %v18415_v49  ;;  %v1042_v62 = vld [vmem:[%s24888_s9 + $0x48] sm:$0xff] }
 0x107   : > { %17588 = vtanh.f32 %v580_v60 }
 0x108   : > { %17590 = vtanh.f32 %v582_v1 }
 0x10a   : > { %v585_v2 = vpop.f32.mrb[4].mxu0  ;;  %v18429_v3 = vpop.f32.mrb[4].mxu1 }
 0x10b   : > { %v586_v4 = vadd.f32 %v585_v2, %v18411_v48  ;;  %v587_v5 = vpop.f32.mrb[5].mxu0  ;;  %v18432_v6 = vpop.f32.mrb[5].mxu1 }
 0x10c   : > { %v588_v7 = vadd.f32 %v587_v5, %v18415_v49  ;;  %v589_v8 = vpop.f32.mrb[6].mxu0  ;;  %v18435_v9 = vpop.f32.mrb[6].mxu1  ;;  %v1043_v5 = vld [vmem:[%s24888_s9 + $0x50] sm:$0xff] }
 0x10d   : > { %17592 = vtanh.f32 %v586_v4  ;;  %v590_v11 = vadd.f32 %v589_v8, %v18411_v48  ;;  %v591_v12 = vpop.f32.mrb[7].mxu0  ;;  %v18441_v13 = vpop.f32.mrb[7].mxu1  ;;  %v827_v8 = vadd.f32 %v18429_v3, %v18411_v48 }
 0x10e   : > { %17594 = vtanh.f32 %v588_v7  ;;  %v592_v14 = vadd.f32 %v591_v12, %v18415_v49 }
 0x10f   : > { %v18444_v15 = vpop.eup %17584  ;;  %17596 = vtanh.f32 %v590_v11 }
 0x110   : > { %25266 = vst [vmem:[#allocation9_spill] sm:$0xff] %v18444_v15  ;;  %v18446_v16 = vpop.eup %17586  ;;  %17598 = vtanh.f32 %v592_v14  ;;  %v1182_v17 = vrot.slane %v18444_v15, 7  ;;  %v1044_v14 = vld [vmem:[%s24888_s9 + $0x58] sm:$0xff] }
 0x111   : > { %25267 = vst [vmem:[#allocation10_spill] sm:$0xff] %v18446_v16  ;;  %v18451_v19 = vpop.eup %17588  ;;  %v1183_v21 = vrot.slane %v18446_v16, 7  ;;  %17600 = vtanh.f32 %v817_v18 }
 0x112   : > { %25268 = vst [vmem:[#allocation11_spill] sm:$0xff] %v18451_v19  ;;  %v18457_v22 = vpop.eup %17590  ;;  %v595_v23 = vpop.f32.mrb[8].mxu0  ;;  %v1184_v25 = vrot.slane %v18451_v19, 7  ;;  %v1319_v39 = vsel %vm1252_vm0, %v18288_v0, %v1182_v17 }
 0x113   : > { %25269 = vst [vmem:[#allocation12_spill] sm:$0xff] %v18457_v22  ;;  %v18464_v27 = vpop.f32.mrb[8].mxu1  ;;  %v596_v28 = vadd.f32 %v595_v23, %v18411_v48  ;;  %v597_v29 = vpop.f32.mrb[9].mxu0  ;;  %v1185_v31 = vrot.slane %v18457_v22, 7  ;;  %v1320_v32 = vsel %vm1252_vm0, %v18288_v0, %v1183_v21  ;;  %v1329_v55 = vmul.f32 %v1319_v39, %v1037_v37  ;;  %v1041_v23 = vld [vmem:[%s24888_s9 + $0x40] sm:$0xff] }
 0x114   : > { %v18475_v34 = vpop.f32.mrb[9].mxu1  ;;  %v598_v35 = vadd.f32 %v597_v29, %v18415_v49  ;;  %v599_v36 = vpop.f32.mrb[10].mxu0  ;;  %v1317_v38 = vsel %vm1252_vm0, %v1182_v17, %v1184_v25  ;;  %v1330_v52 = vmul.f32 %v1320_v32, %v1038_v20 }
 0x115   : > { %v18486_v41 = vpop.f32.mrb[10].mxu1  ;;  %17602 = vtanh.f32 %v596_v28  ;;  %v600_v42 = vadd.f32 %v599_v36, %v18411_v48  ;;  %v601_v43 = vpop.f32.mrb[11].mxu0  ;;  %v1318_v46 = vsel %vm1252_vm0, %v1183_v21, %v1185_v31  ;;  %v1331_v47 = vmul.f32 %v1317_v38, %v1039_v24 }
 0x116   : > { %v18491_v50 = vpop.f32.mrb[11].mxu1  ;;  %17604 = vtanh.f32 %v598_v35  ;;  %v602_v51 = vadd.f32 %v601_v43, %v18415_v49  ;;  %v1332_v53 = vmul.f32 %v1318_v46, %v1040_v30  ;;  %v829_v28 = vadd.f32 %v18432_v6, %v18415_v49 }
 0x117   : > { %v18494_v54 = vpop.eup %17592  ;;  %17606 = vtanh.f32 %v600_v42  ;;  %v18505_v61 = vpack.c.bf16 %v1331_v47, %v1329_v55  ;;  %v831_v42 = vadd.f32 %v18435_v9, %v18411_v48  ;;  %v1047_v9 = vld [vmem:[%s24888_s9 + $0x70] sm:$0xff] }
 0x118   : > { %25270 = vst [vmem:[#allocation13_spill] sm:$0xff] %v18494_v54  ;;  %v18498_v57 = vpop.eup %17594  ;;  %17608 = vtanh.f32 %v602_v51  ;;  %v18500_v58 = vpack.c.bf16 %v1332_v53, %v1330_v52  ;;  %v1186_v59 = vrot.slane %v18494_v54, 7 }
 0x119   : > { %25271 = vst [vmem:[#allocation14_spill] sm:$0xff] %v18498_v57  ;;  %v18503_v60 = vpop.eup %17596  ;;  %25274 = vst [vmem:[#allocation17_spill] sm:$0xff] %v18505_v61  ;;  %v1187_v1 = vrot.slane %v18498_v57, 7  ;;  %17610 = vtanh.f32 %v819_v26 }
 0x11a   : > { %25272 = vst [vmem:[#allocation15_spill] sm:$0xff] %v18500_v58  ;;  %25273 = vst [vmem:[#allocation16_spill] sm:$0xff] %v18503_v60  ;;  %v18508_v2 = vpop.eup %17598  ;;  %v605_v4 = vpop.f32.mrb[12].mxu0  ;;  %2544 = vmatprep.mubr.bf16.mxu0 %v18500_v58  ;;  %v1188_v7 = vrot.slane %v18503_v60, 7  ;;  %17612 = vtanh.f32 %v821_v33  ;;  %v1315_v26 = vsel %vm1252_vm0, %v1184_v25, %v1186_v59 }
 0x11b   : > { %25275 = vst [vmem:[#allocation18_spill] sm:$0xff] %v18508_v2  ;;  %v18520_v10 = vpop.f32.mrb[12].mxu1  ;;  %v606_v11 = vadd.f32 %v605_v4, %v18411_v48  ;;  %v607_v12 = vpop.f32.mrb[13].mxu0  ;;  %2545 = vmatmul.mubr.bf16.gmra.mrb[36].mxu0 %v18505_v61  ;;  %v1189_v17 = vrot.slane %v18508_v2, 7  ;;  %v1316_v18 = vsel %vm1252_vm0, %v1185_v31, %v1187_v1  ;;  %17614 = vtanh.f32 %v823_v56 }
 0x11c   : > { %v18530_v20 = vpop.f32.mrb[13].mxu1  ;;  %v608_v3 = vadd.f32 %v607_v12, %v18415_v49  ;;  %v609_v21 = vpop.f32.mrb[14].mxu0  ;;  %v1313_v24 = vsel %vm1252_vm0, %v1186_v59, %v1188_v7  ;;  %v1334_v37 = vmul.f32 %v1316_v18, %v1042_v62  ;;  %v1333_v39 = vmul.f32 %v1315_v26, %v1041_v23  ;;  %v1048_v12 = vld [vmem:[%s24888_s9 + $0x78] sm:$0xff] }
 0x11d   : > { %v18544_v29 = vpop.f32.mrb[14].mxu1  ;;  %17616 = vtanh.f32 %v606_v11  ;;  %v610_v30 = vadd.f32 %v609_v21, %v18411_v48  ;;  %v611_v31 = vpop.f32.mrb[15].mxu0  ;;  %v1314_v32 = vsel %vm1252_vm0, %v1187_v1, %v1189_v17  ;;  %v1335_v33 = vmul.f32 %v1313_v24, %v1043_v5  ;;  %v1046_v11 = vld [vmem:[%s24888_s9 + $0x68] sm:$0xff]  ;;  %v1045_v24 = vld [vmem:[%s24888_s9 + $0x60] sm:$0xff] }
 0x11e   : > { %v18549_v35 = vpop.f32.mrb[15].mxu1  ;;  %v18551_v36 = vpop.eup %17600  ;;  %17618 = vtanh.f32 %v608_v3  ;;  %v612_v25 = vadd.f32 %v611_v31, %v18415_v49  ;;  %v1336_v38 = vmul.f32 %v1314_v32, %v1044_v14  ;;  %v833_v1 = vadd.f32 %v18441_v13, %v18415_v49 }
 0x11f   : > { %25276 = vst [vmem:[#allocation19_spill] sm:$0xff] %v18551_v36  ;;  %v18554_v6 = vpop.eup %17602  ;;  %17620 = vtanh.f32 %v610_v30  ;;  %v18565_v52 = vpack.c.bf16 %v1335_v33, %v1333_v39 }
 0x120   : > { %25277 = vst [vmem:[#allocation20_spill] sm:$0xff] %v18554_v6  ;;  %v18558_v43 = vpop.eup %17604  ;;  %17622 = vtanh.f32 %v612_v25  ;;  %v18560_v46 = vpack.c.bf16 %v1336_v38, %v1334_v37  ;;  %v1190_v47 = vrot.slane %v18554_v6, 7 }
 0x121   : > { %25278 = vst [vmem:[#allocation21_spill] sm:$0xff] %v18558_v43  ;;  %v18563_v51 = vpop.eup %17606  ;;  %25281 = vst [vmem:[#allocation24_spill] sm:$0xff] %v18565_v52  ;;  %v1191_v53 = vrot.slane %v18558_v43, 7  ;;  %17624 = vtanh.f32 %v827_v8  ;;  %v1071_v43 = vld [vmem:[%s24888_s9 + $0x130] sm:$0xff] }
 0x122   : > { %25279 = vst [vmem:[#allocation22_spill] sm:$0xff] %v18560_v46  ;;  %25280 = vst [vmem:[#allocation23_spill] sm:$0xff] %v18563_v51  ;;  %v18568_v55 = vpop.eup %17608  ;;  %v615_v56 = vpop.f32.mrb[16].mxu0  ;;  %2554 = vmatprep.mubr.bf16.mxu0 %v18560_v46  ;;  %v1192_v59 = vrot.slane %v18563_v51, 7  ;;  %17626 = vtanh.f32 %v829_v28  ;;  %v837_v28 = vadd.f32 %v18464_v27, %v18411_v48 }
 0x123   : > { %25282 = vst [vmem:[#allocation25_spill] sm:$0xff] %v18568_v55  ;;  %v18577_v4 = vpop.f32.mrb[16].mxu1  ;;  %v18579_v62 = vpop.eup %17610  ;;  %v616_v5 = vadd.f32 %v615_v56, %v18411_v48  ;;  %2555 = vmatmul.mubr.bf16.gmra.mrb[40].mxu0 %v18565_v52  ;;  %v1193_v14 = vrot.slane %v18568_v55, 7  ;;  %v1312_v13 = vsel %vm1252_vm0, %v1189_v17, %v1191_v53  ;;  %17628 = vtanh.f32 %v831_v42 }
 0x124   : > { %25283 = vst [vmem:[#allocation26_spill] sm:$0xff] %v18579_v62  ;;  %v617_v8 = vpop.f32.mrb[17].mxu0  ;;  %v18592_v18 = vpop.f32.mrb[17].mxu1  ;;  %v1309_v26 = vsel %vm1252_vm0, %v1190_v47, %v1192_v59  ;;  %v1311_v17 = vsel %vm1252_vm0, %v1188_v7, %v1190_v47  ;;  %v1338_v39 = vmul.f32 %v1312_v13, %v1046_v11  ;;  %v839_v56 = vadd.f32 %v18475_v34, %v18415_v49  ;;  %v1052_v34 = vld [vmem:[%s24888_s9 + $0x98] sm:$0xff] }
 0x125   : > { %v18594_v3 = vpop.eup %17612  ;;  %v618_v21 = vadd.f32 %v617_v8, %v18415_v49  ;;  %v619_v23 = vpop.f32.mrb[18].mxu0  ;;  %17630 = vtanh.f32 %v616_v5  ;;  %v1310_v25 = vsel %vm1252_vm0, %v1191_v53, %v1193_v14  ;;  %v1339_v37 = vmul.f32 %v1309_v26, %v1047_v9 }
 0x126   : > { %25284 = vst [vmem:[#allocation27_spill] sm:$0xff] %v18594_v3  ;;  %v18610_v30 = vpop.f32.mrb[18].mxu1  ;;  %v18612_v31 = vpop.eup %17614  ;;  %v620_v32 = vadd.f32 %v619_v23, %v18411_v48  ;;  %v1340_v42 = vmul.f32 %v1310_v25, %v1048_v12  ;;  %v1337_v47 = vmul.f32 %v1311_v17, %v1045_v24  ;;  %v841_v9 = vadd.f32 %v18486_v41, %v18411_v48  ;;  %v1050_v12 = vld [vmem:[%s24888_s9 + $0x88] sm:$0xff]  ;;  %v1051_v23 = vld [vmem:[%s24888_s9 + $0x90] sm:$0xff] }
 0x127   : > { %25285 = vst [vmem:[#allocation28_spill] sm:$0xff] %v18612_v31  ;;  %v621_v33 = vpop.f32.mrb[19].mxu0  ;;  %v18617_v38 = vpop.f32.mrb[19].mxu1  ;;  %17632 = vtanh.f32 %v618_v21 }
 0x128   : > { %v622_v7 = vadd.f32 %v621_v33, %v18415_v49  ;;  %v18620_v27 = vpop.eup %17616  ;;  %17634 = vtanh.f32 %v620_v32  ;;  %v18626_v8 = vpack.c.bf16 %v1340_v42, %v1338_v39  ;;  %v18633_v11 = vpack.c.bf16 %v1339_v37, %v1337_v47 }
 0x129   : > { %25286 = vst [vmem:[#allocation29_spill] sm:$0xff] %v18620_v27  ;;  %v18624_v5 = vpop.eup %17618  ;;  %v1194_v53 = vrot.slane %v18620_v27, 7  ;;  %v843_v32 = vadd.f32 %v18491_v50, %v18415_v49 }
 0x12a   : > { %25287 = vst [vmem:[#allocation30_spill] sm:$0xff] %v18624_v5  ;;  %17636 = vtanh.f32 %v622_v7  ;;  %25288 = vst [vmem:[#allocation31_spill] sm:$0xff] %v18626_v8  ;;  %v18631_v21 = vpop.eup %17620  ;;  %v1195_v13 = vrot.slane %v18624_v5, 7  ;;  %v625_v26 = vpop.f32.mrb[20].mxu0  ;;  %2564 = vmatprep.mubr.bf16.mxu0 %v18626_v8 }
 0x12b   : > { %25289 = vst [vmem:[#allocation32_spill] sm:$0xff] %v18631_v21  ;;  %25290 = vst [vmem:[#allocation33_spill] sm:$0xff] %v18633_v11  ;;  %17638 = vtanh.f32 %v833_v1  ;;  %v18646_v24 = vpop.eup %17622  ;;  %v24899_v17 = vrot.slane %v18631_v21, 7  ;;  %v18653_v25 = vpop.f32.mrb[20].mxu1  ;;  %v626_v1 = vadd.f32 %v625_v26, %v18411_v48  ;;  %2565 = vmatmul.mubr.bf16.gmra.mrb[44].mxu0 %v18633_v11  ;;  %v1049_v26 = vld [vmem:[%s24888_s9 + $0x80] sm:$0xff] }
 0x12c   : > { %25291 = vst [vmem:[#allocation34_spill] sm:$0xff] %v18646_v24  ;;  %17640 = vtanh.f32 %v837_v28  ;;  %v18655_v37 = vpop.eup %17624  ;;  %v627_v7 = vpop.f32.mrb[21].mxu0  ;;  %v1197_v39 = vrot.slane %v18646_v24, 7  ;;  %v1308_v42 = vsel %vm1252_vm0, %v1193_v14, %v1195_v13  ;;  %v1307_v14 = vsel %vm1252_vm0, %v1192_v59, %v1194_v53 }
 0x12d   : > { %25292 = vst [vmem:[#allocation35_spill] sm:$0xff] %v18655_v37  ;;  %v18663_v47 = vpop.f32.mrb[21].mxu1  ;;  %v18665_v50 = vpop.eup %17626  ;;  %v628_v45 = vadd.f32 %v627_v7, %v18415_v49  ;;  %v1305_v63 = vsel %vm1252_vm0, %v1194_v53, %v24899_v17  ;;  %17642 = vtanh.f32 %v839_v56  ;;  %v1342_v52 = vmul.f32 %v1308_v42, %v1050_v12 }
 0x12e   : > { %25293 = vst [vmem:[#allocation36_spill] sm:$0xff] %v18665_v50  ;;  %v629_v44 = vpop.f32.mrb[22].mxu0  ;;  %v18679_v28 = vpop.f32.mrb[22].mxu1  ;;  %17644 = vtanh.f32 %v626_v1  ;;  %v1306_v0 = vsel %vm1252_vm0, %v1195_v13, %v1197_v39  ;;  %v1343_v11 = vmul.f32 %v1305_v63, %v1051_v23  ;;  %v1341_v53 = vmul.f32 %v1307_v14, %v1049_v26 }
 0x12f   : > { %v18681_v41 = vpop.eup %17628  ;;  %v630_v7 = vadd.f32 %v629_v44, %v18411_v48  ;;  %v631_v33 = vpop.f32.mrb[23].mxu0  ;;  %17646 = vtanh.f32 %v628_v45  ;;  %v1344_v59 = vmul.f32 %v1306_v0, %v1052_v34  ;;  %v847_v1 = vadd.f32 %v18520_v10, %v18411_v48  ;;  %v1072_v0 = vld [vmem:[%s24888_s9 + $0x138] sm:$0xff] }
 0x130   : > { %v18686_v8 = vpop.f32.mrb[23].mxu1  ;;  %v632_v17 = vadd.f32 %v631_v33, %v18415_v49  ;;  %v18689_v56 = vpop.eup %17630  ;;  %v18695_v44 = vadd.f32 %v18530_v20, %v18415_v49  ;;  %v25296_v12 = vrot.slane %v18612_v31, 7  ;;  %v25297_v34 = vrot.slane %v18579_v62, 7  ;;  %v1055_v33 = vld [vmem:[%s24888_s9 + $0xb0] sm:$0xff] }
 0x131   : > { %25294 = vst [vmem:[#allocation37_spill] sm:$0xff] %v18689_v56  ;;  %17648 = vtanh.f32 %v630_v7  ;;  %v18697_v13 = vpop.eup %17632  ;;  %v18699_v63 = vpack.c.bf16 %v1344_v59, %v1342_v52  ;;  %v1198_v45 = vrot.slane %v18689_v56, 7  ;;  %v18713_v23 = vpack.c.bf16 %v1343_v11, %v1341_v53  ;;  %v1054_v52 = vld [vmem:[%s24888_s9 + $0xa8] sm:$0xff] }
 0x132   : > { %17650 = vtanh.f32 %v632_v17  ;;  %v1286_v10 = vsel %vm1252_vm0, %v25297_v34, %v25296_v12  ;;  %v18711_v20 = vpop.eup %17634  ;;  %v1199_v17 = vrot.slane %v18697_v13, 7  ;;  %v851_v42 = vadd.f32 %v18544_v29, %v18411_v48  ;;  %v635_v14 = vpop.f32.mrb[24].mxu0  ;;  %v1056_v34 = vld [vmem:[%s24888_s9 + $0xb8] sm:$0xff] }
 0x133   : > { %25295 = vst [vmem:[#allocation38_spill] sm:$0xff] %v18699_v63  ;;  %25298 = vst [vmem:[#allocation39_spill] sm:$0xff] %v18711_v20  ;;  %17652 = vtanh.f32 %v841_v9  ;;  %2574 = vmatprep.mubr.bf16.mxu0 %v18699_v63  ;;  %v1200_v11 = vrot.slane %v18711_v20, 7  ;;  %v18730_v7 = vadd.f32 %v18549_v35, %v18415_v49  ;;  %v18733_v53 = vpop.f32.mrb[24].mxu1  ;;  %v636_v29 = vadd.f32 %v635_v14, %v18411_v48  ;;  %v637_v12 = vpop.f32.mrb[25].mxu0 }
 0x134   : > { %25299 = vst [vmem:[#allocation40_spill] sm:$0xff] %v18713_v23  ;;  %v18724_v26 = vpop.eup %17636  ;;  %17654 = vtanh.f32 %v843_v32  ;;  %2575 = vmatmul.mubr.bf16.gmra.mrb[48].mxu0 %v18713_v23  ;;  %v1304_v35 = vsel %vm1252_vm0, %v1197_v39, %v1199_v17  ;;  %v18745_v63 = vmul.f32 %v1286_v10, %v1072_v0  ;;  %v18747_v59 = vpop.f32.mrb[25].mxu1  ;;  %v638_v14 = vadd.f32 %v637_v12, %v18415_v49  ;;  %v1053_v23 = vld [vmem:[%s24888_s9 + $0xa0] sm:$0xff] }
 0x135   : > { %v18735_v9 = vpop.eup %17638  ;;  %v1201_v32 = vrot.slane %v18724_v26, 7  ;;  %v639_v61 = vpop.f32.mrb[26].mxu0  ;;  %v1301_v58 = vsel %vm1252_vm0, %v1198_v45, %v1200_v11  ;;  %v25301_v20 = vrot.slane %v18631_v21, 7  ;;  %17656 = vtanh.f32 %v847_v1 }
 0x136   : > { %25300 = vst [vmem:[#allocation41_spill] sm:$0xff] %v18735_v9  ;;  %v18749_v46 = vpop.eup %17640  ;;  %v18761_v0 = vpop.f32.mrb[26].mxu1  ;;  %17658 = vtanh.f32 %v636_v29  ;;  %v640_v10 = vadd.f32 %v639_v61, %v18411_v48  ;;  %v1347_v27 = vmul.f32 %v1301_v58, %v1055_v33  ;;  %v1346_v51 = vmul.f32 %v1304_v35, %v1054_v52 }
 0x137   : > { %v1303_v39 = vsel %vm1252_vm0, %v25301_v20, %v1198_v45  ;;  %v641_v12 = vpop.f32.mrb[27].mxu0  ;;  %v1302_v56 = vsel %vm1252_vm0, %v1199_v17, %v1201_v32  ;;  %v18766_v24 = vpop.f32.mrb[27].mxu1  ;;  %17660 = vtanh.f32 %v638_v14  ;;  %v18775_v61 = vadd.f32 %v18577_v4, %v18411_v48 }
 0x138   : > { %v18768_v5 = vpop.eup %17642  ;;  %v642_v21 = vadd.f32 %v641_v12, %v18415_v49  ;;  %v1348_v45 = vmul.f32 %v1302_v56, %v1056_v34  ;;  %17662 = vtanh.f32 %v640_v10  ;;  %v1345_v20 = vmul.f32 %v1303_v39, %v1053_v23  ;;  %v1057_v56 = vld [vmem:[%s24888_s9 + $0xc0] sm:$0xff] }
 0x139   : > { %25302 = vst [vmem:[#allocation42_spill] sm:$0xff] %v18768_v5  ;;  %v18771_v1 = vpop.eup %17644  ;;  %v18779_v58 = vadd.f32 %v18592_v18, %v18415_v49  ;;  %v18791_v23 = vadd.f32 %v18610_v30, %v18411_v48  ;;  %v1058_v18 = vld [vmem:[%s24888_s9 + $0xc8] sm:$0xff]  ;;  %v25305_v34 = vrot.slane %v18594_v3, 7  ;;  %v25306_v30 = vrot.slane %v18551_v36, 7 }
 0x13a   : > { %v18781_v17 = vpop.eup %17646  ;;  %17664 = vtanh.f32 %v642_v21  ;;  %v18783_v33 = vpack.c.bf16 %v1348_v45, %v1346_v51  ;;  %v1202_v52 = vrot.slane %v18771_v1, 7  ;;  %v18795_v29 = vpack.c.bf16 %v1347_v27, %v1345_v20  ;;  %v1059_v21 = vld [vmem:[%s24888_s9 + $0xd0] sm:$0xff]  ;;  %v645_v14 = vpop.f32.mrb[28].mxu0 }
 0x13b   : > { %v18793_v4 = vpop.eup %17648  ;;  %v1203_v51 = vrot.slane %v18781_v17, 7  ;;  %17666 = vtanh.f32 %v18695_v44  ;;  %v1285_v27 = vsel %vm1252_vm0, %v25306_v30, %v25305_v34  ;;  %v1219_v44 = vrot.slane %v18665_v50, 7  ;;  %v18818_v12 = vpop.f32.mrb[28].mxu1  ;;  %v1060_v30 = vld [vmem:[%s24888_s9 + $0xd8] sm:$0xff] }
 0x13c   : > { %25303 = vst [vmem:[#allocation43_spill] sm:$0xff] %v18783_v33  ;;  %25304 = vst [vmem:[#allocation44_spill] sm:$0xff] %v18795_v29  ;;  %v18811_v35 = vpop.eup %17650  ;;  %2584 = vmatprep.mubr.bf16.mxu0 %v18783_v33  ;;  %v1204_v39 = vrot.slane %v18793_v4, 7  ;;  %v1299_v10 = vsel %vm1252_vm0, %v1200_v11, %v1202_v52  ;;  %17668 = vtanh.f32 %v851_v42  ;;  %v646_v20 = vadd.f32 %v645_v14, %v18411_v48  ;;  %v647_v34 = vpop.f32.mrb[29].mxu0 }
 0x13d   : > { %25307 = vst [vmem:[#allocation45_spill] sm:$0xff] %v18818_v12  ;;  %v18820_v45 = vpop.eup %17652  ;;  %2585 = vmatmul.mubr.bf16.gmra.mrb[52].mxu0 %v18795_v29  ;;  %v1205_v33 = vrot.slane %v18811_v35, 7  ;;  %v1300_v42 = vsel %vm1252_vm0, %v1201_v32, %v1203_v51  ;;  %17670 = vtanh.f32 %v18730_v7  ;;  %v18831_v11 = vpop.f32.mrb[29].mxu1  ;;  %v648_v14 = vadd.f32 %v647_v34, %v18415_v49 }
 0x13e   : > { %25308 = vst [vmem:[#allocation46_spill] sm:$0xff] %v18831_v11  ;;  %v18833_v50 = vpop.eup %17654  ;;  %v649_v6 = vpop.f32.mrb[30].mxu0  ;;  %v1297_v29 = vsel %vm1252_vm0, %v1202_v52, %v1204_v39  ;;  %v1349_v55 = vmul.f32 %v1299_v10, %v1057_v56  ;;  %17672 = vtanh.f32 %v646_v20  ;;  %v1074_v56 = vld [vmem:[%s24888_s9 + $0x148] sm:$0xff]  ;;  %v877_v16 = vadd.f32 %v18733_v53, %v18411_v48 }
 0x13f   : > { %v18842_v32 = vpop.f32.mrb[30].mxu1  ;;  %v650_v7 = vadd.f32 %v649_v6, %v18411_v48  ;;  %v651_v54 = vpop.f32.mrb[31].mxu0  ;;  %v1298_v34 = vsel %vm1252_vm0, %v1203_v51, %v1205_v33  ;;  %v1351_v2 = vmul.f32 %v1297_v29, %v1059_v21  ;;  %17674 = vtanh.f32 %v648_v14 }
 0x140   : > { %25309 = vst [vmem:[#allocation47_spill] sm:$0xff] %v18842_v32  ;;  %v18850_v52 = vpop.f32.mrb[31].mxu1  ;;  %v18852_v10 = vpop.eup %17656  ;;  %v652_v60 = vadd.f32 %v651_v54, %v18415_v49  ;;  %v1350_v32 = vmul.f32 %v1300_v42, %v1058_v18  ;;  %v1352_v20 = vmul.f32 %v1298_v34, %v1060_v30  ;;  %v863_v29 = vadd.f32 %v18617_v38, %v18415_v49  ;;  %v1061_v54 = vld [vmem:[%s24888_s9 + $0xe0] sm:$0xff]  ;;  %v1062_v38 = vld [vmem:[%s24888_s9 + $0xe8] sm:$0xff] }
 0x141   : > { %25310 = vst [vmem:[#allocation48_spill] sm:$0xff] %v18850_v52  ;;  %25311 = vst [vmem:[#allocation49_spill] sm:$0xff] %v18852_v10  ;;  %v18855_v57 = vpop.eup %17658  ;;  %17676 = vtanh.f32 %v650_v7  ;;  %v18857_v6 = vpack.c.bf16 %v1351_v2, %v1349_v55  ;;  %v25313_v51 = vrot.slane %v18612_v31, 7  ;;  %v18873_v55 = vmul.f32 %v1285_v27, %v1071_v43  ;;  %v1063_v27 = vld [vmem:[%s24888_s9 + $0xf0] sm:$0xff] }
 0x142   : > { %v18865_v52 = vpop.eup %17660  ;;  %17678 = vtanh.f32 %v652_v60  ;;  %v18867_v14 = vpack.c.bf16 %v1352_v20, %v1350_v32  ;;  %v1206_v2 = vrot.slane %v18855_v57, 7  ;;  %v25315_v60 = vrot.slane %v18735_v9, 7 }
 0x143   : > { %25312 = vst [vmem:[#allocation50_spill] sm:$0xff] %v18857_v6  ;;  %v1284_v21 = vsel %vm1252_vm0, %v25313_v51, %v1219_v44  ;;  %v18875_v18 = vpop.eup %17662  ;;  %v1207_v30 = vrot.slane %v18865_v52, 7  ;;  %17680 = vtanh.f32 %v18775_v61  ;;  %v867_v32 = vadd.f32 %v18653_v25, %v18411_v48  ;;  %v1064_v25 = vld [vmem:[%s24888_s9 + $0xf8] sm:$0xff] }
 0x144   : > { %25314 = vst [vmem:[#allocation51_spill] sm:$0xff] %v18867_v14  ;;  %v1282_v42 = vsel %vm1252_vm0, %v1219_v44, %v25315_v60  ;;  %v18888_v43 = vpop.eup %17664  ;;  %2594 = vmatprep.mubr.bf16.mxu0 %v18867_v14  ;;  %v1208_v7 = vrot.slane %v18875_v18, 7  ;;  %v1295_v61 = vsel %vm1252_vm0, %v1204_v39, %v1206_v2  ;;  %17682 = vtanh.f32 %v18779_v58 }
 0x145   : > { %v18898_v34 = vmul.f32 %v1284_v21, %v1074_v56  ;;  %v18900_v44 = vpop.eup %17666  ;;  %2595 = vmatmul.mubr.bf16.gmra.mrb[56].mxu0 %v18857_v6  ;;  %v1209_v20 = vrot.slane %v18888_v43, 7  ;;  %v1296_v51 = vsel %vm1252_vm0, %v1205_v33, %v1207_v30  ;;  %17684 = vtanh.f32 %v18791_v23  ;;  %v1076_v21 = vld [vmem:[%s24888_s9 + $0x158] sm:$0xff] }
 0x146   : > { %v869_v58 = vadd.f32 %v18663_v47, %v18415_v49  ;;  %v18912_v39 = vpop.eup %17668  ;;  %v1293_v56 = vsel %vm1252_vm0, %v1206_v2, %v1208_v7  ;;  %v871_v60 = vadd.f32 %v18679_v28, %v18411_v48  ;;  %v873_v33 = vadd.f32 %v18686_v8, %v18415_v49 }
 0x147   : > { %v1218_v23 = vrot.slane %v18655_v37, 7  ;;  %v18924_v6 = vpop.eup %17670  ;;  %v1294_v47 = vsel %vm1252_vm0, %v1207_v30, %v1209_v20  ;;  %v1353_v14 = vmul.f32 %v1295_v61, %v1061_v54  ;;  %v1355_v31 = vmul.f32 %v1293_v56, %v1063_v27 }
 0x148   : > { %17686 = vtanh.f32 %v863_v29  ;;  %v1354_v2 = vmul.f32 %v1296_v51, %v1062_v38  ;;  %v1356_v22 = vmul.f32 %v1294_v47, %v1064_v25  ;;  %v18930_v28 = vpop.eup %17672  ;;  %v24970_v8 = vrot.slane %v18681_v41, 7  ;;  %v1065_v29 = vld [vmem:[%s24888_s9 + $0x100] sm:$0xff] }
 0x149   : > { %17688 = vtanh.f32 %v867_v32  ;;  %v18932_v19 = vpack.c.bf16 %v1355_v31, %v1353_v14  ;;  %v879_v37 = vadd.f32 %v18747_v59, %v18415_v49  ;;  %v18937_v30 = vpop.eup %17674  ;;  %v1210_v53 = vrot.slane %v18930_v28, 7  ;;  %v1066_v59 = vld [vmem:[%s24888_s9 + $0x108] sm:$0xff] }
 0x14a   : > { %17690 = vtanh.f32 %v869_v58  ;;  %v18939_v54 = vpack.c.bf16 %v1356_v22, %v1354_v2  ;;  %v883_v31 = vadd.f32 %v18766_v24, %v18415_v49  ;;  %v1068_v22 = vld [vmem:[%s24888_s9 + $0x118] sm:$0xff]  ;;  %v1211_v38 = vrot.slane %v18937_v30, 7  ;;  %v1067_v24 = vld [vmem:[%s24888_s9 + $0x110] sm:$0xff]  ;;  %v1069_v2 = vld [vmem:[%s24888_s9 + $0x120] sm:$0xff] }
 0x14b   : > { %25316 = vst [vmem:[#allocation52_spill] sm:$0xff] %v18932_v19  ;;  %17692 = vtanh.f32 %v871_v60  ;;  %v18947_v14 = vpop.eup %17676  ;;  %v1368_v32 = vmul.f32 %v1282_v42, %v1076_v21  ;;  %v1223_v27 = vrot.slane %v18768_v5, 7  ;;  %v1291_v51 = vsel %vm1252_vm0, %v1208_v7, %v1210_v53 }
 0x14c   : > { %25317 = vst [vmem:[#allocation53_spill] sm:$0xff] %v18939_v54  ;;  %17694 = vtanh.f32 %v873_v33  ;;  %v18957_v61 = vpop.eup %17678  ;;  %2604 = vmatprep.mubr.bf16.mxu0 %v18939_v54  ;;  %v1212_v25 = vrot.slane %v18947_v14, 7  ;;  %v25318_v58 = vrot.slane %v18594_v3, 7  ;;  %v1292_v60 = vsel %vm1252_vm0, %v1209_v20, %v1211_v38  ;;  %v1070_v33 = vld [vmem:[%s24888_s9 + $0x128] sm:$0xff]  ;;  %v1073_v20 = vld [vmem:[%s24888_s9 + $0x140] sm:$0xff] }
 0x14d   : > { %17696 = vtanh.f32 %v877_v16  ;;  %v18970_v56 = vpop.eup %17680  ;;  %2605 = vmatmul.mubr.bf16.gmra.mrb[60].mxu0 %v18932_v19  ;;  %v1213_v21 = vrot.slane %v18957_v61, 7  ;;  %v881_v7 = vadd.f32 %v18761_v0, %v18411_v48  ;;  %v1281_v0 = vsel %vm1252_vm0, %v1218_v23, %v24970_v8 }
 0x14e   : > { %v1283_v42 = vsel %vm1252_vm0, %v25318_v58, %v1218_v23  ;;  %17698 = vtanh.f32 %v879_v37  ;;  %v18981_v47 = vpop.eup %17682  ;;  %v1289_v16 = vsel %vm1252_vm0, %v1210_v53, %v1212_v25  ;;  %v1075_v37 = vld [vmem:[%s24888_s9 + $0x150] sm:$0xff]  ;;  %v1357_v54 = vmul.f32 %v1291_v51, %v1065_v29  ;;  %v1086_v51 = vld [vmem:[%s24888_s9 + $0x1a8] sm:$0xff] }
 0x14f   : > { %25319 = vst [vmem:[#allocation54_spill] sm:$0xff] %v18981_v47  ;;  %17700 = vtanh.f32 %v883_v31  ;;  %v18999_v53 = vpop.eup %17684  ;;  %v1290_v19 = vsel %vm1252_vm0, %v1211_v38, %v1213_v21  ;;  %v1359_v5 = vmul.f32 %v1289_v16, %v1067_v24  ;;  %v25320_v3 = vrot.slane %v18579_v62, 7 }
 0x150   : > { %v1358_v12 = vmul.f32 %v1292_v60, %v1066_v59  ;;  %v1360_v48 = vmul.f32 %v1290_v19, %v1068_v22  ;;  %v25321_v23 = vrot.slane %v18551_v36, 7  ;;  %v19016_v29 = vpack.c.bf16 %v1368_v32, %v18898_v34  ;;  %v1083_v34 = vld [vmem:[%s24888_s9 + $0x190] sm:$0xff]  ;;  %v1085_v19 = vld [vmem:[%s24888_s9 + $0x1a0] sm:$0xff] }
 0x151   : > { %v1288_v15 = vsel %vm1252_vm0, %v1213_v21, %v25320_v3  ;;  %v19013_v58 = vpack.c.bf16 %v1359_v5, %v1357_v54  ;;  %v19018_v38 = vmul.f32 %v1283_v42, %v1073_v20  ;;  %17702 = vtanh.f32 %v881_v7  ;;  %v1081_v5 = vld [vmem:[%s24888_s9 + $0x180] sm:$0xff] }
 0x152   : > { %v1362_v11 = vmul.f32 %v1288_v15, %v1070_v33  ;;  %v1287_v31 = vsel %vm1252_vm0, %v1212_v25, %v25321_v23  ;;  %v19011_v8 = vpop.eup %17686  ;;  %25323 = vst [vmem:[#allocation56_spill] sm:$0xff] %v19016_v29  ;;  %v19022_v3 = vpack.c.bf16 %v1360_v48, %v1358_v12  ;;  %v19024_v15 = vmul.f32 %v1281_v0, %v1075_v37  ;;  %v1088_v33 = vld [vmem:[%s24888_s9 + $0x1b8] sm:$0xff] }
 0x153   : > { %25322 = vst [vmem:[#allocation55_spill] sm:$0xff] %v19013_v58  ;;  %v19020_v24 = vpop.eup %17688  ;;  %v24971_v59 = vrot.slane %v18820_v45, 7  ;;  %v1361_v22 = vmul.f32 %v1287_v31, %v1069_v2  ;;  %v25325_v48 = vrot.slane %v18735_v9, 7  ;;  %v1226_v25 = vrot.slane %v18852_v10, 7 }
 0x154   : > { %25324 = vst [vmem:[#allocation57_spill] sm:$0xff] %v19022_v3  ;;  %v19034_v54 = vpop.eup %17690  ;;  %2614 = vmatprep.mubr.bf16.mxu0 %v19022_v3  ;;  %v19051_v21 = vpack.c.bf16 %v18745_v63, %v1362_v11  ;;  %v1228_v60 = vrot.slane %v18912_v39, 7  ;;  %v1231_v7 = vrot.slane %v18981_v47, 7  ;;  %v1233_v16 = vrot.slane %v19011_v8, 7 }
 0x155   : > { %v19040_v12 = vsel %vm1252_vm0, %v25325_v48, %v1223_v27  ;;  %v19047_v42 = vpop.eup %17692  ;;  %2615 = vmatmul.mubr.bf16.gmra.mrb[64].mxu0 %v19013_v58  ;;  %v25327_v20 = vrot.slane %v18833_v50, 7  ;;  %v1275_v11 = vsel %vm1252_vm0, %v24971_v59, %v1226_v25  ;;  %v1230_v37 = vrot.slane %v18970_v56, 7  ;;  %v1087_v59 = vld [vmem:[%s24888_s9 + $0x1b0] sm:$0xff] }
 0x156   : > { %25326 = vst [vmem:[#allocation58_spill] sm:$0xff] %v19051_v21  ;;  %v19059_v2 = vpop.eup %17694  ;;  %v1232_v0 = vrot.slane %v18999_v53, 7  ;;  %2624 = vmatprep.mubr.bf16.mxu0 %v19051_v21  ;;  %v1273_v48 = vsel %vm1252_vm0, %v1226_v25, %v1228_v60  ;;  %v19091_v21 = vpack.c.bf16 %v18873_v55, %v1361_v22  ;;  %v25329_v25 = vrot.slane %v18924_v6, 7  ;;  %v1090_v55 = vld [vmem:[%s24888_s9 + $0x1c8] sm:$0xff] }
 0x157   : > { %v19066_v63 = vsel %vm1252_vm0, %v1223_v27, %v25327_v20  ;;  %v19074_v23 = vpop.eup %17696  ;;  %v1373_v27 = vmul.f32 %v1275_v11, %v1081_v5  ;;  %v1270_v20 = vsel %vm1252_vm0, %v1231_v7, %v1233_v16  ;;  %v1375_v31 = vmul.f32 %v1273_v48, %v1083_v34 }
 0x158   : > { %v19088_v32 = vpop.eup %17698  ;;  %25328 = vst [vmem:[#allocation59_spill] sm:$0xff] %v19091_v21  ;;  %v1272_v5 = vsel %vm1252_vm0, %v25329_v25, %v1231_v7  ;;  %v1380_v11 = vmul.f32 %v1270_v20, %v1088_v33  ;;  %v1269_v9 = vsel %vm1252_vm0, %v1230_v37, %v1232_v0  ;;  %v1271_v49 = vsel %vm1252_vm0, %v1228_v60, %v1230_v37  ;;  %v1089_v37 = vld [vmem:[%s24888_s9 + $0x1c0] sm:$0xff]  ;;  %v1094_v25 = vld [vmem:[%s24888_s9 + $0x1e8] sm:$0xff] }
 0x159   : > { %v19097_v58 = vpop.eup %17700  ;;  %v1378_v3 = vmul.f32 %v1272_v5, %v1086_v51  ;;  %v1235_v34 = vrot.slane %v19034_v54, 7  ;;  %v19107_v22 = vpack.c.bf16 %v1375_v31, %v1373_v27  ;;  %v1377_v48 = vmul.f32 %v1271_v49, %v1085_v19  ;;  %v1092_v51 = vld [vmem:[%s24888_s9 + $0x1d8] sm:$0xff]  ;;  %v1091_v49 = vld [vmem:[%s24888_s9 + $0x1d0] sm:$0xff] }
 0x15a   : > { %25330 = vst [vmem:[#allocation60_spill] sm:$0xff] %v19097_v58  ;;  %v1379_v7 = vmul.f32 %v1269_v9, %v1087_v59  ;;  %v1237_v33 = vrot.slane %v19059_v2, 7  ;;  %v1234_v9 = vrot.slane %v19020_v24, 7  ;;  %v1236_v19 = vrot.slane %v19047_v42, 7 }
 0x15b   : > { %25331 = vst [vmem:[#allocation61_spill] sm:$0xff] %v19107_v22  ;;  %v19113_v20 = vpack.c.bf16 %v1380_v11, %v1378_v3  ;;  %v1268_v60 = vsel %vm1252_vm0, %v1233_v16, %v1235_v34  ;;  %v19125_v59 = vpop.eup %17702  ;;  %v1078_v3 = vld [vmem:[%s24888_s9 + $0x168] sm:$0xff]  ;;  %v1239_v5 = vrot.slane %v19088_v32, 7  ;;  %v1080_v11 = vld [vmem:[%s24888_s9 + $0x178] sm:$0xff] }
 0x15c   : > { %25333 = vst [vmem:[#allocation63_spill] sm:$0xff] %v19125_v59  ;;  %v19130_v31 = vpack.c.bf16 %v1379_v7, %v1377_v48  ;;  %v1266_v16 = vsel %vm1252_vm0, %v1235_v34, %v1237_v33  ;;  %v1382_v27 = vmul.f32 %v1268_v60, %v1090_v55  ;;  %v1265_v62 = vsel %vm1252_vm0, %v1234_v9, %v1236_v19  ;;  %v1096_v55 = vld [vmem:[%s24888_s9 + $0x1f8] sm:$0xff] }
 0x15d   : > { %25332 = vst [vmem:[#allocation62_spill] sm:$0xff] %v19113_v20  ;;  %v1384_v36 = vmul.f32 %v1266_v16, %v1092_v51  ;;  %v1267_v48 = vsel %vm1252_vm0, %v1232_v0, %v1234_v9  ;;  %v24990_v34 = vrot.slane %v19097_v58, 7  ;;  %2625 = vmatmul.mubr.bf16.gmra.mrb[68].mxu0 %v19091_v21  ;;  %v1383_v60 = vmul.f32 %v1265_v62, %v1091_v49  ;;  %v1093_v51 = vld [vmem:[%s24888_s9 + $0x1e0] sm:$0xff]  ;;  %v1095_v62 = vld [vmem:[%s24888_s9 + $0x1f0] sm:$0xff] }
 0x15e   : > { %25334 = vst [vmem:[#allocation64_spill] sm:$0xff] %v19130_v31  ;;  %v1381_v7 = vmul.f32 %v1267_v48, %v1089_v37  ;;  %v1264_v31 = vsel %vm1252_vm0, %v1237_v33, %v1239_v5  ;;  %v1238_v16 = vrot.slane %v19074_v23, 7  ;;  %2634 = vmatprep.mubr.bf16.mxu0 %v19016_v29  ;;  %v24989_v33 = vrot.slane %v19125_v59, 7 }
 0x15f   : > { %v19157_v0 = vpack.c.bf16 %v1384_v36, %v1382_v27  ;;  %v1262_v9 = vsel %vm1252_vm0, %v1239_v5, %v24990_v34  ;;  %v1386_v37 = vmul.f32 %v1264_v31, %v1094_v25  ;;  %v1370_v36 = vmul.f32 %v19040_v12, %v1078_v3  ;;  %v1077_v5 = vld [vmem:[%s24888_s9 + $0x160] sm:$0xff] }
 0x160   : > { %v19167_v49 = vpack.c.bf16 %v1383_v60, %v1381_v7  ;;  %v1388_v48 = vmul.f32 %v1262_v9, %v1096_v55  ;;  %v1263_v29 = vsel %vm1252_vm0, %v1236_v19, %v1238_v16  ;;  %v1372_v27 = vmul.f32 %v19066_v63, %v1080_v11  ;;  %v1079_v55 = vld [vmem:[%s24888_s9 + $0x170] sm:$0xff] }
 0x161   : > { %25335 = vst [vmem:[#allocation65_spill] sm:$0xff] %v19157_v0  ;;  %v1261_v31 = vsel %vm1252_vm0, %v1238_v16, %v24989_v33  ;;  %v1385_v25 = vmul.f32 %v1263_v29, %v1093_v51  ;;  %v19187_v12 = vpack.c.bf16 %v19024_v15, %v19018_v38  ;;  %v25339_v63 = vrot.slane %v18820_v45, 7  ;;  %v1082_v16 = vld [vmem:[%s24888_s9 + $0x188] sm:$0xff]  ;;  %v1084_v38 = vld [vmem:[%s24888_s9 + $0x198] sm:$0xff] }
 0x162   : > { %25336 = vst [vmem:[#allocation66_spill] sm:$0xff] %v19167_v49  ;;  %v19183_v7 = vpack.c.bf16 %v1388_v48, %v1386_v37  ;;  %v1387_v19 = vmul.f32 %v1261_v31, %v1095_v62  ;;  %v25340_v3 = vrot.slane %v18749_v46, 7  ;;  %v25342_v60 = vrot.slane %v18681_v41, 7 }
 0x163   : > { %25338 = vst [vmem:[#allocation68_spill] sm:$0xff] %v19187_v12  ;;  %v19211_v9 = vpack.c.bf16 %v18811_v35, %v18781_v17  ;;  %v19215_v37 = vpack.c.bf16 %v18793_v4, %v18771_v1  ;;  %v19219_v62 = vpack.c.bf16 %v18888_v43, %v18865_v52  ;;  %v19221_v48 = vpack.c.bf16 %v1372_v27, %v1370_v36 }
 0x164   : > { %25337 = vst [vmem:[#allocation67_spill] sm:$0xff] %v19183_v7  ;;  %v1277_v29 = vsel %vm1252_vm0, %v25340_v3, %v25339_v63  ;;  %v25341_v11 = vmov %v25340_v3  ;;  %v19207_v15 = vpack.c.bf16 %v1387_v19, %v1385_v25  ;;  %v19225_v31 = vpack.c.bf16 %v18875_v18, %v18855_v57 }
 0x165   : > { %v1279_v51 = vsel %vm1252_vm0, %v25342_v60, %v25341_v11  ;;  %25344 = vst [vmem:[#allocation70_spill] sm:$0xff] %v19211_v9  ;;  %25345 = vst [vmem:[#allocation71_spill] sm:$0xff] %v19215_v37  ;;  %v19229_v25 = vpack.c.bf16 %v18957_v61, %v18937_v30  ;;  %v19233_v19 = vpack.c.bf16 %v18947_v14, %v18930_v28  ;;  %2635 = vmatmul.mubr.bf16.gmra.mrb[72].mxu0 %v19187_v12 }
 0x166   : > { %25343 = vst [vmem:[#allocation69_spill] sm:$0xff] %v19207_v15  ;;  %25346 = vst [vmem:[#allocation72_spill] sm:$0xff] %v19219_v62  ;;  %v25351_v63 = vrot.slane %v18924_v6, 7  ;;  %v25352_v3 = vrot.slane %v18900_v44, 7  ;;  %v25354_v11 = vrot.slane %v18833_v50, 7  ;;  %2644 = vmatprep.mubr.bf16.mxu0 %v19221_v48  ;;  %v1369_v33 = vmul.f32 %v1279_v51, %v1077_v5 }
 0x167   : > { %25347 = vst [vmem:[#allocation73_spill] sm:$0xff] %v19221_v48  ;;  %25348 = vst [vmem:[#allocation74_spill] sm:$0xff] %v19225_v31  ;;  %v1371_v34 = vmul.f32 %v1277_v29, %v1079_v55  ;;  %v19251_v12 = vpack.c.bf16 %v18912_v39, %v18852_v10  ;;  %v19255_v21 = vpack.c.bf16 %v19011_v8, %v18981_v47 }
 0x168   : > { %25349 = vst [vmem:[#allocation75_spill] sm:$0xff] %v19229_v25  ;;  %25350 = vst [vmem:[#allocation76_spill] sm:$0xff] %v19233_v19  ;;  %v1274_v36 = vsel %vm1252_vm0, %v25352_v3, %v25351_v63  ;;  %v25353_v27 = vmov %v25352_v3  ;;  %v19259_v63 = vpack.c.bf16 %v18999_v53, %v18970_v56  ;;  %v19263_v3 = vpack.c.bf16 %v19059_v2, %v19034_v54 }
 0x169   : > { %v1276_v60 = vsel %vm1252_vm0, %v25354_v11, %v25353_v27  ;;  %25355 = vst [vmem:[#allocation77_spill] sm:$0xff] %v19251_v12  ;;  %25356 = vst [vmem:[#allocation78_spill] sm:$0xff] %v19255_v21  ;;  %v19267_v5 = vpack.c.bf16 %v19047_v42, %v19020_v24  ;;  %v19271_v55 = vpack.c.bf16 %v19097_v58, %v19088_v32 }
 0x16a   : > { %25357 = vst [vmem:[#allocation79_spill] sm:$0xff] %v19259_v63  ;;  %25358 = vst [vmem:[#allocation80_spill] sm:$0xff] %v19263_v3  ;;  %v1374_v29 = vmul.f32 %v1276_v60, %v1082_v16  ;;  %v1376_v51 = vmul.f32 %v1274_v36, %v1084_v38  ;;  %v19275_v27 = vpack.c.bf16 %v19125_v59, %v19074_v23  ;;  %v1420_v16 = vrot.slane %v18724_v26, 1 }
 0x16b   : > { %25359 = vst [vmem:[#allocation81_spill] sm:$0xff] %v19267_v5  ;;  %25360 = vst [vmem:[#allocation82_spill] sm:$0xff] %v19271_v55  ;;  %v19277_v11 = vpack.c.bf16 %v1371_v34, %v1369_v33  ;;  %v13299_v5 = vld [vmem:[%s24888_s9 + $0x2f8] sm:$0xff]  ;;  %v1422_v38 = vrot.slane %v18781_v17, 1  ;;  %v25006_v34 = vrot.slane %v18697_v13, 1  ;;  %v13297_v33 = vld [vmem:[%s24888_s9 + $0x2e8] sm:$0xff] }
 0x16c   : > { %25361 = vst [vmem:[#allocation83_spill] sm:$0xff] %v19275_v27  ;;  %v19279_v48 = vpack.c.bf16 %v1376_v51, %v1374_v29  ;;  %v13301_v17 = vld [vmem:[%s24888_s9 + $0x308] sm:$0xff]  ;;  %v13303_v51 = vld [vmem:[%s24888_s9 + $0x318] sm:$0xff] }
 0x16d   : > { %25362 = vst [vmem:[#allocation84_spill] sm:$0xff] %v19277_v11  ;;  %2645 = vmatmul.mubr.bf16.gmra.mrb[76].mxu0 %v19277_v11  ;;  %v1517_v36 = vsel %vm1469_vm1, %v1420_v16, %v1422_v38  ;;  %v1519_v60 = vsel %vm1469_vm1, %v25006_v34, %v1420_v16  ;;  %v13300_v11 = vld [vmem:[%s24888_s9 + $0x300] sm:$0xff]  ;;  %v1426_v16 = vrot.slane %v18865_v52, 1 }
 0x16e   : > { %25363 = vst [vmem:[#allocation85_spill] sm:$0xff] %v19279_v48  ;;  %2654 = vmatprep.mubr.bf16.mxu0 %v19279_v48  ;;  %v1565_v29 = vmul.f32 %v13299_v5, %v1517_v36  ;;  %v1424_v48 = vrot.slane %v18811_v35, 1  ;;  %v1423_v5 = vrot.slane %v18793_v4, 1  ;;  %v13302_v35 = vld [vmem:[%s24888_s9 + $0x310] sm:$0xff]  ;;  %v25365_v4 = vld [vmem:[#allocation64_spill] sm:$0xff] }
 0x170   : > { %v1515_v34 = vsel %vm1469_vm1, %v1422_v38, %v1424_v48  ;;  %v13305_v38 = vld [vmem:[%s24888_s9 + $0x328] sm:$0xff] }
 0x175   : > { %2655 = vmatmul.mubr.bf16.gmra.mrb[80].mxu0 %v19107_v22  ;;  %v25008_v22 = vrot.slane %v18771_v1, 1 }
 0x176   : > { %2664 = vmatprep.mubr.bf16.mxu0 %v19113_v20  ;;  %v1563_v20 = vmul.f32 %v13297_v33, %v1519_v60  ;;  %v1513_v33 = vsel %vm1469_vm1, %v1424_v48, %v1426_v16  ;;  %v1425_v60 = vrot.slane %v18855_v57, 1  ;;  %v1428_v48 = vrot.slane %v18888_v43, 1 }
 0x177   : > { %v1514_v52 = vsel %vm1469_vm1, %v25008_v22, %v1423_v5  ;;  %v13307_v22 = vld [vmem:[%s24888_s9 + $0x338] sm:$0xff] }
 0x178   : > { %v19314_v36 = vpack.c.bf16 %v1565_v29, %v1563_v20  ;;  %v1567_v20 = vmul.f32 %v13301_v17, %v1515_v34  ;;  %v1569_v29 = vmul.f32 %v13303_v51, %v1513_v33  ;;  %v1512_v57 = vsel %vm1469_vm1, %v1423_v5, %v1425_v60  ;;  %v13304_v34 = vld [vmem:[%s24888_s9 + $0x320] sm:$0xff] }
 0x179   : > { %v1427_v17 = vrot.slane %v18875_v18, 1  ;;  %v1568_v43 = vmul.f32 %v13302_v35, %v1512_v57  ;;  %v1511_v33 = vsel %vm1469_vm1, %v1426_v16, %v1428_v48  ;;  %v1429_v5 = vrot.slane %v18930_v28, 1  ;;  %v13309_v18 = vld [vmem:[%s24888_s9 + $0x348] sm:$0xff] }
 0x17a   : > { %25364 = vst [vmem:[#allocation86_spill] sm:$0xff] %v19314_v36  ;;  %v1566_v36 = vmul.f32 %v13300_v11, %v1514_v52  ;;  %v19344_v51 = vpack.c.bf16 %v1569_v29, %v1567_v20  ;;  %v13306_v11 = vld [vmem:[%s24888_s9 + $0x330] sm:$0xff]  ;;  %v1571_v52 = vmul.f32 %v13305_v38, %v1511_v33  ;;  %v1432_v35 = vrot.slane %v18957_v61, 1  ;;  %v13311_v38 = vld [vmem:[%s24888_s9 + $0x358] sm:$0xff]  ;;  %v13308_v61 = vld [vmem:[%s24888_s9 + $0x340] sm:$0xff] }
 0x17b   : > { %v1508_v29 = vsel %vm1469_vm1, %v1427_v17, %v1429_v5 }
 0x17c   : > { %v19360_v16 = vpack.c.bf16 %v1568_v43, %v1566_v36  ;;  %v1572_v57 = vmul.f32 %v13306_v11, %v1508_v29 }
 0x17d   : > { %2665 = vmatmul.mubr.bf16.gmra.mrb[84].mxu0 %v25365_v4  ;;  %v1430_v4 = vrot.slane %v18937_v30, 1 }
 0x17e   : > { %2674 = vmatprep.mubr.bf16.mxu0 %v19157_v0  ;;  %v1510_v0 = vsel %vm1469_vm1, %v1425_v60, %v1427_v17 }
 0x17f   : > { %v1509_v30 = vsel %vm1469_vm1, %v1428_v48, %v1430_v4  ;;  %v1570_v28 = vmul.f32 %v13304_v34, %v1510_v0  ;;  %v25366_v48 = vld [vmem:[#allocation26_spill] sm:$0xff]  ;;  %v1507_v33 = vsel %vm1469_vm1, %v1430_v4, %v1432_v35  ;;  %v13310_v0 = vld [vmem:[%s24888_s9 + $0x350] sm:$0xff] }
 0x180   : > { %v1573_v20 = vmul.f32 %v13307_v22, %v1509_v30  ;;  %v25011_v60 = vrot.slane %v25366_v48, 1  ;;  %v1431_v22 = vrot.slane %v18947_v14, 1  ;;  %v1575_v17 = vmul.f32 %v13309_v18, %v1507_v33  ;;  %v25367_v34 = vld [vmem:[#allocation19_spill] sm:$0xff] }
 0x181   : > { %v25014_v43 = vrot.slane %v25367_v34, 1  ;;  %v19380_v11 = vpack.c.bf16 %v1572_v57, %v1570_v28  ;;  %v25369_v57 = vld [vmem:[#allocation46_spill] sm:$0xff] }
 0x182   : > { %v19374_v36 = vpack.c.bf16 %v1573_v20, %v1571_v52  ;;  %v1505_v4 = vsel %vm1469_vm1, %v1432_v35, %v25011_v60  ;;  %v1506_v30 = vsel %vm1469_vm1, %v1429_v5, %v1431_v22  ;;  %v25368_v35 = vld [vmem:[#allocation8_spill] sm:$0xff]  ;;  %v25370_v5 = vld [vmem:[#allocation7_spill] sm:$0xff]  ;;  %v25371_v60 = vld [vmem:[#allocation45_spill] sm:$0xff] }
 0x183   : > { %v1577_v14 = vmul.f32 %v13311_v38, %v1505_v4  ;;  %v1504_v52 = vsel %vm1469_vm1, %v1431_v22, %v25014_v43  ;;  %v1574_v18 = vmul.f32 %v13308_v61, %v1506_v30  ;;  %v889_v33 = vadd.f32 %v25369_v57, %v25368_v35  ;;  %v13324_v22 = vld [vmem:[%s24888_s9 + $0x3c0] sm:$0xff]  ;;  %v13331_v43 = vld [vmem:[%s24888_s9 + $0x3f8] sm:$0xff] }
 0x184   : > { %v1576_v20 = vmul.f32 %v13310_v0, %v1504_v52  ;;  %v25016_v38 = vmov 0.0|0.0   ;;  %v25015_v61 = vrot.slane %v18852_v10, 1  ;;  %v1447_v0 = vrot.slane %v18912_v39, 1  ;;  %v13329_v39 = vld [vmem:[%s24888_s9 + $0x3e8] sm:$0xff] }
 0x185   : > { %2675 = vmatmul.mubr.bf16.gmra.mrb[88].mxu0 %v19167_v49  ;;  %v19394_v29 = vpack.c.bf16 %v1577_v14, %v1575_v17  ;;  %v887_v49 = vadd.f32 %v25371_v60, %v25370_v5  ;;  %17704 = vtanh.f32 %v889_v33  ;;  %v13326_v17 = vld [vmem:[%s24888_s9 + $0x3d0] sm:$0xff]  ;;  %v1449_v60 = vrot.slane %v18970_v56, 1  ;;  %v25372_v56 = vld [vmem:[#allocation9_spill] sm:$0xff] }
 0x186   : > { %2684 = vmatprep.mubr.bf16.mxu0 %v19183_v7  ;;  %v19396_v28 = vpack.c.bf16 %v1576_v20, %v1574_v18  ;;  %v1452_v4 = vrot.slane %v19011_v8, 1  ;;  %v1490_v52 = vsel %vm1469_vm1, %v25015_v61, %v1447_v0  ;;  %v17037_v8 = vld [vmem:[%s24882_s3 + $0x214] ss:$8 sps:$4 sm:$0xff]   ;;  %v25375_v61 = vld [vmem:[#allocation10_spill] sm:$0xff]  ;;  %v1456_v10 = vrot.slane %v19059_v2, 1 }
 0x187   : > { %17706 = vtanh.f32 %v887_v49  ;;  %v17032_v49 = vld [vmem:[%s24882_s3 + $0x200] ss:$8 sps:$4 sm:$0xff]   ;;  %v1488_v14 = vsel %vm1469_vm1, %v1447_v0, %v1449_v60  ;;  %v25373_v18 = vld [vmem:[#allocation11_spill] sm:$0xff]  ;;  %v1590_v57 = vmul.f32 %v13324_v22, %v1490_v52  ;;  %v1454_v0 = vrot.slane %v19034_v54, 1 }
 0x188   : > { %v19432_v20 = vpack.c.bf16 %v25373_v18, %v25372_v56  ;;  %v1592_v33 = vmul.f32 %v13326_v17, %v1488_v14  ;;  %v13328_v22 = vld [vmem:[%s24888_s9 + $0x3e0] sm:$0xff]  ;;  %v13330_v17 = vld [vmem:[%s24888_s9 + $0x3f0] sm:$0xff]  ;;  %v1451_v14 = vrot.slane %v18999_v53, 1  ;;  %v1453_v54 = vrot.slane %v19020_v24, 1 }
 0x189   : > { %v25379_v52 = vmov 0.0|0.0   ;;  %v1485_v35 = vsel %vm1469_vm1, %v1452_v4, %v1454_v0  ;;  %v17035_v53 = vld [vmem:[%s24882_s3 + $0x210] ss:$8 sps:$4 sm:$0xff]   ;;  %v1458_v2 = vrot.slane %v19088_v32, 1 }
 0x18a   : > { %25374 = vst [vmem:[#allocation26_spill] sm:$0xff] %v19432_v20  ;;  %v19455_v5 = vpack.c.bf16 %v1592_v33, %v1590_v57  ;;  %v1597_v24 = vmul.f32 %v13331_v43, %v1485_v35  ;;  %v1484_v57 = vsel %vm1469_vm1, %v1451_v14, %v1453_v54  ;;  %v1483_v33 = vsel %vm1469_vm1, %v1454_v0, %v1456_v10 }
 0x18b   : > { %v1596_v35 = vmul.f32 %v13330_v17, %v1484_v57  ;;  %v1457_v0 = vrot.slane %v19074_v23, 1 }
 0x18c   : > { %25380 = vst [vmem:[#allocation46_spill] sm:$0xff] %v19455_v5 }
 0x18d   : > { %2685 = vmatmul.mubr.bf16.gmra.mrb[92].mxu0 %v19207_v15  ;;  %v25378_v15 = vrot.slane %v18981_v47, 1  ;;  %v13333_v47 = vld [vmem:[%s24888_s9 + $0x408] sm:$0xff] }
 0x18e   : > { %2727 = vmatprep.mubr.bf16.mxu0 %v25016_v38  ;;  %v25376_v38 = vld [vmem:[#allocation12_spill] sm:$0xff] }
 0x18f   : > { %v19440_v30 = vpack.c.bf16 %v25376_v38, %v25375_v61  ;;  %v1487_v7 = vsel %vm1469_vm1, %v25378_v15, %v1452_v4  ;;  %v13335_v4 = vld [vmem:[%s24888_s9 + $0x418] sm:$0xff] }
 0x190   : > { %v1595_v15 = vmul.f32 %v13329_v39, %v1487_v7  ;;  %v1486_v7 = vsel %vm1469_vm1, %v1449_v60, %v1451_v14  ;;  %v17040_v39 = vld [vmem:[%s24882_s3 + $0x224] ss:$8 sps:$4 sm:$0xff]   ;;  %v1455_v14 = vrot.slane %v19047_v42, 1 }
 0x191   : > { %25377 = vst [vmem:[#allocation19_spill] sm:$0xff] %v19440_v30  ;;  %v1594_v43 = vmul.f32 %v13328_v22, %v1486_v7  ;;  %v13332_v60 = vld [vmem:[%s24888_s9 + $0x400] sm:$0xff]  ;;  %v13334_v22 = vld [vmem:[%s24888_s9 + $0x410] sm:$0xff]  ;;  %v13339_v7 = vld [vmem:[%s24888_s9 + $0x438] sm:$0xff] }
 0x192   : > { %v19488_v32 = vpack.c.bf16 %v1597_v24, %v1595_v15  ;;  %v1482_v42 = vsel %vm1469_vm1, %v1453_v54, %v1455_v14  ;;  %v13337_v15 = vld [vmem:[%s24888_s9 + $0x428] sm:$0xff]  ;;  %v1460_v24 = vrot.slane %v19097_v58, 1 }
 0x193   : > { %v19496_v17 = vpack.c.bf16 %v1596_v35, %v1594_v43  ;;  %v1598_v23 = vmul.f32 %v13332_v60, %v1482_v42  ;;  %v17043_v43 = vld [vmem:[%s24882_s3 + $0x234] ss:$8 sps:$4 sm:$0xff]   ;;  %v25384_v42 = vld [vmem:[#allocation14_spill] sm:$0xff] }
 0x194   : > { %25381 = vst [vmem:[#allocation45_spill] sm:$0xff] %v19488_v32  ;;  %v1479_v60 = vsel %vm1469_vm1, %v1458_v2, %v1460_v24  ;;  %v25385_v54 = vld [vmem:[#allocation18_spill] sm:$0xff] }
 0x195   : > { %2728 = vmatmul.mubr.bf16.vlgmr.msra.gmra.mrb[32].mxu0 %v25379_v52  ;;  %25382 = vst [vmem:[#allocation9_spill] sm:$0xff] %v19496_v17 }
 0x196   : > { %2889 = vmatpush1.bf16.msra.mxu0 %v17032_v49  ;;  %2737 = vmatprep.mubr.bf16.mxu0 %v19440_v30  ;;  %v19475_v49 = vpop.eup %17704  ;;  %v1599_v30 = vmul.f32 %v13333_v47, %v1483_v33  ;;  %v1480_v47 = vsel %vm1469_vm1, %v1455_v14, %v1457_v0  ;;  %v13338_v14 = vld [vmem:[%s24888_s9 + $0x430] sm:$0xff] }
 0x197   : > { %2890 = vmatprep.subr.bf16.mxu0 %v17037_v8  ;;  %v19486_v52 = vpop.eup %17706  ;;  %v1481_v8 = vsel %vm1469_vm1, %v1456_v10, %v1458_v2  ;;  %v17038_v10 = vld [vmem:[%s24882_s3 + $0x220] ss:$8 sps:$4 sm:$0xff]   ;;  %v1600_v33 = vmul.f32 %v13334_v22, %v1480_v47 }
 0x198   : > { %v1601_v57 = vmul.f32 %v13335_v4, %v1481_v8  ;;  %v13336_v4 = vld [vmem:[%s24888_s9 + $0x420] sm:$0xff]  ;;  %v25028_v8 = vrot.slane %v19486_v52, 1 }
 0x199   : > { %v19539_v2 = vpack.c.bf16 %v1600_v33, %v1598_v23 }
 0x19a   : > { %2891 = vmatpush1.bf16.msra.mxu0 %v17035_v53  ;;  %v1459_v53 = vrot.slane %v19125_v59, 1  ;;  %v19520_v35 = vpack.c.bf16 %v1601_v57, %v1599_v30  ;;  %v19530_v59 = vpack.c.bf16 %v25385_v54, %v25384_v42  ;;  %v1603_v57 = vmul.f32 %v13337_v15, %v1479_v60  ;;  %v17041_v15 = vld [vmem:[%s24882_s3 + $0x230] ss:$8 sps:$4 sm:$0xff]   ;;  %v25393_v60 = vld [vmem:[#allocation25_spill] sm:$0xff] }
 0x19b   : > { %2892 = vmatprep.subr.bf16.mxu0 %v17040_v39  ;;  %v25387_v39 = vrot.slane %v19475_v49, 1  ;;  %25388 = vst [vmem:[#allocation12_spill] sm:$0xff] %v19539_v2 }
 0x19c   : > { %25383 = vst [vmem:[#allocation11_spill] sm:$0xff] %v19520_v35  ;;  %25386 = vst [vmem:[#allocation10_spill] sm:$0xff] %v19530_v59  ;;  %v1478_v22 = vsel %vm1469_vm1, %v1457_v0, %v1459_v53  ;;  %v1476_v58 = vsel %vm1469_vm1, %v1459_v53, %v25028_v8  ;;  %v17046_v0 = vld [vmem:[%s24882_s3 + $0x244] ss:$8 sps:$4 sm:$0xff]   ;;  %v25390_v53 = vld [vmem:[#allocation16_spill] sm:$0xff] }
 0x19d   : > { %v1477_v30 = vsel %vm1469_vm1, %v1460_v24, %v25387_v39  ;;  %2738 = vmatmul.mubr.bf16.gmra.mrb[36].mxu0 %v19432_v20  ;;  %v1602_v35 = vmul.f32 %v13336_v4, %v1478_v22  ;;  %v1604_v24 = vmul.f32 %v13338_v14, %v1476_v58  ;;  %v17044_v4 = vld [vmem:[%s24882_s3 + $0x240] ss:$8 sps:$4 sm:$0xff]   ;;  %v17049_v58 = vld [vmem:[%s24882_s3 + $0x254] ss:$8 sps:$4 sm:$0xff]   ;;  %v17052_v39 = vld [vmem:[%s24882_s3 + $0x264] ss:$8 sps:$4 sm:$0xff]  }
 0x19e   : > { %v1605_v47 = vmul.f32 %v13339_v7, %v1477_v30  ;;  %2747 = vmatprep.mubr.bf16.mxu0 %v19530_v59  ;;  %2893 = vmatpush1.bf16.msra.mxu0 %v17038_v10  ;;  %v25389_v10 = vld [vmem:[#allocation13_spill] sm:$0xff]  ;;  %v25396_v22 = vld [vmem:[#allocation23_spill] sm:$0xff] }
 0x19f   : > { %2894 = vmatprep.subr.bf16.mxu0 %v17043_v43  ;;  %v19554_v7 = vpack.c.bf16 %v1604_v24, %v1602_v35  ;;  %v19561_v33 = vpack.c.bf16 %v25390_v53, %v25389_v10  ;;  %v25392_v43 = vld [vmem:[#allocation21_spill] sm:$0xff]  ;;  %v17047_v35 = vld [vmem:[%s24882_s3 + $0x250] ss:$8 sps:$4 sm:$0xff]   ;;  %v25398_v24 = vld [vmem:[#allocation30_spill] sm:$0xff] }
 0x1a0   : > { %v19552_v23 = vpack.c.bf16 %v1605_v47, %v1603_v57  ;;  %v19568_v14 = vpack.c.bf16 %v25393_v60, %v25392_v43  ;;  %v17050_v30 = vld [vmem:[%s24882_s3 + $0x260] ss:$8 sps:$4 sm:$0xff]   ;;  %v25395_v57 = vld [vmem:[#allocation20_spill] sm:$0xff]  ;;  %v13278_v59 = vld [vmem:[%s24888_s9 + $0x250] sm:$0xff] }
 0x1a1   : > { %25391 = vst [vmem:[#allocation14_spill] sm:$0xff] %v19561_v33  ;;  %v19583_v47 = vpack.c.bf16 %v25396_v22, %v25395_v57  ;;  %v25401_v8 = vld [vmem:[#allocation29_spill] sm:$0xff] }
 0x1a2   : > { %2895 = vmatpush1.bf16.msra.mxu0 %v17041_v15  ;;  %25394 = vst [vmem:[#allocation18_spill] sm:$0xff] %v19568_v14  ;;  %v17055_v15 = vld [vmem:[%s24882_s3 + $0x274] ss:$8 sps:$4 sm:$0xff]   ;;  %v17080_v20 = vld [vmem:[%s24882_s3 + $0x300] ss:$8 sps:$4 sm:$0xff]  }
 0x1a3   : > { %2896 = vmatprep.subr.bf16.mxu0 %v17046_v0  ;;  %25397 = vst [vmem:[#allocation13_spill] sm:$0xff] %v19583_v47  ;;  %v25399_v0 = vld [vmem:[#allocation34_spill] sm:$0xff] }
 0x1a5   : > { %2748 = vmatmul.mubr.bf16.gmra.mrb[40].mxu0 %v19561_v33  ;;  %v25406_v33 = vld [vmem:[#allocation39_spill] sm:$0xff] }
 0x1a6   : > { %2757 = vmatprep.mubr.bf16.mxu0 %v19568_v14  ;;  %2897 = vmatpush1.bf16.msra.mxu0 %v17044_v4  ;;  %v19590_v4 = vpack.c.bf16 %v25399_v0, %v25398_v24  ;;  %v25402_v14 = vld [vmem:[#allocation32_spill] sm:$0xff] }
 0x1a7   : > { %2898 = vmatprep.subr.bf16.mxu0 %v17049_v58  ;;  %v17053_v58 = vld [vmem:[%s24882_s3 + $0x270] ss:$8 sps:$4 sm:$0xff]  }
 0x1a8   : > { %25400 = vst [vmem:[#allocation16_spill] sm:$0xff] %v19590_v4 }
 0x1aa   : > { %2899 = vmatpush1.bf16.msra.mxu0 %v17047_v35  ;;  %v17058_v35 = vld [vmem:[%s24882_s3 + $0x284] ss:$8 sps:$4 sm:$0xff]  }
 0x1ab   : > { %2900 = vmatprep.subr.bf16.mxu0 %v17052_v39  ;;  %v17056_v39 = vld [vmem:[%s24882_s3 + $0x280] ss:$8 sps:$4 sm:$0xff]  }
 0x1ad   : > { %2758 = vmatmul.mubr.bf16.gmra.mrb[44].mxu0 %v19583_v47  ;;  %v19605_v47 = vpack.c.bf16 %v25402_v14, %v25401_v8 }
 0x1ae   : > { %2767 = vmatprep.mubr.bf16.mxu0 %v19590_v4  ;;  %2901 = vmatpush1.bf16.msra.mxu0 %v17050_v30  ;;  %v17061_v30 = vld [vmem:[%s24882_s3 + $0x294] ss:$8 sps:$4 sm:$0xff]   ;;  %v25405_v4 = vld [vmem:[#allocation37_spill] sm:$0xff] }
 0x1af   : > { %2902 = vmatprep.subr.bf16.mxu0 %v17055_v15  ;;  %25403 = vst [vmem:[#allocation21_spill] sm:$0xff] %v19605_v47  ;;  %v19612_v15 = vpack.c.bf16 %v18724_v26, %v18697_v13  ;;  %v17062_v26 = vld [vmem:[%s24882_s3 + $0x2a0] ss:$8 sps:$4 sm:$0xff]  }
 0x1b1   : > { %25404 = vst [vmem:[#allocation25_spill] sm:$0xff] %v19612_v15 }
 0x1b2   : > { %2903 = vmatpush1.bf16.msra.mxu0 %v17053_v58  ;;  %v17059_v58 = vld [vmem:[%s24882_s3 + $0x290] ss:$8 sps:$4 sm:$0xff]  }
 0x1b3   : > { %2904 = vmatprep.subr.bf16.mxu0 %v17058_v35  ;;  %v17064_v35 = vld [vmem:[%s24882_s3 + $0x2a4] ss:$8 sps:$4 sm:$0xff]  }
 0x1b5   : > { %2768 = vmatmul.mubr.bf16.gmra.mrb[48].mxu0 %v19605_v47  ;;  %v19627_v47 = vpack.c.bf16 %v25406_v33, %v25405_v4 }
 0x1b6   : > { %2777 = vmatprep.mubr.bf16.mxu0 %v19612_v15  ;;  %2905 = vmatpush1.bf16.msra.mxu0 %v17056_v39  ;;  %v17067_v39 = vld [vmem:[%s24882_s3 + $0x2b4] ss:$8 sps:$4 sm:$0xff]   ;;  %v13276_v15 = vld [vmem:[%s24888_s9 + $0x240] sm:$0xff] }
 0x1b7   : > { %2906 = vmatprep.subr.bf16.mxu0 %v17061_v30  ;;  %25407 = vst [vmem:[#allocation20_spill] sm:$0xff] %v19627_v47  ;;  %v17065_v30 = vld [vmem:[%s24882_s3 + $0x2b0] ss:$8 sps:$4 sm:$0xff]  }
 0x1ba   : > { %2907 = vmatpush1.bf16.msra.mxu0 %v17059_v58  ;;  %v17070_v58 = vld [vmem:[%s24882_s3 + $0x2c4] ss:$8 sps:$4 sm:$0xff]  }
 0x1bb   : > { %2908 = vmatprep.subr.bf16.mxu0 %v17064_v35  ;;  %v17068_v35 = vld [vmem:[%s24882_s3 + $0x2c0] ss:$8 sps:$4 sm:$0xff]  }
 0x1bd   : > { %2778 = vmatmul.mubr.bf16.gmra.mrb[52].mxu0 %v19627_v47  ;;  %v25423_v47 = vld [vmem:[#allocation81_spill] sm:$0xff] }
 0x1be   : > { %2787 = vmatprep.mubr.bf16.mxu0 %v19211_v9  ;;  %2909 = vmatpush1.bf16.msra.mxu0 %v17062_v26  ;;  %v17073_v9 = vld [vmem:[%s24882_s3 + $0x2d4] ss:$8 sps:$4 sm:$0xff]   ;;  %v17071_v26 = vld [vmem:[%s24882_s3 + $0x2d0] ss:$8 sps:$4 sm:$0xff]  }
 0x1bf   : > { %2910 = vmatprep.subr.bf16.mxu0 %v17067_v39  ;;  %v17076_v39 = vld [vmem:[%s24882_s3 + $0x2e4] ss:$8 sps:$4 sm:$0xff]  }
 0x1c2   : > { %2911 = vmatpush1.bf16.msra.mxu0 %v17065_v30  ;;  %v17074_v30 = vld [vmem:[%s24882_s3 + $0x2e0] ss:$8 sps:$4 sm:$0xff]  }
 0x1c3   : > { %2912 = vmatprep.subr.bf16.mxu0 %v17070_v58  ;;  %v17079_v58 = vld [vmem:[%s24882_s3 + $0x2f4] ss:$8 sps:$4 sm:$0xff]  }
 0x1c5   : > { %2788 = vmatmul.mubr.bf16.gmra.mrb[56].mxu0 %v19215_v37  ;;  %v25417_v37 = vld [vmem:[#allocation42_spill] sm:$0xff] }
 0x1c6   : > { %2797 = vmatprep.mubr.bf16.mxu0 %v19219_v62  ;;  %2913 = vmatpush1.bf16.msra.mxu0 %v17068_v35  ;;  %v17082_v35 = vld [vmem:[%s24882_s3 + $0x304] ss:$8 sps:$4 sm:$0xff]  }
 0x1c7   : > { %2914 = vmatprep.subr.bf16.mxu0 %v17073_v9  ;;  %v17077_v9 = vld [vmem:[%s24882_s3 + $0x2f0] ss:$8 sps:$4 sm:$0xff]  }
 0x1ca   : > { %2915 = vmatpush1.bf16.msra.mxu0 %v17071_v26  ;;  %v25408_v26 = vld [vmem:[#allocation28_spill] sm:$0xff] }
 0x1cb   : > { %2916 = vmatprep.subr.bf16.mxu0 %v17076_v39  ;;  %v19670_v39 = vpack.c.bf16 %v25408_v26, %v25366_v48 }
 0x1cd   : > { %2798 = vmatmul.mubr.bf16.gmra.mrb[60].mxu0 %v19225_v31  ;;  %25409 = vst [vmem:[#allocation23_spill] sm:$0xff] %v19670_v39  ;;  %v25412_v31 = vld [vmem:[#allocation36_spill] sm:$0xff] }
 0x1ce   : > { %2807 = vmatprep.mubr.bf16.mxu0 %v19229_v25  ;;  %2917 = vmatpush1.bf16.msra.mxu0 %v17074_v30  ;;  %v25410_v30 = vld [vmem:[#allocation27_spill] sm:$0xff] }
 0x1cf   : > { %2918 = vmatprep.subr.bf16.mxu0 %v17079_v58  ;;  %v19676_v25 = vpack.c.bf16 %v25410_v30, %v25367_v34  ;;  %v25413_v58 = vld [vmem:[#allocation41_spill] sm:$0xff] }
 0x1d0   : > { %v19680_v62 = vpack.c.bf16 %v25413_v58, %v25412_v31 }
 0x1d1   : > { %25411 = vst [vmem:[#allocation30_spill] sm:$0xff] %v19676_v25 }
 0x1d2   : > { %2919 = vmatpush1.bf16.msra.mxu0 %v17077_v9  ;;  %25414 = vst [vmem:[#allocation34_spill] sm:$0xff] %v19680_v62  ;;  %v25415_v9 = vld [vmem:[#allocation35_spill] sm:$0xff] }
 0x1d3   : > { %3882 = vmatprep.subr.bf16.mxu0 %v17082_v35  ;;  %v19686_v35 = vpack.c.bf16 %v18681_v41, %v25415_v9 }
 0x1d5   : > { %2808 = vmatmul.mubr.bf16.gmra.mrb[64].mxu0 %v19233_v19  ;;  %25416 = vst [vmem:[#allocation29_spill] sm:$0xff] %v19686_v35  ;;  %v19690_v19 = vpack.c.bf16 %v18833_v50, %v25417_v37 }
 0x1d6   : > { %2817 = vmatprep.mubr.bf16.mxu0 %v19670_v39  ;;  %v19696_v39 = vpack.c.bf16 %v18820_v45, %v18749_v46 }
 0x1d7   : > { %25418 = vst [vmem:[#allocation32_spill] sm:$0xff] %v19690_v19 }
 0x1d8   : > { %25419 = vst [vmem:[#allocation37_spill] sm:$0xff] %v19696_v39 }
 0x1dd   : > { %2818 = vmatmul.mubr.bf16.gmra.mrb[68].mxu0 %v19676_v25  ;;  %v19700_v25 = vpack.c.bf16 %v18924_v6, %v18900_v44 }
 0x1de   : > { %2827 = vmatprep.mubr.bf16.mxu0 %v19680_v62  ;;  %v1402_v62 = vrot.slane %v25375_v61, 1  ;;  %v1401_v61 = vrot.slane %v25372_v56, 1  ;;  %v13281_v56 = vld [vmem:[%s24888_s9 + $0x268] sm:$0xff] }
 0x1df   : > { %25420 = vst [vmem:[#allocation39_spill] sm:$0xff] %v19700_v25 }
 0x1e5   : > { %2828 = vmatmul.mubr.bf16.gmra.mrb[72].mxu0 %v19686_v35 }
 0x1e6   : > { %2837 = vmatprep.mubr.bf16.mxu0 %v19690_v19  ;;  %v25421_v19 = vmov 0.0  }
 0x1e7   : > { %v19709_v35 = vrot.slane %v25421_v19, 1 }
 0x1e9   : > { %25422 = vst [vmem:[#allocation28_spill] sm:$0xff] %v19709_v35 }
 0x1ed   : > { %2838 = vmatmul.mubr.bf16.gmra.mrb[76].mxu0 %v19696_v39  ;;  %v13277_v39 = vld [vmem:[%s24888_s9 + $0x248] sm:$0xff] }
 0x1ee   : > { %2847 = vmatprep.mubr.bf16.mxu0 %v19700_v25  ;;  %v1543_v19 = vmul.f32 %v13277_v39, %v19709_v35  ;;  %v1536_v39 = vsel %vm1469_vm1, %v19709_v35, %v1401_v61 }
 0x1f5   : > { %2848 = vmatmul.mubr.bf16.gmra.mrb[80].mxu0 %v19251_v12  ;;  %v13279_v12 = vld [vmem:[%s24888_s9 + $0x258] sm:$0xff] }
 0x1f6   : > { %2857 = vmatprep.mubr.bf16.mxu0 %v19255_v21  ;;  %v1404_v21 = vrot.slane %v25376_v38, 1  ;;  %v1544_v38 = vmul.f32 %v13278_v59, %v1536_v39  ;;  %v17085_v39 = vld [vmem:[%s24882_s3 + $0x314] ss:$8 sps:$4 sm:$0xff]  }
 0x1fd   : > { %2858 = vmatmul.mubr.bf16.gmra.mrb[84].mxu0 %v19259_v63  ;;  %v1537_v63 = vsel %vm1469_vm1, %v19709_v35, %v1402_v62 }
 0x1fe   : > { %2867 = vmatprep.mubr.bf16.mxu0 %v19263_v3  ;;  %v1545_v3 = vmul.f32 %v13279_v12, %v1537_v63  ;;  %v13283_v12 = vld [vmem:[%s24888_s9 + $0x278] sm:$0xff] }
 0x200   : > { %v1759_v25 = vpack.c.bf16 %v1545_v3, %v1543_v19  ;;  %v1542_v3 = vmul.f32 %v13276_v15, %v19709_v35  ;;  %v1403_v15 = vrot.slane %v25373_v18, 1  ;;  %v1408_v35 = vrot.slane %v25385_v54, 1  ;;  %v13287_v18 = vld [vmem:[%s24888_s9 + $0x298] sm:$0xff] }
 0x201   : > { %v17083_v54 = vld [vmem:[%s24882_s3 + $0x310] ss:$8 sps:$4 sm:$0xff]  }
 0x202   : > { %v1758_v59 = vpack.c.bf16 %v1544_v38, %v1542_v3  ;;  %v13285_v38 = vld [vmem:[%s24888_s9 + $0x288] sm:$0xff] }
 0x205   : > { %2868 = vmatmul.mubr.bf16.gmra.mrb[88].mxu0 %v25423_v47  ;;  %v1406_v47 = vrot.slane %v25384_v42, 1  ;;  %v1535_v42 = vsel %vm1469_vm1, %v1402_v62, %v1404_v21  ;;  %v13282_v62 = vld [vmem:[%s24888_s9 + $0x270] sm:$0xff] }
 0x206   : > { %2877 = vmatprep.mubr.bf16.mxu0 %v19271_v55  ;;  %v1410_v55 = vrot.slane %v25392_v43, 1 }
 0x207   : > { %v1533_v63 = vsel %vm1469_vm1, %v1404_v21, %v1406_v47 }
 0x208   : > { %v1549_v19 = vmul.f32 %v13283_v12, %v1533_v63  ;;  %v1529_v43 = vsel %vm1469_vm1, %v1408_v35, %v1410_v55  ;;  %v13280_v12 = vld [vmem:[%s24888_s9 + $0x260] sm:$0xff]  ;;  %v1534_v63 = vsel %vm1469_vm1, %v1401_v61, %v1403_v15 }
 0x20d   : > { %2878 = vmatmul.mubr.bf16.gmra.mrb[92].mxu0 %v19275_v27  ;;  %v1405_v27 = vrot.slane %v25389_v10, 1 }
 0x20e   : > { %2920 = vmatprep.mubr.bf16.mxu0 %v1759_v25  ;;  %v1547_v25 = vmul.f32 %v13281_v56, %v1535_v42  ;;  %v17088_v56 = vld [vmem:[%s24882_s3 + $0x324] ss:$8 sps:$4 sm:$0xff]   ;;  %v1553_v42 = vmul.f32 %v13287_v18, %v1529_v43 }
 0x20f   : > { %v1532_v10 = vsel %vm1469_vm1, %v1403_v15, %v1405_v27  ;;  %v17086_v15 = vld [vmem:[%s24882_s3 + $0x320] ss:$8 sps:$4 sm:$0xff]  }
 0x210   : > { %v19758_v21 = vpack.c.bf16 %v1549_v19, %v1547_v25  ;;  %v1548_v3 = vmul.f32 %v13282_v62, %v1532_v10  ;;  %v1409_v19 = vrot.slane %v25395_v57, 1  ;;  %v1546_v25 = vmul.f32 %v13280_v12, %v1534_v63  ;;  %v17091_v57 = vld [vmem:[%s24882_s3 + $0x334] ss:$8 sps:$4 sm:$0xff]   ;;  %v13284_v18 = vld [vmem:[%s24888_s9 + $0x280] sm:$0xff]  ;;  %v13289_v63 = vld [vmem:[%s24888_s9 + $0x2a8] sm:$0xff] }
 0x212   : > { %v19793_v62 = vpack.c.bf16 %v1548_v3, %v1546_v25  ;;  %v1411_v25 = vrot.slane %v25396_v22, 1 }
 0x215   : > { %2921 = vmatmul.mubr.bf16.vlgmr.msra.gmra.mrb[32].mxu0 %v1758_v59  ;;  %v1414_v59 = vrot.slane %v25398_v24, 1  ;;  %v13286_v24 = vld [vmem:[%s24888_s9 + $0x290] sm:$0xff] }
 0x216   : > { %3883 = vmatpush1.bf16.msra.mxu0 %v17080_v20  ;;  %2930 = vmatprep.mubr.bf16.mxu0 %v19758_v21  ;;  %v1531_v20 = vsel %vm1469_vm1, %v1406_v47, %v1408_v35  ;;  %v1412_v47 = vrot.slane %v25393_v60, 1 }
 0x217   : > { %3884 = vmatprep.subr.bf16.mxu0 %v17085_v39  ;;  %v1551_v61 = vmul.f32 %v13285_v38, %v1531_v20  ;;  %v1407_v39 = vrot.slane %v25390_v53, 1  ;;  %v13291_v53 = vld [vmem:[%s24888_s9 + $0x2b8] sm:$0xff]  ;;  %v17094_v38 = vld [vmem:[%s24882_s3 + $0x344] ss:$8 sps:$4 sm:$0xff]  }
 0x218   : > { %v1525_v60 = vsel %vm1469_vm1, %v1412_v47, %v1414_v59  ;;  %v1527_v3 = vsel %vm1469_vm1, %v1410_v55, %v1412_v47  ;;  %v1416_v55 = vrot.slane %v25399_v0, 1  ;;  %v13295_v0 = vld [vmem:[%s24888_s9 + $0x2d8] sm:$0xff] }
 0x219   : > { %v19799_v35 = vpack.c.bf16 %v1553_v42, %v1551_v61  ;;  %v1528_v10 = vsel %vm1469_vm1, %v1407_v39, %v1409_v19  ;;  %v1530_v43 = vsel %vm1469_vm1, %v1405_v27, %v1407_v39  ;;  %v1557_v20 = vmul.f32 %v13291_v53, %v1525_v60  ;;  %v17092_v61 = vld [vmem:[%s24882_s3 + $0x340] ss:$8 sps:$4 sm:$0xff]   ;;  %v17097_v39 = vld [vmem:[%s24882_s3 + $0x354] ss:$8 sps:$4 sm:$0xff]   ;;  %v17095_v60 = vld [vmem:[%s24882_s3 + $0x350] ss:$8 sps:$4 sm:$0xff]  }
 0x21a   : > { %3885 = vmatpush1.bf16.msra.mxu0 %v17083_v54  ;;  %v17089_v54 = vld [vmem:[%s24882_s3 + $0x330] ss:$8 sps:$4 sm:$0xff]   ;;  %v1552_v12 = vmul.f32 %v13286_v24, %v1528_v10  ;;  %v1413_v27 = vrot.slane %v25401_v8, 1  ;;  %v1555_v42 = vmul.f32 %v13289_v63, %v1527_v3  ;;  %v13288_v10 = vld [vmem:[%s24888_s9 + $0x2a0] sm:$0xff]  ;;  %v1526_v53 = vsel %vm1469_vm1, %v1409_v19, %v1411_v25 }
 0x21b   : > { %3886 = vmatprep.subr.bf16.mxu0 %v17088_v56  ;;  %v1550_v56 = vmul.f32 %v13284_v18, %v1530_v43  ;;  %v13290_v8 = vld [vmem:[%s24888_s9 + $0x2b0] sm:$0xff]  ;;  %v1523_v43 = vsel %vm1469_vm1, %v1414_v59, %v1416_v55  ;;  %v1417_v19 = vrot.slane %v25405_v4, 1  ;;  %v1554_v63 = vmul.f32 %v13288_v10, %v1526_v53 }
 0x21c   : > { %v19840_v47 = vpack.c.bf16 %v1557_v20, %v1555_v42  ;;  %v1524_v22 = vsel %vm1469_vm1, %v1411_v25, %v1413_v27  ;;  %v17098_v20 = vld [vmem:[%s24882_s3 + $0x360] ss:$8 sps:$4 sm:$0xff]   ;;  %v17103_v59 = vld [vmem:[%s24882_s3 + $0x374] ss:$8 sps:$4 sm:$0xff]   ;;  %v25425_v53 = vrot.slane %v18771_v1, 1 }
 0x21d   : > { %2931 = vmatmul.mubr.bf16.gmra.mrb[36].mxu0 %v19793_v62  ;;  %v1556_v18 = vmul.f32 %v13290_v8, %v1524_v22  ;;  %v13294_v4 = vld [vmem:[%s24888_s9 + $0x2d0] sm:$0xff]  ;;  %v13292_v25 = vld [vmem:[%s24888_s9 + $0x2c0] sm:$0xff] }
 0x21e   : > { %2940 = vmatprep.mubr.bf16.mxu0 %v19799_v35  ;;  %3887 = vmatpush1.bf16.msra.mxu0 %v17086_v15  ;;  %v19834_v15 = vpack.c.bf16 %v1552_v12, %v1550_v56  ;;  %v17106_v8 = vld [vmem:[%s24882_s3 + $0x384] ss:$8 sps:$4 sm:$0xff]   ;;  %v13298_v10 = vld [vmem:[%s24888_s9 + $0x2f0] sm:$0xff] }
 0x21f   : > { %3888 = vmatprep.subr.bf16.mxu0 %v17091_v57  ;;  %v25424_v57 = vrot.slane %v18697_v13, 1  ;;  %v13293_v13 = vld [vmem:[%s24888_s9 + $0x2c8] sm:$0xff]  ;;  %v19877_v56 = vpack.c.bf16 %v1556_v18, %v1554_v63  ;;  %v13296_v18 = vld [vmem:[%s24888_s9 + $0x2e0] sm:$0xff] }
 0x220   : > { %v1559_v3 = vmul.f32 %v13293_v13, %v1523_v43  ;;  %v17107_v43 = vld [vmem:[%s24882_s3 + $0x390] ss:$8 sps:$4 sm:$0xff]   ;;  %v17110_v63 = vld [vmem:[%s24882_s3 + $0x3a0] ss:$8 sps:$4 sm:$0xff]  }
 0x221   : > { %v1521_v24 = vsel %vm1469_vm1, %v1416_v55, %v25424_v57  ;;  %v17101_v55 = vld [vmem:[%s24882_s3 + $0x370] ss:$8 sps:$4 sm:$0xff]   ;;  %v17104_v57 = vld [vmem:[%s24882_s3 + $0x380] ss:$8 sps:$4 sm:$0xff]  }
 0x222   : > { %3889 = vmatpush1.bf16.msra.mxu0 %v17089_v54  ;;  %v17100_v54 = vld [vmem:[%s24882_s3 + $0x364] ss:$8 sps:$4 sm:$0xff]   ;;  %v1561_v12 = vmul.f32 %v13295_v0, %v1521_v24  ;;  %v1419_v0 = vrot.slane %v25406_v33, 1  ;;  %v17109_v24 = vld [vmem:[%s24882_s3 + $0x394] ss:$8 sps:$4 sm:$0xff]  }
 0x223   : > { %3890 = vmatprep.subr.bf16.mxu0 %v17094_v38  ;;  %v1415_v38 = vrot.slane %v25402_v14, 1 }
 0x224   : > { %v19882_v42 = vpack.c.bf16 %v1561_v12, %v1559_v3  ;;  %v1516_v33 = vsel %vm1469_vm1, %v1419_v0, %v25425_v53  ;;  %v1518_v13 = vsel %vm1469_vm1, %v1417_v19, %v1419_v0  ;;  %v25427_v0 = vrot.slane %v25366_v48, 1 }
 0x225   : > { %2941 = vmatmul.mubr.bf16.gmra.mrb[40].mxu0 %v19834_v15  ;;  %v1520_v14 = vsel %vm1469_vm1, %v1415_v38, %v1417_v19  ;;  %v1564_v1 = vmul.f32 %v13298_v10, %v1516_v33  ;;  %v1562_v12 = vmul.f32 %v13296_v18, %v1518_v13  ;;  %v17115_v19 = vld [vmem:[%s24882_s3 + $0x3b4] ss:$8 sps:$4 sm:$0xff]   ;;  %v17130_v10 = vld [vmem:[%s24882_s3 + $0x404] ss:$8 sps:$4 sm:$0xff]   ;;  %v1435_v18 = vrot.slane %v25410_v30, 1 }
 0x226   : > { %2950 = vmatprep.mubr.bf16.mxu0 %v19840_v47  ;;  %3891 = vmatpush1.bf16.msra.mxu0 %v17092_v61  ;;  %v1522_v61 = vsel %vm1469_vm1, %v1413_v27, %v1415_v38  ;;  %v17113_v38 = vld [vmem:[%s24882_s3 + $0x3b0] ss:$8 sps:$4 sm:$0xff]   ;;  %v1437_v48 = vrot.slane %v25415_v9, 1  ;;  %v1440_v13 = vrot.slane %v25413_v58, 1  ;;  %v25428_v9 = vrot.slane %v25367_v34, 1  ;;  %v13317_v58 = vld [vmem:[%s24888_s9 + $0x388] sm:$0xff] }
 0x227   : > { %3892 = vmatprep.subr.bf16.mxu0 %v17097_v39  ;;  %v1560_v39 = vmul.f32 %v13294_v4, %v1520_v14  ;;  %v1558_v22 = vmul.f32 %v13292_v25, %v1522_v61  ;;  %v19934_v3 = vpack.c.bf16 %v1564_v1, %v1562_v12  ;;  %v17121_v4 = vld [vmem:[%s24882_s3 + $0x3d4] ss:$8 sps:$4 sm:$0xff]   ;;  %v17119_v14 = vld [vmem:[%s24882_s3 + $0x3d0] ss:$8 sps:$4 sm:$0xff]   ;;  %v17124_v25 = vld [vmem:[%s24882_s3 + $0x3e4] ss:$8 sps:$4 sm:$0xff]  }
 0x228   : > { %v1436_v61 = vrot.slane %v25408_v26, 1  ;;  %v13314_v12 = vld [vmem:[%s24888_s9 + $0x370] sm:$0xff]  ;;  %v1500_v30 = vsel %vm1469_vm1, %v1435_v18, %v1437_v48 }
 0x229   : > { %v19906_v27 = vpack.c.bf16 %v1560_v39, %v1558_v22  ;;  %v17122_v39 = vld [vmem:[%s24882_s3 + $0x3e0] ss:$8 sps:$4 sm:$0xff]  }
 0x22a   : > { %3893 = vmatpush1.bf16.msra.mxu0 %v17095_v60  ;;  %v25426_v60 = vld [vmem:[#allocation86_spill] sm:$0xff] }
 0x22b   : > { %3894 = vmatprep.subr.bf16.mxu0 %v17100_v54  ;;  %v17112_v54 = vld [vmem:[%s24882_s3 + $0x3a4] ss:$8 sps:$4 sm:$0xff]  }
 0x22c   : > { %v13313_v22 = vld [vmem:[%s24888_s9 + $0x368] sm:$0xff] }
 0x22d   : > { %2951 = vmatmul.mubr.bf16.gmra.mrb[44].mxu0 %v19877_v56 }
 0x22e   : > { %2960 = vmatprep.mubr.bf16.mxu0 %v19882_v42  ;;  %3895 = vmatpush1.bf16.msra.mxu0 %v17098_v20  ;;  %v17118_v20 = vld [vmem:[%s24882_s3 + $0x3c4] ss:$8 sps:$4 sm:$0xff]  }
 0x22f   : > { %3896 = vmatprep.subr.bf16.mxu0 %v17103_v59  ;;  %v17116_v59 = vld [vmem:[%s24882_s3 + $0x3c0] ss:$8 sps:$4 sm:$0xff]  }
 0x232   : > { %3897 = vmatpush1.bf16.msra.mxu0 %v17101_v55  ;;  %v1438_v55 = vrot.slane %v25412_v31, 1  ;;  %v13315_v31 = vld [vmem:[%s24888_s9 + $0x378] sm:$0xff] }
 0x233   : > { %3898 = vmatprep.subr.bf16.mxu0 %v17106_v8  ;;  %v17127_v8 = vld [vmem:[%s24882_s3 + $0x3f4] ss:$8 sps:$4 sm:$0xff]  }
 0x234   : > { %v1501_v26 = vsel %vm1469_vm1, %v1436_v61, %v1438_v55 }
 0x235   : > { %2961 = vmatmul.mubr.bf16.gmra.mrb[48].mxu0 %v19906_v27  ;;  %v1581_v33 = vmul.f32 %v13315_v31, %v1501_v26  ;;  %v13318_v31 = vld [vmem:[%s24888_s9 + $0x390] sm:$0xff] }
 0x236   : > { %2970 = vmatprep.mubr.bf16.mxu0 %v25426_v60  ;;  %3899 = vmatpush1.bf16.msra.mxu0 %v17104_v57  ;;  %v1503_v57 = vsel %vm1469_vm1, %v25427_v0, %v1436_v61  ;;  %v1444_v61 = vrot.slane %v18833_v50, 1  ;;  %v13321_v50 = vld [vmem:[%s24888_s9 + $0x3a8] sm:$0xff] }
 0x237   : > { %3900 = vmatprep.subr.bf16.mxu0 %v17109_v24  ;;  %v17125_v24 = vld [vmem:[%s24882_s3 + $0x3f0] ss:$8 sps:$4 sm:$0xff]   ;;  %v1579_v53 = vmul.f32 %v13313_v22, %v1503_v57 }
 0x239   : > { %v19993_v1 = vpack.c.bf16 %v1581_v33, %v1579_v53  ;;  %v1443_v33 = vrot.slane %v18820_v45, 1 }
 0x23a   : > { %3901 = vmatpush1.bf16.msra.mxu0 %v17107_v43  ;;  %v1442_v43 = vrot.slane %v25417_v37, 1  ;;  %v1502_v37 = vsel %vm1469_vm1, %v25428_v9, %v1435_v18  ;;  %v1448_v18 = vrot.slane %v18924_v6, 1  ;;  %v13325_v6 = vld [vmem:[%s24888_s9 + $0x3c8] sm:$0xff] }
 0x23b   : > { %3902 = vmatprep.subr.bf16.mxu0 %v17112_v54  ;;  %v13312_v54 = vld [vmem:[%s24888_s9 + $0x360] sm:$0xff] }
 0x23c   : > { %v1578_v34 = vmul.f32 %v13312_v54, %v1502_v37  ;;  %v1495_v0 = vsel %vm1469_vm1, %v1442_v43, %v1444_v61  ;;  %v13320_v54 = vld [vmem:[%s24888_s9 + $0x3a0] sm:$0xff]  ;;  %v13327_v37 = vld [vmem:[%s24888_s9 + $0x3d8] sm:$0xff] }
 0x23d   : > { %2971 = vmatmul.mubr.bf16.gmra.mrb[52].mxu0 %v19934_v3 }
 0x23e   : > { %2980 = vmatprep.mubr.bf16.mxu0 %v19344_v51  ;;  %3903 = vmatpush1.bf16.msra.mxu0 %v17110_v63  ;;  %v13319_v63 = vld [vmem:[%s24888_s9 + $0x398] sm:$0xff] }
 0x23f   : > { %3904 = vmatprep.subr.bf16.mxu0 %v17115_v19  ;;  %v1497_v19 = vsel %vm1469_vm1, %v1440_v13, %v1442_v43  ;;  %v13322_v43 = vld [vmem:[%s24888_s9 + $0x3b0] sm:$0xff] }
 0x242   : > { %3905 = vmatpush1.bf16.msra.mxu0 %v17113_v38  ;;  %v1499_v38 = vsel %vm1469_vm1, %v1438_v55, %v1440_v13  ;;  %v13316_v55 = vld [vmem:[%s24888_s9 + $0x380] sm:$0xff] }
 0x243   : > { %3906 = vmatprep.subr.bf16.mxu0 %v17118_v20  ;;  %v1580_v20 = vmul.f32 %v13314_v12, %v1500_v30  ;;  %v25429_v12 = vld [vmem:[#allocation49_spill] sm:$0xff] }
 0x244   : > { %v25430_v30 = vrot.slane %v25429_v12, 1  ;;  %v17143_v12 = vld [vmem:[%s24882_s3 + $0x450] ss:$8 sps:$4 sm:$0xff]  }
 0x245   : > { %2981 = vmatmul.mubr.bf16.gmra.mrb[56].mxu0 %v19360_v16 }
 0x246   : > { %2990 = vmatprep.mubr.bf16.mxu0 %v19374_v36  ;;  %3907 = vmatpush1.bf16.msra.mxu0 %v17116_v59  ;;  %v1583_v59 = vmul.f32 %v13317_v58, %v1499_v38  ;;  %v1492_v9 = vsel %vm1469_vm1, %v1443_v33, %v25430_v30  ;;  %v25431_v58 = vld [vmem:[#allocation54_spill] sm:$0xff] }
 0x247   : > { %3908 = vmatprep.subr.bf16.mxu0 %v17121_v4  ;;  %v1585_v4 = vmul.f32 %v13319_v63, %v1497_v19  ;;  %v25432_v63 = vrot.slane %v25431_v58, 1  ;;  %v17148_v30 = vld [vmem:[%s24882_s3 + $0x464] ss:$8 sps:$4 sm:$0xff]   ;;  %v17149_v58 = vld [vmem:[%s24882_s3 + $0x470] ss:$8 sps:$4 sm:$0xff]  }
 0x249   : > { %v20025_v22 = vpack.c.bf16 %v1585_v4, %v1583_v59  ;;  %v1489_v19 = vsel %vm1469_vm1, %v1448_v18, %v25432_v63  ;;  %v17154_v63 = vld [vmem:[%s24882_s3 + $0x484] ss:$8 sps:$4 sm:$0xff]  }
 0x24a   : > { %3909 = vmatpush1.bf16.msra.mxu0 %v17119_v14  ;;  %v1439_v14 = vrot.slane %v18681_v41, 1  ;;  %v1593_v4 = vmul.f32 %v13327_v37, %v1489_v19  ;;  %v25444_v37 = vld [vmem:[#allocation43_spill] sm:$0xff]  ;;  %v17152_v19 = vld [vmem:[%s24882_s3 + $0x480] ss:$8 sps:$4 sm:$0xff]  }
 0x24b   : > { %3910 = vmatprep.subr.bf16.mxu0 %v17124_v25  ;;  %v1441_v25 = vrot.slane %v18749_v46, 1 }
 0x24c   : > { %v1498_v46 = vsel %vm1469_vm1, %v1437_v48, %v1439_v14 }
 0x24d   : > { %2991 = vmatmul.mubr.bf16.gmra.mrb[60].mxu0 %v19380_v11  ;;  %v1496_v41 = vsel %vm1469_vm1, %v1439_v14, %v1441_v25  ;;  %v1582_v57 = vmul.f32 %v13316_v55, %v1498_v46  ;;  %v1494_v45 = vsel %vm1469_vm1, %v1441_v25, %v1443_v33  ;;  %v17128_v55 = vld [vmem:[%s24882_s3 + $0x400] ss:$8 sps:$4 sm:$0xff]  }
 0x24e   : > { %3000 = vmatprep.mubr.bf16.mxu0 %v19394_v29  ;;  %3911 = vmatpush1.bf16.msra.mxu0 %v17122_v39  ;;  %v1446_v39 = vrot.slane %v18900_v44, 1  ;;  %v13323_v44 = vld [vmem:[%s24888_s9 + $0x3b8] sm:$0xff]  ;;  %v25438_v46 = vld [vmem:[#allocation22_spill] sm:$0xff] }
 0x24f   : > { %3912 = vmatprep.subr.bf16.mxu0 %v17127_v8  ;;  %v20023_v8 = vpack.c.bf16 %v1580_v20, %v1578_v34  ;;  %v1586_v34 = vmul.f32 %v13320_v54, %v1494_v45  ;;  %v1588_v20 = vmul.f32 %v13322_v43, %v1492_v9  ;;  %v17140_v33 = vld [vmem:[%s24882_s3 + $0x440] ss:$8 sps:$4 sm:$0xff]   ;;  %v17151_v45 = vld [vmem:[%s24882_s3 + $0x474] ss:$8 sps:$4 sm:$0xff]  }
 0x250   : > { %v1493_v26 = vsel %vm1469_vm1, %v1444_v61, %v1446_v39  ;;  %v1491_v38 = vsel %vm1469_vm1, %v1446_v39, %v1448_v18  ;;  %v25435_v61 = vld [vmem:[#allocation11_spill] sm:$0xff]  ;;  %v25441_v54 = vld [vmem:[#allocation33_spill] sm:$0xff]  ;;  %v25442_v43 = vld [vmem:[#allocation38_spill] sm:$0xff] }
 0x251   : > { %v1589_v53 = vmul.f32 %v13323_v44, %v1493_v26  ;;  %v1591_v59 = vmul.f32 %v13325_v6, %v1491_v38  ;;  %v20081_v14 = vpack.c.bf16 %v1588_v20, %v1586_v34  ;;  %v25436_v39 = vld [vmem:[#allocation15_spill] sm:$0xff]  ;;  %v17136_v44 = vld [vmem:[%s24882_s3 + $0x424] ss:$8 sps:$4 sm:$0xff]   ;;  %v17134_v26 = vld [vmem:[%s24882_s3 + $0x420] ss:$8 sps:$4 sm:$0xff]  }
 0x252   : > { %3913 = vmatpush1.bf16.msra.mxu0 %v17125_v24  ;;  %v1584_v24 = vmul.f32 %v13318_v31, %v1496_v41  ;;  %v17133_v31 = vld [vmem:[%s24882_s3 + $0x414] ss:$8 sps:$4 sm:$0xff]   ;;  %v25437_v41 = vld [vmem:[#allocation17_spill] sm:$0xff] }
 0x253   : > { %4075 = vmatprep.subr.bf16.mxu0 %v17130_v10  ;;  %v1587_v10 = vmul.f32 %v13321_v50, %v1495_v0  ;;  %25433 = vst [vmem:[#allocation27_spill] sm:$0xff] %v20081_v14  ;;  %v20083_v25 = vpack.c.bf16 %v1593_v4, %v1591_v59  ;;  %v17131_v50 = vld [vmem:[%s24882_s3 + $0x410] ss:$8 sps:$4 sm:$0xff]   ;;  %v17139_v0 = vld [vmem:[%s24882_s3 + $0x434] ss:$8 sps:$4 sm:$0xff]  }
 0x254   : > { %v20051_v48 = vpack.c.bf16 %v1584_v24, %v1582_v57  ;;  %v25439_v57 = vld [vmem:[#allocation24_spill] sm:$0xff]  ;;  %v25440_v24 = vld [vmem:[#allocation31_spill] sm:$0xff]  ;;  %v17146_v9 = vld [vmem:[%s24882_s3 + $0x460] ss:$8 sps:$4 sm:$0xff]  }
 0x255   : > { %3001 = vmatmul.mubr.bf16.gmra.mrb[64].mxu0 %v19396_v28  ;;  %v20053_v13 = vpack.c.bf16 %v1589_v53, %v1587_v10  ;;  %25434 = vst [vmem:[#allocation36_spill] sm:$0xff] %v20083_v25  ;;  %v17137_v10 = vld [vmem:[%s24882_s3 + $0x430] ss:$8 sps:$4 sm:$0xff]   ;;  %v17142_v53 = vld [vmem:[%s24882_s3 + $0x444] ss:$8 sps:$4 sm:$0xff]  }
 0x256   : > { %3010 = vmatprep.mubr.bf16.mxu0 %v19993_v1  ;;  %v17145_v18 = vld [vmem:[%s24882_s3 + $0x454] ss:$8 sps:$4 sm:$0xff]   ;;  %v17155_v59 = vld [vmem:[%s24882_s3 + $0x490] ss:$8 sps:$4 sm:$0xff]   ;;  %v17160_v4 = vld [vmem:[%s24882_s3 + $0x4a4] ss:$8 sps:$4 sm:$0xff]  }
 0x257   : > { %v25443_v6 = vld [vmem:[#allocation40_spill] sm:$0xff]  ;;  %v25446_v20 = vld [vmem:[#allocation51_spill] sm:$0xff] }
 0x258   : > { %v17157_v38 = vld [vmem:[%s24882_s3 + $0x494] ss:$8 sps:$4 sm:$0xff]  }
 0x259   : > { %v25445_v34 = vld [vmem:[#allocation44_spill] sm:$0xff] }
 0x25d   : > { %3011 = vmatmul.mubr.bf16.gmra.mrb[68].mxu0 %v20023_v8 }
 0x25e   : > { %3020 = vmatprep.mubr.bf16.mxu0 %v20025_v22 }
 0x265   : > { %3021 = vmatmul.mubr.bf16.gmra.mrb[72].mxu0 %v20051_v48 }
 0x266   : > { %3030 = vmatprep.mubr.bf16.mxu0 %v20053_v13 }
 0x26d   : > { %3031 = vmatmul.mubr.bf16.gmra.mrb[76].mxu0 %v20081_v14 }
 0x26e   : > { %3040 = vmatprep.mubr.bf16.mxu0 %v20083_v25 }
 0x275   : > { %3041 = vmatmul.mubr.bf16.gmra.mrb[80].mxu0 %v19455_v5 }
 0x276   : > { %3050 = vmatprep.mubr.bf16.mxu0 %v19488_v32 }
 0x27d   : > { %3051 = vmatmul.mubr.bf16.gmra.mrb[84].mxu0 %v19496_v17 }
 0x27e   : > { %3060 = vmatprep.mubr.bf16.mxu0 %v25435_v61 }
 0x285   : > { %3061 = vmatmul.mubr.bf16.gmra.mrb[88].mxu0 %v19539_v2 }
 0x286   : > { %3070 = vmatprep.mubr.bf16.mxu0 %v19552_v23 }
 0x28d   : > { %3071 = vmatmul.mubr.bf16.gmra.mrb[92].mxu0 %v19554_v7 }
 0x28e   : > { %3914 = vmatprep.mubr.bf16.mxu0 %v25436_v39  ;;  %v17158_v39 = vld [vmem:[%s24882_s3 + $0x4a0] ss:$8 sps:$4 sm:$0xff]  }
 0x295   : > { %3915 = vmatmul.mubr.bf16.vlgmr.msra.gmra.mrb[32].mxu0 %v25437_v41  ;;  %v25448_v41 = vld [vmem:[#allocation53_spill] sm:$0xff] }
 0x296   : > { %4076 = vmatpush1.bf16.msra.mxu0 %v17128_v55  ;;  %3924 = vmatprep.mubr.bf16.mxu0 %v25438_v46  ;;  %v17163_v55 = vld [vmem:[%s24882_s3 + $0x4b4] ss:$8 sps:$4 sm:$0xff]  }
 0x297   : > { %4077 = vmatprep.subr.bf16.mxu0 %v17133_v31  ;;  %v25447_v31 = vld [vmem:[#allocation50_spill] sm:$0xff] }
 0x29a   : > { %4078 = vmatpush1.bf16.msra.mxu0 %v17131_v50  ;;  %v17161_v50 = vld [vmem:[%s24882_s3 + $0x4b0] ss:$8 sps:$4 sm:$0xff]  }
 0x29b   : > { %4079 = vmatprep.subr.bf16.mxu0 %v17136_v44  ;;  %v17166_v44 = vld [vmem:[%s24882_s3 + $0x4c4] ss:$8 sps:$4 sm:$0xff]  }
 0x29d   : > { %3925 = vmatmul.mubr.bf16.gmra.mrb[36].mxu0 %v25439_v57 }
 0x29e   : > { %3934 = vmatprep.mubr.bf16.mxu0 %v25440_v24  ;;  %4080 = vmatpush1.bf16.msra.mxu0 %v17134_v26  ;;  %v17164_v26 = vld [vmem:[%s24882_s3 + $0x4c0] ss:$8 sps:$4 sm:$0xff]  }
 0x29f   : > { %4081 = vmatprep.subr.bf16.mxu0 %v17139_v0  ;;  %v17169_v0 = vld [vmem:[%s24882_s3 + $0x4d4] ss:$8 sps:$4 sm:$0xff]  }
 0x2a2   : > { %4082 = vmatpush1.bf16.msra.mxu0 %v17137_v10  ;;  %v25449_v10 = vld [vmem:[#allocation52_spill] sm:$0xff] }
 0x2a3   : > { %4083 = vmatprep.subr.bf16.mxu0 %v17142_v53  ;;  %v25450_v53 = vld [vmem:[#allocation57_spill] sm:$0xff] }
 0x2a5   : > { %3935 = vmatmul.mubr.bf16.gmra.mrb[40].mxu0 %v25441_v54 }
 0x2a6   : > { %3944 = vmatprep.mubr.bf16.mxu0 %v25442_v43  ;;  %4084 = vmatpush1.bf16.msra.mxu0 %v17140_v33  ;;  %v17167_v33 = vld [vmem:[%s24882_s3 + $0x4d0] ss:$8 sps:$4 sm:$0xff]  }
 0x2a7   : > { %4085 = vmatprep.subr.bf16.mxu0 %v17145_v18  ;;  %v17172_v18 = vld [vmem:[%s24882_s3 + $0x4e4] ss:$8 sps:$4 sm:$0xff]  }
 0x2aa   : > { %4086 = vmatpush1.bf16.msra.mxu0 %v17143_v12  ;;  %v17170_v12 = vld [vmem:[%s24882_s3 + $0x4e0] ss:$8 sps:$4 sm:$0xff]  }
 0x2ab   : > { %4087 = vmatprep.subr.bf16.mxu0 %v17148_v30  ;;  %v17175_v30 = vld [vmem:[%s24882_s3 + $0x4f4] ss:$8 sps:$4 sm:$0xff]  }
 0x2ad   : > { %3945 = vmatmul.mubr.bf16.gmra.mrb[44].mxu0 %v25443_v6 }
 0x2ae   : > { %3954 = vmatprep.mubr.bf16.mxu0 %v25444_v37  ;;  %4088 = vmatpush1.bf16.msra.mxu0 %v17146_v9  ;;  %v25451_v9 = vld [vmem:[#allocation55_spill] sm:$0xff] }
 0x2af   : > { %4089 = vmatprep.subr.bf16.mxu0 %v17151_v45  ;;  %v25452_v45 = vld [vmem:[#allocation58_spill] sm:$0xff] }
 0x2b2   : > { %4090 = vmatpush1.bf16.msra.mxu0 %v17149_v58  ;;  %v17173_v58 = vld [vmem:[%s24882_s3 + $0x4f0] ss:$8 sps:$4 sm:$0xff]  }
 0x2b3   : > { %4091 = vmatprep.subr.bf16.mxu0 %v17154_v63  ;;  %v17178_v63 = vld [vmem:[%s24882_s3 + $0x504] ss:$8 sps:$4 sm:$0xff]  }
 0x2b5   : > { %3955 = vmatmul.mubr.bf16.gmra.mrb[48].mxu0 %v25445_v34 }
 0x2b6   : > { %3964 = vmatprep.mubr.bf16.mxu0 %v25446_v20  ;;  %4092 = vmatpush1.bf16.msra.mxu0 %v17152_v19  ;;  %v25453_v19 = vld [vmem:[#allocation59_spill] sm:$0xff] }
 0x2b7   : > { %4093 = vmatprep.subr.bf16.mxu0 %v17157_v38  ;;  %v25454_v38 = vld [vmem:[#allocation56_spill] sm:$0xff] }
 0x2ba   : > { %4094 = vmatpush1.bf16.msra.mxu0 %v17155_v59  ;;  %v25455_v59 = vld [vmem:[#allocation68_spill] sm:$0xff] }
 0x2bb   : > { %4095 = vmatprep.subr.bf16.mxu0 %v17160_v4  ;;  %v25456_v4 = vld [vmem:[#allocation73_spill] sm:$0xff] }
 0x2bd   : > { %3965 = vmatmul.mubr.bf16.gmra.mrb[52].mxu0 %v25447_v31 }
 0x2be   : > { %3974 = vmatprep.mubr.bf16.mxu0 %v25448_v41  ;;  %4096 = vmatpush1.bf16.msra.mxu0 %v17158_v39  ;;  %v25457_v39 = vld [vmem:[#allocation84_spill] sm:$0xff] }
 0x2bf   : > { %4097 = vmatprep.subr.bf16.mxu0 %v17163_v55  ;;  %v25458_v55 = vld [vmem:[#allocation85_spill] sm:$0xff] }
 0x2c2   : > { %4098 = vmatpush1.bf16.msra.mxu0 %v17161_v50  ;;  %v25459_v50 = vld [vmem:[#allocation8_spill] sm:$0xff] }
 0x2c3   : > { %4099 = vmatprep.subr.bf16.mxu0 %v17166_v44  ;;  %v25460_v44 = vld [vmem:[#allocation48_spill] sm:$0xff] }
 0x2c5   : > { %3975 = vmatmul.mubr.bf16.gmra.mrb[56].mxu0 %v25449_v10 }
 0x2c6   : > { %3984 = vmatprep.mubr.bf16.mxu0 %v25450_v53  ;;  %4100 = vmatpush1.bf16.msra.mxu0 %v17164_v26  ;;  %v893_v26 = vadd.f32 %v25460_v44, %v25459_v50  ;;  %v25467_v44 = vld [vmem:[#allocation66_spill] sm:$0xff] }
 0x2c7   : > { %4101 = vmatprep.subr.bf16.mxu0 %v17169_v0  ;;  %v25461_v0 = vld [vmem:[#allocation61_spill] sm:$0xff] }
 0x2c8   : > { %17708 = vtanh.f32 %v893_v26  ;;  %v1098_v26 = vld [vmem:[%s24888_s9 + $0x208] sm:$0xff] }
 0x2ca   : > { %4102 = vmatpush1.bf16.msra.mxu0 %v17167_v33  ;;  %v25462_v33 = vld [vmem:[#allocation62_spill] sm:$0xff] }
 0x2cb   : > { %4103 = vmatprep.subr.bf16.mxu0 %v17172_v18  ;;  %v25463_v18 = vld [vmem:[#allocation7_spill] sm:$0xff] }
 0x2cd   : > { %3985 = vmatmul.mubr.bf16.gmra.mrb[60].mxu0 %v25451_v9 }
 0x2ce   : > { %3994 = vmatprep.mubr.bf16.mxu0 %v25452_v45  ;;  %4104 = vmatpush1.bf16.msra.mxu0 %v17170_v12  ;;  %v25464_v12 = vld [vmem:[#allocation47_spill] sm:$0xff]  ;;  %v1097_v45 = vld [vmem:[%s24888_s9 + $0x200] sm:$0xff] }
 0x2cf   : > { %4105 = vmatprep.subr.bf16.mxu0 %v17175_v30  ;;  %v891_v30 = vadd.f32 %v25464_v12, %v25463_v18  ;;  %v1100_v18 = vld [vmem:[%s24888_s9 + $0x218] sm:$0xff] }
 0x2d1   : > { %17710 = vtanh.f32 %v891_v30  ;;  %v25468_v30 = vld [vmem:[#allocation60_spill] sm:$0xff] }
 0x2d2   : > { %4106 = vmatpush1.bf16.msra.mxu0 %v17173_v58  ;;  %v25465_v58 = vld [vmem:[#allocation64_spill] sm:$0xff] }
 0x2d3   : > { %4268 = vmatprep.subr.bf16.mxu0 %v17178_v63  ;;  %v20220_v63 = vpop.eup %17708 }
 0x2d5   : > { %3995 = vmatmul.mubr.bf16.gmra.mrb[64].mxu0 %v25453_v19 }
 0x2d6   : > { %4004 = vmatprep.mubr.bf16.mxu0 %v25454_v38 }
 0x2db   : > { %v20225_v50 = vpop.eup %17710 }
 0x2dc   : > { %v25087_v38 = vrot.slane %v20225_v50, 7 }
 0x2dd   : > { %4005 = vmatmul.mubr.bf16.gmra.mrb[68].mxu0 %v25455_v59  ;;  %v1242_v59 = vrot.slane %v19486_v52, 7 }
 0x2de   : > { %4014 = vmatprep.mubr.bf16.mxu0 %v25456_v4  ;;  %v25466_v4 = vld [vmem:[#allocation65_spill] sm:$0xff] }
 0x2e5   : > { %4015 = vmatmul.mubr.bf16.gmra.mrb[72].mxu0 %v25457_v39  ;;  %v25086_v39 = vrot.slane %v20220_v63, 7 }
 0x2e6   : > { %4024 = vmatprep.mubr.bf16.mxu0 %v25458_v55  ;;  %v1243_v55 = vrot.slane %v19475_v49, 7 }
 0x2e8   : > { %v1258_v12 = vsel %vm1252_vm0, %v1243_v55, %v25086_v39  ;;  %v25474_v39 = vld [vmem:[#allocation19_spill] sm:$0xff] }
 0x2ed   : > { %4025 = vmatmul.mubr.bf16.gmra.mrb[76].mxu0 %v25461_v0  ;;  %v1392_v0 = vmul.f32 %v1258_v12, %v1100_v18 }
 0x2ee   : > { %4034 = vmatprep.mubr.bf16.mxu0 %v25462_v33  ;;  %v25470_v33 = vld [vmem:[#allocation67_spill] sm:$0xff] }
 0x2f5   : > { %4035 = vmatmul.mubr.bf16.gmra.mrb[80].mxu0 %v25465_v58 }
 0x2f6   : > { %4044 = vmatprep.mubr.bf16.mxu0 %v25466_v4  ;;  %v25469_v4 = vrot.slane %v25468_v30, 7  ;;  %v1099_v30 = vld [vmem:[%s24888_s9 + $0x210] sm:$0xff] }
 0x2f8   : > { %v1260_v58 = vsel %vm1252_vm0, %v25469_v4, %v1243_v55  ;;  %v1257_v4 = vsel %vm1252_vm0, %v1242_v59, %v25087_v38  ;;  %v25471_v55 = vld [vmem:[#allocation63_spill] sm:$0xff]  ;;  %v17176_v38 = vld [vmem:[%s24882_s3 + $0x500] ss:$8 sps:$4 sm:$0xff]  }
 0x2f9   : > { %v1391_v18 = vmul.f32 %v1257_v4, %v1099_v30  ;;  %v17182_v30 = vld [vmem:[%s24882_s3 + $0x520] ss:$8 sps:$4 sm:$0xff]  }
 0x2fa   : > { %v25477_v4 = vld [vmem:[#allocation14_spill] sm:$0xff] }
 0x2fd   : > { %4045 = vmatmul.mubr.bf16.gmra.mrb[84].mxu0 %v25467_v44  ;;  %v1390_v44 = vmul.f32 %v1260_v58, %v1098_v26  ;;  %v25472_v58 = vrot.slane %v25471_v55, 7  ;;  %v25475_v55 = vld [vmem:[#allocation26_spill] sm:$0xff] }
 0x2fe   : > { %4054 = vmatprep.mubr.bf16.mxu0 %v25470_v33 }
 0x2ff   : > { %v20245_v19 = vpack.c.bf16 %v1392_v0, %v1390_v44  ;;  %v1259_v26 = vsel %vm1252_vm0, %v25472_v58, %v1242_v59  ;;  %v25473_v0 = vld [vmem:[#allocation69_spill] sm:$0xff]  ;;  %v17181_v59 = vld [vmem:[%s24882_s3 + $0x514] ss:$8 sps:$4 sm:$0xff]   ;;  %v25476_v58 = vld [vmem:[#allocation10_spill] sm:$0xff] }
 0x300   : > { %v1389_v44 = vmul.f32 %v1259_v26, %v1097_v45  ;;  %v17179_v45 = vld [vmem:[%s24882_s3 + $0x510] ss:$8 sps:$4 sm:$0xff]   ;;  %v25478_v26 = vld [vmem:[#allocation18_spill] sm:$0xff] }
 0x302   : > { %v20263_v12 = vpack.c.bf16 %v1391_v18, %v1389_v44  ;;  %v17185_v44 = vld [vmem:[%s24882_s3 + $0x530] ss:$8 sps:$4 sm:$0xff]   ;;  %v17190_v18 = vld [vmem:[%s24882_s3 + $0x544] ss:$8 sps:$4 sm:$0xff]  }
 0x305   : > { %4055 = vmatmul.mubr.bf16.gmra.mrb[88].mxu0 %v25473_v0 }
 0x306   : > { %4064 = vmatprep.mubr.bf16.mxu0 %v20245_v19 }
 0x30d   : > { %4065 = vmatmul.mubr.bf16.gmra.mrb[92].mxu0 %v20263_v12 }
 0x30e   : > { %4107 = vmatprep.mubr.bf16.mxu0 %v25474_v39  ;;  %v17184_v39 = vld [vmem:[%s24882_s3 + $0x524] ss:$8 sps:$4 sm:$0xff]  }
 0x315   : > { %4108 = vmatmul.mubr.bf16.vlgmr.msra.gmra.mrb[32].mxu0 %v25475_v55  ;;  %v17193_v55 = vld [vmem:[%s24882_s3 + $0x554] ss:$8 sps:$4 sm:$0xff]  }
 0x316   : > { %4269 = vmatpush1.bf16.msra.mxu0 %v17176_v38  ;;  %4117 = vmatprep.mubr.bf16.mxu0 %v25476_v58  ;;  %v17187_v38 = vld [vmem:[%s24882_s3 + $0x534] ss:$8 sps:$4 sm:$0xff]  }
 0x317   : > { %4270 = vmatprep.subr.bf16.mxu0 %v17181_v59  ;;  %v17188_v59 = vld [vmem:[%s24882_s3 + $0x540] ss:$8 sps:$4 sm:$0xff]   ;;  %v25499_v58 = vld [vmem:[#allocation79_spill] sm:$0xff] }
 0x31a   : > { %4271 = vmatpush1.bf16.msra.mxu0 %v17179_v45  ;;  %v25479_v45 = vld [vmem:[#allocation13_spill] sm:$0xff] }
 0x31b   : > { %4272 = vmatprep.subr.bf16.mxu0 %v17184_v39  ;;  %v25480_v39 = vld [vmem:[#allocation16_spill] sm:$0xff] }
 0x31d   : > { %4118 = vmatmul.mubr.bf16.gmra.mrb[36].mxu0 %v25477_v4  ;;  %v25497_v4 = vld [vmem:[#allocation77_spill] sm:$0xff] }
 0x31e   : > { %4127 = vmatprep.mubr.bf16.mxu0 %v25478_v26  ;;  %4273 = vmatpush1.bf16.msra.mxu0 %v17182_v30  ;;  %v17191_v30 = vld [vmem:[%s24882_s3 + $0x550] ss:$8 sps:$4 sm:$0xff]   ;;  %v25493_v26 = vld [vmem:[#allocation29_spill] sm:$0xff] }
 0x31f   : > { %4274 = vmatprep.subr.bf16.mxu0 %v17187_v38  ;;  %v17196_v38 = vld [vmem:[%s24882_s3 + $0x564] ss:$8 sps:$4 sm:$0xff]  }
 0x322   : > { %4275 = vmatpush1.bf16.msra.mxu0 %v17185_v44  ;;  %v17194_v44 = vld [vmem:[%s24882_s3 + $0x560] ss:$8 sps:$4 sm:$0xff]  }
 0x323   : > { %4276 = vmatprep.subr.bf16.mxu0 %v17190_v18  ;;  %v17199_v18 = vld [vmem:[%s24882_s3 + $0x574] ss:$8 sps:$4 sm:$0xff]  }
 0x325   : > { %4128 = vmatmul.mubr.bf16.gmra.mrb[40].mxu0 %v25479_v45  ;;  %v25492_v45 = vld [vmem:[#allocation34_spill] sm:$0xff] }
 0x326   : > { %4137 = vmatprep.mubr.bf16.mxu0 %v25480_v39  ;;  %4277 = vmatpush1.bf16.msra.mxu0 %v17188_v59  ;;  %v25481_v59 = vld [vmem:[#allocation21_spill] sm:$0xff] }
 0x327   : > { %4278 = vmatprep.subr.bf16.mxu0 %v17193_v55  ;;  %v25482_v39 = vld [vmem:[#allocation25_spill] sm:$0xff]  ;;  %v17197_v55 = vld [vmem:[%s24882_s3 + $0x570] ss:$8 sps:$4 sm:$0xff]  }
 0x32a   : > { %4279 = vmatpush1.bf16.msra.mxu0 %v17191_v30  ;;  %v17202_v30 = vld [vmem:[%s24882_s3 + $0x584] ss:$8 sps:$4 sm:$0xff]  }
 0x32b   : > { %4280 = vmatprep.subr.bf16.mxu0 %v17196_v38  ;;  %v17200_v38 = vld [vmem:[%s24882_s3 + $0x580] ss:$8 sps:$4 sm:$0xff]  }
 0x32d   : > { %4138 = vmatmul.mubr.bf16.gmra.mrb[44].mxu0 %v25481_v59  ;;  %v25484_v59 = vld [vmem:[#allocation70_spill] sm:$0xff] }
 0x32e   : > { %4147 = vmatprep.mubr.bf16.mxu0 %v25482_v39  ;;  %4281 = vmatpush1.bf16.msra.mxu0 %v17194_v44  ;;  %v17205_v39 = vld [vmem:[%s24882_s3 + $0x594] ss:$8 sps:$4 sm:$0xff]  }
 0x32f   : > { %4282 = vmatprep.subr.bf16.mxu0 %v17199_v18  ;;  %v25483_v44 = vld [vmem:[#allocation20_spill] sm:$0xff] }
 0x330   : > { %v17203_v18 = vld [vmem:[%s24882_s3 + $0x590] ss:$8 sps:$4 sm:$0xff]  }
 0x332   : > { %4283 = vmatpush1.bf16.msra.mxu0 %v17197_v55  ;;  %v17208_v55 = vld [vmem:[%s24882_s3 + $0x5a4] ss:$8 sps:$4 sm:$0xff]  }
 0x333   : > { %4284 = vmatprep.subr.bf16.mxu0 %v17202_v30  ;;  %v17206_v30 = vld [vmem:[%s24882_s3 + $0x5a0] ss:$8 sps:$4 sm:$0xff]  }
 0x335   : > { %4148 = vmatmul.mubr.bf16.gmra.mrb[48].mxu0 %v25483_v44  ;;  %v25486_v44 = vld [vmem:[#allocation72_spill] sm:$0xff] }
 0x336   : > { %4157 = vmatprep.mubr.bf16.mxu0 %v25484_v59  ;;  %4285 = vmatpush1.bf16.msra.mxu0 %v17200_v38  ;;  %v17211_v59 = vld [vmem:[%s24882_s3 + $0x5b4] ss:$8 sps:$4 sm:$0xff]  }
 0x337   : > { %4286 = vmatprep.subr.bf16.mxu0 %v17205_v39  ;;  %v25485_v38 = vld [vmem:[#allocation71_spill] sm:$0xff] }
 0x338   : > { %v17209_v39 = vld [vmem:[%s24882_s3 + $0x5b0] ss:$8 sps:$4 sm:$0xff]  }
 0x33a   : > { %4287 = vmatpush1.bf16.msra.mxu0 %v17203_v18  ;;  %v17214_v18 = vld [vmem:[%s24882_s3 + $0x5c4] ss:$8 sps:$4 sm:$0xff]  }
 0x33b   : > { %4288 = vmatprep.subr.bf16.mxu0 %v17208_v55  ;;  %v17212_v55 = vld [vmem:[%s24882_s3 + $0x5c0] ss:$8 sps:$4 sm:$0xff]  }
 0x33d   : > { %4158 = vmatmul.mubr.bf16.gmra.mrb[52].mxu0 %v25485_v38  ;;  %v25488_v38 = vld [vmem:[#allocation75_spill] sm:$0xff] }
 0x33e   : > { %4167 = vmatprep.mubr.bf16.mxu0 %v25486_v44  ;;  %4289 = vmatpush1.bf16.msra.mxu0 %v17206_v30  ;;  %v17217_v44 = vld [vmem:[%s24882_s3 + $0x5d4] ss:$8 sps:$4 sm:$0xff]   ;;  %v25487_v30 = vld [vmem:[#allocation74_spill] sm:$0xff] }
 0x33f   : > { %4290 = vmatprep.subr.bf16.mxu0 %v17211_v59  ;;  %v17215_v59 = vld [vmem:[%s24882_s3 + $0x5d0] ss:$8 sps:$4 sm:$0xff]  }
 0x342   : > { %4291 = vmatpush1.bf16.msra.mxu0 %v17209_v39  ;;  %v17220_v39 = vld [vmem:[%s24882_s3 + $0x5e4] ss:$8 sps:$4 sm:$0xff]  }
 0x343   : > { %4292 = vmatprep.subr.bf16.mxu0 %v17214_v18  ;;  %v17218_v18 = vld [vmem:[%s24882_s3 + $0x5e0] ss:$8 sps:$4 sm:$0xff]  }
 0x345   : > { %4168 = vmatmul.mubr.bf16.gmra.mrb[56].mxu0 %v25487_v30  ;;  %v25490_v30 = vld [vmem:[#allocation23_spill] sm:$0xff] }
 0x346   : > { %4177 = vmatprep.mubr.bf16.mxu0 %v25488_v38  ;;  %4293 = vmatpush1.bf16.msra.mxu0 %v17212_v55  ;;  %v17223_v38 = vld [vmem:[%s24882_s3 + $0x5f4] ss:$8 sps:$4 sm:$0xff]  }
 0x347   : > { %4294 = vmatprep.subr.bf16.mxu0 %v17217_v44  ;;  %v25489_v55 = vld [vmem:[#allocation76_spill] sm:$0xff] }
 0x348   : > { %v17221_v44 = vld [vmem:[%s24882_s3 + $0x5f0] ss:$8 sps:$4 sm:$0xff]  }
 0x34a   : > { %4295 = vmatpush1.bf16.msra.mxu0 %v17215_v59  ;;  %v17226_v59 = vld [vmem:[%s24882_s3 + $0x604] ss:$8 sps:$4 sm:$0xff]  }
 0x34b   : > { %4296 = vmatprep.subr.bf16.mxu0 %v17220_v39  ;;  %v25491_v39 = vld [vmem:[#allocation30_spill] sm:$0xff] }
 0x34d   : > { %4178 = vmatmul.mubr.bf16.gmra.mrb[60].mxu0 %v25489_v55  ;;  %v25494_v55 = vld [vmem:[#allocation32_spill] sm:$0xff] }
 0x34e   : > { %4187 = vmatprep.mubr.bf16.mxu0 %v25490_v30  ;;  %4297 = vmatpush1.bf16.msra.mxu0 %v17218_v18  ;;  %v25495_v18 = vld [vmem:[#allocation37_spill] sm:$0xff]  ;;  %v25496_v30 = vld [vmem:[#allocation39_spill] sm:$0xff] }
 0x34f   : > { %4298 = vmatprep.subr.bf16.mxu0 %v17223_v38  ;;  %v25498_v38 = vld [vmem:[#allocation78_spill] sm:$0xff] }
 0x352   : > { %4299 = vmatpush1.bf16.msra.mxu0 %v17221_v44  ;;  %v25500_v44 = vld [vmem:[#allocation80_spill] sm:$0xff] }
 0x353   : > { %5326 = vmatprep.subr.bf16.mxu0 %v17226_v59  ;;  %v25501_v59 = vld [vmem:[#allocation81_spill] sm:$0xff] }
 0x355   : > { %4188 = vmatmul.mubr.bf16.gmra.mrb[64].mxu0 %v25491_v39  ;;  %v25502_v39 = vld [vmem:[#allocation82_spill] sm:$0xff] }
 0x356   : > { %4197 = vmatprep.mubr.bf16.mxu0 %v25492_v45 }
 0x35d   : > { %4198 = vmatmul.mubr.bf16.gmra.mrb[68].mxu0 %v25493_v26  ;;  %v20393_v26 = vpack.c.bf16 %v20220_v63, %v19475_v49 }
 0x35e   : > { %4207 = vmatprep.mubr.bf16.mxu0 %v25494_v55  ;;  %v25504_v55 = vld [vmem:[#allocation83_spill] sm:$0xff] }
 0x35f   : > { %25503 = vst [vmem:[#allocation41_spill] sm:$0xff] %v20393_v26 }
 0x365   : > { %4208 = vmatmul.mubr.bf16.gmra.mrb[72].mxu0 %v25495_v18 }
 0x366   : > { %4217 = vmatprep.mubr.bf16.mxu0 %v25496_v30 }
 0x36d   : > { %4218 = vmatmul.mubr.bf16.gmra.mrb[76].mxu0 %v25497_v4  ;;  %v20399_v4 = vpack.c.bf16 %v20225_v50, %v19486_v52 }
 0x36e   : > { %4227 = vmatprep.mubr.bf16.mxu0 %v25498_v38 }
 0x36f   : > { %25505 = vst [vmem:[#allocation35_spill] sm:$0xff] %v20399_v4 }
 0x375   : > { %4228 = vmatmul.mubr.bf16.gmra.mrb[80].mxu0 %v25499_v58 }
 0x376   : > { %4237 = vmatprep.mubr.bf16.mxu0 %v25500_v44 }
 0x37d   : > { %4238 = vmatmul.mubr.bf16.gmra.mrb[84].mxu0 %v25501_v59  ;;  %v17229_v59 = vld [vmem:[%s24882_s3 + $0x614] ss:$8 sps:$4 sm:$0xff]  }
 0x37e   : > { %4247 = vmatprep.mubr.bf16.mxu0 %v25502_v39  ;;  %v17224_v39 = vld [vmem:[%s24882_s3 + $0x600] ss:$8 sps:$4 sm:$0xff]  }
 0x385   : > { %4248 = vmatmul.mubr.bf16.gmra.mrb[88].mxu0 %v25504_v55 }
 0x386   : > { %4257 = vmatprep.mubr.bf16.mxu0 %v20393_v26  ;;  %v17227_v26 = vld [vmem:[%s24882_s3 + $0x610] ss:$8 sps:$4 sm:$0xff]  }
 0x38d   : > { %4258 = vmatmul.mubr.bf16.gmra.mrb[92].mxu0 %v20399_v4  ;;  %v17230_v4 = vld [vmem:[%s24882_s3 + $0x620] ss:$8 sps:$4 sm:$0xff]  }
 0x38e   : > { %4300 = vmatprep.mubr.bf16.mxu0 %v19758_v21  ;;  %v17232_v21 = vld [vmem:[%s24882_s3 + $0x624] ss:$8 sps:$4 sm:$0xff]  }
 0x395   : > { %4301 = vmatmul.mubr.bf16.vlgmr.msra.gmra.mrb[32].mxu0 %v19793_v62  ;;  %v17235_v62 = vld [vmem:[%s24882_s3 + $0x634] ss:$8 sps:$4 sm:$0xff]  }
 0x396   : > { %5327 = vmatpush1.bf16.msra.mxu0 %v17224_v39  ;;  %4310 = vmatprep.mubr.bf16.mxu0 %v19799_v35  ;;  %v17233_v39 = vld [vmem:[%s24882_s3 + $0x630] ss:$8 sps:$4 sm:$0xff]  }
 0x397   : > { %5328 = vmatprep.subr.bf16.mxu0 %v17229_v59  ;;  %v17236_v59 = vld [vmem:[%s24882_s3 + $0x640] ss:$8 sps:$4 sm:$0xff]  }
 0x39a   : > { %5329 = vmatpush1.bf16.msra.mxu0 %v17227_v26  ;;  %v17238_v26 = vld [vmem:[%s24882_s3 + $0x644] ss:$8 sps:$4 sm:$0xff]  }
 0x39b   : > { %5330 = vmatprep.subr.bf16.mxu0 %v17232_v21  ;;  %v17241_v21 = vld [vmem:[%s24882_s3 + $0x654] ss:$8 sps:$4 sm:$0xff]  }
 0x39d   : > { %4311 = vmatmul.mubr.bf16.gmra.mrb[36].mxu0 %v19834_v15 }
 0x39e   : > { %4320 = vmatprep.mubr.bf16.mxu0 %v19840_v47  ;;  %5331 = vmatpush1.bf16.msra.mxu0 %v17230_v4  ;;  %v17239_v4 = vld [vmem:[%s24882_s3 + $0x650] ss:$8 sps:$4 sm:$0xff]  }
 0x39f   : > { %5332 = vmatprep.subr.bf16.mxu0 %v17235_v62  ;;  %v17244_v62 = vld [vmem:[%s24882_s3 + $0x664] ss:$8 sps:$4 sm:$0xff]  }
 0x3a2   : > { %5333 = vmatpush1.bf16.msra.mxu0 %v17233_v39  ;;  %v17242_v39 = vld [vmem:[%s24882_s3 + $0x660] ss:$8 sps:$4 sm:$0xff]  }
 0x3a3   : > { %5334 = vmatprep.subr.bf16.mxu0 %v17238_v26  ;;  %v17247_v26 = vld [vmem:[%s24882_s3 + $0x674] ss:$8 sps:$4 sm:$0xff]  }
 0x3a5   : > { %4321 = vmatmul.mubr.bf16.gmra.mrb[40].mxu0 %v19877_v56 }
 0x3a6   : > { %4330 = vmatprep.mubr.bf16.mxu0 %v19882_v42  ;;  %5335 = vmatpush1.bf16.msra.mxu0 %v17236_v59  ;;  %v17245_v59 = vld [vmem:[%s24882_s3 + $0x670] ss:$8 sps:$4 sm:$0xff]  }
 0x3a7   : > { %5336 = vmatprep.subr.bf16.mxu0 %v17241_v21  ;;  %v17250_v21 = vld [vmem:[%s24882_s3 + $0x684] ss:$8 sps:$4 sm:$0xff]  }
 0x3aa   : > { %5337 = vmatpush1.bf16.msra.mxu0 %v17239_v4  ;;  %v17248_v4 = vld [vmem:[%s24882_s3 + $0x680] ss:$8 sps:$4 sm:$0xff]  }
 0x3ab   : > { %5338 = vmatprep.subr.bf16.mxu0 %v17244_v62  ;;  %v17253_v62 = vld [vmem:[%s24882_s3 + $0x694] ss:$8 sps:$4 sm:$0xff]  }
 0x3ad   : > { %4331 = vmatmul.mubr.bf16.gmra.mrb[44].mxu0 %v19906_v27 }
 0x3ae   : > { %4340 = vmatprep.mubr.bf16.mxu0 %v25426_v60  ;;  %5339 = vmatpush1.bf16.msra.mxu0 %v17242_v39  ;;  %v17251_v39 = vld [vmem:[%s24882_s3 + $0x690] ss:$8 sps:$4 sm:$0xff]  }
 0x3af   : > { %5340 = vmatprep.subr.bf16.mxu0 %v17247_v26  ;;  %v17256_v26 = vld [vmem:[%s24882_s3 + $0x6a4] ss:$8 sps:$4 sm:$0xff]  }
 0x3b2   : > { %5341 = vmatpush1.bf16.msra.mxu0 %v17245_v59  ;;  %v17254_v59 = vld [vmem:[%s24882_s3 + $0x6a0] ss:$8 sps:$4 sm:$0xff]  }
 0x3b3   : > { %5342 = vmatprep.subr.bf16.mxu0 %v17250_v21  ;;  %v17259_v21 = vld [vmem:[%s24882_s3 + $0x6b4] ss:$8 sps:$4 sm:$0xff]  }
 0x3b5   : > { %4341 = vmatmul.mubr.bf16.gmra.mrb[48].mxu0 %v19934_v3 }
 0x3b6   : > { %4350 = vmatprep.mubr.bf16.mxu0 %v19344_v51  ;;  %5343 = vmatpush1.bf16.msra.mxu0 %v17248_v4  ;;  %v17257_v4 = vld [vmem:[%s24882_s3 + $0x6b0] ss:$8 sps:$4 sm:$0xff]  }
 0x3b7   : > { %5344 = vmatprep.subr.bf16.mxu0 %v17253_v62  ;;  %v17262_v62 = vld [vmem:[%s24882_s3 + $0x6c4] ss:$8 sps:$4 sm:$0xff]  }
 0x3ba   : > { %5345 = vmatpush1.bf16.msra.mxu0 %v17251_v39  ;;  %v17260_v39 = vld [vmem:[%s24882_s3 + $0x6c0] ss:$8 sps:$4 sm:$0xff]  }
 0x3bb   : > { %5346 = vmatprep.subr.bf16.mxu0 %v17256_v26  ;;  %v17265_v26 = vld [vmem:[%s24882_s3 + $0x6d4] ss:$8 sps:$4 sm:$0xff]  }
 0x3bd   : > { %4351 = vmatmul.mubr.bf16.gmra.mrb[52].mxu0 %v19360_v16 }
 0x3be   : > { %4360 = vmatprep.mubr.bf16.mxu0 %v19374_v36  ;;  %5347 = vmatpush1.bf16.msra.mxu0 %v17254_v59  ;;  %v17263_v59 = vld [vmem:[%s24882_s3 + $0x6d0] ss:$8 sps:$4 sm:$0xff]  }
 0x3bf   : > { %5348 = vmatprep.subr.bf16.mxu0 %v17259_v21  ;;  %v17268_v21 = vld [vmem:[%s24882_s3 + $0x6e4] ss:$8 sps:$4 sm:$0xff]  }
 0x3c2   : > { %5349 = vmatpush1.bf16.msra.mxu0 %v17257_v4  ;;  %v17266_v4 = vld [vmem:[%s24882_s3 + $0x6e0] ss:$8 sps:$4 sm:$0xff]  }
 0x3c3   : > { %5350 = vmatprep.subr.bf16.mxu0 %v17262_v62  ;;  %v17271_v62 = vld [vmem:[%s24882_s3 + $0x6f4] ss:$8 sps:$4 sm:$0xff]  }
 0x3c5   : > { %4361 = vmatmul.mubr.bf16.gmra.mrb[56].mxu0 %v19380_v11 }
 0x3c6   : > { %4370 = vmatprep.mubr.bf16.mxu0 %v19394_v29  ;;  %5351 = vmatpush1.bf16.msra.mxu0 %v17260_v39  ;;  %v17269_v39 = vld [vmem:[%s24882_s3 + $0x6f0] ss:$8 sps:$4 sm:$0xff]  }
 0x3c7   : > { %5352 = vmatprep.subr.bf16.mxu0 %v17265_v26  ;;  %v17274_v26 = vld [vmem:[%s24882_s3 + $0x704] ss:$8 sps:$4 sm:$0xff]  }
 0x3ca   : > { %5353 = vmatpush1.bf16.msra.mxu0 %v17263_v59  ;;  %v1464_v59 = vrot.slane %v20220_v63, 1 }
 0x3cb   : > { %5354 = vmatprep.subr.bf16.mxu0 %v17268_v21  ;;  %v13341_v21 = vld [vmem:[%s24888_s9 + $0x448] sm:$0xff] }
 0x3cd   : > { %4371 = vmatmul.mubr.bf16.gmra.mrb[60].mxu0 %v19396_v28 }
 0x3ce   : > { %4380 = vmatprep.mubr.bf16.mxu0 %v19993_v1  ;;  %5355 = vmatpush1.bf16.msra.mxu0 %v17266_v4  ;;  %v13343_v4 = vld [vmem:[%s24888_s9 + $0x458] sm:$0xff] }
 0x3cf   : > { %5356 = vmatprep.subr.bf16.mxu0 %v17271_v62  ;;  %v25506_v62 = vld [vmem:[#allocation28_spill] sm:$0xff] }
 0x3d2   : > { %5357 = vmatpush1.bf16.msra.mxu0 %v17269_v39  ;;  %v1473_v39 = vsel %vm1469_vm1, %v1464_v59, %v25506_v62 }
 0x3d3   : > { %5519 = vmatprep.subr.bf16.mxu0 %v17274_v26  ;;  %v25507_v26 = vrot.slane %v19475_v49, 1 }
 0x3d5   : > { %4381 = vmatmul.mubr.bf16.gmra.mrb[64].mxu0 %v20023_v8 }
 0x3d6   : > { %4390 = vmatprep.mubr.bf16.mxu0 %v20025_v22 }
 0x3dd   : > { %4391 = vmatmul.mubr.bf16.gmra.mrb[68].mxu0 %v20051_v48 }
 0x3de   : > { %4400 = vmatprep.mubr.bf16.mxu0 %v20053_v13 }
 0x3e5   : > { %4401 = vmatmul.mubr.bf16.gmra.mrb[72].mxu0 %v20081_v14  ;;  %v13342_v14 = vld [vmem:[%s24888_s9 + $0x450] sm:$0xff] }
 0x3e6   : > { %4410 = vmatprep.mubr.bf16.mxu0 %v20083_v25  ;;  %v13340_v25 = vld [vmem:[%s24888_s9 + $0x440] sm:$0xff] }
 0x3ed   : > { %4411 = vmatmul.mubr.bf16.gmra.mrb[76].mxu0 %v19455_v5 }
 0x3ee   : > { %4420 = vmatprep.mubr.bf16.mxu0 %v19488_v32  ;;  %v1463_v32 = vrot.slane %v20225_v50, 1 }
 0x3f0   : > { %v1472_v49 = vsel %vm1469_vm1, %v1463_v32, %v25506_v62 }
 0x3f5   : > { %4421 = vmatmul.mubr.bf16.gmra.mrb[80].mxu0 %v19496_v17  ;;  %v1609_v17 = vmul.f32 %v13343_v4, %v1473_v39  ;;  %v17272_v4 = vld [vmem:[%s24882_s3 + $0x700] ss:$8 sps:$4 sm:$0xff]  }
 0x3f6   : > { %4430 = vmatprep.mubr.bf16.mxu0 %v25435_v61  ;;  %v1475_v61 = vsel %vm1469_vm1, %v25507_v26, %v1464_v59  ;;  %v25508_v59 = vrot.slane %v19486_v52, 1  ;;  %v17277_v52 = vld [vmem:[%s24882_s3 + $0x714] ss:$8 sps:$4 sm:$0xff]   ;;  %v17284_v39 = vld [vmem:[%s24882_s3 + $0x740] ss:$8 sps:$4 sm:$0xff]  }
 0x3f7   : > { %v17292_v26 = vld [vmem:[%s24882_s3 + $0x764] ss:$8 sps:$4 sm:$0xff]  }
 0x3fd   : > { %4431 = vmatmul.mubr.bf16.gmra.mrb[84].mxu0 %v19539_v2  ;;  %v1607_v2 = vmul.f32 %v13341_v21, %v1475_v61  ;;  %v1474_v61 = vsel %vm1469_vm1, %v25508_v59, %v1463_v32  ;;  %v17275_v32 = vld [vmem:[%s24882_s3 + $0x710] ss:$8 sps:$4 sm:$0xff]   ;;  %v17298_v59 = vld [vmem:[%s24882_s3 + $0x784] ss:$8 sps:$4 sm:$0xff]  }
 0x3fe   : > { %4440 = vmatprep.mubr.bf16.mxu0 %v19552_v23 }
 0x3ff   : > { %v20542_v5 = vpack.c.bf16 %v1609_v17, %v1607_v2  ;;  %v1606_v17 = vmul.f32 %v13340_v25, %v1474_v61  ;;  %v1608_v2 = vmul.f32 %v13342_v14, %v1472_v49  ;;  %v17280_v14 = vld [vmem:[%s24882_s3 + $0x724] ss:$8 sps:$4 sm:$0xff]   ;;  %v17278_v25 = vld [vmem:[%s24882_s3 + $0x720] ss:$8 sps:$4 sm:$0xff]  }
 0x400   : > { %v17290_v49 = vld [vmem:[%s24882_s3 + $0x760] ss:$8 sps:$4 sm:$0xff]  }
 0x401   : > { %v20559_v21 = vpack.c.bf16 %v1608_v2, %v1606_v17  ;;  %v17296_v61 = vld [vmem:[%s24882_s3 + $0x780] ss:$8 sps:$4 sm:$0xff]   ;;  %v17304_v17 = vld [vmem:[%s24882_s3 + $0x7a4] ss:$8 sps:$4 sm:$0xff]  }
 0x402   : > { %v17302_v2 = vld [vmem:[%s24882_s3 + $0x7a0] ss:$8 sps:$4 sm:$0xff]  }
 0x405   : > { %4441 = vmatmul.mubr.bf16.gmra.mrb[88].mxu0 %v19554_v7 }
 0x406   : > { %4450 = vmatprep.mubr.bf16.mxu0 %v20542_v5 }
 0x40d   : > { %4451 = vmatmul.mubr.bf16.gmra.mrb[92].mxu0 %v20559_v21 }
 0x40e   : > { %5358 = vmatprep.mubr.bf16.mxu0 %v25438_v46  ;;  %v17283_v46 = vld [vmem:[%s24882_s3 + $0x734] ss:$8 sps:$4 sm:$0xff]  }
 0x415   : > { %5359 = vmatmul.mubr.bf16.vlgmr.msra.gmra.mrb[32].mxu0 %v25439_v57  ;;  %v17281_v57 = vld [vmem:[%s24882_s3 + $0x730] ss:$8 sps:$4 sm:$0xff]  }
 0x416   : > { %5520 = vmatpush1.bf16.msra.mxu0 %v17272_v4  ;;  %5368 = vmatprep.mubr.bf16.mxu0 %v25440_v24  ;;  %v17286_v24 = vld [vmem:[%s24882_s3 + $0x744] ss:$8 sps:$4 sm:$0xff]  }
 0x417   : > { %5521 = vmatprep.subr.bf16.mxu0 %v17277_v52  ;;  %v17310_v4 = vld [vmem:[%s24882_s3 + $0x7c4] ss:$8 sps:$4 sm:$0xff]   ;;  %v17308_v52 = vld [vmem:[%s24882_s3 + $0x7c0] ss:$8 sps:$4 sm:$0xff]  }
 0x41a   : > { %5522 = vmatpush1.bf16.msra.mxu0 %v17275_v32  ;;  %v17311_v32 = vld [vmem:[%s24882_s3 + $0x7d0] ss:$8 sps:$4 sm:$0xff]  }
 0x41b   : > { %5523 = vmatprep.subr.bf16.mxu0 %v17280_v14  ;;  %v17316_v14 = vld [vmem:[%s24882_s3 + $0x7e4] ss:$8 sps:$4 sm:$0xff]  }
 0x41d   : > { %5369 = vmatmul.mubr.bf16.gmra.mrb[36].mxu0 %v25441_v54  ;;  %v17289_v54 = vld [vmem:[%s24882_s3 + $0x754] ss:$8 sps:$4 sm:$0xff]  }
 0x41e   : > { %5378 = vmatprep.mubr.bf16.mxu0 %v25442_v43  ;;  %5524 = vmatpush1.bf16.msra.mxu0 %v17278_v25  ;;  %v17287_v43 = vld [vmem:[%s24882_s3 + $0x750] ss:$8 sps:$4 sm:$0xff]   ;;  %v17314_v25 = vld [vmem:[%s24882_s3 + $0x7e0] ss:$8 sps:$4 sm:$0xff]  }
 0x41f   : > { %5525 = vmatprep.subr.bf16.mxu0 %v17283_v46  ;;  %v25510_v46 = vld [vmem:[#allocation59_spill] sm:$0xff] }
 0x422   : > { %5526 = vmatpush1.bf16.msra.mxu0 %v17281_v57  ;;  %v25511_v57 = vld [vmem:[#allocation56_spill] sm:$0xff] }
 0x423   : > { %5527 = vmatprep.subr.bf16.mxu0 %v17286_v24  ;;  %v17317_v24 = vld [vmem:[%s24882_s3 + $0x7f0] ss:$8 sps:$4 sm:$0xff]  }
 0x425   : > { %5379 = vmatmul.mubr.bf16.gmra.mrb[40].mxu0 %v25443_v6  ;;  %v17295_v6 = vld [vmem:[%s24882_s3 + $0x774] ss:$8 sps:$4 sm:$0xff]  }
 0x426   : > { %5388 = vmatprep.mubr.bf16.mxu0 %v25444_v37  ;;  %5528 = vmatpush1.bf16.msra.mxu0 %v17284_v39  ;;  %v17293_v37 = vld [vmem:[%s24882_s3 + $0x770] ss:$8 sps:$4 sm:$0xff]   ;;  %v17322_v39 = vld [vmem:[%s24882_s3 + $0x804] ss:$8 sps:$4 sm:$0xff]  }
 0x427   : > { %5529 = vmatprep.subr.bf16.mxu0 %v17289_v54  ;;  %v25512_v54 = vld [vmem:[#allocation68_spill] sm:$0xff] }
 0x42a   : > { %5530 = vmatpush1.bf16.msra.mxu0 %v17287_v43  ;;  %v25513_v43 = vld [vmem:[#allocation73_spill] sm:$0xff] }
 0x42b   : > { %5531 = vmatprep.subr.bf16.mxu0 %v17292_v26  ;;  %v25514_v26 = vld [vmem:[#allocation84_spill] sm:$0xff] }
 0x42d   : > { %5389 = vmatmul.mubr.bf16.gmra.mrb[44].mxu0 %v25445_v34  ;;  %v17301_v34 = vld [vmem:[%s24882_s3 + $0x794] ss:$8 sps:$4 sm:$0xff]  }
 0x42e   : > { %5398 = vmatprep.mubr.bf16.mxu0 %v25446_v20  ;;  %5532 = vmatpush1.bf16.msra.mxu0 %v17290_v49  ;;  %v17299_v20 = vld [vmem:[%s24882_s3 + $0x790] ss:$8 sps:$4 sm:$0xff]   ;;  %v25515_v49 = vld [vmem:[#allocation85_spill] sm:$0xff] }
 0x42f   : > { %5533 = vmatprep.subr.bf16.mxu0 %v17295_v6  ;;  %v25516_v6 = vld [vmem:[#allocation61_spill] sm:$0xff] }
 0x432   : > { %5534 = vmatpush1.bf16.msra.mxu0 %v17293_v37  ;;  %v25517_v37 = vld [vmem:[#allocation62_spill] sm:$0xff] }
 0x433   : > { %5535 = vmatprep.subr.bf16.mxu0 %v17298_v59  ;;  %v25518_v59 = vld [vmem:[#allocation64_spill] sm:$0xff] }
 0x435   : > { %5399 = vmatmul.mubr.bf16.gmra.mrb[48].mxu0 %v25447_v31  ;;  %v17307_v31 = vld [vmem:[%s24882_s3 + $0x7b4] ss:$8 sps:$4 sm:$0xff]  }
 0x436   : > { %5408 = vmatprep.mubr.bf16.mxu0 %v25448_v41  ;;  %5536 = vmatpush1.bf16.msra.mxu0 %v17296_v61  ;;  %v17305_v41 = vld [vmem:[%s24882_s3 + $0x7b0] ss:$8 sps:$4 sm:$0xff]   ;;  %v25519_v61 = vld [vmem:[#allocation65_spill] sm:$0xff] }
 0x437   : > { %5537 = vmatprep.subr.bf16.mxu0 %v17301_v34  ;;  %v25520_v34 = vld [vmem:[#allocation66_spill] sm:$0xff] }
 0x43a   : > { %5538 = vmatpush1.bf16.msra.mxu0 %v17299_v20  ;;  %v1102_v20 = vld [vmem:[%s24888_s9 + $0x228] sm:$0xff] }
 0x43b   : > { %5539 = vmatprep.subr.bf16.mxu0 %v17304_v17  ;;  %v1104_v17 = vld [vmem:[%s24888_s9 + $0x238] sm:$0xff] }
 0x43d   : > { %5409 = vmatmul.mubr.bf16.gmra.mrb[52].mxu0 %v25449_v10  ;;  %v17313_v10 = vld [vmem:[%s24882_s3 + $0x7d4] ss:$8 sps:$4 sm:$0xff]  }
 0x43e   : > { %5418 = vmatprep.mubr.bf16.mxu0 %v25450_v53  ;;  %5540 = vmatpush1.bf16.msra.mxu0 %v17302_v2  ;;  %v25509_v53 = vld [vmem:[#allocation58_spill] sm:$0xff]  ;;  %v25521_v2 = vld [vmem:[#allocation5_spill] sm:$0xff] }
 0x43f   : > { %5541 = vmatprep.subr.bf16.mxu0 %v17307_v31  ;;  %v25522_v31 = vrot.slane %v20220_v63, 7  ;;  %v25523_v63 = vrot.slane %v20225_v50, 7  ;;  %v17325_v50 = vld [vmem:[%s24882_s3 + $0x814] ss:$8 sps:$4 sm:$0xff]  }
 0x442   : > { %5542 = vmatpush1.bf16.msra.mxu0 %v17305_v41  ;;  %v1256_v41 = vsel %vm1252_vm0, %v25522_v31, %v25521_v2  ;;  %v17338_v31 = vld [vmem:[%s24882_s3 + $0x860] ss:$8 sps:$4 sm:$0xff]  }
 0x443   : > { %5543 = vmatprep.subr.bf16.mxu0 %v17310_v4  ;;  %v1394_v4 = vmul.f32 %v1256_v41, %v1102_v20  ;;  %v17335_v20 = vld [vmem:[%s24882_s3 + $0x850] ss:$8 sps:$4 sm:$0xff]   ;;  %v17343_v41 = vld [vmem:[%s24882_s3 + $0x874] ss:$8 sps:$4 sm:$0xff]  }
 0x445   : > { %5419 = vmatmul.mubr.bf16.gmra.mrb[56].mxu0 %v25451_v9  ;;  %v17319_v9 = vld [vmem:[%s24882_s3 + $0x7f4] ss:$8 sps:$4 sm:$0xff]  }
 0x446   : > { %5428 = vmatprep.mubr.bf16.mxu0 %v25509_v53  ;;  %5544 = vmatpush1.bf16.msra.mxu0 %v17308_v52  ;;  %v1101_v52 = vld [vmem:[%s24888_s9 + $0x220] sm:$0xff]  ;;  %v1255_v53 = vsel %vm1252_vm0, %v25523_v63, %v25521_v2  ;;  %v17349_v63 = vld [vmem:[%s24882_s3 + $0x894] ss:$8 sps:$4 sm:$0xff]  }
 0x447   : > { %5545 = vmatprep.subr.bf16.mxu0 %v17313_v10  ;;  %v1103_v10 = vld [vmem:[%s24888_s9 + $0x230] sm:$0xff] }
 0x44a   : > { %5546 = vmatpush1.bf16.msra.mxu0 %v17311_v32  ;;  %v1395_v32 = vmul.f32 %v25521_v2, %v1103_v10  ;;  %v17344_v10 = vld [vmem:[%s24882_s3 + $0x880] ss:$8 sps:$4 sm:$0xff]  }
 0x44b   : > { %5547 = vmatprep.subr.bf16.mxu0 %v17316_v14 }
 0x44d   : > { %5429 = vmatmul.mubr.bf16.gmra.mrb[60].mxu0 %v25510_v46  ;;  %v25525_v46 = vld [vmem:[#allocation14_spill] sm:$0xff] }
 0x44e   : > { %5438 = vmatprep.mubr.bf16.mxu0 %v25511_v57  ;;  %5548 = vmatpush1.bf16.msra.mxu0 %v17314_v25  ;;  %v25524_v25 = vld [vmem:[#allocation10_spill] sm:$0xff]  ;;  %v17323_v57 = vld [vmem:[%s24882_s3 + $0x810] ss:$8 sps:$4 sm:$0xff]  }
 0x44f   : > { %5549 = vmatprep.subr.bf16.mxu0 %v17319_v9  ;;  %v17320_v9 = vld [vmem:[%s24882_s3 + $0x800] ss:$8 sps:$4 sm:$0xff]  }
 0x452   : > { %5550 = vmatpush1.bf16.msra.mxu0 %v17317_v24  ;;  %v17328_v24 = vld [vmem:[%s24882_s3 + $0x824] ss:$8 sps:$4 sm:$0xff]  }
 0x453   : > { %5712 = vmatprep.subr.bf16.mxu0 %v17322_v39  ;;  %v17326_v39 = vld [vmem:[%s24882_s3 + $0x820] ss:$8 sps:$4 sm:$0xff]  }
 0x455   : > { %5439 = vmatmul.mubr.bf16.gmra.mrb[64].mxu0 %v25512_v54  ;;  %v17331_v54 = vld [vmem:[%s24882_s3 + $0x834] ss:$8 sps:$4 sm:$0xff]  }
 0x456   : > { %5448 = vmatprep.mubr.bf16.mxu0 %v25513_v43  ;;  %v25527_v43 = vld [vmem:[#allocation13_spill] sm:$0xff] }
 0x45d   : > { %5449 = vmatmul.mubr.bf16.gmra.mrb[68].mxu0 %v25514_v26  ;;  %v25528_v26 = vld [vmem:[#allocation16_spill] sm:$0xff] }
 0x45e   : > { %5458 = vmatprep.mubr.bf16.mxu0 %v25515_v49  ;;  %v17329_v49 = vld [vmem:[%s24882_s3 + $0x830] ss:$8 sps:$4 sm:$0xff]  }
 0x465   : > { %5459 = vmatmul.mubr.bf16.gmra.mrb[72].mxu0 %v25516_v6  ;;  %v17334_v6 = vld [vmem:[%s24882_s3 + $0x844] ss:$8 sps:$4 sm:$0xff]  }
 0x466   : > { %5468 = vmatprep.mubr.bf16.mxu0 %v25517_v37  ;;  %v17332_v37 = vld [vmem:[%s24882_s3 + $0x840] ss:$8 sps:$4 sm:$0xff]  }
 0x46d   : > { %5469 = vmatmul.mubr.bf16.gmra.mrb[76].mxu0 %v25518_v59  ;;  %v17337_v59 = vld [vmem:[%s24882_s3 + $0x854] ss:$8 sps:$4 sm:$0xff]  }
 0x46e   : > { %5478 = vmatprep.mubr.bf16.mxu0 %v25519_v61  ;;  %v25529_v61 = vld [vmem:[#allocation21_spill] sm:$0xff] }
 0x475   : > { %5479 = vmatmul.mubr.bf16.gmra.mrb[80].mxu0 %v25520_v34  ;;  %v25530_v34 = vld [vmem:[#allocation25_spill] sm:$0xff] }
 0x476   : > { %5488 = vmatprep.mubr.bf16.mxu0 %v25470_v33  ;;  %v1396_v33 = vmul.f32 %v25521_v2, %v1104_v17  ;;  %v17340_v17 = vld [vmem:[%s24882_s3 + $0x864] ss:$8 sps:$4 sm:$0xff]  }
 0x47d   : > { %5489 = vmatmul.mubr.bf16.gmra.mrb[84].mxu0 %v25473_v0  ;;  %v1649_v0 = vpack.c.bf16 %v1396_v33, %v1394_v4  ;;  %v25531_v4 = vld [vmem:[#allocation20_spill] sm:$0xff]  ;;  %v25532_v33 = vld [vmem:[#allocation70_spill] sm:$0xff] }
 0x47e   : > { %5498 = vmatprep.mubr.bf16.mxu0 %v20245_v19  ;;  %v1393_v19 = vmul.f32 %v1255_v53, %v1101_v52  ;;  %v17346_v52 = vld [vmem:[%s24882_s3 + $0x884] ss:$8 sps:$4 sm:$0xff]   ;;  %v25533_v53 = vld [vmem:[#allocation71_spill] sm:$0xff] }
 0x480   : > { %v1648_v14 = vpack.c.bf16 %v1395_v32, %v1393_v19  ;;  %v25534_v19 = vld [vmem:[#allocation72_spill] sm:$0xff] }
 0x481   : > { %v17347_v32 = vld [vmem:[%s24882_s3 + $0x890] ss:$8 sps:$4 sm:$0xff]  }
 0x485   : > { %5499 = vmatmul.mubr.bf16.gmra.mrb[88].mxu0 %v20263_v12  ;;  %v25526_v12 = vld [vmem:[#allocation18_spill] sm:$0xff] }
 0x486   : > { %5508 = vmatprep.mubr.bf16.mxu0 %v1649_v0  ;;  %v17341_v0 = vld [vmem:[%s24882_s3 + $0x870] ss:$8 sps:$4 sm:$0xff]  }
 0x48d   : > { %5509 = vmatmul.mubr.bf16.gmra.mrb[92].mxu0 %v1648_v14  ;;  %v17352_v14 = vld [vmem:[%s24882_s3 + $0x8a4] ss:$8 sps:$4 sm:$0xff]  }
 0x48e   : > { %5551 = vmatprep.mubr.bf16.mxu0 %v25524_v25  ;;  %v17350_v25 = vld [vmem:[%s24882_s3 + $0x8a0] ss:$8 sps:$4 sm:$0xff]  }
 0x495   : > { %5552 = vmatmul.mubr.bf16.vlgmr.msra.gmra.mrb[32].mxu0 %v25525_v46  ;;  %v25536_v46 = vld [vmem:[#allocation75_spill] sm:$0xff] }
 0x496   : > { %5713 = vmatpush1.bf16.msra.mxu0 %v17320_v9  ;;  %5561 = vmatprep.mubr.bf16.mxu0 %v25526_v12  ;;  %v17355_v9 = vld [vmem:[%s24882_s3 + $0x8b4] ss:$8 sps:$4 sm:$0xff]   ;;  %v17353_v12 = vld [vmem:[%s24882_s3 + $0x8b0] ss:$8 sps:$4 sm:$0xff]  }
 0x497   : > { %5714 = vmatprep.subr.bf16.mxu0 %v17325_v50  ;;  %v25535_v50 = vld [vmem:[#allocation74_spill] sm:$0xff] }
 0x49a   : > { %5715 = vmatpush1.bf16.msra.mxu0 %v17323_v57  ;;  %v17358_v57 = vld [vmem:[%s24882_s3 + $0x8c4] ss:$8 sps:$4 sm:$0xff]  }
 0x49b   : > { %5716 = vmatprep.subr.bf16.mxu0 %v17328_v24  ;;  %v17356_v24 = vld [vmem:[%s24882_s3 + $0x8c0] ss:$8 sps:$4 sm:$0xff]  }
 0x49d   : > { %5562 = vmatmul.mubr.bf16.gmra.mrb[36].mxu0 %v25527_v43  ;;  %v25538_v43 = vld [vmem:[#allocation23_spill] sm:$0xff] }
 0x49e   : > { %5571 = vmatprep.mubr.bf16.mxu0 %v25528_v26  ;;  %5717 = vmatpush1.bf16.msra.mxu0 %v17326_v39  ;;  %v17361_v39 = vld [vmem:[%s24882_s3 + $0x8d4] ss:$8 sps:$4 sm:$0xff]   ;;  %v17359_v26 = vld [vmem:[%s24882_s3 + $0x8d0] ss:$8 sps:$4 sm:$0xff]  }
 0x49f   : > { %5718 = vmatprep.subr.bf16.mxu0 %v17331_v54  ;;  %v25537_v54 = vld [vmem:[#allocation76_spill] sm:$0xff] }
 0x4a2   : > { %5719 = vmatpush1.bf16.msra.mxu0 %v17329_v49  ;;  %v17364_v49 = vld [vmem:[%s24882_s3 + $0x8e4] ss:$8 sps:$4 sm:$0xff]  }
 0x4a3   : > { %5720 = vmatprep.subr.bf16.mxu0 %v17334_v6  ;;  %v17362_v6 = vld [vmem:[%s24882_s3 + $0x8e0] ss:$8 sps:$4 sm:$0xff]  }
 0x4a5   : > { %5572 = vmatmul.mubr.bf16.gmra.mrb[40].mxu0 %v25529_v61  ;;  %v17365_v61 = vld [vmem:[%s24882_s3 + $0x8f0] ss:$8 sps:$4 sm:$0xff]  }
 0x4a6   : > { %5581 = vmatprep.mubr.bf16.mxu0 %v25530_v34  ;;  %5721 = vmatpush1.bf16.msra.mxu0 %v17332_v37  ;;  %v17367_v37 = vld [vmem:[%s24882_s3 + $0x8f4] ss:$8 sps:$4 sm:$0xff]   ;;  %v25540_v34 = vld [vmem:[#allocation29_spill] sm:$0xff] }
 0x4a7   : > { %5722 = vmatprep.subr.bf16.mxu0 %v17337_v59  ;;  %v25539_v59 = vld [vmem:[#allocation30_spill] sm:$0xff] }
 0x4aa   : > { %5723 = vmatpush1.bf16.msra.mxu0 %v17335_v20  ;;  %v25541_v20 = vld [vmem:[#allocation32_spill] sm:$0xff] }
 0x4ab   : > { %5724 = vmatprep.subr.bf16.mxu0 %v17340_v17  ;;  %v25542_v17 = vld [vmem:[#allocation77_spill] sm:$0xff] }
 0x4ad   : > { %5582 = vmatmul.mubr.bf16.gmra.mrb[44].mxu0 %v25531_v4  ;;  %v25546_v4 = vld [vmem:[#allocation35_spill] sm:$0xff] }
 0x4ae   : > { %5591 = vmatprep.mubr.bf16.mxu0 %v25532_v33  ;;  %5725 = vmatpush1.bf16.msra.mxu0 %v17338_v31  ;;  %v25544_v31 = vld [vmem:[#allocation82_spill] sm:$0xff]  ;;  %v17374_v33 = vld [vmem:[%s24884_s5 + $0x58] sm:$0xff]  }
 0x4af   : > { %5726 = vmatprep.subr.bf16.mxu0 %v17343_v41  ;;  %v25545_v41 = vld [vmem:[#allocation41_spill] sm:$0xff] }
 0x4b2   : > { %5727 = vmatpush1.bf16.msra.mxu0 %v17341_v0 }
 0x4b3   : > { %5728 = vmatprep.subr.bf16.mxu0 %v17346_v52 }
 0x4b5   : > { %5592 = vmatmul.mubr.bf16.gmra.mrb[48].mxu0 %v25533_v53  ;;  %v6374_v53 = vld [vmem:[%s24888_s9 + $0x8] sm:$0xff] }
 0x4b6   : > { %5601 = vmatprep.mubr.bf16.mxu0 %v25534_v19  ;;  %5729 = vmatpush1.bf16.msra.mxu0 %v17344_v10  ;;  %v13344_v10 = vld [vmem:[%s24888_s9 + $0x460] sm:$0xff] }
 0x4b7   : > { %5730 = vmatprep.subr.bf16.mxu0 %v17349_v63  ;;  %v13346_v63 = vld [vmem:[%s24888_s9 + $0x470] sm:$0xff] }
 0x4b8   : > { %v1612_v19 = vmul.f32 %v13346_v63, %v25506_v62 }
 0x4ba   : > { %5731 = vmatpush1.bf16.msra.mxu0 %v17347_v32  ;;  %v6662_v32 = vmul.f32 %v6374_v53, %v25521_v2 }
 0x4bb   : > { %5732 = vmatprep.subr.bf16.mxu0 %v17352_v14 }
 0x4bd   : > { %5602 = vmatmul.mubr.bf16.gmra.mrb[52].mxu0 %v25535_v50  ;;  %v6373_v50 = vld [vmem:[%s24888_s9] sm:$0xff] }
 0x4be   : > { %5611 = vmatprep.mubr.bf16.mxu0 %v25536_v46  ;;  %5733 = vmatpush1.bf16.msra.mxu0 %v17350_v25  ;;  %v6375_v46 = vld [vmem:[%s24888_s9 + $0x10] sm:$0xff] }
 0x4bf   : > { %5734 = vmatprep.subr.bf16.mxu0 %v17355_v9 }
 0x4c2   : > { %5735 = vmatpush1.bf16.msra.mxu0 %v17353_v12  ;;  %v6663_v12 = vmul.f32 %v6375_v46, %v25521_v2 }
 0x4c3   : > { %5736 = vmatprep.subr.bf16.mxu0 %v17358_v57 }
 0x4c5   : > { %5612 = vmatmul.mubr.bf16.gmra.mrb[56].mxu0 %v25537_v54  ;;  %v25555_v54 = vsub.s32 0, %v18390_v40 }
 0x4c6   : > { %5621 = vmatprep.mubr.bf16.mxu0 %v25538_v43  ;;  %5737 = vmatpush1.bf16.msra.mxu0 %v17356_v24  ;;  %v17384_v24 = vld [vmem:[%s24884_s5 + $0xc0] sm:$0xff]  }
 0x4c7   : > { %5738 = vmatprep.subr.bf16.mxu0 %v17361_v39  ;;  %v960_v39 = vld [vmem:[%s24883_s4] sm:$0x3] }
 0x4c8   : > { %v20955_v43 = vrot.slane %v960_v39, %v25555_v54 }
 0x4ca   : > { %5739 = vmatpush1.bf16.msra.mxu0 %v17359_v26  ;;  %v25556_v26 = vsub.s32 1, %v18390_v40 }
 0x4cb   : > { %5740 = vmatprep.subr.bf16.mxu0 %v17364_v49 }
 0x4cc   : > { %v20959_v49 = vrot.slane %v960_v39, %v25556_v26  ;;  %v6382_v39 = vld [vmem:[%s24888_s9 + $0x48] sm:$0xff] }
 0x4cd   : > { %5622 = vmatmul.mubr.bf16.gmra.mrb[60].mxu0 %v25539_v59 }
 0x4ce   : > { %5631 = vmatprep.mubr.bf16.mxu0 %v25492_v45  ;;  %5741 = vmatpush1.bf16.msra.mxu0 %v17362_v6  ;;  %v25543_v45 = vld [vmem:[#allocation81_spill] sm:$0xff] }
 0x4cf   : > { %5742 = vmatprep.subr.bf16.mxu0 %v17367_v37 }
 0x4d2   : > { %5743 = vmatpush1.bf16.msra.mxu0 %v17365_v61 }
 0x4d5   : > { %5632 = vmatmul.mubr.bf16.gmra.mrb[64].mxu0 %v25540_v34 }
 0x4d6   : > { %5641 = vmatprep.mubr.bf16.mxu0 %v25541_v20 }
 0x4dd   : > { %5642 = vmatmul.mubr.bf16.gmra.mrb[68].mxu0 %v25495_v18  ;;  %v25547_v18 = vmov 0.0|0.0  }
 0x4de   : > { %5651 = vmatprep.mubr.bf16.mxu0 %v25496_v30  ;;  %v17369_v30 = vld [vmem:[%s24884_s5] sm:$0xff]  }
 0x4e5   : > { %5652 = vmatmul.mubr.bf16.gmra.mrb[72].mxu0 %v25542_v17 }
 0x4e6   : > { %5661 = vmatprep.mubr.bf16.mxu0 %v25498_v38  ;;  %v17371_v38 = vld [vmem:[%s24884_s5 + $0x8] sm:$0xff]  }
 0x4ed   : > { %5662 = vmatmul.mubr.bf16.gmra.mrb[76].mxu0 %v25499_v58  ;;  %v17368_v58 = vld [vmem:[%s24884_s5 + $0x40] sm:$0xff]  }
 0x4ee   : > { %5671 = vmatprep.mubr.bf16.mxu0 %v25500_v44  ;;  %16197 = vmatprep.subr.bf16.mxu1 %v17368_v58  ;;  %v17373_v44 = vld [vmem:[%s24884_s5 + $0x10] sm:$0xff]  }
 0x4ef   : > { %14637 = vmatprep.subr.bf16.mxu0 %v17368_v58  ;;  %16205 = vmatpush3.bf16.msra.mxu1 %v17369_v30 }
 0x4f5   : > { %5672 = vmatmul.mubr.bf16.gmra.mrb[80].mxu0 %v25543_v45 }
 0x4f6   : > { %5681 = vmatprep.mubr.bf16.mxu0 %v25544_v31 }
 0x4fd   : > { %5682 = vmatmul.mubr.bf16.gmra.mrb[84].mxu0 %v25504_v55  ;;  %v17370_v55 = vld [vmem:[%s24884_s5 + $0x48] sm:$0xff]  }
 0x4fe   : > { %5691 = vmatprep.mubr.bf16.mxu0 %v25545_v41  ;;  %16198 = vmatprep.subr.bf16.mxu1 %v17370_v55 }
 0x4ff   : > { %16206 = vmatpush3.bf16.msra.mxu1 %v17371_v38 }
 0x505   : > { %5692 = vmatmul.mubr.bf16.gmra.mrb[88].mxu0 %v25546_v4 }
 0x506   : > { %5701 = vmatprep.mubr.bf16.mxu0 %v25547_v18 }
 0x50d   : > { %5702 = vmatmul.mubr.bf16.gmra.mrb[92].mxu0 %v25547_v18 }
 0x50e   : > { %5744 = vmatprep.mubr.bf16.mxu0 %v19799_v35  ;;  %v17372_v35 = vld [vmem:[%s24884_s5 + $0x50] sm:$0xff]  }
 0x50f   : > { %16199 = vmatprep.subr.bf16.mxu1 %v17372_v35 }
 0x510   : > { %16207 = vmatpush3.bf16.msra.mxu1 %v17373_v44 }
 0x511   : > { %16200 = vmatprep.subr.bf16.mxu1 %v17374_v33 }
 0x515   : > { %5745 = vmatmul.mubr.bf16.vlgmr.msra.gmra.mrb[32].mxu0 %v19834_v15  ;;  %v17375_v15 = vld [vmem:[%s24884_s5 + $0x18] sm:$0xff]  }
 0x516   : > { %5754 = vmatprep.mubr.bf16.mxu0 %v19840_v47  ;;  %14638 = vmatpush3.bf16.msra.mxu0 %v17369_v30  ;;  %v17377_v47 = vld [vmem:[%s24884_s5 + $0x20] sm:$0xff]  }
 0x517   : > { %14639 = vmatprep.subr.bf16.mxu0 %v17370_v55  ;;  %16208 = vmatpush3.bf16.msra.mxu1 %v17375_v15 }
 0x51a   : > { %14640 = vmatpush3.bf16.msra.mxu0 %v17371_v38 }
 0x51b   : > { %14641 = vmatprep.subr.bf16.mxu0 %v17372_v35 }
 0x51d   : > { %5755 = vmatmul.mubr.bf16.gmra.mrb[36].mxu0 %v19877_v56  ;;  %v25553_v56 = vld [vmem:[#allocation11_spill] sm:$0xff] }
 0x51e   : > { %5764 = vmatprep.mubr.bf16.mxu0 %v19882_v42  ;;  %14642 = vmatpush3.bf16.msra.mxu0 %v17373_v44  ;;  %v17378_v42 = vld [vmem:[%s24884_s5 + $0x68] sm:$0xff]  }
 0x51f   : > { %14643 = vmatprep.subr.bf16.mxu0 %v17374_v33 }
 0x522   : > { %14644 = vmatpush3.bf16.msra.mxu0 %v17375_v15 }
 0x525   : > { %5765 = vmatmul.mubr.bf16.gmra.mrb[40].mxu0 %v19906_v27  ;;  %v17379_v27 = vld [vmem:[%s24884_s5 + $0x28] sm:$0xff]  }
 0x526   : > { %5774 = vmatprep.mubr.bf16.mxu0 %v25426_v60  ;;  %v17380_v60 = vld [vmem:[%s24884_s5 + $0x70] sm:$0xff]  }
 0x52d   : > { %5775 = vmatmul.mubr.bf16.gmra.mrb[44].mxu0 %v19934_v3  ;;  %v25554_v3 = vld [vmem:[#allocation12_spill] sm:$0xff] }
 0x52e   : > { %5784 = vmatprep.mubr.bf16.mxu0 %v19344_v51  ;;  %v25548_v51 = vld [vmem:[#allocation27_spill] sm:$0xff] }
 0x535   : > { %5785 = vmatmul.mubr.bf16.gmra.mrb[48].mxu0 %v19360_v16  ;;  %v25549_v16 = vld [vmem:[#allocation36_spill] sm:$0xff] }
 0x536   : > { %5794 = vmatprep.mubr.bf16.mxu0 %v19374_v36  ;;  %v25550_v36 = vld [vmem:[#allocation46_spill] sm:$0xff] }
 0x53d   : > { %5795 = vmatmul.mubr.bf16.gmra.mrb[52].mxu0 %v19380_v11  ;;  %v25551_v11 = vld [vmem:[#allocation45_spill] sm:$0xff] }
 0x53e   : > { %5804 = vmatprep.mubr.bf16.mxu0 %v19394_v29  ;;  %v17376_v29 = vld [vmem:[%s24884_s5 + $0x60] sm:$0xff]  }
 0x53f   : > { %14645 = vmatprep.subr.bf16.mxu0 %v17376_v29  ;;  %16201 = vmatprep.subr.bf16.mxu1 %v17376_v29 }
 0x540   : > { %14646 = vmatpush3.bf16.msra.mxu0 %v17377_v47  ;;  %16209 = vmatpush3.bf16.msra.mxu1 %v17377_v47 }
 0x541   : > { %14647 = vmatprep.subr.bf16.mxu0 %v17378_v42  ;;  %16202 = vmatprep.subr.bf16.mxu1 %v17378_v42 }
 0x544   : > { %14648 = vmatpush3.bf16.msra.mxu0 %v17379_v27  ;;  %16210 = vmatpush3.bf16.msra.mxu1 %v17379_v27 }
 0x545   : > { %5805 = vmatmul.mubr.bf16.gmra.mrb[56].mxu0 %v19396_v28  ;;  %v25552_v28 = vld [vmem:[#allocation9_spill] sm:$0xff]  ;;  %14649 = vmatprep.subr.bf16.mxu0 %v17380_v60 }
 0x546   : > { %5814 = vmatprep.mubr.bf16.mxu0 %v19993_v1  ;;  %v17381_v1 = vld [vmem:[%s24884_s5 + $0x30] sm:$0xff]   ;;  %16203 = vmatprep.subr.bf16.mxu1 %v17380_v60 }
 0x548   : > { %14650 = vmatpush3.bf16.msra.mxu0 %v17381_v1  ;;  %16211 = vmatpush3.bf16.msra.mxu1 %v17381_v1  ;;  %v6380_v1 = vld [vmem:[%s24888_s9 + $0x38] sm:$0xff] }
 0x54d   : > { %5815 = vmatmul.mubr.bf16.gmra.mrb[60].mxu0 %v20023_v8  ;;  %v17382_v8 = vld [vmem:[%s24884_s5 + $0x78] sm:$0xff]  }
 0x54e   : > { %5824 = vmatprep.mubr.bf16.mxu0 %v20025_v22  ;;  %v17383_v22 = vld [vmem:[%s24884_s5 + $0x38] sm:$0xff]   ;;  %14651 = vmatprep.subr.bf16.mxu0 %v17382_v8 }
 0x54f   : > { %16204 = vmatprep.subr.bf16.mxu1 %v17382_v8  ;;  %14652 = vmatpush3.bf16.msra.mxu0 %v17383_v22 }
 0x550   : > { %16212 = vmatpush3.bf16.msra.mxu1 %v17383_v22 }
 0x551   : > { %14749 = vmatprep.subr.bf16.mxu1 %v17384_v24 }
 0x555   : > { %5825 = vmatmul.mubr.bf16.gmra.mrb[64].mxu0 %v20051_v48  ;;  %v13345_v48 = vld [vmem:[%s24888_s9 + $0x468] sm:$0xff] }
 0x556   : > { %5834 = vmatprep.mubr.bf16.mxu0 %v20053_v13  ;;  %v1611_v13 = vmul.f32 %v13345_v48, %v25506_v62 }
 0x55d   : > { %5835 = vmatmul.mubr.bf16.gmra.mrb[68].mxu0 %v25548_v51 }
 0x55e   : > { %5844 = vmatprep.mubr.bf16.mxu0 %v25549_v16 }
 0x565   : > { %5845 = vmatmul.mubr.bf16.gmra.mrb[72].mxu0 %v25550_v36  ;;  %v6377_v36 = vld [vmem:[%s24888_s9 + $0x20] sm:$0xff] }
 0x566   : > { %5854 = vmatprep.mubr.bf16.mxu0 %v25551_v11 }
 0x56d   : > { %5855 = vmatmul.mubr.bf16.gmra.mrb[76].mxu0 %v25552_v28  ;;  %v6379_v28 = vld [vmem:[%s24888_s9 + $0x30] sm:$0xff] }
 0x56e   : > { %5864 = vmatprep.mubr.bf16.mxu0 %v25553_v56 }
 0x575   : > { %5865 = vmatmul.mubr.bf16.gmra.mrb[80].mxu0 %v25554_v3  ;;  %v6378_v3 = vld [vmem:[%s24888_s9 + $0x28] sm:$0xff] }
 0x576   : > { %5874 = vmatprep.mubr.bf16.mxu0 %v19552_v23  ;;  %v13347_v23 = vld [vmem:[%s24888_s9 + $0x478] sm:$0xff] }
 0x577   : > { %v1613_v0 = vmul.f32 %v13347_v23, %v25506_v62 }
 0x579   : > { %v1793_v52 = vpack.c.bf16 %v1613_v0, %v1611_v13 }
 0x57d   : > { %5875 = vmatmul.mubr.bf16.gmra.mrb[84].mxu0 %v19554_v7  ;;  %v1610_v7 = vmul.f32 %v13344_v10, %v25506_v62 }
 0x57e   : > { %5884 = vmatprep.mubr.bf16.mxu0 %v20542_v5  ;;  %v6376_v5 = vld [vmem:[%s24888_s9 + $0x18] sm:$0xff] }
 0x57f   : > { %v6664_v14 = vmul.f32 %v6376_v5, %v25521_v2  ;;  %v1792_v25 = vpack.c.bf16 %v1612_v19, %v1610_v7 }
 0x581   : > { %v6950_v9 = vpack.c.bf16 %v6664_v14, %v6662_v32 }
 0x585   : > { %5885 = vmatmul.mubr.bf16.gmra.mrb[88].mxu0 %v20559_v21  ;;  %v6661_v21 = vmul.f32 %v6373_v50, %v25521_v2 }
 0x586   : > { %5894 = vmatprep.mubr.bf16.mxu0 %v1793_v52 }
 0x587   : > { %v6949_v57 = vpack.c.bf16 %v6663_v12, %v6661_v21  ;;  %v6381_v21 = vld [vmem:[%s24888_s9 + $0x40] sm:$0xff] }
 0x58d   : > { %5895 = vmatmul.mubr.bf16.gmra.mrb[92].mxu0 %v1792_v25 }
 0x58e   : > { %7677 = vmatprep.mubr.bf16.mxu0 %v6950_v9 }
 0x595   : > { %7678 = vmatmul.mubr.bf16.vlgmr.msra.gmra.mrb[96].mxu0 %v6949_v57 }
 0x5e8   : > { %v5746_v6 = vpop.f32.mrb[32].mxu0 }
 0x5e9   : > { %v6076_v37 = vadd.f32 %v20955_v43, %v5746_v6  ;;  %v5748_v59 = vpop.f32.mrb[33].mxu0 }
 0x5ea   : > { %v6077_v61 = vadd.f32 %v20959_v49, %v5748_v59  ;;  %v5750_v34 = vpop.f32.mrb[34].mxu0 }
 0x5eb   : > { %17712 = vtanh.f32 %v6076_v37  ;;  %v6078_v20 = vadd.f32 %v20955_v43, %v5750_v34  ;;  %v5752_v17 = vpop.f32.mrb[35].mxu0 }
 0x5ec   : > { %17714 = vtanh.f32 %v6077_v61  ;;  %v6079_v45 = vadd.f32 %v20959_v49, %v5752_v17  ;;  %v6383_v61 = vld [vmem:[%s24888_s9 + $0x50] sm:$0xff] }
 0x5ed   : > { %17716 = vtanh.f32 %v6078_v20 }
 0x5ee   : > { %17718 = vtanh.f32 %v6079_v45 }
 0x5f0   : > { %v5756_v31 = vpop.f32.mrb[36].mxu0 }
 0x5f1   : > { %v6080_v41 = vadd.f32 %v20955_v43, %v5756_v31  ;;  %v5758_v4 = vpop.f32.mrb[37].mxu0 }
 0x5f2   : > { %v6081_v58 = vadd.f32 %v20959_v49, %v5758_v4  ;;  %v5760_v30 = vpop.f32.mrb[38].mxu0  ;;  %v6384_v4 = vld [vmem:[%s24888_s9 + $0x58] sm:$0xff] }
 0x5f3   : > { %17720 = vtanh.f32 %v6080_v41  ;;  %v6082_v55 = vadd.f32 %v20955_v43, %v5760_v30  ;;  %v5762_v38 = vpop.f32.mrb[39].mxu0 }
 0x5f4   : > { %17722 = vtanh.f32 %v6081_v58  ;;  %v6083_v35 = vadd.f32 %v20959_v49, %v5762_v38 }
 0x5f5   : > { %v20969_v44 = vpop.eup %17712  ;;  %17724 = vtanh.f32 %v6082_v55 }
 0x5f6   : > { %25557 = vst [vmem:[#allocation42_spill] sm:$0xff] %v20969_v44  ;;  %v20971_v33 = vpop.eup %17714  ;;  %17726 = vtanh.f32 %v6083_v35  ;;  %v6521_v15 = vrot.slane %v20969_v44, 7  ;;  %v25097_v26 = vrot.slane %v20969_v44, 1 }
 0x5f7   : > { %25558 = vst [vmem:[#allocation86_spill] sm:$0xff] %v20971_v33  ;;  %v20974_v51 = vpop.eup %17716  ;;  %v6522_v16 = vrot.slane %v20971_v33, 7  ;;  %v25098_v9 = vrot.slane %v20971_v33, 1 }
 0x5f8   : > { %v20980_v11 = vpop.eup %17718  ;;  %v5766_v29 = vpop.f32.mrb[40].mxu0  ;;  %v6523_v47 = vrot.slane %v20974_v51, 7  ;;  %v6655_v56 = vsel %vm1252_vm0, %v25521_v2, %v6521_v15  ;;  %v20991_v42 = vpack.c.bf16 %v20974_v51, %v20969_v44 }
 0x5f9   : > { %v6084_v27 = vadd.f32 %v20955_v43, %v5766_v29  ;;  %v5768_v60 = vpop.f32.mrb[41].mxu0  ;;  %v6524_v8 = vrot.slane %v20980_v11, 7  ;;  %v6656_v22 = vsel %vm1252_vm0, %v25521_v2, %v6522_v16  ;;  %v6665_v0 = vmul.f32 %v6655_v56, %v6377_v36  ;;  %v13835_v29 = vld [vmem:[%s24888_s9 + $0x278] sm:$0xff] }
 0x5fa   : > { %v6085_v48 = vadd.f32 %v20959_v49, %v5768_v60  ;;  %v5770_v23 = vpop.f32.mrb[42].mxu0  ;;  %v6653_v13 = vsel %vm1252_vm0, %v6521_v15, %v6523_v47  ;;  %v21009_v52 = vpack.c.bf16 %v20980_v11, %v20971_v33  ;;  %v6666_v19 = vmul.f32 %v6656_v22, %v6378_v3 }
 0x5fb   : > { %17728 = vtanh.f32 %v6084_v27  ;;  %v6086_v10 = vadd.f32 %v20955_v43, %v5770_v23  ;;  %v5772_v63 = vpop.f32.mrb[43].mxu0  ;;  %v6654_v53 = vsel %vm1252_vm0, %v6522_v16, %v6524_v8  ;;  %v6667_v5 = vmul.f32 %v6653_v13, %v6379_v28 }
 0x5fc   : > { %17730 = vtanh.f32 %v6085_v48  ;;  %v6087_v7 = vadd.f32 %v20959_v49, %v5772_v63  ;;  %v6668_v32 = vmul.f32 %v6654_v53, %v6380_v1  ;;  %v6740_v57 = vrot.slane %v20980_v11, 1  ;;  %v13833_v11 = vld [vmem:[%s24888_s9 + $0x268] sm:$0xff] }
 0x5fd   : > { %v21015_v14 = vpop.eup %17720  ;;  %17732 = vtanh.f32 %v6086_v10  ;;  %v21017_v25 = vpack.c.bf16 %v6667_v5, %v6665_v0  ;;  %v6385_v10 = vld [vmem:[%s24888_s9 + $0x60] sm:$0xff]  ;;  %v6739_v53 = vrot.slane %v20974_v51, 1  ;;  %v6387_v51 = vld [vmem:[%s24888_s9 + $0x70] sm:$0xff] }
 0x5fe   : > { %v21020_v50 = vpop.eup %17722  ;;  %17734 = vtanh.f32 %v6087_v7  ;;  %v21022_v46 = vpack.c.bf16 %v6668_v32, %v6666_v19  ;;  %v6525_v12 = vrot.slane %v21015_v14, 7  ;;  %v6870_v45 = vsel %vm1469_vm1, %v25098_v9, %v6740_v57  ;;  %v6386_v7 = vld [vmem:[%s24888_s9 + $0x68] sm:$0xff] }
 0x5ff   : > { %25559 = vst [vmem:[#allocation49_spill] sm:$0xff] %v21017_v25  ;;  %v21029_v24 = vpop.eup %17724  ;;  %v6526_v54 = vrot.slane %v21020_v50, 7  ;;  %v6742_v6 = vrot.slane %v21020_v50, 1  ;;  %v6882_v48 = vmul.f32 %v13833_v11, %v6870_v45 }
 0x600   : > { %25560 = vst [vmem:[#allocation54_spill] sm:$0xff] %v21022_v46  ;;  %v21037_v37 = vpop.eup %17726  ;;  %v5776_v59 = vpop.f32.mrb[44].mxu0  ;;  %7685 = vmatprep.mubr.bf16.mxu0 %v21022_v46  ;;  %v6527_v34 = vrot.slane %v21029_v24, 7  ;;  %v6651_v20 = vsel %vm1252_vm0, %v6523_v47, %v6525_v12  ;;  %v21048_v17 = vpack.c.bf16 %v21029_v24, %v21015_v14 }
 0x601   : > { %v6088_v31 = vadd.f32 %v20955_v43, %v5776_v59  ;;  %v5778_v41 = vpop.f32.mrb[45].mxu0  ;;  %7686 = vmatmul.mubr.bf16.gmra.mrb[100].mxu0 %v21017_v25  ;;  %v6528_v58 = vrot.slane %v21037_v37, 7  ;;  %v6652_v30 = vsel %vm1252_vm0, %v6524_v8, %v6526_v54  ;;  %v6669_v55 = vmul.f32 %v6651_v20, %v6381_v21 }
 0x602   : > { %25561 = vst [vmem:[#allocation15_spill] sm:$0xff] %v21048_v17  ;;  %v6089_v38 = vadd.f32 %v20959_v49, %v5778_v41  ;;  %v5780_v35 = vpop.f32.mrb[46].mxu0  ;;  %v6670_v15 = vmul.f32 %v6652_v30, %v6382_v39  ;;  %v6649_v16 = vsel %vm1252_vm0, %v6525_v12, %v6527_v34  ;;  %v21067_v36 = vpack.c.bf16 %v21037_v37, %v21020_v50 }
 0x603   : > { %17736 = vtanh.f32 %v6088_v31  ;;  %v6090_v28 = vadd.f32 %v20955_v43, %v5780_v35  ;;  %v5782_v47 = vpop.f32.mrb[47].mxu0  ;;  %v6650_v56 = vsel %vm1252_vm0, %v6526_v54, %v6528_v58  ;;  %v6671_v27 = vmul.f32 %v6649_v16, %v6383_v61  ;;  %v6388_v31 = vld [vmem:[%s24888_s9 + $0x78] sm:$0xff]  ;;  %v13832_v16 = vld [vmem:[%s24888_s9 + $0x260] sm:$0xff] }
 0x604   : > { %17738 = vtanh.f32 %v6089_v38  ;;  %v6091_v60 = vadd.f32 %v20959_v49, %v5782_v47  ;;  %v6672_v3 = vmul.f32 %v6650_v56, %v6384_v4  ;;  %v6868_v1 = vsel %vm1469_vm1, %v6740_v57, %v6742_v6 }
 0x605   : > { %v21083_v8 = vpop.eup %17728  ;;  %17740 = vtanh.f32 %v6090_v28  ;;  %v21085_v22 = vpack.c.bf16 %v6671_v27, %v6669_v55  ;;  %v6884_v23 = vmul.f32 %v13835_v29, %v6868_v1  ;;  %v6741_v21 = vrot.slane %v21015_v14, 1 }
 0x606   : > { %v21087_v13 = vpop.eup %17730  ;;  %17742 = vtanh.f32 %v6091_v60  ;;  %v21089_v0 = vpack.c.bf16 %v6672_v3, %v6670_v15  ;;  %v6529_v63 = vrot.slane %v21083_v8, 7  ;;  %v6744_v12 = vrot.slane %v21037_v37, 1 }
 0x607   : > { %25562 = vst [vmem:[#allocation17_spill] sm:$0xff] %v21085_v22  ;;  %v21096_v5 = vpop.eup %17732  ;;  %v6530_v19 = vrot.slane %v21087_v13, 7  ;;  %v21102_v32 = vpack.c.bf16 %v6884_v23, %v6882_v48  ;;  %v6869_v37 = vsel %vm1469_vm1, %v25097_v26, %v6739_v53  ;;  %v6867_v60 = vsel %vm1469_vm1, %v6739_v53, %v6741_v21 }
 0x608   : > { %25563 = vst [vmem:[#allocation22_spill] sm:$0xff] %v21089_v0  ;;  %v21106_v57 = vpop.eup %17734  ;;  %v5786_v39 = vpop.f32.mrb[48].mxu0  ;;  %7693 = vmatprep.mubr.bf16.mxu0 %v21089_v0  ;;  %v6531_v54 = vrot.slane %v21096_v5, 7  ;;  %v6647_v59 = vsel %vm1252_vm0, %v6527_v34, %v6529_v63  ;;  %v21117_v61 = vpack.c.bf16 %v21096_v5, %v21083_v8  ;;  %v6881_v48 = vmul.f32 %v13832_v16, %v6869_v37 }
 0x609   : > { %25564 = vst [vmem:[#allocation24_spill] sm:$0xff] %v21102_v32  ;;  %v6092_v20 = vadd.f32 %v20955_v43, %v5786_v39  ;;  %v5788_v45 = vpop.f32.mrb[49].mxu0  ;;  %7694 = vmatmul.mubr.bf16.gmra.mrb[104].mxu0 %v21085_v22  ;;  %v6532_v34 = vrot.slane %v21106_v57, 7  ;;  %v6648_v41 = vsel %vm1252_vm0, %v6528_v58, %v6530_v19  ;;  %v6673_v4 = vmul.f32 %v6647_v59, %v6385_v10  ;;  %v13834_v58 = vld [vmem:[%s24888_s9 + $0x270] sm:$0xff] }
 0x60a   : > { %25565 = vst [vmem:[#allocation31_spill] sm:$0xff] %v21117_v61  ;;  %v6093_v30 = vadd.f32 %v20959_v49, %v5788_v45  ;;  %v5790_v55 = vpop.f32.mrb[50].mxu0  ;;  %v6674_v38 = vmul.f32 %v6648_v41, %v6386_v7  ;;  %v6645_v35 = vsel %vm1252_vm0, %v6529_v63, %v6531_v54  ;;  %v21136_v15 = vpack.c.bf16 %v21106_v57, %v21087_v13  ;;  %v6389_v7 = vld [vmem:[%s24888_s9 + $0x80] sm:$0xff] }
 0x60b   : > { %17744 = vtanh.f32 %v6092_v20  ;;  %v6094_v11 = vadd.f32 %v20955_v43, %v5790_v55  ;;  %v5792_v29 = vpop.f32.mrb[51].mxu0  ;;  %v6646_v28 = vsel %vm1252_vm0, %v6530_v19, %v6532_v34  ;;  %v6675_v47 = vmul.f32 %v6645_v35, %v6387_v51  ;;  %v6390_v51 = vld [vmem:[%s24888_s9 + $0x88] sm:$0xff]  ;;  %v6392_v35 = vld [vmem:[%s24888_s9 + $0x98] sm:$0xff] }
 0x60c   : > { %25566 = vst [vmem:[#allocation33_spill] sm:$0xff] %v21136_v15  ;;  %17746 = vtanh.f32 %v6093_v30  ;;  %v6095_v56 = vadd.f32 %v20959_v49, %v5792_v29  ;;  %v6676_v27 = vmul.f32 %v6646_v28, %v6388_v31  ;;  %v6883_v23 = vmul.f32 %v13834_v58, %v6867_v60 }
 0x60d   : > { %v21152_v3 = vpop.eup %17736  ;;  %17748 = vtanh.f32 %v6094_v11  ;;  %v21154_v1 = vpack.c.bf16 %v6675_v47, %v6673_v4  ;;  %v25100_v53 = vrot.slane %v21087_v13, 1  ;;  %v6866_v20 = vsel %vm1469_vm1, %v6742_v6, %v6744_v12  ;;  %v6391_v4 = vld [vmem:[%s24888_s9 + $0x90] sm:$0xff]  ;;  %v13837_v11 = vld [vmem:[%s24888_s9 + $0x288] sm:$0xff] }
 0x60e   : > { %v21156_v10 = vpop.eup %17738  ;;  %17750 = vtanh.f32 %v6095_v56  ;;  %v21158_v63 = vpack.c.bf16 %v6676_v27, %v6674_v38  ;;  %v6533_v19 = vrot.slane %v21152_v3, 7  ;;  %v21171_v37 = vpack.c.bf16 %v6883_v23, %v6881_v48 }
 0x60f   : > { %25567 = vst [vmem:[#allocation38_spill] sm:$0xff] %v21154_v1  ;;  %v21165_v39 = vpop.eup %17740  ;;  %v6534_v59 = vrot.slane %v21156_v10, 7  ;;  %v6743_v45 = vrot.slane %v21029_v24, 1  ;;  %v6864_v24 = vsel %vm1469_vm1, %v6744_v12, %v25100_v53 }
 0x610   : > { %25568 = vst [vmem:[#allocation40_spill] sm:$0xff] %v21158_v63  ;;  %25569 = vst [vmem:[#allocation43_spill] sm:$0xff] %v21171_v37  ;;  %v21178_v31 = vpop.eup %17742  ;;  %v5796_v41 = vpop.f32.mrb[52].mxu0  ;;  %7701 = vmatprep.mubr.bf16.mxu0 %v21158_v63  ;;  %v6535_v30 = vrot.slane %v21165_v39, 7  ;;  %v6643_v55 = vsel %vm1252_vm0, %v6531_v54, %v6533_v19  ;;  %v21189_v50 = vpack.c.bf16 %v21165_v39, %v21152_v3  ;;  %v17391_v63 = vld [vmem:[%s24884_s5 + $0x98] sm:$0xff]  }
 0x611   : > { %v6096_v6 = vadd.f32 %v20955_v43, %v5796_v41  ;;  %v5798_v38 = vpop.f32.mrb[53].mxu0  ;;  %7702 = vmatmul.mubr.bf16.gmra.mrb[108].mxu0 %v21154_v1  ;;  %v6536_v54 = vrot.slane %v21178_v31, 7  ;;  %v6644_v16 = vsel %vm1252_vm0, %v6532_v34, %v6534_v59  ;;  %v6677_v58 = vmul.f32 %v6643_v55, %v6389_v7  ;;  %v13839_v34 = vld [vmem:[%s24888_s9 + $0x298] sm:$0xff]  ;;  %v13836_v41 = vld [vmem:[%s24888_s9 + $0x280] sm:$0xff] }
 0x612   : > { %25570 = vst [vmem:[#allocation44_spill] sm:$0xff] %v21189_v50  ;;  %v6097_v12 = vadd.f32 %v20959_v49, %v5798_v38  ;;  %v5800_v29 = vpop.f32.mrb[54].mxu0  ;;  %v6678_v28 = vmul.f32 %v6644_v16, %v6390_v51  ;;  %v6641_v47 = vsel %vm1252_vm0, %v6533_v19, %v6535_v30  ;;  %v21211_v56 = vpack.c.bf16 %v21178_v31, %v21156_v10  ;;  %v13843_v1 = vld [vmem:[%s24888_s9 + $0x2b8] sm:$0xff] }
 0x613   : > { %11118 = vmatprep.mubr.bf16.mxu0 %v25547_v18  ;;  %17752 = vtanh.f32 %v6096_v6  ;;  %v6098_v27 = vadd.f32 %v20955_v43, %v5800_v29  ;;  %v5802_v60 = vpop.f32.mrb[55].mxu0  ;;  %v6642_v48 = vsel %vm1252_vm0, %v6534_v59, %v6536_v54  ;;  %v6679_v23 = vmul.f32 %v6641_v47, %v6391_v4  ;;  %v13838_v59 = vld [vmem:[%s24888_s9 + $0x290] sm:$0xff]  ;;  %v6394_v29 = vld [vmem:[%s24888_s9 + $0xa8] sm:$0xff] }
 0x614   : > { %25571 = vst [vmem:[#allocation51_spill] sm:$0xff] %v21211_v56  ;;  %17754 = vtanh.f32 %v6097_v12  ;;  %v6099_v7 = vadd.f32 %v20959_v49, %v5802_v60  ;;  %v6680_v19 = vmul.f32 %v6642_v48, %v6392_v35  ;;  %v6886_v51 = vmul.f32 %v13837_v11, %v6866_v20  ;;  %v17385_v35 = vld [vmem:[%s24884_s5 + $0x80] sm:$0xff]   ;;  %v17386_v47 = vld [vmem:[%s24884_s5 + $0xc8] sm:$0xff]   ;;  %v6395_v48 = vld [vmem:[%s24888_s9 + $0xb0] sm:$0xff] }
 0x615   : > { %v21224_v55 = vpop.eup %17744  ;;  %17756 = vtanh.f32 %v6098_v27  ;;  %v21226_v6 = vpack.c.bf16 %v6679_v23, %v6677_v58  ;;  %v6888_v38 = vmul.f32 %v13839_v34, %v6864_v24  ;;  %v25099_v4 = vrot.slane %v21083_v8, 1  ;;  %v6393_v58 = vld [vmem:[%s24888_s9 + $0xa0] sm:$0xff] }
 0x616   : > { %v21232_v16 = vpop.eup %17746  ;;  %17758 = vtanh.f32 %v6099_v7  ;;  %v21234_v20 = vpack.c.bf16 %v6680_v19, %v6678_v28  ;;  %v6537_v24 = vrot.slane %v21224_v55, 7  ;;  %v6865_v11 = vsel %vm1469_vm1, %v6741_v21, %v6743_v45 }
 0x617   : > { %25572 = vst [vmem:[#allocation50_spill] sm:$0xff] %v21226_v6  ;;  %v21247_v12 = vpop.eup %17748  ;;  %v6538_v28 = vrot.slane %v21232_v16, 7  ;;  %v21256_v34 = vpack.c.bf16 %v6888_v38, %v6886_v51  ;;  %v6863_v14 = vsel %vm1469_vm1, %v6743_v45, %v25099_v4  ;;  %v6885_v21 = vmul.f32 %v13836_v41, %v6865_v11  ;;  %v6396_v38 = vld [vmem:[%s24888_s9 + $0xb8] sm:$0xff] }
 0x618   : > { %25573 = vst [vmem:[#allocation53_spill] sm:$0xff] %v21234_v20  ;;  %v21262_v27 = vpop.eup %17750  ;;  %v5806_v60 = vpop.f32.mrb[56].mxu0  ;;  %7709 = vmatprep.mubr.bf16.mxu1 %v21234_v20  ;;  %v6539_v23 = vrot.slane %v21247_v12, 7  ;;  %v6639_v7 = vsel %vm1252_vm0, %v6535_v30, %v6537_v24  ;;  %v21273_v19 = vpack.c.bf16 %v21247_v12, %v21224_v55  ;;  %v6887_v45 = vmul.f32 %v13838_v59, %v6863_v14 }
 0x619   : > { %25574 = vst [vmem:[#allocation52_spill] sm:$0xff] %v21256_v34  ;;  %v6100_v51 = vadd.f32 %v20955_v43, %v5806_v60  ;;  %v5808_v41 = vpop.f32.mrb[57].mxu0  ;;  %7710 = vmatmul.mubr.bf16.vlgmr.msra.gmra.mrb[32].mxu1 %v21226_v6  ;;  %v6540_v11 = vrot.slane %v21262_v27, 7  ;;  %v6640_v26 = vsel %vm1252_vm0, %v6536_v54, %v6538_v28  ;;  %v6681_v30 = vmul.f32 %v6639_v7, %v6393_v58  ;;  %v17387_v60 = vld [vmem:[%s24884_s5 + $0x88] sm:$0xff]  }
 0x61a   : > { %25575 = vst [vmem:[#allocation57_spill] sm:$0xff] %v21273_v19  ;;  %v6101_v9 = vadd.f32 %v20959_v49, %v5808_v41  ;;  %14750 = vmatpush3.bf16.msra.mxu1 %v17385_v35  ;;  %v5810_v4 = vpop.f32.mrb[58].mxu0  ;;  %v6682_v59 = vmul.f32 %v6640_v26, %v6394_v29  ;;  %v6637_v14 = vsel %vm1252_vm0, %v6537_v24, %v6539_v23  ;;  %v17388_v26 = vld [vmem:[%s24884_s5 + $0xd0] sm:$0xff]  }
 0x61b   : > { %v21291_v53 = vpack.c.bf16 %v21262_v27, %v21232_v16  ;;  %17760 = vtanh.f32 %v6100_v51  ;;  %v6102_v54 = vadd.f32 %v20955_v43, %v5810_v4  ;;  %v5812_v58 = vpop.f32.mrb[59].mxu0  ;;  %v6638_v35 = vsel %vm1252_vm0, %v6538_v28, %v6540_v11  ;;  %14751 = vmatprep.subr.bf16.mxu1 %v17386_v47  ;;  %v13841_v28 = vld [vmem:[%s24888_s9 + $0x2a8] sm:$0xff] }
 0x61c   : > { %v6683_v7 = vmul.f32 %v6637_v14, %v6395_v48  ;;  %17762 = vtanh.f32 %v6101_v9  ;;  %v6103_v24 = vadd.f32 %v20959_v49, %v5812_v58  ;;  %v6684_v29 = vmul.f32 %v6638_v35, %v6396_v38  ;;  %v17389_v38 = vld [vmem:[%s24884_s5 + $0x90] sm:$0xff]  }
 0x61d   : > { %25576 = vst [vmem:[#allocation55_spill] sm:$0xff] %v21291_v53  ;;  %v21300_v41 = vpack.c.bf16 %v6887_v45, %v6885_v21  ;;  %v21302_v2 = vpop.eup %17752  ;;  %17764 = vtanh.f32 %v6102_v54  ;;  %v6748_v47 = vrot.slane %v21106_v57, 1  ;;  %v25102_v48 = vrot.slane %v21156_v10, 1  ;;  %v6397_v21 = vld [vmem:[%s24888_s9 + $0xc0] sm:$0xff] }
 0x61e   : > { %v21304_v4 = vpack.c.bf16 %v6683_v7, %v6681_v30  ;;  %v21311_v51 = vpop.eup %17754  ;;  %17766 = vtanh.f32 %v6103_v24  ;;  %v21313_v9 = vpack.c.bf16 %v6684_v29, %v6682_v59  ;;  %14752 = vmatpush3.bf16.msra.mxu1 %v17387_v60  ;;  %v6541_v45 = vrot.slane %v21302_v2, 7  ;;  %v6398_v59 = vld [vmem:[%s24888_s9 + $0xc8] sm:$0xff]  ;;  %v17390_v60 = vld [vmem:[%s24884_s5 + $0xd8] sm:$0xff]  }
 0x61f   : > { %25577 = vst [vmem:[#allocation8_spill] sm:$0xff] %v21300_v41  ;;  %v6747_v57 = vrot.slane %v21096_v5, 1  ;;  %v21323_v30 = vpop.eup %17756  ;;  %v6542_v14 = vrot.slane %v21311_v51, 7  ;;  %14753 = vmatprep.subr.bf16.mxu1 %v17388_v26  ;;  %v6860_v54 = vsel %vm1469_vm1, %v6748_v47, %v25102_v48  ;;  %v25580_v5 = vrot.slane %v21087_v13, 1  ;;  %v6399_v26 = vld [vmem:[%s24888_s9 + $0xd0] sm:$0xff] }
 0x620   : > { %25578 = vst [vmem:[#allocation48_spill] sm:$0xff] %v21304_v4  ;;  %25579 = vst [vmem:[#allocation7_spill] sm:$0xff] %v21313_v9  ;;  %v21341_v7 = vpop.eup %17758  ;;  %v5816_v24 = vpop.f32.mrb[60].mxu0  ;;  %7717 = vmatprep.mubr.bf16.mxu1 %v21313_v9  ;;  %v6543_v29 = vrot.slane %v21323_v30, 7  ;;  %v6635_v48 = vsel %vm1252_vm0, %v6539_v23, %v6541_v45  ;;  %v21352_v13 = vpack.c.bf16 %v21323_v30, %v21302_v2  ;;  %v6400_v9 = vld [vmem:[%s24888_s9 + $0xd8] sm:$0xff] }
 0x621   : > { %v6862_v58 = vsel %vm1469_vm1, %v25580_v5, %v6748_v47  ;;  %v6104_v5 = vadd.f32 %v20955_v43, %v5816_v24  ;;  %v5818_v35 = vpop.f32.mrb[61].mxu0  ;;  %7718 = vmatmul.mubr.bf16.gmra.mrb[36].mxu1 %v21304_v4  ;;  %v6544_v6 = vrot.slane %v21341_v7, 7  ;;  %v6636_v20 = vsel %vm1252_vm0, %v6540_v11, %v6542_v14 }
 0x622   : > { %25581 = vst [vmem:[#allocation47_spill] sm:$0xff] %v21352_v13  ;;  %v6890_v47 = vmul.f32 %v13841_v28, %v6862_v58  ;;  %v6685_v23 = vmul.f32 %v6635_v48, %v6397_v21  ;;  %v6105_v28 = vadd.f32 %v20959_v49, %v5818_v35  ;;  %v5820_v58 = vpop.f32.mrb[62].mxu0  ;;  %v6686_v24 = vmul.f32 %v6636_v20, %v6398_v59 }
 0x623   : > { %v6633_v4 = vsel %vm1252_vm0, %v6541_v45, %v6543_v29  ;;  %14754 = vmatpush3.bf16.msra.mxu1 %v17389_v38  ;;  %v21373_v11 = vpack.c.bf16 %v21341_v7, %v21311_v51  ;;  %17768 = vtanh.f32 %v6104_v5  ;;  %v6106_v48 = vadd.f32 %v20955_v43, %v5820_v58  ;;  %v5822_v21 = vpop.f32.mrb[63].mxu0  ;;  %v17392_v45 = vld [vmem:[%s24884_s5 + $0xe0] sm:$0xff]   ;;  %v13842_v58 = vld [vmem:[%s24888_s9 + $0x2b0] sm:$0xff] }
 0x624   : > { %v6634_v35 = vsel %vm1252_vm0, %v6542_v14, %v6544_v6  ;;  %v6687_v20 = vmul.f32 %v6633_v4, %v6399_v26  ;;  %14755 = vmatprep.subr.bf16.mxu1 %v17390_v60  ;;  %17770 = vtanh.f32 %v6105_v28  ;;  %v6107_v38 = vadd.f32 %v20959_v49, %v5822_v21  ;;  %v13840_v5 = vld [vmem:[%s24888_s9 + $0x2a0] sm:$0xff] }
 0x625   : > { %25582 = vst [vmem:[#allocation60_spill] sm:$0xff] %v21373_v11  ;;  %v6688_v59 = vmul.f32 %v6634_v35, %v6400_v9  ;;  %v6892_v22 = vmul.f32 %v13843_v1, %v6860_v54  ;;  %v21388_v14 = vpop.eup %17760  ;;  %17772 = vtanh.f32 %v6106_v48  ;;  %v25584_v60 = vrot.slane %v21152_v3, 1  ;;  %v17393_v21 = vld [vmem:[%s24884_s5 + $0xa0] sm:$0xff]  }
 0x626   : > { %v21390_v4 = vpack.c.bf16 %v6687_v20, %v6685_v23  ;;  %v25585_v1 = vrot.slane %v21083_v8, 1  ;;  %v21400_v54 = vpop.eup %17762  ;;  %17774 = vtanh.f32 %v6107_v38  ;;  %v6401_v23 = vld [vmem:[%s24888_s9 + $0xe0] sm:$0xff]  ;;  %v6545_v48 = vrot.slane %v21388_v14, 7  ;;  %v17394_v20 = vld [vmem:[%s24884_s5 + $0xe8] sm:$0xff]  }
 0x627   : > { %v6859_v26 = vsel %vm1469_vm1, %v6747_v57, %v25584_v60  ;;  %v21402_v28 = vpack.c.bf16 %v6688_v59, %v6686_v24  ;;  %14756 = vmatpush3.bf16.msra.mxu1 %v17391_v63  ;;  %v21411_v8 = vpack.c.bf16 %v6892_v22, %v6890_v47  ;;  %v21413_v35 = vpop.eup %17764  ;;  %v6546_v24 = vrot.slane %v21400_v54, 7  ;;  %v6403_v47 = vld [vmem:[%s24888_s9 + $0xf0] sm:$0xff] }
 0x628   : > { %25583 = vst [vmem:[#allocation67_spill] sm:$0xff] %v21390_v4  ;;  %v6861_v9 = vsel %vm1469_vm1, %v25585_v1, %v6747_v57  ;;  %v6402_v57 = vld [vmem:[%s24888_s9 + $0xe8] sm:$0xff]  ;;  %14757 = vmatprep.subr.bf16.mxu1 %v17392_v45  ;;  %v6891_v38 = vmul.f32 %v13842_v58, %v6859_v26  ;;  %v6752_v59 = vrot.slane %v21178_v31, 1  ;;  %v21423_v60 = vpop.eup %17766  ;;  %v5826_v22 = vpop.f32.mrb[64].mxu0  ;;  %v6547_v1 = vrot.slane %v21413_v35, 7 }
 0x629   : > { %25586 = vst [vmem:[#allocation63_spill] sm:$0xff] %v21402_v28  ;;  %25587 = vst [vmem:[#allocation69_spill] sm:$0xff] %v21411_v8  ;;  %v6889_v63 = vmul.f32 %v13840_v5, %v6861_v9  ;;  %7725 = vmatprep.mubr.bf16.mxu1 %v21402_v28  ;;  %v6631_v45 = vsel %vm1252_vm0, %v6543_v29, %v6545_v48  ;;  %v21434_v5 = vpack.c.bf16 %v21413_v35, %v21388_v14  ;;  %v5828_v26 = vpop.f32.mrb[65].mxu0  ;;  %v6404_v9 = vld [vmem:[%s24888_s9 + $0xf8] sm:$0xff]  ;;  %v17395_v31 = vld [vmem:[%s24884_s5 + $0xa8] sm:$0xff]  }
 0x62a   : > { %v6204_v58 = vadd.f32 %v20955_v43, %v5826_v22  ;;  %7726 = vmatmul.mubr.bf16.gmra.mrb[40].mxu1 %v21390_v4  ;;  %v6548_v28 = vrot.slane %v21423_v60, 7  ;;  %v6632_v29 = vsel %vm1252_vm0, %v6544_v6, %v6546_v24  ;;  %v6689_v0 = vmul.f32 %v6631_v45, %v6401_v23  ;;  %v5830_v46 = vpop.f32.mrb[66].mxu0 }
 0x62b   : > { %25588 = vst [vmem:[#allocation19_spill] sm:$0xff] %v21434_v5  ;;  %v6205_v25 = vadd.f32 %v20959_v49, %v5828_v26  ;;  %v6690_v8 = vmul.f32 %v6632_v29, %v6402_v57  ;;  %v6629_v22 = vsel %vm1252_vm0, %v6545_v48, %v6547_v1  ;;  %14758 = vmatpush3.bf16.msra.mxu1 %v17393_v21  ;;  %v5832_v23 = vpop.f32.mrb[67].mxu0  ;;  %v17396_v48 = vld [vmem:[%s24884_s5 + $0xf0] sm:$0xff]   ;;  %v13845_v21 = vld [vmem:[%s24888_s9 + $0x2c8] sm:$0xff] }
 0x62c   : > { %v21453_v4 = vpack.c.bf16 %v21423_v60, %v21400_v54  ;;  %17776 = vtanh.f32 %v6204_v58  ;;  %v6206_v6 = vadd.f32 %v20955_v43, %v5830_v46  ;;  %v6630_v45 = vsel %vm1252_vm0, %v6546_v24, %v6548_v28  ;;  %14759 = vmatprep.subr.bf16.mxu1 %v17394_v20  ;;  %v13847_v46 = vld [vmem:[%s24888_s9 + $0x2d8] sm:$0xff] }
 0x62d   : > { %v6691_v57 = vmul.f32 %v6629_v22, %v6403_v47  ;;  %17778 = vtanh.f32 %v6205_v25  ;;  %v6207_v26 = vadd.f32 %v20959_v49, %v5832_v23  ;;  %v6692_v58 = vmul.f32 %v6630_v45, %v6404_v9  ;;  %v21470_v24 = vpop.eup %17768  ;;  %v17397_v23 = vld [vmem:[%s24884_s5 + $0xb0] sm:$0xff]  }
 0x62e   : > { %25589 = vst [vmem:[#allocation26_spill] sm:$0xff] %v21453_v4  ;;  %v21465_v29 = vpack.c.bf16 %v6891_v38, %v6889_v63  ;;  %17780 = vtanh.f32 %v6206_v6  ;;  %v25592_v47 = vrot.slane %v21232_v16, 1  ;;  %v25593_v25 = vrot.slane %v21156_v10, 1  ;;  %v21482_v38 = vpop.eup %17770 }
 0x62f   : > { %v21472_v20 = vpack.c.bf16 %v6691_v57, %v6689_v0  ;;  %17782 = vtanh.f32 %v6207_v26  ;;  %v21484_v9 = vpack.c.bf16 %v6692_v58, %v6690_v8  ;;  %v6405_v0 = vld [vmem:[%s24888_s9 + $0x100] sm:$0xff]  ;;  %v6549_v6 = vrot.slane %v21470_v24, 7  ;;  %14760 = vmatpush3.bf16.msra.mxu1 %v17395_v31  ;;  %v21493_v45 = vpop.eup %17772  ;;  %v17398_v57 = vld [vmem:[%s24884_s5 + $0xf8] sm:$0xff]  }
 0x630   : > { %25590 = vst [vmem:[#allocation34_spill] sm:$0xff] %v21465_v29  ;;  %v6856_v22 = vsel %vm1469_vm1, %v6752_v59, %v25592_v47  ;;  %v6858_v63 = vsel %vm1469_vm1, %v25593_v25, %v6752_v59  ;;  %v6406_v59 = vld [vmem:[%s24888_s9 + $0x108] sm:$0xff]  ;;  %v6550_v8 = vrot.slane %v21482_v38, 7  ;;  %14761 = vmatprep.subr.bf16.mxu1 %v17396_v48  ;;  %v6751_v31 = vrot.slane %v21165_v39, 1  ;;  %v21504_v47 = vpop.eup %17774  ;;  %v6407_v25 = vld [vmem:[%s24888_s9 + $0x110] sm:$0xff]  ;;  %v17399_v39 = vld [vmem:[%s24884_s5 + $0xb8] sm:$0xff]  }
 0x631   : > { %25591 = vst [vmem:[#allocation37_spill] sm:$0xff] %v21472_v20  ;;  %25594 = vst [vmem:[#allocation39_spill] sm:$0xff] %v21484_v9  ;;  %v6894_v10 = vmul.f32 %v13845_v21, %v6858_v63  ;;  %v6896_v26 = vmul.f32 %v13847_v46, %v6856_v22  ;;  %v5836_v21 = vpop.f32.mrb[68].mxu0  ;;  %7733 = vmatprep.mubr.bf16.mxu1 %v21484_v9  ;;  %v6551_v48 = vrot.slane %v21493_v45, 7  ;;  %v6408_v9 = vld [vmem:[%s24888_s9 + $0x118] sm:$0xff]  ;;  %v6552_v29 = vrot.slane %v21504_v47, 7 }
 0x632   : > { %v6627_v63 = vsel %vm1252_vm0, %v6547_v1, %v6549_v6  ;;  %v21515_v46 = vpack.c.bf16 %v21493_v45, %v21470_v24  ;;  %v6208_v22 = vadd.f32 %v20955_v43, %v5836_v21  ;;  %v5838_v58 = vpop.f32.mrb[69].mxu0  ;;  %7734 = vmatmul.mubr.bf16.gmra.mrb[44].mxu1 %v21472_v20  ;;  %v6628_v1 = vsel %vm1252_vm0, %v6548_v28, %v6550_v8 }
 0x633   : > { %v6693_v41 = vmul.f32 %v6627_v63, %v6405_v0  ;;  %v6209_v34 = vadd.f32 %v20959_v49, %v5838_v58  ;;  %v5840_v37 = vpop.f32.mrb[70].mxu0  ;;  %v6694_v32 = vmul.f32 %v6628_v1, %v6406_v59  ;;  %v6625_v21 = vsel %vm1252_vm0, %v6549_v6, %v6551_v48  ;;  %14762 = vmatpush3.bf16.msra.mxu1 %v17397_v23  ;;  %v17400_v6 = vld [vmem:[%s24884_s5 + $0x140] sm:$0xff]  }
 0x634   : > { %25595 = vst [vmem:[#allocation78_spill] sm:$0xff] %v21515_v46  ;;  %v21534_v20 = vpack.c.bf16 %v21504_v47, %v21482_v38  ;;  %17784 = vtanh.f32 %v6208_v22  ;;  %v6210_v28 = vadd.f32 %v20955_v43, %v5840_v37  ;;  %v5842_v0 = vpop.f32.mrb[71].mxu0  ;;  %v6626_v58 = vsel %vm1252_vm0, %v6550_v8, %v6552_v29  ;;  %14763 = vmatprep.subr.bf16.mxu1 %v17398_v57  ;;  %v13844_v23 = vld [vmem:[%s24888_s9 + $0x2c0] sm:$0xff]  ;;  %v13846_v37 = vld [vmem:[%s24888_s9 + $0x2d0] sm:$0xff] }
 0x635   : > { %v6695_v59 = vmul.f32 %v6625_v21, %v6407_v25  ;;  %17786 = vtanh.f32 %v6209_v34  ;;  %v6211_v63 = vadd.f32 %v20959_v49, %v5842_v0  ;;  %v6696_v22 = vmul.f32 %v6626_v58, %v6408_v9 }
 0x636   : > { %25596 = vst [vmem:[#allocation79_spill] sm:$0xff] %v21534_v20  ;;  %v21546_v1 = vpack.c.bf16 %v6896_v26, %v6894_v10  ;;  %v21551_v8 = vpop.eup %17776  ;;  %17788 = vtanh.f32 %v6210_v28  ;;  %v25599_v25 = vrot.slane %v21224_v55, 1  ;;  %v25600_v34 = vrot.slane %v21152_v3, 1  ;;  %v13849_v10 = vld [vmem:[%s24888_s9 + $0x2e8] sm:$0xff] }
 0x637   : > { %v21553_v57 = vpack.c.bf16 %v6695_v59, %v6693_v41  ;;  %v21566_v26 = vpop.eup %17778  ;;  %17790 = vtanh.f32 %v6211_v63  ;;  %v21568_v28 = vpack.c.bf16 %v6696_v22, %v6694_v32  ;;  %v6409_v41 = vld [vmem:[%s24888_s9 + $0x120] sm:$0xff]  ;;  %v6553_v0 = vrot.slane %v21551_v8, 7  ;;  %14764 = vmatpush3.bf16.msra.mxu1 %v17399_v39  ;;  %v6412_v32 = vld [vmem:[%s24888_s9 + $0x138] sm:$0xff] }
 0x638   : > { %25597 = vst [vmem:[#allocation80_spill] sm:$0xff] %v21546_v1  ;;  %v6855_v21 = vsel %vm1469_vm1, %v6751_v31, %v25599_v25  ;;  %v6857_v9 = vsel %vm1469_vm1, %v25600_v34, %v6751_v31  ;;  %v21574_v58 = vpop.eup %17780  ;;  %v6410_v31 = vld [vmem:[%s24888_s9 + $0x128] sm:$0xff]  ;;  %v6554_v59 = vrot.slane %v21566_v26, 7  ;;  %14861 = vmatprep.subr.bf16.mxu1 %v17400_v6  ;;  %v25602_v22 = vrot.slane %v21262_v27, 1  ;;  %v5846_v34 = vpop.f32.mrb[72].mxu0 }
 0x639   : > { %25598 = vst [vmem:[#allocation83_spill] sm:$0xff] %v21553_v57  ;;  %25601 = vst [vmem:[#allocation58_spill] sm:$0xff] %v21568_v28  ;;  %v6893_v3 = vmul.f32 %v13844_v23, %v6857_v9  ;;  %v6895_v63 = vmul.f32 %v13846_v37, %v6855_v21  ;;  %v25603_v25 = vrot.slane %v21232_v16, 1  ;;  %v21587_v23 = vpop.eup %17782  ;;  %7741 = vmatprep.mubr.bf16.mxu1 %v21568_v28  ;;  %v6411_v9 = vld [vmem:[%s24888_s9 + $0x130] sm:$0xff]  ;;  %v6555_v6 = vrot.slane %v21574_v58, 7 }
 0x63a   : > { %v6623_v37 = vsel %vm1252_vm0, %v6551_v48, %v6553_v0  ;;  %v21598_v16 = vpack.c.bf16 %v21574_v58, %v21551_v8  ;;  %7742 = vmatmul.mubr.bf16.gmra.mrb[48].mxu1 %v21553_v57  ;;  %v6556_v28 = vrot.slane %v21587_v23, 7  ;;  %v6624_v1 = vsel %vm1252_vm0, %v6552_v29, %v6554_v59 }
 0x63b   : > { %v6854_v39 = vsel %vm1469_vm1, %v25603_v25, %v25602_v22  ;;  %v6212_v22 = vadd.f32 %v20955_v43, %v5846_v34  ;;  %v5848_v25 = vpop.f32.mrb[73].mxu0  ;;  %v6697_v48 = vmul.f32 %v6623_v37, %v6409_v41  ;;  %v13851_v41 = vld [vmem:[%s24888_s9 + $0x2f8] sm:$0xff] }
 0x63c   : > { %25604 = vst [vmem:[#allocation59_spill] sm:$0xff] %v21598_v16  ;;  %v6898_v21 = vmul.f32 %v13849_v10, %v6854_v39  ;;  %v6213_v44 = vadd.f32 %v20959_v49, %v5848_v25  ;;  %v5850_v33 = vpop.f32.mrb[74].mxu0  ;;  %v6698_v16 = vmul.f32 %v6624_v1, %v6410_v31  ;;  %v6621_v10 = vsel %vm1252_vm0, %v6553_v0, %v6555_v6 }
 0x63d   : > { %v21613_v39 = vpack.c.bf16 %v21587_v23, %v21566_v26  ;;  %17792 = vtanh.f32 %v6212_v22  ;;  %v6214_v34 = vadd.f32 %v20955_v43, %v5850_v33  ;;  %v5852_v57 = vpop.f32.mrb[75].mxu0  ;;  %v6622_v46 = vsel %vm1252_vm0, %v6554_v59, %v6556_v28 }
 0x63e   : > { %v6699_v29 = vmul.f32 %v6621_v10, %v6411_v9  ;;  %17794 = vtanh.f32 %v6213_v44  ;;  %v6215_v1 = vadd.f32 %v20959_v49, %v5852_v57  ;;  %v6700_v0 = vmul.f32 %v6622_v46, %v6412_v32  ;;  %v21624_v37 = vpop.eup %17784  ;;  %v6413_v57 = vld [vmem:[%s24888_s9 + $0x140] sm:$0xff] }
 0x63f   : > { %25605 = vst [vmem:[#allocation56_spill] sm:$0xff] %v21613_v39  ;;  %v21622_v31 = vpack.c.bf16 %v6895_v63, %v6893_v3  ;;  %17796 = vtanh.f32 %v6214_v34  ;;  %v25608_v33 = vrot.slane %v21311_v51, 1  ;;  %v25609_v59 = vrot.slane %v21262_v27, 1  ;;  %v21635_v44 = vpop.eup %17786  ;;  %v6414_v27 = vld [vmem:[%s24888_s9 + $0x148] sm:$0xff] }
 0x640   : > { %v21626_v22 = vpack.c.bf16 %v6699_v29, %v6697_v48  ;;  %v6755_v25 = vrot.slane %v21247_v12, 1  ;;  %17798 = vtanh.f32 %v6215_v1  ;;  %v21637_v46 = vpack.c.bf16 %v6700_v0, %v6698_v16  ;;  %v21643_v32 = vpop.eup %17788  ;;  %v6415_v1 = vld [vmem:[%s24888_s9 + $0x150] sm:$0xff] }
 0x641   : > { %25606 = vst [vmem:[#allocation68_spill] sm:$0xff] %v21622_v31  ;;  %v6852_v9 = vsel %vm1469_vm1, %v25609_v59, %v25608_v33  ;;  %v6557_v3 = vrot.slane %v21624_v37, 7  ;;  %v6558_v12 = vrot.slane %v21635_v44, 7  ;;  %v25611_v16 = vrot.slane %v21224_v55, 1  ;;  %v21655_v29 = vpop.eup %17790 }
 0x642   : > { %25607 = vst [vmem:[#allocation73_spill] sm:$0xff] %v21626_v22  ;;  %25610 = vst [vmem:[#allocation84_spill] sm:$0xff] %v21637_v46  ;;  %v6900_v63 = vmul.f32 %v13851_v41, %v6852_v9  ;;  %v6760_v34 = vrot.slane %v21341_v7, 1  ;;  %v5856_v41 = vpop.f32.mrb[76].mxu0  ;;  %7749 = vmatprep.mubr.bf16.mxu1 %v21637_v46  ;;  %v6559_v0 = vrot.slane %v21643_v32, 7  ;;  %v21666_v55 = vpack.c.bf16 %v21643_v32, %v21624_v37 }
 0x643   : > { %v6853_v10 = vsel %vm1469_vm1, %v25611_v16, %v6755_v25  ;;  %v6619_v33 = vsel %vm1252_vm0, %v6555_v6, %v6557_v3  ;;  %v6216_v7 = vadd.f32 %v20955_v43, %v5856_v41  ;;  %v5858_v9 = vpop.f32.mrb[77].mxu0  ;;  %7750 = vmatmul.mubr.bf16.gmra.mrb[52].mxu1 %v21626_v22  ;;  %v6416_v16 = vld [vmem:[%s24888_s9 + $0x158] sm:$0xff]  ;;  %v6560_v48 = vrot.slane %v21655_v29, 7  ;;  %v13848_v22 = vld [vmem:[%s24888_s9 + $0x2e0] sm:$0xff] }
 0x644   : > { %25612 = vst [vmem:[#allocation85_spill] sm:$0xff] %v21666_v55  ;;  %v21668_v59 = vpack.c.bf16 %v6900_v63, %v6898_v21  ;;  %v6620_v6 = vsel %vm1252_vm0, %v6556_v28, %v6558_v12  ;;  %v6701_v46 = vmul.f32 %v6619_v33, %v6413_v57  ;;  %v6217_v31 = vadd.f32 %v20959_v49, %v5858_v9  ;;  %v5860_v55 = vpop.f32.mrb[78].mxu0  ;;  %v13850_v28 = vld [vmem:[%s24888_s9 + $0x2f0] sm:$0xff] }
 0x645   : > { %v6702_v21 = vmul.f32 %v6620_v6, %v6414_v27  ;;  %v6617_v63 = vsel %vm1252_vm0, %v6557_v3, %v6559_v0  ;;  %v21683_v41 = vpack.c.bf16 %v21655_v29, %v21635_v44  ;;  %17800 = vtanh.f32 %v6216_v7  ;;  %v5862_v33 = vpop.f32.mrb[79].mxu0 }
 0x646   : > { %25613 = vst [vmem:[#allocation61_spill] sm:$0xff] %v21668_v59  ;;  %v6218_v57 = vadd.f32 %v20955_v43, %v5860_v55  ;;  %v6618_v27 = vsel %vm1252_vm0, %v6558_v12, %v6560_v48  ;;  %v6703_v3 = vmul.f32 %v6617_v63, %v6415_v1  ;;  %17802 = vtanh.f32 %v6217_v31  ;;  %v6417_v31 = vld [vmem:[%s24888_s9 + $0x160] sm:$0xff] }
 0x647   : > { %25614 = vst [vmem:[#allocation62_spill] sm:$0xff] %v21683_v41  ;;  %v6219_v9 = vadd.f32 %v20959_v49, %v5862_v33  ;;  %v6704_v6 = vmul.f32 %v6618_v27, %v6416_v16  ;;  %v25615_v59 = vrot.slane %v21302_v2, 1  ;;  %v21699_v39 = vpop.eup %17792  ;;  %v6897_v55 = vmul.f32 %v13848_v22, %v6853_v10  ;;  %v6418_v22 = vld [vmem:[%s24888_s9 + $0x168] sm:$0xff] }
 0x648   : > { %17804 = vtanh.f32 %v6218_v57  ;;  %v21701_v7 = vpack.c.bf16 %v6703_v3, %v6701_v46  ;;  %v21703_v5 = vpop.eup %17794  ;;  %v6561_v1 = vrot.slane %v21699_v39, 7  ;;  %v25619_v16 = vrot.slane %v21311_v51, 1  ;;  %v6419_v57 = vld [vmem:[%s24888_s9 + $0x170] sm:$0xff] }
 0x649   : > { %v6851_v41 = vsel %vm1469_vm1, %v6755_v25, %v25615_v59  ;;  %17806 = vtanh.f32 %v6219_v9  ;;  %v21705_v12 = vpack.c.bf16 %v6704_v6, %v6702_v21  ;;  %v25155_v25 = vrot.slane %v21400_v54, 1  ;;  %v21712_v59 = vpop.eup %17796  ;;  %v6420_v9 = vld [vmem:[%s24888_s9 + $0x178] sm:$0xff] }
 0x64a   : > { %25616 = vst [vmem:[#allocation64_spill] sm:$0xff] %v21701_v7  ;;  %v6899_v20 = vmul.f32 %v13850_v28, %v6851_v41  ;;  %v6562_v46 = vrot.slane %v21703_v5, 7  ;;  %v6850_v21 = vsel %vm1469_vm1, %v25619_v16, %v6760_v34  ;;  %v6759_v63 = vrot.slane %v21323_v30, 1  ;;  %v21725_v41 = vpop.eup %17798  ;;  %v5866_v28 = vpop.f32.mrb[80].mxu0  ;;  %v13853_v16 = vld [vmem:[%s24888_s9 + $0x308] sm:$0xff] }
 0x64b   : > { %25617 = vst [vmem:[#allocation65_spill] sm:$0xff] %v21705_v12  ;;  %7757 = vmatprep.mubr.bf16.mxu1 %v21705_v12  ;;  %v6563_v33 = vrot.slane %v21712_v59, 7  ;;  %v21736_v51 = vpack.c.bf16 %v21712_v59, %v21699_v39  ;;  %v6848_v30 = vsel %vm1469_vm1, %v6760_v34, %v25155_v25  ;;  %v6220_v27 = vadd.f32 %v20955_v43, %v5866_v28  ;;  %v5868_v3 = vpop.f32.mrb[81].mxu0 }
 0x64c   : > { %v21718_v10 = vpack.c.bf16 %v6899_v20, %v6897_v55  ;;  %v6615_v20 = vsel %vm1252_vm0, %v6559_v0, %v6561_v1  ;;  %7758 = vmatmul.mubr.bf16.gmra.mrb[56].mxu1 %v21701_v7  ;;  %v6564_v0 = vrot.slane %v21725_v41, 7  ;;  %v6616_v6 = vsel %vm1252_vm0, %v6560_v48, %v6562_v46  ;;  %v5870_v28 = vpop.f32.mrb[82].mxu0  ;;  %v13855_v48 = vld [vmem:[%s24888_s9 + $0x318] sm:$0xff] }
 0x64d   : > { %25620 = vst [vmem:[#allocation10_spill] sm:$0xff] %v21736_v51  ;;  %v6705_v55 = vmul.f32 %v6615_v20, %v6417_v31  ;;  %v6221_v34 = vadd.f32 %v20959_v49, %v5868_v3  ;;  %v6706_v25 = vmul.f32 %v6616_v6, %v6418_v22  ;;  %v6613_v7 = vsel %vm1252_vm0, %v6561_v1, %v6563_v33  ;;  %v5872_v20 = vpop.f32.mrb[83].mxu0  ;;  %v13852_v51 = vld [vmem:[%s24888_s9 + $0x300] sm:$0xff] }
 0x64e   : > { %25618 = vst [vmem:[#allocation66_spill] sm:$0xff] %v21718_v10  ;;  %v21758_v12 = vpack.c.bf16 %v21725_v41, %v21703_v5  ;;  %17808 = vtanh.f32 %v6220_v27  ;;  %v6222_v31 = vadd.f32 %v20955_v43, %v5870_v28  ;;  %v6614_v3 = vsel %vm1252_vm0, %v6562_v46, %v6564_v0  ;;  %v13854_v46 = vld [vmem:[%s24888_s9 + $0x310] sm:$0xff] }
 0x64f   : > { %v6707_v10 = vmul.f32 %v6613_v7, %v6419_v57  ;;  %17810 = vtanh.f32 %v6221_v34  ;;  %v6223_v22 = vadd.f32 %v20959_v49, %v5872_v20  ;;  %v6708_v1 = vmul.f32 %v6614_v3, %v6420_v9  ;;  %v6421_v9 = vld [vmem:[%s24888_s9 + $0x180] sm:$0xff]  ;;  %v6422_v34 = vld [vmem:[%s24888_s9 + $0x188] sm:$0xff] }
 0x650   : > { %25621 = vst [vmem:[#allocation14_spill] sm:$0xff] %v21758_v12  ;;  %v6902_v6 = vmul.f32 %v13853_v16, %v6850_v21  ;;  %v21770_v12 = vpop.eup %17800  ;;  %17812 = vtanh.f32 %v6222_v31  ;;  %v6904_v28 = vmul.f32 %v13855_v48, %v6848_v30  ;;  %v25163_v7 = vrot.slane %v21388_v14, 1  ;;  %v5876_v3 = vpop.f32.mrb[84].mxu0 }
 0x651   : > { %v21772_v27 = vpack.c.bf16 %v6707_v10, %v6705_v55  ;;  %v21778_v57 = vpop.eup %17802  ;;  %17814 = vtanh.f32 %v6223_v22  ;;  %v21780_v21 = vpack.c.bf16 %v6708_v1, %v6706_v25  ;;  %v6565_v16 = vrot.slane %v21770_v12, 7  ;;  %v6423_v22 = vld [vmem:[%s24888_s9 + $0x190] sm:$0xff] }
 0x652   : > { %v25624_v10 = vrot.slane %v21302_v2, 1  ;;  %v21790_v55 = vpop.eup %17804  ;;  %v6566_v25 = vrot.slane %v21778_v57, 7  ;;  %v21796_v48 = vpack.c.bf16 %v6904_v28, %v6902_v6  ;;  %v6847_v31 = vsel %vm1469_vm1, %v6759_v63, %v25163_v7 }
 0x653   : > { %25622 = vst [vmem:[#allocation18_spill] sm:$0xff] %v21772_v27  ;;  %25623 = vst [vmem:[#allocation13_spill] sm:$0xff] %v21780_v21  ;;  %v21802_v2 = vpop.eup %17806  ;;  %7765 = vmatprep.mubr.bf16.mxu1 %v21780_v21  ;;  %v6567_v1 = vrot.slane %v21790_v55, 7  ;;  %v6611_v6 = vsel %vm1252_vm0, %v6563_v33, %v6565_v16  ;;  %v21813_v28 = vpack.c.bf16 %v21790_v55, %v21770_v12 }
 0x654   : > { %v6849_v30 = vsel %vm1469_vm1, %v25624_v10, %v6759_v63  ;;  %25625 = vst [vmem:[#allocation16_spill] sm:$0xff] %v21796_v48  ;;  %v6903_v63 = vmul.f32 %v13854_v46, %v6847_v31  ;;  %v5878_v10 = vpop.f32.mrb[85].mxu0  ;;  %7766 = vmatmul.mubr.bf16.gmra.mrb[60].mxu1 %v21772_v27  ;;  %v6568_v7 = vrot.slane %v21802_v2, 7  ;;  %v6612_v21 = vsel %vm1252_vm0, %v6564_v0, %v6566_v25 }
 0x655   : > { %v6901_v20 = vmul.f32 %v13852_v51, %v6849_v30  ;;  %25626 = vst [vmem:[#allocation21_spill] sm:$0xff] %v21813_v28  ;;  %v6224_v51 = vadd.f32 %v20955_v43, %v5876_v3  ;;  %v6424_v30 = vld [vmem:[%s24888_s9 + $0x198] sm:$0xff]  ;;  %v6709_v33 = vmul.f32 %v6611_v6, %v6421_v9  ;;  %v6225_v48 = vadd.f32 %v20959_v49, %v5878_v10  ;;  %v5880_v4 = vpop.f32.mrb[86].mxu0 }
 0x656   : > { %v6710_v28 = vmul.f32 %v6612_v21, %v6422_v34  ;;  %v6609_v46 = vsel %vm1252_vm0, %v6565_v16, %v6567_v1  ;;  %v21828_v31 = vpack.c.bf16 %v21802_v2, %v21778_v57  ;;  %v6226_v3 = vadd.f32 %v20955_v43, %v5880_v4  ;;  %v5882_v27 = vpop.f32.mrb[87].mxu0  ;;  %v13857_v4 = vld [vmem:[%s24888_s9 + $0x328] sm:$0xff] }
 0x657   : > { %17816 = vtanh.f32 %v6224_v51  ;;  %v6610_v13 = vsel %vm1252_vm0, %v6566_v25, %v6568_v7  ;;  %v6711_v0 = vmul.f32 %v6609_v46, %v6423_v22  ;;  %v6227_v9 = vadd.f32 %v20959_v49, %v5882_v27 }
 0x658   : > { %25627 = vst [vmem:[#allocation25_spill] sm:$0xff] %v21828_v31  ;;  %17818 = vtanh.f32 %v6225_v48  ;;  %v6712_v6 = vmul.f32 %v6610_v13, %v6424_v30  ;;  %v21834_v21 = vpack.c.bf16 %v6903_v63, %v6901_v20  ;;  %v21836_v34 = vpop.eup %17808  ;;  %v6764_v51 = vrot.slane %v21423_v60, 1  ;;  %v6425_v13 = vld [vmem:[%s24888_s9 + $0x1a0] sm:$0xff]  ;;  %v6426_v60 = vld [vmem:[%s24888_s9 + $0x1a8] sm:$0xff] }
 0x659   : > { %17820 = vtanh.f32 %v6226_v3  ;;  %v21838_v16 = vpack.c.bf16 %v6711_v0, %v6709_v33  ;;  %v25172_v25 = vrot.slane %v21482_v38, 1  ;;  %v21845_v22 = vpop.eup %17810  ;;  %v6569_v48 = vrot.slane %v21836_v34, 7  ;;  %v5886_v3 = vpop.f32.mrb[88].mxu0  ;;  %v6427_v0 = vld [vmem:[%s24888_s9 + $0x1b0] sm:$0xff] }
 0x65a   : > { %25628 = vst [vmem:[#allocation20_spill] sm:$0xff] %v21834_v21  ;;  %17822 = vtanh.f32 %v6227_v9  ;;  %v21847_v27 = vpack.c.bf16 %v6712_v6, %v6710_v28  ;;  %v6763_v20 = vrot.slane %v21413_v35, 1  ;;  %v21854_v63 = vpop.eup %17812  ;;  %v6570_v10 = vrot.slane %v21845_v22, 7  ;;  %v6428_v35 = vld [vmem:[%s24888_s9 + $0x1b8] sm:$0xff] }
 0x65b   : > { %25629 = vst [vmem:[#allocation70_spill] sm:$0xff] %v21838_v16  ;;  %v6844_v28 = vsel %vm1469_vm1, %v6764_v51, %v25172_v25  ;;  %v25631_v30 = vrot.slane %v21400_v54, 1  ;;  %v21869_v46 = vpop.eup %17814  ;;  %v6571_v9 = vrot.slane %v21854_v63, 7  ;;  %v6607_v6 = vsel %vm1252_vm0, %v6567_v1, %v6569_v48  ;;  %v5888_v25 = vpop.f32.mrb[89].mxu0 }
 0x65c   : > { %25630 = vst [vmem:[#allocation71_spill] sm:$0xff] %v21847_v27  ;;  %7773 = vmatprep.mubr.bf16.mxu1 %v21847_v27  ;;  %v21880_v54 = vpack.c.bf16 %v21854_v63, %v21836_v34  ;;  %v6572_v27 = vrot.slane %v21869_v46, 7  ;;  %v6608_v21 = vsel %vm1252_vm0, %v6568_v7, %v6570_v10  ;;  %v6713_v1 = vmul.f32 %v6607_v6, %v6425_v13 }
 0x65d   : > { %v6846_v33 = vsel %vm1469_vm1, %v25631_v30, %v6764_v51  ;;  %v6228_v30 = vadd.f32 %v20955_v43, %v5886_v3  ;;  %7774 = vmatmul.mubr.bf16.gmra.mrb[64].mxu1 %v21838_v16  ;;  %v6714_v3 = vmul.f32 %v6608_v21, %v6426_v60  ;;  %v6605_v16 = vsel %vm1252_vm0, %v6569_v48, %v6571_v9  ;;  %v13856_v48 = vld [vmem:[%s24888_s9 + $0x320] sm:$0xff]  ;;  %v13858_v60 = vld [vmem:[%s24888_s9 + $0x330] sm:$0xff] }
 0x65e   : > { %25632 = vst [vmem:[#allocation72_spill] sm:$0xff] %v21880_v54  ;;  %v6906_v51 = vmul.f32 %v13857_v4, %v6846_v33  ;;  %v13859_v54 = vld [vmem:[%s24888_s9 + $0x338] sm:$0xff]  ;;  %v6229_v4 = vadd.f32 %v20959_v49, %v5888_v25  ;;  %v5890_v33 = vpop.f32.mrb[90].mxu0  ;;  %v21898_v31 = vpack.c.bf16 %v21869_v46, %v21845_v22  ;;  %v6606_v13 = vsel %vm1252_vm0, %v6570_v10, %v6572_v27 }
 0x65f   : > { %17824 = vtanh.f32 %v6228_v30  ;;  %v6230_v11 = vadd.f32 %v20955_v43, %v5890_v33  ;;  %v5892_v7 = vpop.f32.mrb[91].mxu0  ;;  %v6715_v6 = vmul.f32 %v6605_v16, %v6427_v0  ;;  %v6716_v19 = vmul.f32 %v6606_v13, %v6428_v35 }
 0x660   : > { %25633 = vst [vmem:[#allocation74_spill] sm:$0xff] %v21898_v31  ;;  %17826 = vtanh.f32 %v6229_v4  ;;  %v6231_v25 = vadd.f32 %v20959_v49, %v5892_v7  ;;  %v6908_v21 = vmul.f32 %v13859_v54, %v6844_v28  ;;  %v25635_v16 = vrot.slane %v21470_v24, 1 }
 0x661   : > { %v21910_v30 = vpop.eup %17816  ;;  %17828 = vtanh.f32 %v6230_v11  ;;  %v21912_v33 = vpack.c.bf16 %v6715_v6, %v6713_v1  ;;  %v25636_v28 = vrot.slane %v21388_v14, 1  ;;  %v21924_v54 = vpack.c.bf16 %v6716_v19, %v6714_v3  ;;  %v6429_v11 = vld [vmem:[%s24888_s9 + $0x1c0] sm:$0xff]  ;;  %v6430_v14 = vld [vmem:[%s24888_s9 + $0x1c8] sm:$0xff] }
 0x662   : > { %v6843_v10 = vsel %vm1469_vm1, %v6763_v20, %v25635_v16  ;;  %v21922_v0 = vpop.eup %17818  ;;  %17830 = vtanh.f32 %v6231_v25  ;;  %v6573_v1 = vrot.slane %v21910_v30, 7  ;;  %v21930_v4 = vpack.c.bf16 %v6908_v21, %v6906_v51  ;;  %v5896_v25 = vpop.f32.mrb[92].mxu0  ;;  %v6431_v51 = vld [vmem:[%s24888_s9 + $0x1d0] sm:$0xff] }
 0x663   : > { %25634 = vst [vmem:[#allocation75_spill] sm:$0xff] %v21912_v33  ;;  %v6845_v35 = vsel %vm1469_vm1, %v25636_v28, %v6763_v20  ;;  %25637 = vst [vmem:[#allocation76_spill] sm:$0xff] %v21924_v54  ;;  %v21932_v7 = vpop.eup %17820  ;;  %v6574_v20 = vrot.slane %v21922_v0, 7  ;;  %v6907_v6 = vmul.f32 %v13858_v60, %v6843_v10  ;;  %v6768_v19 = vrot.slane %v21504_v47, 1  ;;  %7781 = vmatprep.mubr.bf16.mxu1 %v21924_v54  ;;  %v5898_v10 = vpop.f32.mrb[93].mxu0  ;;  %v6432_v28 = vld [vmem:[%s24888_s9 + $0x1d8] sm:$0xff] }
 0x664   : > { %25638 = vst [vmem:[#allocation23_spill] sm:$0xff] %v21930_v4  ;;  %v6905_v13 = vmul.f32 %v13856_v48, %v6845_v35  ;;  %v21939_v3 = vpop.eup %17822  ;;  %v6575_v21 = vrot.slane %v21932_v7, 7  ;;  %v6603_v16 = vsel %vm1252_vm0, %v6571_v9, %v6573_v1  ;;  %v21950_v48 = vpack.c.bf16 %v21932_v7, %v21910_v30 }
 0x665   : > { %v6232_v60 = vadd.f32 %v20955_v43, %v5896_v25  ;;  %7782 = vmatmul.mubr.bf16.gmra.mrb[68].mxu1 %v21912_v33  ;;  %v6576_v35 = vrot.slane %v21939_v3, 7  ;;  %v6604_v9 = vsel %vm1252_vm0, %v6572_v27, %v6574_v20  ;;  %v6717_v54 = vmul.f32 %v6603_v16, %v6429_v11  ;;  %v13861_v11 = vld [vmem:[%s24888_s9 + $0x348] sm:$0xff] }
 0x666   : > { %25639 = vst [vmem:[#allocation30_spill] sm:$0xff] %v21950_v48  ;;  %v6233_v4 = vadd.f32 %v20959_v49, %v5898_v10  ;;  %v5900_v48 = vpop.f32.mrb[94].mxu0  ;;  %v6718_v31 = vmul.f32 %v6604_v9, %v6430_v14  ;;  %v6601_v25 = vsel %vm1252_vm0, %v6573_v1, %v6575_v21  ;;  %v21966_v47 = vpack.c.bf16 %v21939_v3, %v21922_v0 }
 0x667   : > { %17832 = vtanh.f32 %v6232_v60  ;;  %v6234_v33 = vadd.f32 %v20955_v43, %v5900_v48  ;;  %v5902_v53 = vpop.f32.mrb[95].mxu0  ;;  %v6602_v50 = vsel %vm1252_vm0, %v6574_v20, %v6576_v35  ;;  %v6719_v27 = vmul.f32 %v6601_v25, %v6431_v51  ;;  %v13863_v60 = vld [vmem:[%s24888_s9 + $0x358] sm:$0xff]  ;;  %v6435_v25 = vld [vmem:[%s24888_s9 + $0x1f0] sm:$0xff] }
 0x668   : > { %25640 = vst [vmem:[#allocation29_spill] sm:$0xff] %v21966_v47  ;;  %17834 = vtanh.f32 %v6233_v4  ;;  %v6235_v14 = vadd.f32 %v20959_v49, %v5902_v53  ;;  %v6720_v1 = vmul.f32 %v6602_v50, %v6432_v28  ;;  %v21975_v16 = vpack.c.bf16 %v6907_v6, %v6905_v13 }
 0x669   : > { %v21980_v43 = vpop.eup %17824  ;;  %17836 = vtanh.f32 %v6234_v33  ;;  %v21982_v48 = vpack.c.bf16 %v6719_v27, %v6717_v54  ;;  %v25643_v20 = vrot.slane %v21566_v26, 1  ;;  %v25644_v4 = vrot.slane %v21482_v38, 1  ;;  %v6433_v33 = vld [vmem:[%s24888_s9 + $0x1e0] sm:$0xff]  ;;  %v6434_v38 = vld [vmem:[%s24888_s9 + $0x1e8] sm:$0xff] }
 0x66a   : > { %25641 = vst [vmem:[#allocation32_spill] sm:$0xff] %v21975_v16  ;;  %v21992_v53 = vpop.eup %17826  ;;  %17838 = vtanh.f32 %v6235_v14  ;;  %v21994_v50 = vpack.c.bf16 %v6720_v1, %v6718_v31  ;;  %v6577_v54 = vrot.slane %v21980_v43, 7  ;;  %v6767_v28 = vrot.slane %v21493_v45, 1  ;;  %v14653_v14 = vpop.f32.mrb[96].mxu0 }
 0x66b   : > { %25642 = vst [vmem:[#allocation77_spill] sm:$0xff] %v21982_v48  ;;  %v6840_v51 = vsel %vm1469_vm1, %v6768_v19, %v25643_v20  ;;  %v6842_v49 = vsel %vm1469_vm1, %v25644_v4, %v6768_v19  ;;  %v22000_v6 = vpop.eup %17828  ;;  %v6578_v19 = vrot.slane %v21992_v53, 7  ;;  %v6769_v31 = vrot.slane %v21551_v8, 1  ;;  %v6436_v8 = vld [vmem:[%s24888_s9 + $0x1f8] sm:$0xff] }
 0x66c   : > { %25645 = vst [vmem:[#allocation81_spill] sm:$0xff] %v21994_v50  ;;  %v6910_v13 = vmul.f32 %v13861_v11, %v6842_v49  ;;  %v6912_v10 = vmul.f32 %v13863_v60, %v6840_v51  ;;  %v22008_v9 = vpop.eup %17830  ;;  %7789 = vmatprep.mubr.bf16.mxu1 %v21994_v50  ;;  %v6579_v27 = vrot.slane %v22000_v6, 7  ;;  %v6599_v11 = vsel %vm1252_vm0, %v6575_v21, %v6577_v54  ;;  %v14654_v21 = vpop.f32.mrb[97].mxu0  ;;  %v13862_v49 = vld [vmem:[%s24888_s9 + $0x350] sm:$0xff] }
 0x66d   : > { %v22019_v1 = vpack.c.bf16 %v22000_v6, %v21980_v43  ;;  %v6772_v45 = vrot.slane %v21587_v23, 1  ;;  %7790 = vmatmul.mubr.bf16.gmra.mrb[72].mxu1 %v21982_v48  ;;  %v6600_v20 = vsel %vm1252_vm0, %v6576_v35, %v6578_v19  ;;  %v6721_v51 = vmul.f32 %v6599_v11, %v6433_v33  ;;  %v13860_v23 = vld [vmem:[%s24888_s9 + $0x340] sm:$0xff]  ;;  %v14656_v35 = vpop.f32.mrb[98].mxu0 }
 0x66e   : > { %v22031_v4 = vpack.c.bf16 %v22008_v9, %v21992_v53  ;;  %v6722_v48 = vmul.f32 %v6600_v20, %v6434_v38  ;;  %v6597_v60 = vsel %vm1252_vm0, %v6577_v54, %v6579_v27  ;;  %v22041_v50 = vadd.f32 %v14654_v21, %v14653_v14 }
 0x66f   : > { %25646 = vst [vmem:[#allocation82_spill] sm:$0xff] %v22019_v1  ;;  %v22043_v33 = vpack.c.bf16 %v6912_v10, %v6910_v13  ;;  %v25649_v11 = vrot.slane %v22008_v9, 7  ;;  %v6723_v1 = vmul.f32 %v6597_v60, %v6435_v25  ;;  %v6839_v47 = vsel %vm1469_vm1, %v6767_v28, %v6769_v31  ;;  %v13865_v13 = vld [vmem:[%s24888_s9 + $0x368] sm:$0xff] }
 0x670   : > { %25647 = vst [vmem:[#allocation41_spill] sm:$0xff] %v22031_v4  ;;  %v14657_v4 = vpop.f32.mrb[99].mxu0  ;;  %v25650_v38 = vrot.slane %v21470_v24, 1  ;;  %v6911_v21 = vmul.f32 %v13862_v49, %v6839_v47  ;;  %v13867_v24 = vld [vmem:[%s24888_s9 + $0x378] sm:$0xff]  ;;  %v6774_v60 = vrot.slane %v21635_v44, 1  ;;  %v6771_v47 = vrot.slane %v21574_v58, 1 }
 0x671   : > { %25648 = vst [vmem:[#allocation35_spill] sm:$0xff] %v22043_v33  ;;  %v6598_v16 = vsel %vm1252_vm0, %v6578_v19, %v25649_v11  ;;  %v22058_v14 = vadd.f32 %v14657_v4, %v14656_v35  ;;  %v22060_v19 = vpop.eup %17832  ;;  %v22062_v25 = vpack.c.bf16 %v6723_v1, %v6721_v51  ;;  %v6437_v51 = vld [vmem:[%s24888_s9 + $0x200] sm:$0xff]  ;;  %v13866_v58 = vld [vmem:[%s24888_s9 + $0x370] sm:$0xff] }
 0x672   : > { %v6841_v54 = vsel %vm1469_vm1, %v25650_v38, %v6767_v28  ;;  %v6724_v10 = vmul.f32 %v6598_v16, %v6436_v8  ;;  %v25651_v28 = vrot.slane %v21566_v26, 1  ;;  %v13864_v16 = vld [vmem:[%s24888_s9 + $0x360] sm:$0xff]  ;;  %v22076_v8 = vpop.eup %17834  ;;  %v6581_v44 = vrot.slane %v22060_v19, 7  ;;  %v13869_v38 = vld [vmem:[%s24888_s9 + $0x388] sm:$0xff] }
 0x673   : > { %v6909_v20 = vmul.f32 %v13860_v23, %v6841_v54  ;;  %v22086_v23 = vpop.eup %17836  ;;  %v6836_v49 = vsel %vm1469_vm1, %v6772_v45, %v6774_v60  ;;  %v6837_v35 = vsel %vm1469_vm1, %v6769_v31, %v6771_v47  ;;  %v6776_v54 = vrot.slane %v21655_v29, 1 }
 0x674   : > { %v6838_v11 = vsel %vm1469_vm1, %v25651_v28, %v6772_v45  ;;  %v22078_v1 = vpack.c.bf16 %v6724_v10, %v6722_v48  ;;  %25654 = vst [vmem:[#allocation46_spill] sm:$0xff] %v22086_v23  ;;  %v6773_v48 = vrot.slane %v21624_v37, 1  ;;  %v6439_v45 = vld [vmem:[%s24888_s9 + $0x210] sm:$0xff]  ;;  %v6595_v37 = vsel %vm1252_vm0, %v6579_v27, %v6581_v44  ;;  %v13871_v28 = vld [vmem:[%s24888_s9 + $0x398] sm:$0xff] }
 0x675   : > { %v22084_v26 = vpack.c.bf16 %v6911_v21, %v6909_v20  ;;  %v6914_v4 = vmul.f32 %v13865_v13, %v6838_v11  ;;  %v22100_v13 = vpop.eup %17838  ;;  %v6916_v31 = vmul.f32 %v13867_v24, %v6836_v49  ;;  %v6913_v20 = vmul.f32 %v13864_v16, %v6837_v35  ;;  %v13875_v35 = vld [vmem:[%s24888_s9 + $0x3b8] sm:$0xff] }
 0x676   : > { %25652 = vst [vmem:[#allocation27_spill] sm:$0xff] %v22078_v1  ;;  %25655 = vst [vmem:[#allocation45_spill] sm:$0xff] %v22100_v13  ;;  %7797 = vmatprep.mubr.bf16.mxu1 %v22078_v1  ;;  %v6725_v21 = vmul.f32 %v6595_v37, %v6437_v51  ;;  %v6835_v29 = vsel %vm1469_vm1, %v6771_v47, %v6773_v48  ;;  %v6778_v11 = vrot.slane %v21703_v5, 1  ;;  %v25656_v1 = vrot.slane %v22086_v23, 7  ;;  %v13868_v5 = vld [vmem:[%s24888_s9 + $0x380] sm:$0xff] }
 0x677   : > { %25653 = vst [vmem:[#allocation36_spill] sm:$0xff] %v22084_v26  ;;  %7798 = vmatmul.mubr.bf16.gmra.mrb[76].mxu1 %v22062_v25  ;;  %v6834_v10 = vsel %vm1469_vm1, %v6774_v60, %v6776_v54  ;;  %v22123_v24 = vpack.c.bf16 %v6916_v31, %v6914_v4  ;;  %v6915_v16 = vmul.f32 %v13866_v58, %v6835_v29  ;;  %v13870_v60 = vld [vmem:[%s24888_s9 + $0x390] sm:$0xff]  ;;  %v13872_v37 = vld [vmem:[%s24888_s9 + $0x3a0] sm:$0xff]  ;;  %v17402_v29 = vld [vmem:[%s24884_s5 + $0x148] sm:$0xff]  }
 0x678   : > { %v6593_v27 = vsel %vm1252_vm0, %v6581_v44, %v25656_v1  ;;  %7838 = vmatprep.mubr.bf16.mxu1 %v25547_v18  ;;  %v6918_v47 = vmul.f32 %v13869_v38, %v6834_v10  ;;  %v6832_v49 = vsel %vm1469_vm1, %v6776_v54, %v6778_v11  ;;  %v6775_v1 = vrot.slane %v21643_v32, 1 }
 0x679   : > { %25657 = vst [vmem:[#allocation9_spill] sm:$0xff] %v22123_v24  ;;  %v6727_v51 = vmul.f32 %v6593_v27, %v6439_v45  ;;  %v6777_v44 = vrot.slane %v21699_v39, 1  ;;  %v22135_v4 = vpack.c.bf16 %v6915_v16, %v6913_v20  ;;  %v6920_v58 = vmul.f32 %v13871_v28, %v6832_v49  ;;  %v13873_v39 = vld [vmem:[%s24888_s9 + $0x3a8] sm:$0xff] }
 0x67a   : > { %v6780_v38 = vrot.slane %v21725_v41, 1  ;;  %v6782_v54 = vrot.slane %v21778_v57, 1  ;;  %v6833_v32 = vsel %vm1469_vm1, %v6773_v48, %v6775_v1  ;;  %v6779_v41 = vrot.slane %v21712_v59, 1  ;;  %v17401_v57 = vld [vmem:[%s24884_s5 + $0x100] sm:$0xff]   ;;  %v13874_v59 = vld [vmem:[%s24888_s9 + $0x3b0] sm:$0xff] }
 0x67b   : > { %25658 = vst [vmem:[#allocation11_spill] sm:$0xff] %v22135_v4  ;;  %v22142_v10 = vpack.c.bf16 %v6727_v51, %v6725_v21  ;;  %v6831_v45 = vsel %vm1469_vm1, %v6775_v1, %v6777_v44  ;;  %v22158_v31 = vpack.c.bf16 %v6920_v58, %v6918_v47  ;;  %v6917_v20 = vmul.f32 %v13868_v5, %v6833_v32  ;;  %v13876_v58 = vld [vmem:[%s24888_s9 + $0x3c0] sm:$0xff] }
 0x67c   : > { %v6919_v21 = vmul.f32 %v13870_v60, %v6831_v45  ;;  %v6828_v48 = vsel %vm1469_vm1, %v6780_v38, %v6782_v54  ;;  %v6830_v28 = vsel %vm1469_vm1, %v6778_v11, %v6780_v38  ;;  %v6781_v16 = vrot.slane %v21770_v12, 1  ;;  %v13877_v60 = vld [vmem:[%s24888_s9 + $0x3c8] sm:$0xff]  ;;  %v13879_v12 = vld [vmem:[%s24888_s9 + $0x3d8] sm:$0xff] }
 0x67d   : > { %25659 = vst [vmem:[#allocation12_spill] sm:$0xff] %v22158_v31  ;;  %v6924_v27 = vmul.f32 %v13875_v35, %v6828_v48  ;;  %v6829_v47 = vsel %vm1469_vm1, %v6777_v44, %v6779_v41  ;;  %v6922_v49 = vmul.f32 %v13873_v39, %v6830_v28  ;;  %v6784_v11 = vrot.slane %v21802_v2, 1  ;;  %v13878_v35 = vld [vmem:[%s24888_s9 + $0x3d0] sm:$0xff]  ;;  %v17403_v45 = vld [vmem:[%s24884_s5 + $0x108] sm:$0xff]   ;;  %v13883_v28 = vld [vmem:[%s24888_s9 + $0x3f8] sm:$0xff] }
 0x67e   : > { %v22173_v51 = vpack.c.bf16 %v6919_v21, %v6917_v20  ;;  %v6921_v5 = vmul.f32 %v13872_v37, %v6829_v47  ;;  %v6827_v1 = vsel %vm1469_vm1, %v6779_v41, %v6781_v16  ;;  %v6786_v44 = vrot.slane %v21845_v22, 1  ;;  %v13882_v47 = vld [vmem:[%s24888_s9 + $0x3f0] sm:$0xff] }
 0x67f   : > { %7839 = vmatmul.mubr.bf16.vlgmr.msra.gmra.mrb[80].mxu1 %v25547_v18  ;;  %v6783_v2 = vrot.slane %v21790_v55, 1  ;;  %v6785_v38 = vrot.slane %v21836_v34, 1  ;;  %v22198_v22 = vpack.c.bf16 %v6924_v27, %v6922_v49  ;;  %v6923_v32 = vmul.f32 %v13874_v59, %v6827_v1  ;;  %v17404_v55 = vld [vmem:[%s24884_s5 + $0x150] sm:$0xff]  }
 0x680   : > { %25660 = vst [vmem:[#allocation87_spill] sm:$0xff] %v22173_v51  ;;  %14862 = vmatpush3.bf16.msra.mxu1 %v17401_v57  ;;  %7846 = vmatprep.mubr.bf16.mxu1 %v21009_v52  ;;  %v6826_v39 = vsel %vm1469_vm1, %v6782_v54, %v6784_v11  ;;  %v6788_v37 = vrot.slane %v21869_v46, 1  ;;  %v6824_v34 = vsel %vm1469_vm1, %v6784_v11, %v6786_v44  ;;  %v13881_v54 = vld [vmem:[%s24888_s9 + $0x3e8] sm:$0xff]  ;;  %v6790_v27 = vrot.slane %v21922_v0, 1  ;;  %v17405_v0 = vld [vmem:[%s24884_s5 + $0x110] sm:$0xff]  }
 0x681   : > { %25661 = vst [vmem:[#allocation88_spill] sm:$0xff] %v22198_v22  ;;  %14863 = vmatprep.subr.bf16.mxu1 %v17402_v29  ;;  %v6926_v41 = vmul.f32 %v13877_v60, %v6826_v39  ;;  %v6823_v57 = vsel %vm1469_vm1, %v6783_v2, %v6785_v38  ;;  %v6825_v20 = vsel %vm1469_vm1, %v6781_v16, %v6783_v2  ;;  %v13880_v16 = vld [vmem:[%s24888_s9 + $0x3e0] sm:$0xff]  ;;  %v6787_v49 = vrot.slane %v21854_v63, 1  ;;  %v17406_v63 = vld [vmem:[%s24884_s5 + $0x158] sm:$0xff]  }
 0x682   : > { %v22215_v46 = vpack.c.bf16 %v6923_v32, %v6921_v5  ;;  %v6928_v21 = vmul.f32 %v13879_v12, %v6824_v34  ;;  %v6925_v48 = vmul.f32 %v13876_v58, %v6825_v20  ;;  %v6927_v29 = vmul.f32 %v13878_v35, %v6823_v57  ;;  %v13885_v12 = vld [vmem:[%s24888_s9 + $0x408] sm:$0xff]  ;;  %v13887_v2 = vld [vmem:[%s24888_s9 + $0x418] sm:$0xff] }
 0x683   : > { %v6822_v59 = vsel %vm1469_vm1, %v6786_v44, %v6788_v37  ;;  %v6789_v5 = vrot.slane %v21910_v30, 1  ;;  %v6792_v44 = vrot.slane %v21939_v3, 1  ;;  %v6820_v30 = vsel %vm1469_vm1, %v6788_v37, %v6790_v27  ;;  %v17407_v20 = vld [vmem:[%s24884_s5 + $0x118] sm:$0xff]  }
 0x684   : > { %25662 = vst [vmem:[#allocation89_spill] sm:$0xff] %v22215_v46  ;;  %14864 = vmatpush3.bf16.msra.mxu1 %v17403_v45  ;;  %v22234_v60 = vpack.c.bf16 %v6928_v21, %v6926_v41  ;;  %v22236_v11 = vpack.c.bf16 %v6927_v29, %v6925_v48  ;;  %v6930_v1 = vmul.f32 %v13881_v54, %v6822_v59  ;;  %v6794_v3 = vrot.slane %v21992_v53, 1  ;;  %v13886_v53 = vld [vmem:[%s24888_s9 + $0x410] sm:$0xff]  ;;  %v13889_v29 = vld [vmem:[%s24888_s9 + $0x428] sm:$0xff]  ;;  %v13891_v59 = vld [vmem:[%s24888_s9 + $0x438] sm:$0xff] }
 0x685   : > { %14865 = vmatprep.subr.bf16.mxu1 %v17404_v55  ;;  %v6819_v58 = vsel %vm1469_vm1, %v6787_v49, %v6789_v5  ;;  %v6821_v35 = vsel %vm1469_vm1, %v6785_v38, %v6787_v49  ;;  %v6932_v45 = vmul.f32 %v13883_v28, %v6820_v30  ;;  %v6818_v55 = vsel %vm1469_vm1, %v6790_v27, %v6792_v44  ;;  %v13884_v38 = vld [vmem:[%s24888_s9 + $0x400] sm:$0xff]  ;;  %v13890_v30 = vld [vmem:[%s24888_s9 + $0x430] sm:$0xff] }
 0x686   : > { %25663 = vst [vmem:[#allocation90_spill] sm:$0xff] %v22234_v60  ;;  %v6929_v32 = vmul.f32 %v13880_v16, %v6821_v35  ;;  %v6931_v39 = vmul.f32 %v13882_v47, %v6819_v58  ;;  %v6816_v37 = vsel %vm1469_vm1, %v6792_v44, %v6794_v3  ;;  %v6934_v34 = vmul.f32 %v13885_v12, %v6818_v55  ;;  %v13888_v44 = vld [vmem:[%s24888_s9 + $0x420] sm:$0xff]  ;;  %v13894_v58 = vld [vmem:[%s24888_s9 + $0x450] sm:$0xff] }
 0x687   : > { %7847 = vmatmul.mubr.bf16.gmra.mrb[84].mxu1 %v20991_v42  ;;  %v6791_v41 = vrot.slane %v21932_v7, 1  ;;  %v6793_v57 = vrot.slane %v21980_v43, 1  ;;  %v22272_v54 = vpack.c.bf16 %v6932_v45, %v6930_v1  ;;  %v6936_v48 = vmul.f32 %v13887_v2, %v6816_v37  ;;  %v17408_v43 = vld [vmem:[%s24884_s5 + $0x160] sm:$0xff]   ;;  %v17410_v37 = vld [vmem:[%s24884_s5 + $0x168] sm:$0xff]  }
 0x688   : > { %7854 = vmatprep.mubr.bf16.mxu1 %v21067_v36  ;;  %14866 = vmatpush3.bf16.msra.mxu1 %v17405_v0  ;;  %v22274_v21 = vpack.c.bf16 %v6931_v39, %v6929_v32  ;;  %v6796_v7 = vrot.slane %v22008_v9, 1  ;;  %v6798_v16 = vrot.slane %v22076_v8, 1  ;;  %v6795_v47 = vrot.slane %v22000_v6, 1  ;;  %v13892_v6 = vld [vmem:[%s24888_s9 + $0x440] sm:$0xff] }
 0x689   : > { %25664 = vst [vmem:[#allocation91_spill] sm:$0xff] %v22272_v54  ;;  %14867 = vmatprep.subr.bf16.mxu1 %v17406_v63  ;;  %v6815_v28 = vsel %vm1469_vm1, %v6791_v41, %v6793_v57  ;;  %v6817_v27 = vsel %vm1469_vm1, %v6789_v5, %v6791_v41  ;;  %v22292_v49 = vpack.c.bf16 %v6936_v48, %v6934_v34  ;;  %v6797_v35 = vrot.slane %v22060_v19, 1 }
 0x68a   : > { %25665 = vst [vmem:[#allocation92_spill] sm:$0xff] %v22274_v21  ;;  %v6933_v0 = vmul.f32 %v13884_v38, %v6817_v27  ;;  %v6935_v1 = vmul.f32 %v13886_v53, %v6815_v28  ;;  %v6814_v12 = vsel %vm1469_vm1, %v6794_v3, %v6796_v7  ;;  %v6812_v5 = vsel %vm1469_vm1, %v6796_v7, %v6798_v16  ;;  %v17409_v3 = vld [vmem:[%s24884_s5 + $0x120] sm:$0xff]   ;;  %v6438_v7 = vld [vmem:[%s24888_s9 + $0x208] sm:$0xff] }
 0x68b   : > { %25666 = vst [vmem:[#allocation93_spill] sm:$0xff] %v22292_v49  ;;  %v6938_v63 = vmul.f32 %v13889_v29, %v6814_v12  ;;  %v6799_v2 = vrot.slane %v22086_v23, 1  ;;  %v6940_v32 = vmul.f32 %v13891_v59, %v6812_v5  ;;  %v6813_v39 = vsel %vm1469_vm1, %v6793_v57, %v6795_v47  ;;  %v17412_v5 = vld [vmem:[%s24884_s5 + $0x170] sm:$0xff]  }
 0x68c   : > { %14868 = vmatpush3.bf16.msra.mxu1 %v17407_v20  ;;  %v22315_v45 = vpack.c.bf16 %v6935_v1, %v6933_v0  ;;  %v6582_v55 = vrot.slane %v22076_v8, 7  ;;  %v6811_v53 = vsel %vm1469_vm1, %v6795_v47, %v6797_v35  ;;  %v6937_v41 = vmul.f32 %v13888_v44, %v6813_v39  ;;  %v17411_v1 = vld [vmem:[%s24884_s5 + $0x128] sm:$0xff]  }
 0x68d   : > { %14869 = vmatprep.subr.bf16.mxu1 %v17408_v43  ;;  %v6807_v34 = vsel %vm1469_vm1, %v6799_v2, %v25506_v62  ;;  %v6809_v38 = vsel %vm1469_vm1, %v6797_v35, %v6799_v2  ;;  %v22330_v20 = vpack.c.bf16 %v6940_v32, %v6938_v63  ;;  %v6939_v57 = vmul.f32 %v13890_v30, %v6811_v53  ;;  %v6440_v43 = vld [vmem:[%s24888_s9 + $0x218] sm:$0xff]  ;;  %v17413_v32 = vld [vmem:[%s24884_s5 + $0x130] sm:$0xff]  }
 0x68e   : > { %25667 = vst [vmem:[#allocation94_spill] sm:$0xff] %v22315_v45  ;;  %v6941_v48 = vmul.f32 %v13892_v6, %v6809_v38  ;;  %v6943_v29 = vmul.f32 %v13894_v58, %v6807_v34  ;;  %v25201_v28 = vrot.slane %v22100_v13, 7  ;;  %v25669_v27 = vrot.slane %v22008_v9, 7  ;;  %v17416_v34 = vld [vmem:[%s24884_s5 + $0x1c0] sm:$0xff]   ;;  %v25675_v38 = vld [vmem:[#allocation44_spill] sm:$0xff]  ;;  %v25676_v53 = vld [vmem:[#allocation55_spill] sm:$0xff] }
 0x68f   : > { %25668 = vst [vmem:[#allocation95_spill] sm:$0xff] %v22330_v20  ;;  %7855 = vmatmul.mubr.bf16.gmra.mrb[88].mxu1 %v21048_v17  ;;  %v22346_v47 = vpack.c.bf16 %v22100_v13, %v22076_v8  ;;  %v22350_v0 = vpack.c.bf16 %v22086_v23, %v22060_v19  ;;  %v22356_v12 = vpack.c.bf16 %v6939_v57, %v6937_v41  ;;  %v13893_v8 = vld [vmem:[%s24888_s9 + $0x448] sm:$0xff]  ;;  %v13895_v19 = vld [vmem:[%s24888_s9 + $0x458] sm:$0xff]  ;;  %v6800_v44 = vrot.slane %v22100_v13, 1  ;;  %v25677_v41 = vld [vmem:[#allocation57_spill] sm:$0xff] }
 0x690   : > { %v6596_v59 = vsel %vm1252_vm0, %v25669_v27, %v6582_v55  ;;  %7862 = vmatprep.mubr.bf16.mxu1 %v21136_v15  ;;  %14870 = vmatpush3.bf16.msra.mxu1 %v17409_v3  ;;  %v22358_v9 = vpack.c.bf16 %v6943_v29, %v6941_v48  ;;  %v6594_v63 = vsel %vm1252_vm0, %v6582_v55, %v25201_v28  ;;  %v17414_v55 = vld [vmem:[%s24884_s5 + $0x178] sm:$0xff]   ;;  %v25679_v48 = vld [vmem:[#allocation47_spill] sm:$0xff]  ;;  %v25680_v29 = vld [vmem:[#allocation26_spill] sm:$0xff] }
 0x691   : > { %25670 = vst [vmem:[#allocation96_spill] sm:$0xff] %v22346_v47  ;;  %25671 = vst [vmem:[#allocation97_spill] sm:$0xff] %v22350_v0  ;;  %14871 = vmatprep.subr.bf16.mxu1 %v17410_v37  ;;  %v6726_v30 = vmul.f32 %v6596_v59, %v6438_v7  ;;  %v6728_v6 = vmul.f32 %v6594_v63, %v6440_v43  ;;  %v6808_v58 = vsel %vm1469_vm1, %v6800_v44, %v25506_v62  ;;  %v25678_v57 = vld [vmem:[#allocation60_spill] sm:$0xff]  ;;  %v25681_v7 = vld [vmem:[#allocation19_spill] sm:$0xff] }
 0x692   : > { %25672 = vst [vmem:[#allocation98_spill] sm:$0xff] %v22356_v12  ;;  %25673 = vst [vmem:[#allocation99_spill] sm:$0xff] %v22358_v9  ;;  %v6810_v35 = vsel %vm1469_vm1, %v6798_v16, %v6800_v44  ;;  %v6944_v3 = vmul.f32 %v13895_v19, %v6808_v58  ;;  %v17415_v16 = vld [vmem:[%s24884_s5 + $0x138] sm:$0xff]   ;;  %v25682_v43 = vld [vmem:[#allocation79_spill] sm:$0xff] }
 0x693   : > { %v6942_v2 = vmul.f32 %v13893_v8, %v6810_v35  ;;  %v22382_v39 = vpack.c.bf16 %v6728_v6, %v6726_v30  ;;  %v25683_v27 = vld [vmem:[#allocation78_spill] sm:$0xff]  ;;  %v25684_v59 = vld [vmem:[#allocation56_spill] sm:$0xff]  ;;  %v25687_v19 = vld [vmem:[#allocation85_spill] sm:$0xff] }
 0x694   : > { %14872 = vmatpush3.bf16.msra.mxu1 %v17411_v1  ;;  %v25685_v1 = vld [vmem:[#allocation59_spill] sm:$0xff]  ;;  %v25686_v8 = vld [vmem:[#allocation62_spill] sm:$0xff]  ;;  %v25690_v63 = vld [vmem:[#allocation25_spill] sm:$0xff] }
 0x695   : > { %14873 = vmatprep.subr.bf16.mxu1 %v17412_v5  ;;  %v22387_v37 = vpack.c.bf16 %v6944_v3, %v6942_v2  ;;  %v25688_v44 = vld [vmem:[#allocation14_spill] sm:$0xff]  ;;  %v25693_v9 = vld [vmem:[#allocation72_spill] sm:$0xff] }
 0x696   : > { %v25689_v5 = vld [vmem:[#allocation10_spill] sm:$0xff] }
 0x697   : > { %25674 = vst [vmem:[#allocation100_spill] sm:$0xff] %v22387_v37  ;;  %7863 = vmatmul.mubr.bf16.gmra.mrb[92].mxu1 %v21117_v61 }
 0x698   : > { %7870 = vmatprep.mubr.bf16.mxu1 %v21211_v56  ;;  %14874 = vmatpush3.bf16.msra.mxu1 %v17413_v32  ;;  %v25691_v32 = vld [vmem:[#allocation21_spill] sm:$0xff] }
 0x699   : > { %14875 = vmatprep.subr.bf16.mxu1 %v17414_v55  ;;  %v25692_v55 = vld [vmem:[#allocation74_spill] sm:$0xff] }
 0x69c   : > { %14876 = vmatpush3.bf16.msra.mxu1 %v17415_v16 }
 0x69d   : > { %14973 = vmatprep.subr.bf16.mxu1 %v17416_v34 }
 0x69f   : > { %7871 = vmatmul.mubr.bf16.gmra.mrb[96].mxu1 %v25675_v38 }
 0x6a0   : > { %7878 = vmatprep.mubr.bf16.mxu1 %v25676_v53 }
 0x6a7   : > { %7879 = vmatmul.mubr.bf16.gmra.mrb[100].mxu1 %v25677_v41 }
 0x6a8   : > { %7886 = vmatprep.mubr.bf16.mxu1 %v25678_v57 }
 0x6af   : > { %7887 = vmatmul.mubr.bf16.gmra.mrb[104].mxu1 %v25679_v48 }
 0x6b0   : > { %7894 = vmatprep.mubr.bf16.mxu1 %v25680_v29 }
 0x6b7   : > { %7895 = vmatmul.mubr.bf16.gmra.mrb[108].mxu1 %v25681_v7 }
 0x6b8   : > { %7902 = vmatprep.mubr.bf16.mxu1 %v25682_v43 }
 0x6bf   : > { %7903 = vmatmul.mubr.bf16.gmra.mrb[112].mxu1 %v25683_v27 }
 0x6c0   : > { %7910 = vmatprep.mubr.bf16.mxu1 %v25684_v59 }
 0x6c7   : > { %7911 = vmatmul.mubr.bf16.gmra.mrb[116].mxu1 %v25685_v1  ;;  %v25708_v1 = vld [vmem:[#allocation80_spill] sm:$0xff] }
 0x6c8   : > { %7918 = vmatprep.mubr.bf16.mxu1 %v25686_v8 }
 0x6cf   : > { %7919 = vmatmul.mubr.bf16.gmra.mrb[120].mxu1 %v25687_v19 }
 0x6d0   : > { %7926 = vmatprep.mubr.bf16.mxu1 %v25688_v44 }
 0x6d4   : > { %v14659_v30 = vpop.f32.mrb[100].mxu0 }
 0x6d5   : > { %v14660_v6 = vpop.f32.mrb[101].mxu0 }
 0x6d6   : > { %v22413_v58 = vadd.f32 %v14660_v6, %v14659_v30  ;;  %v14662_v35 = vpop.f32.mrb[102].mxu0  ;;  %v25694_v30 = vld [vmem:[#allocation29_spill] sm:$0xff] }
 0x6d7   : > { %7927 = vmatmul.mubr.bf16.gmra.mrb[124].mxu1 %v25689_v5  ;;  %v14663_v2 = vpop.f32.mrb[103].mxu0 }
 0x6d8   : > { %7934 = vmatprep.mubr.bf16.mxu1 %v25690_v63  ;;  %v22415_v3 = vadd.f32 %v14663_v2, %v14662_v35 }
 0x6dc   : > { %v14665_v16 = vpop.f32.mrb[104].mxu0 }
 0x6dd   : > { %v14666_v34 = vpop.f32.mrb[105].mxu0 }
 0x6de   : > { %v22419_v28 = vadd.f32 %v14666_v34, %v14665_v16  ;;  %v14668_v18 = vpop.f32.mrb[106].mxu0  ;;  %v13829_v16 = vld [vmem:[%s24888_s9 + $0x248] sm:$0xff] }
 0x6df   : > { %7935 = vmatmul.mubr.bf16.gmra.mrb[128].mxu1 %v25691_v32  ;;  %v14669_v23 = vpop.f32.mrb[107].mxu0 }
 0x6e0   : > { %7942 = vmatprep.mubr.bf16.mxu1 %v25692_v55  ;;  %v22421_v13 = vadd.f32 %v14669_v23, %v14668_v18  ;;  %v25695_v55 = vld [vmem:[#allocation30_spill] sm:$0xff]  ;;  %v13831_v18 = vld [vmem:[%s24888_s9 + $0x258] sm:$0xff] }
 0x6e1   : > { %v25696_v23 = vld [vmem:[#allocation86_spill] sm:$0xff] }
 0x6e2   : > { %v25697_v34 = vrot.slane %v25696_v23, 1  ;;  %v13828_v23 = vld [vmem:[%s24888_s9 + $0x240] sm:$0xff] }
 0x6e4   : > { %v14671_v6 = vpop.f32.mrb[108].mxu0 }
 0x6e5   : > { %v14672_v37 = vpop.f32.mrb[109].mxu0 }
 0x6e6   : > { %v22425_v35 = vadd.f32 %v14672_v37, %v14671_v6  ;;  %v14674_v2 = vpop.f32.mrb[110].mxu0  ;;  %v6872_v37 = vsel %vm1469_vm1, %v25506_v62, %v25697_v34  ;;  %v25698_v6 = vld [vmem:[#allocation41_spill] sm:$0xff]  ;;  %v13830_v34 = vld [vmem:[%s24888_s9 + $0x250] sm:$0xff] }
 0x6e7   : > { %7943 = vmatmul.mubr.bf16.gmra.mrb[132].mxu1 %v25693_v9  ;;  %v14675_v0 = vpop.f32.mrb[111].mxu0 }
 0x6e8   : > { %7950 = vmatprep.mubr.bf16.mxu1 %v25694_v30  ;;  %v22427_v47 = vadd.f32 %v14675_v0, %v14674_v2  ;;  %v6878_v2 = vmul.f32 %v13829_v16, %v25506_v62  ;;  %v25701_v16 = vld [vmem:[#allocation82_spill] sm:$0xff] }
 0x6ec   : > { %v14677_v0 = vpop.f32.mrb[32].mxu1 }
 0x6ed   : > { %v14678_v30 = vpop.f32.mrb[33].mxu1 }
 0x6ee   : > { %v22443_v9 = vadd.f32 %v14678_v30, %v14677_v0  ;;  %v14680_v32 = vpop.f32.mrb[34].mxu1 }
 0x6ef   : > { %7951 = vmatmul.mubr.bf16.gmra.mrb[136].mxu1 %v25695_v55  ;;  %v6880_v55 = vmul.f32 %v13831_v18, %v6872_v37  ;;  %v14681_v63 = vpop.f32.mrb[35].mxu1 }
 0x6f0   : > { %7958 = vmatprep.mubr.bf16.mxu1 %v25698_v6  ;;  %v22445_v5 = vadd.f32 %v14681_v63, %v14680_v32  ;;  %v25699_v6 = vld [vmem:[#allocation42_spill] sm:$0xff]  ;;  %v6877_v63 = vmul.f32 %v13828_v23, %v25506_v62 }
 0x6f1   : > { %v7094_v44 = vpack.c.bf16 %v6880_v55, %v6878_v2  ;;  %v25700_v19 = vrot.slane %v25699_v6, 1  ;;  %v17417_v2 = vld [vmem:[%s24884_s5 + $0x180] sm:$0xff]   ;;  %v17419_v23 = vld [vmem:[%s24884_s5 + $0x188] sm:$0xff]  }
 0x6f3   : > { %v6871_v30 = vsel %vm1469_vm1, %v25506_v62, %v25700_v19  ;;  %v17418_v19 = vld [vmem:[%s24884_s5 + $0x1c8] sm:$0xff]  }
 0x6f4   : > { %v6879_v32 = vmul.f32 %v13830_v34, %v6871_v30  ;;  %v14683_v55 = vpop.f32.mrb[36].mxu1  ;;  %v17420_v34 = vld [vmem:[%s24884_s5 + $0x1d0] sm:$0xff]  }
 0x6f5   : > { %v14684_v18 = vpop.f32.mrb[37].mxu1 }
 0x6f6   : > { %v22460_v37 = vadd.f32 %v14684_v18, %v14683_v55  ;;  %v14686_v0 = vpop.f32.mrb[38].mxu1  ;;  %v7093_v8 = vpack.c.bf16 %v6879_v32, %v6877_v63 }
 0x6f7   : > { %7959 = vmatmul.mubr.bf16.gmra.mrb[140].mxu1 %v25701_v16  ;;  %v14687_v6 = vpop.f32.mrb[39].mxu1 }
 0x6f8   : > { %7999 = vmatprep.mubr.bf16.mxu1 %v7094_v44  ;;  %v22468_v40 = vadd.f32 %v14687_v6, %v14686_v0  ;;  %v25702_v44 = vld [vmem:[#allocation24_spill] sm:$0xff]  ;;  %v25703_v6 = vld [vmem:[#allocation43_spill] sm:$0xff] }
 0x6f9   : > { %v17422_v0 = vld [vmem:[%s24884_s5 + $0x1d8] sm:$0xff]  }
 0x6fd   : > { %v14689_v30 = vpop.f32.mrb[40].mxu1 }
 0x6fe   : > { %v14690_v63 = vpop.f32.mrb[41].mxu1 }
 0x6ff   : > { %8000 = vmatmul.mubr.bf16.vlgmr.msra.gmra.mrb[144].mxu1 %v7093_v8  ;;  %v22477_v32 = vadd.f32 %v14690_v63, %v14689_v30  ;;  %v14692_v55 = vpop.f32.mrb[42].mxu1  ;;  %v17421_v8 = vld [vmem:[%s24884_s5 + $0x190] sm:$0xff]  }
 0x700   : > { %14974 = vmatpush3.bf16.msra.mxu1 %v17417_v2  ;;  %8007 = vmatprep.mubr.bf16.mxu1 %v25702_v44  ;;  %v14693_v18 = vpop.f32.mrb[43].mxu1  ;;  %v25706_v44 = vld [vmem:[#allocation69_spill] sm:$0xff] }
 0x701   : > { %14975 = vmatprep.subr.bf16.mxu1 %v17418_v19  ;;  %v22485_v2 = vadd.f32 %v14693_v18, %v14692_v55  ;;  %v25704_v19 = vld [vmem:[#allocation52_spill] sm:$0xff]  ;;  %v17425_v18 = vld [vmem:[%s24884_s5 + $0x1a0] sm:$0xff]  }
 0x704   : > { %14976 = vmatpush3.bf16.msra.mxu1 %v17419_v23  ;;  %v17423_v23 = vld [vmem:[%s24884_s5 + $0x198] sm:$0xff]  }
 0x705   : > { %14977 = vmatprep.subr.bf16.mxu1 %v17420_v34  ;;  %v17424_v34 = vld [vmem:[%s24884_s5 + $0x1e0] sm:$0xff]   ;;  %v14695_v30 = vpop.f32.mrb[44].mxu1 }
 0x706   : > { %v14696_v63 = vpop.f32.mrb[45].mxu1 }
 0x707   : > { %8008 = vmatmul.mubr.bf16.gmra.mrb[148].mxu1 %v25703_v6  ;;  %v22495_v62 = vadd.f32 %v14696_v63, %v14695_v30  ;;  %v14698_v55 = vpop.f32.mrb[46].mxu1  ;;  %v25705_v6 = vld [vmem:[#allocation8_spill] sm:$0xff] }
 0x708   : > { %8015 = vmatprep.mubr.bf16.mxu1 %v25704_v19  ;;  %14978 = vmatpush3.bf16.msra.mxu1 %v17421_v8  ;;  %v14699_v8 = vpop.f32.mrb[47].mxu1 }
 0x709   : > { %14979 = vmatprep.subr.bf16.mxu1 %v17422_v0  ;;  %v17426_v0 = vld [vmem:[%s24884_s5 + $0x1e8] sm:$0xff]   ;;  %v22503_v19 = vadd.f32 %v14699_v8, %v14698_v55  ;;  %v17429_v8 = vld [vmem:[%s24884_s5 + $0x1b0] sm:$0xff]  }
 0x70c   : > { %14980 = vmatpush3.bf16.msra.mxu1 %v17423_v23  ;;  %v17427_v23 = vld [vmem:[%s24884_s5 + $0x1a8] sm:$0xff]  }
 0x70d   : > { %14981 = vmatprep.subr.bf16.mxu1 %v17424_v34  ;;  %v17428_v34 = vld [vmem:[%s24884_s5 + $0x1f0] sm:$0xff]   ;;  %v14701_v30 = vpop.f32.mrb[48].mxu1 }
 0x70e   : > { %v14702_v63 = vpop.f32.mrb[49].mxu1 }
 0x70f   : > { %8016 = vmatmul.mubr.bf16.gmra.mrb[152].mxu1 %v25705_v6  ;;  %v22513_v16 = vadd.f32 %v14702_v63, %v14701_v30  ;;  %v14704_v55 = vpop.f32.mrb[50].mxu1  ;;  %v25707_v6 = vld [vmem:[#allocation34_spill] sm:$0xff] }
 0x710   : > { %8023 = vmatprep.mubr.bf16.mxu1 %v25706_v44  ;;  %14982 = vmatpush3.bf16.msra.mxu1 %v17425_v18  ;;  %v14705_v18 = vpop.f32.mrb[51].mxu1 }
 0x711   : > { %14983 = vmatprep.subr.bf16.mxu1 %v17426_v0  ;;  %v17430_v0 = vld [vmem:[%s24884_s5 + $0x1f8] sm:$0xff]   ;;  %v22521_v44 = vadd.f32 %v14705_v18, %v14704_v55 }
 0x714   : > { %14984 = vmatpush3.bf16.msra.mxu1 %v17427_v23  ;;  %v17431_v23 = vld [vmem:[%s24884_s5 + $0x1b8] sm:$0xff]  }
 0x715   : > { %14985 = vmatprep.subr.bf16.mxu1 %v17428_v34  ;;  %v17432_v34 = vld [vmem:[%s24884_s5 + $0x240] sm:$0xff]  }
 0x716   : > { %v14707_v30 = vpop.f32.mrb[52].mxu1 }
 0x717   : > { %8024 = vmatmul.mubr.bf16.gmra.mrb[156].mxu1 %v25707_v6  ;;  %v14708_v63 = vpop.f32.mrb[53].mxu1 }
 0x718   : > { %8031 = vmatprep.mubr.bf16.mxu1 %v25708_v1  ;;  %14986 = vmatpush3.bf16.msra.mxu1 %v17429_v8  ;;  %v22531_v59 = vadd.f32 %v14708_v63, %v14707_v30  ;;  %v14710_v55 = vpop.f32.mrb[54].mxu1  ;;  %v25709_v8 = vld [vmem:[#allocation68_spill] sm:$0xff]  ;;  %v25710_v1 = vld [vmem:[#allocation61_spill] sm:$0xff]  ;;  %v25711_v30 = vld [vmem:[#allocation66_spill] sm:$0xff] }
 0x719   : > { %14987 = vmatprep.subr.bf16.mxu1 %v17430_v0  ;;  %v14711_v18 = vpop.f32.mrb[55].mxu1  ;;  %v25712_v63 = vld [vmem:[#allocation16_spill] sm:$0xff] }
 0x71a   : > { %v22533_v6 = vadd.f32 %v14711_v18, %v14710_v55 }
 0x71c   : > { %14988 = vmatpush3.bf16.msra.mxu1 %v17431_v23 }
 0x71d   : > { %15085 = vmatprep.subr.bf16.mxu1 %v17432_v34 }
 0x71f   : > { %8032 = vmatmul.mubr.bf16.gmra.mrb[160].mxu1 %v25709_v8  ;;  %v14713_v27 = vpop.f32.mrb[56].mxu1 }
 0x720   : > { %8039 = vmatprep.mubr.bf16.mxu1 %v25710_v1  ;;  %v14714_v0 = vpop.f32.mrb[57].mxu1  ;;  %v25713_v1 = vld [vmem:[#allocation20_spill] sm:$0xff] }
 0x721   : > { %v22537_v43 = vadd.f32 %v14714_v0, %v14713_v27  ;;  %v14716_v7 = vpop.f32.mrb[58].mxu1  ;;  %v25714_v27 = vld [vmem:[#allocation23_spill] sm:$0xff] }
 0x722   : > { %v14717_v29 = vpop.f32.mrb[59].mxu1 }
 0x723   : > { %v22539_v48 = vadd.f32 %v14717_v29, %v14716_v7 }
 0x727   : > { %8040 = vmatmul.mubr.bf16.gmra.mrb[164].mxu1 %v25711_v30  ;;  %v14719_v23 = vpop.f32.mrb[60].mxu1 }
 0x728   : > { %8047 = vmatprep.mubr.bf16.mxu1 %v25712_v63  ;;  %v14720_v34 = vpop.f32.mrb[61].mxu1  ;;  %v25715_v63 = vld [vmem:[#allocation32_spill] sm:$0xff] }
 0x729   : > { %v22543_v55 = vadd.f32 %v14720_v34, %v14719_v23  ;;  %v14722_v18 = vpop.f32.mrb[62].mxu1 }
 0x72a   : > { %v14723_v8 = vpop.f32.mrb[63].mxu1 }
 0x72b   : > { %v22545_v57 = vadd.f32 %v14723_v8, %v14722_v18 }
 0x72f   : > { %8048 = vmatmul.mubr.bf16.gmra.mrb[168].mxu1 %v25713_v1 }
 0x730   : > { %8055 = vmatprep.mubr.bf16.mxu1 %v25714_v27  ;;  %v14725_v0 = vpop.f32.mrb[64].mxu1 }
 0x731   : > { %v14726_v41 = vpop.f32.mrb[65].mxu1 }
 0x732   : > { %v22549_v29 = vadd.f32 %v14726_v41, %v14725_v0  ;;  %v14728_v7 = vpop.f32.mrb[66].mxu1 }
 0x733   : > { %v14729_v30 = vpop.f32.mrb[67].mxu1 }
 0x734   : > { %v22551_v53 = vadd.f32 %v14729_v30, %v14728_v7 }
 0x737   : > { %8056 = vmatmul.mubr.bf16.gmra.mrb[172].mxu1 %v25715_v63 }
 0x738   : > { %8063 = vmatprep.mubr.bf16.mxu1 %v22043_v33  ;;  %v14731_v23 = vpop.f32.mrb[68].mxu1 }
 0x739   : > { %v14732_v34 = vpop.f32.mrb[69].mxu1 }
 0x73a   : > { %v22555_v8 = vadd.f32 %v14732_v34, %v14731_v23  ;;  %v14734_v18 = vpop.f32.mrb[70].mxu1 }
 0x73b   : > { %v14735_v1 = vpop.f32.mrb[71].mxu1 }
 0x73c   : > { %v22557_v38 = vadd.f32 %v14735_v1, %v14734_v18 }
 0x73f   : > { %8064 = vmatmul.mubr.bf16.gmra.mrb[176].mxu1 %v22084_v26 }
 0x740   : > { %8071 = vmatprep.mubr.bf16.mxu1 %v22123_v24  ;;  %v14737_v41 = vpop.f32.mrb[72].mxu1 }
 0x741   : > { %v14738_v0 = vpop.f32.mrb[73].mxu1 }
 0x742   : > { %v22561_v30 = vadd.f32 %v14738_v0, %v14737_v41  ;;  %v14740_v7 = vpop.f32.mrb[74].mxu1 }
 0x743   : > { %v14741_v63 = vpop.f32.mrb[75].mxu1 }
 0x744   : > { %v22563_v27 = vadd.f32 %v14741_v63, %v14740_v7 }
 0x747   : > { %8072 = vmatmul.mubr.bf16.gmra.mrb[180].mxu1 %v22135_v4 }
 0x748   : > { %8079 = vmatprep.mubr.bf16.mxu1 %v22158_v31 }
 0x74a   : > { %v14743_v23 = vpop.f32.mrb[76].mxu1 }
 0x74b   : > { %v14744_v34 = vpop.f32.mrb[77].mxu1 }
 0x74c   : > { %v22567_v1 = vadd.f32 %v14744_v34, %v14743_v23  ;;  %v14746_v18 = vpop.f32.mrb[78].mxu1 }
 0x74d   : > { %v14747_v26 = vpop.f32.mrb[79].mxu1 }
 0x74e   : > { %v22569_v33 = vadd.f32 %v14747_v26, %v14746_v18 }
 0x74f   : > { %8080 = vmatmul.mubr.bf16.gmra.mrb[184].mxu1 %v22173_v51 }
 0x750   : > { %8087 = vmatprep.mubr.bf16.mxu1 %v22198_v22 }
 0x752   : > { %v14765_v41 = vpop.f32.mrb[80].mxu1 }
 0x753   : > { %v14766_v0 = vpop.f32.mrb[81].mxu1 }
 0x754   : > { %v14767_v63 = vadd.f32 %v14766_v0, %v14765_v41  ;;  %v14768_v7 = vpop.f32.mrb[82].mxu1 }
 0x755   : > { %v14769_v24 = vpop.f32.mrb[83].mxu1 }
 0x756   : > { %v22574_v4 = vadd.f32 %v14767_v63, %v22041_v50  ;;  %v14770_v31 = vadd.f32 %v14769_v24, %v14768_v7 }
 0x757   : > { %8088 = vmatmul.mubr.bf16.gmra.mrb[188].mxu1 %v22215_v46 }
 0x758   : > { %v22578_v23 = vadd.f32 %v14770_v31, %v22058_v14  ;;  %8095 = vmatprep.mubr.bf16.mxu1 %v22234_v60 }
 0x75a   : > { %v14771_v26 = vpop.f32.mrb[84].mxu1 }
 0x75b   : > { %v14772_v34 = vpop.f32.mrb[85].mxu1 }
 0x75c   : > { %v14773_v18 = vadd.f32 %v14772_v34, %v14771_v26  ;;  %v14774_v22 = vpop.f32.mrb[86].mxu1 }
 0x75d   : > { %v14775_v51 = vpop.f32.mrb[87].mxu1 }
 0x75e   : > { %v22582_v41 = vadd.f32 %v14773_v18, %v22413_v58  ;;  %v14776_v0 = vadd.f32 %v14775_v51, %v14774_v22 }
 0x75f   : > { %8096 = vmatmul.mubr.bf16.gmra.mrb[192].mxu1 %v22236_v11 }
 0x760   : > { %v22586_v50 = vadd.f32 %v14776_v0, %v22415_v3  ;;  %8103 = vmatprep.mubr.bf16.mxu1 %v22272_v54 }
 0x762   : > { %v14777_v14 = vpop.f32.mrb[88].mxu1 }
 0x763   : > { %v14778_v24 = vpop.f32.mrb[89].mxu1 }
 0x764   : > { %v14779_v31 = vadd.f32 %v14778_v24, %v14777_v14  ;;  %v14780_v63 = vpop.f32.mrb[90].mxu1 }
 0x765   : > { %v14781_v7 = vpop.f32.mrb[91].mxu1 }
 0x766   : > { %v22590_v26 = vadd.f32 %v14779_v31, %v22419_v28  ;;  %v14782_v34 = vadd.f32 %v14781_v7, %v14780_v63 }
 0x767   : > { %8104 = vmatmul.mubr.bf16.gmra.mrb[196].mxu1 %v22274_v21 }
 0x768   : > { %v22594_v51 = vadd.f32 %v14782_v34, %v22421_v13  ;;  %8111 = vmatprep.mubr.bf16.mxu1 %v22292_v49 }
 0x76a   : > { %v14783_v22 = vpop.f32.mrb[92].mxu1 }
 0x76b   : > { %v14784_v58 = vpop.f32.mrb[93].mxu1 }
 0x76c   : > { %v14785_v3 = vadd.f32 %v14784_v58, %v14783_v22  ;;  %v14786_v18 = vpop.f32.mrb[94].mxu1 }
 0x76d   : > { %v14787_v0 = vpop.f32.mrb[95].mxu1 }
 0x76e   : > { %v22598_v14 = vadd.f32 %v14785_v3, %v22425_v35  ;;  %v14788_v24 = vadd.f32 %v14787_v0, %v14786_v18  ;;  %v25716_v3 = vld [vmem:[#allocation54_spill] sm:$0xff] }
 0x76f   : > { %8112 = vmatmul.mubr.bf16.gmra.mrb[200].mxu1 %v22315_v45 }
 0x770   : > { %v22602_v28 = vadd.f32 %v14788_v24, %v22427_v47  ;;  %8119 = vmatprep.mubr.bf16.mxu1 %v22330_v20 }
 0x772   : > { %v14789_v13 = vpop.f32.mrb[96].mxu1 }
 0x773   : > { %v14790_v31 = vpop.f32.mrb[97].mxu1 }
 0x774   : > { %v14791_v63 = vadd.f32 %v14790_v31, %v14789_v13  ;;  %v14792_v7 = vpop.f32.mrb[98].mxu1  ;;  %v17433_v13 = vld [vmem:[%s24884_s5 + $0x200] sm:$0xff]  }
 0x775   : > { %v14793_v34 = vpop.f32.mrb[99].mxu1 }
 0x776   : > { %v22606_v22 = vadd.f32 %v14791_v63, %v22443_v9  ;;  %v14794_v58 = vadd.f32 %v14793_v34, %v14792_v7  ;;  %v17434_v9 = vld [vmem:[%s24884_s5 + $0x248] sm:$0xff]   ;;  %v25717_v7 = vld [vmem:[#allocation49_spill] sm:$0xff] }
 0x777   : > { %8120 = vmatmul.mubr.bf16.gmra.mrb[204].mxu1 %v22356_v12 }
 0x778   : > { %v22610_v35 = vadd.f32 %v14794_v58, %v22445_v5  ;;  %8705 = vmatprep.mubr.bf16.mxu1 %v25716_v3  ;;  %v25718_v58 = vld [vmem:[#allocation22_spill] sm:$0xff] }
 0x779   : > { %v17435_v3 = vld [vmem:[%s24884_s5 + $0x208] sm:$0xff]  }
 0x77a   : > { %v14795_v47 = vpop.f32.mrb[100].mxu1 }
 0x77b   : > { %v14796_v18 = vpop.f32.mrb[101].mxu1 }
 0x77c   : > { %v14797_v0 = vadd.f32 %v14796_v18, %v14795_v47  ;;  %v14798_v24 = vpop.f32.mrb[102].mxu1  ;;  %v17436_v47 = vld [vmem:[%s24884_s5 + $0x250] sm:$0xff]  }
 0x77d   : > { %v14799_v31 = vpop.f32.mrb[103].mxu1 }
 0x77e   : > { %v22620_v63 = vadd.f32 %v14797_v0, %v22460_v37  ;;  %v14800_v5 = vadd.f32 %v14799_v31, %v14798_v24  ;;  %v17438_v31 = vld [vmem:[%s24884_s5 + $0x258] sm:$0xff]  }
 0x77f   : > { %8706 = vmatmul.mubr.bf16.vlgmr.msra.gmra.mrb[208].mxu1 %v25717_v7  ;;  %v25719_v7 = vld [vmem:[#allocation17_spill] sm:$0xff] }
 0x780   : > { %v22624_v34 = vadd.f32 %v14800_v5, %v22468_v40  ;;  %15086 = vmatpush3.bf16.msra.mxu1 %v17433_v13  ;;  %8713 = vmatprep.mubr.bf16.mxu1 %v25718_v58  ;;  %v17437_v40 = vld [vmem:[%s24884_s5 + $0x210] sm:$0xff]  }
 0x781   : > { %15087 = vmatprep.subr.bf16.mxu1 %v17434_v9 }
 0x782   : > { %v14801_v37 = vpop.f32.mrb[104].mxu1 }
 0x783   : > { %v14802_v18 = vpop.f32.mrb[105].mxu1 }
 0x784   : > { %v14803_v0 = vadd.f32 %v14802_v18, %v14801_v37  ;;  %v14804_v24 = vpop.f32.mrb[106].mxu1  ;;  %15088 = vmatpush3.bf16.msra.mxu1 %v17435_v3  ;;  %v25720_v3 = vld [vmem:[#allocation40_spill] sm:$0xff]  ;;  %v17440_v18 = vld [vmem:[%s24884_s5 + $0x260] sm:$0xff]  }
 0x785   : > { %v14805_v13 = vpop.f32.mrb[107].mxu1  ;;  %15089 = vmatprep.subr.bf16.mxu1 %v17436_v47  ;;  %v17439_v47 = vld [vmem:[%s24884_s5 + $0x218] sm:$0xff]  }
 0x786   : > { %v22640_v9 = vadd.f32 %v14803_v0, %v22477_v32  ;;  %v14806_v5 = vadd.f32 %v14805_v13, %v14804_v24 }
 0x787   : > { %8714 = vmatmul.mubr.bf16.gmra.mrb[212].mxu1 %v25719_v7  ;;  %v25721_v7 = vld [vmem:[#allocation38_spill] sm:$0xff] }
 0x788   : > { %v22644_v37 = vadd.f32 %v14806_v5, %v22485_v2  ;;  %8721 = vmatprep.mubr.bf16.mxu1 %v25720_v3  ;;  %15090 = vmatpush3.bf16.msra.mxu1 %v17437_v40  ;;  %v17441_v2 = vld [vmem:[%s24884_s5 + $0x220] sm:$0xff]   ;;  %v17442_v40 = vld [vmem:[%s24884_s5 + $0x268] sm:$0xff]  }
 0x789   : > { %15091 = vmatprep.subr.bf16.mxu1 %v17438_v31 }
 0x78a   : > { %v14807_v32 = vpop.f32.mrb[108].mxu1 }
 0x78b   : > { %v14808_v0 = vpop.f32.mrb[109].mxu1 }
 0x78c   : > { %v14809_v24 = vadd.f32 %v14808_v0, %v14807_v32  ;;  %v14810_v13 = vpop.f32.mrb[110].mxu1  ;;  %15092 = vmatpush3.bf16.msra.mxu1 %v17439_v47  ;;  %v25722_v47 = vld [vmem:[#allocation53_spill] sm:$0xff]  ;;  %v17444_v0 = vld [vmem:[%s24884_s5 + $0x270] sm:$0xff]  }
 0x78d   : > { %v14811_v5 = vpop.f32.mrb[111].mxu1  ;;  %15093 = vmatprep.subr.bf16.mxu1 %v17440_v18  ;;  %v17443_v18 = vld [vmem:[%s24884_s5 + $0x228] sm:$0xff]  }
 0x78e   : > { %v22660_v31 = vadd.f32 %v14809_v24, %v22495_v62  ;;  %v14812_v3 = vadd.f32 %v14811_v5, %v14810_v13 }
 0x78f   : > { %8722 = vmatmul.mubr.bf16.gmra.mrb[216].mxu1 %v25721_v7  ;;  %v25723_v7 = vld [vmem:[#allocation50_spill] sm:$0xff] }
 0x790   : > { %v22664_v32 = vadd.f32 %v14812_v3, %v22503_v19  ;;  %8729 = vmatprep.mubr.bf16.mxu1 %v25722_v47  ;;  %15094 = vmatpush3.bf16.msra.mxu1 %v17441_v2  ;;  %v17445_v19 = vld [vmem:[%s24884_s5 + $0x230] sm:$0xff]   ;;  %v17446_v2 = vld [vmem:[%s24884_s5 + $0x278] sm:$0xff]  }
 0x791   : > { %15095 = vmatprep.subr.bf16.mxu1 %v17442_v40 }
 0x792   : > { %v14813_v62 = vpop.f32.mrb[112].mxu1 }
 0x793   : > { %v14814_v24 = vpop.f32.mrb[113].mxu1 }
 0x794   : > { %v14815_v13 = vadd.f32 %v14814_v24, %v14813_v62  ;;  %v14816_v5 = vpop.f32.mrb[114].mxu1  ;;  %15096 = vmatpush3.bf16.msra.mxu1 %v17443_v18  ;;  %v25724_v18 = vld [vmem:[#allocation7_spill] sm:$0xff]  ;;  %v17448_v24 = vld [vmem:[%s24884_s5 + $0x2c0] sm:$0xff]  }
 0x795   : > { %v14817_v3 = vpop.f32.mrb[115].mxu1  ;;  %15097 = vmatprep.subr.bf16.mxu1 %v17444_v0  ;;  %v17447_v0 = vld [vmem:[%s24884_s5 + $0x238] sm:$0xff]  }
 0x796   : > { %v22680_v40 = vadd.f32 %v14815_v13, %v22513_v16  ;;  %v14818_v47 = vadd.f32 %v14817_v3, %v14816_v5 }
 0x797   : > { %8730 = vmatmul.mubr.bf16.gmra.mrb[220].mxu1 %v25723_v7 }
 0x798   : > { %v22684_v62 = vadd.f32 %v14818_v47, %v22521_v44  ;;  %8737 = vmatprep.mubr.bf16.mxu1 %v25724_v18  ;;  %15098 = vmatpush3.bf16.msra.mxu1 %v17445_v19  ;;  %v25725_v19 = vld [vmem:[#allocation48_spill] sm:$0xff] }
 0x799   : > { %15099 = vmatprep.subr.bf16.mxu1 %v17446_v2  ;;  %v25726_v2 = vld [vmem:[#allocation63_spill] sm:$0xff] }
 0x79a   : > { %v14819_v16 = vpop.f32.mrb[116].mxu1 }
 0x79b   : > { %v14820_v13 = vpop.f32.mrb[117].mxu1 }
 0x79c   : > { %v14821_v5 = vadd.f32 %v14820_v13, %v14819_v16  ;;  %v14822_v3 = vpop.f32.mrb[118].mxu1  ;;  %15100 = vmatpush3.bf16.msra.mxu1 %v17447_v0  ;;  %v25727_v13 = vld [vmem:[#allocation67_spill] sm:$0xff] }
 0x79d   : > { %v14823_v7 = vpop.f32.mrb[119].mxu1  ;;  %15197 = vmatprep.subr.bf16.mxu1 %v17448_v24 }
 0x79e   : > { %v22694_v44 = vadd.f32 %v14821_v5, %v22531_v59  ;;  %v14824_v47 = vadd.f32 %v14823_v7, %v14822_v3  ;;  %v25728_v7 = vld [vmem:[#allocation39_spill] sm:$0xff] }
 0x79f   : > { %8738 = vmatmul.mubr.bf16.gmra.mrb[224].mxu1 %v25725_v19  ;;  %v25729_v19 = vld [vmem:[#allocation37_spill] sm:$0xff] }
 0x7a0   : > { %v22698_v18 = vadd.f32 %v14824_v47, %v22533_v6  ;;  %8745 = vmatprep.mubr.bf16.mxu1 %v25726_v2 }
 0x7a2   : > { %v14825_v58 = vpop.f32.mrb[120].mxu1 }
 0x7a3   : > { %v14826_v12 = vpop.f32.mrb[121].mxu1 }
 0x7a4   : > { %v14827_v20 = vadd.f32 %v14826_v12, %v14825_v58  ;;  %v14828_v45 = vpop.f32.mrb[122].mxu1 }
 0x7a5   : > { %v14829_v16 = vpop.f32.mrb[123].mxu1 }
 0x7a6   : > { %v22702_v0 = vadd.f32 %v14827_v20, %v22537_v43  ;;  %v14830_v24 = vadd.f32 %v14829_v16, %v14828_v45  ;;  %v25730_v20 = vld [vmem:[#allocation58_spill] sm:$0xff] }
 0x7a7   : > { %8746 = vmatmul.mubr.bf16.gmra.mrb[228].mxu1 %v25727_v13  ;;  %v25731_v13 = vld [vmem:[#allocation83_spill] sm:$0xff] }
 0x7a8   : > { %v22706_v59 = vadd.f32 %v14830_v24, %v22539_v48  ;;  %8753 = vmatprep.mubr.bf16.mxu1 %v25728_v7 }
 0x7aa   : > { %v14831_v6 = vpop.f32.mrb[124].mxu1 }
 0x7ab   : > { %v14832_v5 = vpop.f32.mrb[125].mxu1 }
 0x7ac   : > { %v14833_v3 = vadd.f32 %v14832_v5, %v14831_v6  ;;  %v14834_v47 = vpop.f32.mrb[126].mxu1 }
 0x7ad   : > { %v14835_v2 = vpop.f32.mrb[127].mxu1 }
 0x7ae   : > { %v22710_v12 = vadd.f32 %v14833_v3, %v22543_v55  ;;  %v14836_v58 = vadd.f32 %v14835_v2, %v14834_v47  ;;  %v25732_v2 = vld [vmem:[#allocation84_spill] sm:$0xff] }
 0x7af   : > { %8754 = vmatmul.mubr.bf16.gmra.mrb[232].mxu1 %v25729_v19  ;;  %v25733_v19 = vld [vmem:[#allocation73_spill] sm:$0xff] }
 0x7b0   : > { %v22714_v45 = vadd.f32 %v14836_v58, %v22545_v57  ;;  %8761 = vmatprep.mubr.bf16.mxu1 %v25730_v20 }
 0x7b2   : > { %v14837_v48 = vpop.f32.mrb[128].mxu1 }
 0x7b3   : > { %v14838_v43 = vpop.f32.mrb[129].mxu1 }
 0x7b4   : > { %v14839_v16 = vadd.f32 %v14838_v43, %v14837_v48  ;;  %v14840_v24 = vpop.f32.mrb[130].mxu1 }
 0x7b5   : > { %v14841_v7 = vpop.f32.mrb[131].mxu1 }
 0x7b6   : > { %v22718_v6 = vadd.f32 %v14839_v16, %v22549_v29  ;;  %v14842_v5 = vadd.f32 %v14841_v7, %v14840_v24  ;;  %v25734_v7 = vld [vmem:[#allocation65_spill] sm:$0xff] }
 0x7b7   : > { %8762 = vmatmul.mubr.bf16.gmra.mrb[236].mxu1 %v25731_v13  ;;  %v25735_v13 = vld [vmem:[#allocation64_spill] sm:$0xff] }
 0x7b8   : > { %v22722_v55 = vadd.f32 %v14842_v5, %v22551_v53  ;;  %8769 = vmatprep.mubr.bf16.mxu1 %v25732_v2 }
 0x7ba   : > { %v14843_v57 = vpop.f32.mrb[132].mxu1 }
 0x7bb   : > { %v14844_v3 = vpop.f32.mrb[133].mxu1 }
 0x7bc   : > { %v14845_v47 = vadd.f32 %v14844_v3, %v14843_v57  ;;  %v14846_v58 = vpop.f32.mrb[134].mxu1 }
 0x7bd   : > { %v14847_v20 = vpop.f32.mrb[135].mxu1 }
 0x7be   : > { %v22726_v48 = vadd.f32 %v14845_v47, %v22555_v8  ;;  %v14848_v43 = vadd.f32 %v14847_v20, %v14846_v58  ;;  %v25736_v20 = vld [vmem:[#allocation13_spill] sm:$0xff] }
 0x7bf   : > { %8770 = vmatmul.mubr.bf16.gmra.mrb[240].mxu1 %v25733_v19  ;;  %v25737_v19 = vld [vmem:[#allocation18_spill] sm:$0xff] }
 0x7c0   : > { %v22730_v29 = vadd.f32 %v14848_v43, %v22557_v38  ;;  %8777 = vmatprep.mubr.bf16.mxu1 %v25734_v7 }
 0x7c2   : > { %v14849_v53 = vpop.f32.mrb[136].mxu1 }
 0x7c3   : > { %v14850_v16 = vpop.f32.mrb[137].mxu1 }
 0x7c4   : > { %v14851_v24 = vadd.f32 %v14850_v16, %v14849_v53  ;;  %v14852_v5 = vpop.f32.mrb[138].mxu1 }
 0x7c5   : > { %v14853_v2 = vpop.f32.mrb[139].mxu1 }
 0x7c6   : > { %v22734_v57 = vadd.f32 %v14851_v24, %v22561_v30  ;;  %v14854_v3 = vadd.f32 %v14853_v2, %v14852_v5  ;;  %v25738_v2 = vld [vmem:[#allocation71_spill] sm:$0xff] }
 0x7c7   : > { %8778 = vmatmul.mubr.bf16.gmra.mrb[244].mxu1 %v25735_v13  ;;  %v25740_v13 = vld [vmem:[#allocation70_spill] sm:$0xff] }
 0x7c8   : > { %v22738_v8 = vadd.f32 %v14854_v3, %v22563_v27  ;;  %8785 = vmatprep.mubr.bf16.mxu1 %v25736_v20 }
 0x7ca   : > { %v14855_v38 = vpop.f32.mrb[140].mxu1 }
 0x7cb   : > { %v14856_v47 = vpop.f32.mrb[141].mxu1 }
 0x7cc   : > { %v14857_v58 = vadd.f32 %v14856_v47, %v14855_v38  ;;  %v14858_v43 = vpop.f32.mrb[142].mxu1 }
 0x7cd   : > { %v14859_v7 = vpop.f32.mrb[143].mxu1 }
 0x7ce   : > { %v22742_v53 = vadd.f32 %v14857_v58, %v22567_v1  ;;  %v14860_v16 = vadd.f32 %v14859_v7, %v14858_v43  ;;  %v25742_v7 = vld [vmem:[#allocation76_spill] sm:$0xff] }
 0x7cf   : > { %8786 = vmatmul.mubr.bf16.gmra.mrb[248].mxu1 %v25737_v19  ;;  %v25743_v19 = vld [vmem:[#allocation75_spill] sm:$0xff] }
 0x7d0   : > { %v22746_v30 = vadd.f32 %v14860_v16, %v22569_v33  ;;  %8793 = vmatprep.mubr.bf16.mxu1 %v25738_v2 }
 0x7d2   : > { %v14877_v27 = vpop.f32.mrb[144].mxu1 }
 0x7d3   : > { %v14878_v24 = vpop.f32.mrb[145].mxu1 }
 0x7d4   : > { %v14879_v5 = vadd.f32 %v14878_v24, %v14877_v27  ;;  %v14880_v3 = vpop.f32.mrb[146].mxu1 }
 0x7d5   : > { %v14881_v20 = vpop.f32.mrb[147].mxu1 }
 0x7d6   : > { %v22750_v38 = vadd.f32 %v14879_v5, %v22574_v4  ;;  %v14882_v47 = vadd.f32 %v14881_v20, %v14880_v3  ;;  %v25745_v20 = vld [vmem:[#allocation81_spill] sm:$0xff] }
 0x7d7   : > { %8794 = vmatmul.mubr.bf16.gmra.mrb[252].mxu1 %v25740_v13 }
 0x7d8   : > { %25739 = vst [vmem:[#allocation86_spill] sm:$0xff] %v22750_v38  ;;  %v22754_v1 = vadd.f32 %v14882_v47, %v22578_v23  ;;  %8801 = vmatprep.mubr.bf16.mxu1 %v25742_v7  ;;  %v25746_v38 = vld [vmem:[#allocation77_spill] sm:$0xff] }
 0x7da   : > { %25741 = vst [vmem:[#allocation42_spill] sm:$0xff] %v22754_v1  ;;  %v14883_v33 = vpop.f32.mrb[148].mxu1 }
 0x7db   : > { %v14884_v58 = vpop.f32.mrb[149].mxu1 }
 0x7dc   : > { %v14885_v43 = vadd.f32 %v14884_v58, %v14883_v33  ;;  %v14886_v16 = vpop.f32.mrb[150].mxu1 }
 0x7dd   : > { %v14887_v2 = vpop.f32.mrb[151].mxu1 }
 0x7de   : > { %v22758_v27 = vadd.f32 %v14885_v43, %v22582_v41  ;;  %v14888_v24 = vadd.f32 %v14887_v2, %v14886_v16  ;;  %v25747_v2 = vld [vmem:[#allocation27_spill] sm:$0xff] }
 0x7df   : > { %8802 = vmatmul.mubr.bf16.gmra.mrb[0].mxu1 %v25743_v19 }
 0x7e0   : > { %v22762_v4 = vadd.f32 %v14888_v24, %v22586_v50  ;;  %8809 = vmatprep.mubr.bf16.mxu1 %v25745_v20 }
 0x7e2   : > { %25744 = vst [vmem:[#allocation54_spill] sm:$0xff] %v22762_v4  ;;  %v14889_v23 = vpop.f32.mrb[152].mxu1 }
 0x7e3   : > { %v14890_v5 = vpop.f32.mrb[153].mxu1 }
 0x7e4   : > { %v14891_v3 = vadd.f32 %v14890_v5, %v14889_v23  ;;  %v14892_v47 = vpop.f32.mrb[154].mxu1 }
 0x7e5   : > { %v14893_v1 = vpop.f32.mrb[155].mxu1 }
 0x7e6   : > { %v22766_v33 = vadd.f32 %v14891_v3, %v22590_v26  ;;  %v14894_v58 = vadd.f32 %v14893_v1, %v14892_v47 }
 0x7e7   : > { %8810 = vmatmul.mubr.bf16.gmra.mrb[4].mxu1 %v25746_v38 }
 0x7e8   : > { %v22770_v41 = vadd.f32 %v14894_v58, %v22594_v51  ;;  %8817 = vmatprep.mubr.bf16.mxu1 %v25747_v2 }
 0x7ea   : > { %v14895_v50 = vpop.f32.mrb[156].mxu1 }
 0x7eb   : > { %v14896_v43 = vpop.f32.mrb[157].mxu1 }
 0x7ec   : > { %v14897_v16 = vadd.f32 %v14896_v43, %v14895_v50  ;;  %v14898_v24 = vpop.f32.mrb[158].mxu1 }
 0x7ed   : > { %v14899_v4 = vpop.f32.mrb[159].mxu1 }
 0x7ee   : > { %v22774_v23 = vadd.f32 %v14897_v16, %v22598_v14  ;;  %v14900_v5 = vadd.f32 %v14899_v4, %v14898_v24 }
 0x7ef   : > { %8818 = vmatmul.mubr.bf16.gmra.mrb[8].mxu1 %v22062_v25 }
 0x7f0   : > { %v22778_v26 = vadd.f32 %v14900_v5, %v22602_v28  ;;  %8825 = vmatprep.mubr.bf16.mxu1 %v22382_v39  ;;  %v17449_v5 = vld [vmem:[%s24884_s5 + $0x280] sm:$0xff]  }
 0x7f2   : > { %v14901_v51 = vpop.f32.mrb[160].mxu1 }
 0x7f3   : > { %v14902_v1 = vpop.f32.mrb[161].mxu1 }
 0x7f4   : > { %v14903_v3 = vadd.f32 %v14902_v1, %v14901_v51  ;;  %v14904_v47 = vpop.f32.mrb[162].mxu1 }
 0x7f5   : > { %v14905_v58 = vpop.f32.mrb[163].mxu1 }
 0x7f6   : > { %v22782_v50 = vadd.f32 %v14903_v3, %v22606_v22  ;;  %v14906_v43 = vadd.f32 %v14905_v58, %v14904_v47  ;;  %v17450_v22 = vld [vmem:[%s24884_s5 + $0x2c8] sm:$0xff]   ;;  %v17452_v47 = vld [vmem:[%s24884_s5 + $0x2d0] sm:$0xff]  }
 0x7f7   : > { %8826 = vmatmul.mubr.bf16.gmra.mrb[12].mxu1 %v22142_v10  ;;  %v17451_v3 = vld [vmem:[%s24884_s5 + $0x288] sm:$0xff]  }
 0x7f8   : > { %25748 = vst [vmem:[#allocation49_spill] sm:$0xff] %v22782_v50  ;;  %v22786_v14 = vadd.f32 %v14906_v43, %v22610_v35  ;;  %8866 = vmatprep.mubr.bf16.mxu1 %v21009_v52 }
 0x7fa   : > { %25749 = vst [vmem:[#allocation70_spill] sm:$0xff] %v22786_v14  ;;  %v14907_v28 = vpop.f32.mrb[164].mxu1 }
 0x7fb   : > { %v14908_v4 = vpop.f32.mrb[165].mxu1 }
 0x7fc   : > { %v14909_v16 = vadd.f32 %v14908_v4, %v14907_v28  ;;  %v14910_v24 = vpop.f32.mrb[166].mxu1  ;;  %v17454_v4 = vld [vmem:[%s24884_s5 + $0x2d8] sm:$0xff]  }
 0x7fd   : > { %v14911_v51 = vpop.f32.mrb[167].mxu1 }
 0x7fe   : > { %v22796_v1 = vadd.f32 %v14909_v16, %v22620_v63  ;;  %v14912_v35 = vadd.f32 %v14911_v51, %v14910_v24  ;;  %v17455_v51 = vld [vmem:[%s24884_s5 + $0x298] sm:$0xff]  }
 0x7ff   : > { %8867 = vmatmul.mubr.bf16.vlgmr.msra.gmra.mrb[16].mxu1 %v20991_v42  ;;  %v17453_v42 = vld [vmem:[%s24884_s5 + $0x290] sm:$0xff]  }
 0x800   : > { %25750 = vst [vmem:[#allocation76_spill] sm:$0xff] %v22796_v1  ;;  %v22800_v52 = vadd.f32 %v14912_v35, %v22624_v34  ;;  %15198 = vmatpush3.bf16.msra.mxu1 %v17449_v5  ;;  %8874 = vmatprep.mubr.bf16.mxu1 %v21067_v36 }
 0x801   : > { %15199 = vmatprep.subr.bf16.mxu1 %v17450_v22  ;;  %v17456_v22 = vld [vmem:[%s24884_s5 + $0x2e0] sm:$0xff]  }
 0x802   : > { %25751 = vst [vmem:[#allocation75_spill] sm:$0xff] %v22800_v52  ;;  %v14913_v63 = vpop.f32.mrb[168].mxu1 }
 0x803   : > { %v14914_v58 = vpop.f32.mrb[169].mxu1 }
 0x804   : > { %v14915_v43 = vadd.f32 %v14914_v58, %v14913_v63  ;;  %v14916_v28 = vpop.f32.mrb[170].mxu1  ;;  %15200 = vmatpush3.bf16.msra.mxu1 %v17451_v3  ;;  %v17458_v58 = vld [vmem:[%s24884_s5 + $0x2e8] sm:$0xff]  }
 0x805   : > { %v14917_v34 = vpop.f32.mrb[171].mxu1  ;;  %15201 = vmatprep.subr.bf16.mxu1 %v17452_v47 }
 0x806   : > { %v22816_v16 = vadd.f32 %v14915_v43, %v22640_v9  ;;  %v14918_v24 = vadd.f32 %v14917_v34, %v14916_v28  ;;  %v17459_v34 = vld [vmem:[%s24884_s5 + $0x2a8] sm:$0xff]  }
 0x807   : > { %8875 = vmatmul.mubr.bf16.gmra.mrb[20].mxu1 %v21048_v17 }
 0x808   : > { %25752 = vst [vmem:[#allocation81_spill] sm:$0xff] %v22816_v16  ;;  %v22820_v5 = vadd.f32 %v14918_v24, %v22644_v37  ;;  %8882 = vmatprep.mubr.bf16.mxu1 %v21136_v15  ;;  %15202 = vmatpush3.bf16.msra.mxu1 %v17453_v42  ;;  %v17457_v37 = vld [vmem:[%s24884_s5 + $0x2a0] sm:$0xff]  }
 0x809   : > { %15203 = vmatprep.subr.bf16.mxu1 %v17454_v4  ;;  %v17460_v4 = vld [vmem:[%s24884_s5 + $0x2f0] sm:$0xff]  }
 0x80a   : > { %25753 = vst [vmem:[#allocation77_spill] sm:$0xff] %v22820_v5  ;;  %v14919_v9 = vpop.f32.mrb[172].mxu1 }
 0x80b   : > { %v14920_v35 = vpop.f32.mrb[173].mxu1 }
 0x80c   : > { %v14921_v3 = vadd.f32 %v14920_v35, %v14919_v9  ;;  %v14922_v47 = vpop.f32.mrb[174].mxu1  ;;  %15204 = vmatpush3.bf16.msra.mxu1 %v17455_v51  ;;  %v17462_v35 = vld [vmem:[%s24884_s5 + $0x2f8] sm:$0xff]  }
 0x80d   : > { %v14923_v63 = vpop.f32.mrb[175].mxu1  ;;  %15205 = vmatprep.subr.bf16.mxu1 %v17456_v22 }
 0x80e   : > { %v22836_v43 = vadd.f32 %v14921_v3, %v22660_v31  ;;  %v14924_v28 = vadd.f32 %v14923_v63, %v14922_v47 }
 0x80f   : > { %8883 = vmatmul.mubr.bf16.gmra.mrb[24].mxu1 %v21117_v61 }
 0x810   : > { %25754 = vst [vmem:[#allocation27_spill] sm:$0xff] %v22836_v43  ;;  %v22840_v42 = vadd.f32 %v14924_v28, %v22664_v32  ;;  %8890 = vmatprep.mubr.bf16.mxu1 %v21211_v56  ;;  %15206 = vmatpush3.bf16.msra.mxu1 %v17457_v37  ;;  %v17461_v32 = vld [vmem:[%s24884_s5 + $0x2b0] sm:$0xff]   ;;  %v25757_v37 = vld [vmem:[#allocation44_spill] sm:$0xff] }
 0x811   : > { %15207 = vmatprep.subr.bf16.mxu1 %v17458_v58  ;;  %v25759_v58 = vld [vmem:[#allocation55_spill] sm:$0xff]  ;;  %v17463_v28 = vld [vmem:[%s24884_s5 + $0x2b8] sm:$0xff]  }
 0x812   : > { %25755 = vst [vmem:[#allocation101_spill] sm:$0xff] %v22840_v42  ;;  %v14925_v31 = vpop.f32.mrb[176].mxu1 }
 0x813   : > { %v14926_v24 = vpop.f32.mrb[177].mxu1 }
 0x814   : > { %v14927_v51 = vadd.f32 %v14926_v24, %v14925_v31  ;;  %v14928_v22 = vpop.f32.mrb[178].mxu1  ;;  %15208 = vmatpush3.bf16.msra.mxu1 %v17459_v34  ;;  %v17464_v34 = vld [vmem:[%s24884_s5 + $0x340] sm:$0xff]  }
 0x815   : > { %v14929_v9 = vpop.f32.mrb[179].mxu1  ;;  %15209 = vmatprep.subr.bf16.mxu1 %v17460_v4 }
 0x816   : > { %v22856_v3 = vadd.f32 %v14927_v51, %v22680_v40  ;;  %v14930_v47 = vadd.f32 %v14929_v9, %v14928_v22 }
 0x817   : > { %8891 = vmatmul.mubr.bf16.gmra.mrb[28].mxu1 %v25757_v37 }
 0x818   : > { %25756 = vst [vmem:[#allocation102_spill] sm:$0xff] %v22856_v3  ;;  %v22860_v63 = vadd.f32 %v14930_v47, %v22684_v62  ;;  %8898 = vmatprep.mubr.bf16.mxu1 %v25759_v58  ;;  %15210 = vmatpush3.bf16.msra.mxu1 %v17461_v32  ;;  %v25761_v32 = vld [vmem:[#allocation57_spill] sm:$0xff] }
 0x819   : > { %15211 = vmatprep.subr.bf16.mxu1 %v17462_v35  ;;  %v25763_v35 = vld [vmem:[#allocation60_spill] sm:$0xff] }
 0x81a   : > { %25758 = vst [vmem:[#allocation103_spill] sm:$0xff] %v22860_v63  ;;  %v14931_v40 = vpop.f32.mrb[180].mxu1 }
 0x81b   : > { %v14932_v4 = vpop.f32.mrb[181].mxu1 }
 0x81c   : > { %v14933_v31 = vadd.f32 %v14932_v4, %v14931_v40  ;;  %v14934_v24 = vpop.f32.mrb[182].mxu1  ;;  %15212 = vmatpush3.bf16.msra.mxu1 %v17463_v28  ;;  %v25765_v4 = vld [vmem:[#allocation47_spill] sm:$0xff] }
 0x81d   : > { %v14935_v51 = vpop.f32.mrb[183].mxu1  ;;  %15309 = vmatprep.subr.bf16.mxu1 %v17464_v34 }
 0x81e   : > { %v22870_v62 = vadd.f32 %v14933_v31, %v22694_v44  ;;  %v14936_v22 = vadd.f32 %v14935_v51, %v14934_v24  ;;  %v25767_v31 = vld [vmem:[#allocation26_spill] sm:$0xff] }
 0x81f   : > { %8899 = vmatmul.mubr.bf16.gmra.mrb[32].mxu1 %v25761_v32 }
 0x820   : > { %25760 = vst [vmem:[#allocation104_spill] sm:$0xff] %v22870_v62  ;;  %v22874_v9 = vadd.f32 %v14936_v22, %v22698_v18  ;;  %8906 = vmatprep.mubr.bf16.mxu1 %v25763_v35  ;;  %v25769_v62 = vld [vmem:[#allocation19_spill] sm:$0xff] }
 0x822   : > { %25762 = vst [vmem:[#allocation105_spill] sm:$0xff] %v22874_v9  ;;  %v14937_v47 = vpop.f32.mrb[184].mxu1 }
 0x823   : > { %v14938_v63 = vpop.f32.mrb[185].mxu1 }
 0x824   : > { %v14939_v3 = vadd.f32 %v14938_v63, %v14937_v47  ;;  %v14940_v42 = vpop.f32.mrb[186].mxu1 }
 0x825   : > { %v14941_v40 = vpop.f32.mrb[187].mxu1 }
 0x826   : > { %v22878_v28 = vadd.f32 %v14939_v3, %v22702_v0  ;;  %v14942_v34 = vadd.f32 %v14941_v40, %v14940_v42  ;;  %v25771_v42 = vld [vmem:[#allocation79_spill] sm:$0xff] }
 0x827   : > { %8907 = vmatmul.mubr.bf16.gmra.mrb[36].mxu1 %v25765_v4  ;;  %v25805_v4 = vld [vmem:[#allocation61_spill] sm:$0xff] }
 0x828   : > { %25764 = vst [vmem:[#allocation106_spill] sm:$0xff] %v22878_v28  ;;  %v22882_v44 = vadd.f32 %v14942_v34, %v22706_v59  ;;  %8914 = vmatprep.mubr.bf16.mxu1 %v25767_v31  ;;  %v25773_v28 = vld [vmem:[#allocation78_spill] sm:$0xff] }
 0x82a   : > { %25766 = vst [vmem:[#allocation107_spill] sm:$0xff] %v22882_v44  ;;  %v14943_v18 = vpop.f32.mrb[188].mxu1 }
 0x82b   : > { %v14944_v24 = vpop.f32.mrb[189].mxu1 }
 0x82c   : > { %v14945_v51 = vadd.f32 %v14944_v24, %v14943_v18  ;;  %v14946_v22 = vpop.f32.mrb[190].mxu1 }
 0x82d   : > { %v14947_v9 = vpop.f32.mrb[191].mxu1 }
 0x82e   : > { %v22886_v63 = vadd.f32 %v14945_v51, %v22710_v12  ;;  %v14948_v47 = vadd.f32 %v14947_v9, %v14946_v22  ;;  %v25775_v9 = vld [vmem:[#allocation56_spill] sm:$0xff] }
 0x82f   : > { %8915 = vmatmul.mubr.bf16.gmra.mrb[40].mxu1 %v25769_v62  ;;  %v25803_v62 = vld [vmem:[#allocation80_spill] sm:$0xff] }
 0x830   : > { %25768 = vst [vmem:[#allocation108_spill] sm:$0xff] %v22886_v63  ;;  %v22890_v0 = vadd.f32 %v14948_v47, %v22714_v45  ;;  %8922 = vmatprep.mubr.bf16.mxu1 %v25771_v42  ;;  %v25777_v63 = vld [vmem:[#allocation59_spill] sm:$0xff] }
 0x832   : > { %25770 = vst [vmem:[#allocation109_spill] sm:$0xff] %v22890_v0  ;;  %v14949_v59 = vpop.f32.mrb[192].mxu1 }
 0x833   : > { %v14950_v3 = vpop.f32.mrb[193].mxu1 }
 0x834   : > { %v14951_v40 = vadd.f32 %v14950_v3, %v14949_v59  ;;  %v14952_v34 = vpop.f32.mrb[194].mxu1 }
 0x835   : > { %v14953_v44 = vpop.f32.mrb[195].mxu1 }
 0x836   : > { %v22894_v18 = vadd.f32 %v14951_v40, %v22718_v6  ;;  %v14954_v24 = vadd.f32 %v14953_v44, %v14952_v34  ;;  %v25779_v44 = vld [vmem:[#allocation62_spill] sm:$0xff] }
 0x837   : > { %8923 = vmatmul.mubr.bf16.gmra.mrb[44].mxu1 %v25773_v28  ;;  %v25801_v28 = vld [vmem:[#allocation69_spill] sm:$0xff] }
 0x838   : > { %25772 = vst [vmem:[#allocation110_spill] sm:$0xff] %v22894_v18  ;;  %v22898_v12 = vadd.f32 %v14954_v24, %v22722_v55  ;;  %8930 = vmatprep.mubr.bf16.mxu1 %v25775_v9  ;;  %v25781_v18 = vld [vmem:[#allocation85_spill] sm:$0xff] }
 0x83a   : > { %25774 = vst [vmem:[#allocation111_spill] sm:$0xff] %v22898_v12  ;;  %v14955_v45 = vpop.f32.mrb[196].mxu1 }
 0x83b   : > { %v14956_v51 = vpop.f32.mrb[197].mxu1 }
 0x83c   : > { %v14957_v22 = vadd.f32 %v14956_v51, %v14955_v45  ;;  %v14958_v47 = vpop.f32.mrb[198].mxu1 }
 0x83d   : > { %v14959_v0 = vpop.f32.mrb[199].mxu1 }
 0x83e   : > { %v22902_v59 = vadd.f32 %v14957_v22, %v22726_v48  ;;  %v14960_v3 = vadd.f32 %v14959_v0, %v14958_v47  ;;  %v25783_v0 = vld [vmem:[#allocation14_spill] sm:$0xff] }
 0x83f   : > { %8931 = vmatmul.mubr.bf16.gmra.mrb[48].mxu1 %v25777_v63 }
 0x840   : > { %25776 = vst [vmem:[#allocation112_spill] sm:$0xff] %v22902_v59  ;;  %v22906_v6 = vadd.f32 %v14960_v3, %v22730_v29  ;;  %8938 = vmatprep.mubr.bf16.mxu1 %v25779_v44  ;;  %v25785_v59 = vld [vmem:[#allocation10_spill] sm:$0xff] }
 0x842   : > { %25778 = vst [vmem:[#allocation113_spill] sm:$0xff] %v22906_v6  ;;  %v14961_v55 = vpop.f32.mrb[200].mxu1 }
 0x843   : > { %v14962_v40 = vpop.f32.mrb[201].mxu1 }
 0x844   : > { %v14963_v34 = vadd.f32 %v14962_v40, %v14961_v55  ;;  %v14964_v24 = vpop.f32.mrb[202].mxu1 }
 0x845   : > { %v14965_v12 = vpop.f32.mrb[203].mxu1 }
 0x846   : > { %v22910_v45 = vadd.f32 %v14963_v34, %v22734_v57  ;;  %v14966_v51 = vadd.f32 %v14965_v12, %v14964_v24  ;;  %v25787_v12 = vld [vmem:[#allocation25_spill] sm:$0xff] }
 0x847   : > { %8939 = vmatmul.mubr.bf16.gmra.mrb[52].mxu1 %v25781_v18 }
 0x848   : > { %25780 = vst [vmem:[#allocation114_spill] sm:$0xff] %v22910_v45  ;;  %v22914_v48 = vadd.f32 %v14966_v51, %v22738_v8  ;;  %8946 = vmatprep.mubr.bf16.mxu1 %v25783_v0 }
 0x84a   : > { %25782 = vst [vmem:[#allocation115_spill] sm:$0xff] %v22914_v48  ;;  %v14967_v29 = vpop.f32.mrb[204].mxu1 }
 0x84b   : > { %v14968_v22 = vpop.f32.mrb[205].mxu1 }
 0x84c   : > { %v14969_v47 = vadd.f32 %v14968_v22, %v14967_v29  ;;  %v14970_v3 = vpop.f32.mrb[206].mxu1  ;;  %v25788_v22 = vld [vmem:[#allocation21_spill] sm:$0xff] }
 0x84d   : > { %v14971_v6 = vpop.f32.mrb[207].mxu1 }
 0x84e   : > { %v22918_v55 = vadd.f32 %v14969_v47, %v22742_v53  ;;  %v14972_v40 = vadd.f32 %v14971_v6, %v14970_v3  ;;  %v25789_v53 = vld [vmem:[#allocation74_spill] sm:$0xff] }
 0x84f   : > { %8947 = vmatmul.mubr.bf16.gmra.mrb[56].mxu1 %v25785_v59 }
 0x850   : > { %25784 = vst [vmem:[#allocation116_spill] sm:$0xff] %v22918_v55  ;;  %v22922_v57 = vadd.f32 %v14972_v40, %v22746_v30  ;;  %8954 = vmatprep.mubr.bf16.mxu1 %v25787_v12  ;;  %v25790_v55 = vld [vmem:[#allocation72_spill] sm:$0xff] }
 0x852   : > { %25786 = vst [vmem:[#allocation117_spill] sm:$0xff] %v22922_v57  ;;  %v14989_v8 = vpop.f32.mrb[208].mxu1 }
 0x853   : > { %v14990_v34 = vpop.f32.mrb[209].mxu1 }
 0x854   : > { %v22925_v24 = vadd.f32 %v14990_v34, %v14989_v8  ;;  %v14992_v51 = vpop.f32.mrb[210].mxu1  ;;  %v25791_v8 = vld [vmem:[#allocation29_spill] sm:$0xff] }
 0x855   : > { %v14993_v48 = vpop.f32.mrb[211].mxu1 }
 0x856   : > { %v22927_v29 = vadd.f32 %v14993_v48, %v14992_v51 }
 0x857   : > { %8955 = vmatmul.mubr.bf16.gmra.mrb[60].mxu1 %v25788_v22 }
 0x858   : > { %8962 = vmatprep.mubr.bf16.mxu1 %v25789_v53  ;;  %v25792_v53 = vld [vmem:[#allocation30_spill] sm:$0xff] }
 0x85a   : > { %v14995_v6 = vpop.f32.mrb[212].mxu1 }
 0x85b   : > { %v14996_v47 = vpop.f32.mrb[213].mxu1 }
 0x85c   : > { %v22931_v3 = vadd.f32 %v14996_v47, %v14995_v6  ;;  %v14998_v30 = vpop.f32.mrb[214].mxu1  ;;  %v25793_v6 = vld [vmem:[#allocation41_spill] sm:$0xff] }
 0x85d   : > { %v14999_v40 = vpop.f32.mrb[215].mxu1 }
 0x85e   : > { %v22933_v57 = vadd.f32 %v14999_v40, %v14998_v30 }
 0x85f   : > { %8963 = vmatmul.mubr.bf16.gmra.mrb[64].mxu1 %v25790_v55 }
 0x860   : > { %8970 = vmatprep.mubr.bf16.mxu1 %v25791_v8  ;;  %v25794_v8 = vld [vmem:[#allocation82_spill] sm:$0xff] }
 0x862   : > { %v15001_v34 = vpop.f32.mrb[216].mxu1 }
 0x863   : > { %v15002_v45 = vpop.f32.mrb[217].mxu1 }
 0x864   : > { %v22937_v48 = vadd.f32 %v15002_v45, %v15001_v34  ;;  %v15004_v51 = vpop.f32.mrb[218].mxu1  ;;  %v25795_v45 = vld [vmem:[#allocation96_spill] sm:$0xff] }
 0x865   : > { %v15005_v22 = vpop.f32.mrb[219].mxu1 }
 0x866   : > { %v22939_v12 = vadd.f32 %v15005_v22, %v15004_v51 }
 0x867   : > { %8971 = vmatmul.mubr.bf16.gmra.mrb[68].mxu1 %v25792_v53 }
 0x868   : > { %8978 = vmatprep.mubr.bf16.mxu1 %v25793_v6  ;;  %v25796_v6 = vld [vmem:[#allocation97_spill] sm:$0xff] }
 0x86a   : > { %v15007_v47 = vpop.f32.mrb[220].mxu1 }
 0x86b   : > { %v15008_v59 = vpop.f32.mrb[221].mxu1 }
 0x86c   : > { %v22943_v30 = vadd.f32 %v15008_v59, %v15007_v47  ;;  %v15010_v40 = vpop.f32.mrb[222].mxu1  ;;  %v25797_v59 = vld [vmem:[#allocation24_spill] sm:$0xff] }
 0x86d   : > { %v15011_v55 = vpop.f32.mrb[223].mxu1 }
 0x86e   : > { %v22945_v0 = vadd.f32 %v15011_v55, %v15010_v40 }
 0x86f   : > { %8979 = vmatmul.mubr.bf16.gmra.mrb[72].mxu1 %v25794_v8 }
 0x870   : > { %8986 = vmatprep.mubr.bf16.mxu1 %v25795_v45  ;;  %v17465_v45 = vld [vmem:[%s24884_s5 + $0x300] sm:$0xff]  }
 0x872   : > { %v15013_v34 = vpop.f32.mrb[224].mxu1 }
 0x873   : > { %v15014_v18 = vpop.f32.mrb[225].mxu1 }
 0x874   : > { %v22949_v22 = vadd.f32 %v15014_v18, %v15013_v34  ;;  %v15016_v51 = vpop.f32.mrb[226].mxu1  ;;  %v17466_v18 = vld [vmem:[%s24884_s5 + $0x348] sm:$0xff]   ;;  %v25798_v34 = vld [vmem:[#allocation43_spill] sm:$0xff] }
 0x875   : > { %v15017_v53 = vpop.f32.mrb[227].mxu1 }
 0x876   : > { %v22951_v44 = vadd.f32 %v15017_v53, %v15016_v51  ;;  %v25799_v51 = vld [vmem:[#allocation52_spill] sm:$0xff] }
 0x877   : > { %8987 = vmatmul.mubr.bf16.gmra.mrb[76].mxu1 %v25796_v6 }
 0x878   : > { %9027 = vmatprep.mubr.bf16.mxu1 %v25797_v59  ;;  %v17468_v59 = vld [vmem:[%s24884_s5 + $0x350] sm:$0xff]  }
 0x87a   : > { %v15019_v47 = vpop.f32.mrb[228].mxu1 }
 0x87b   : > { %v15020_v63 = vpop.f32.mrb[229].mxu1 }
 0x87c   : > { %v22955_v55 = vadd.f32 %v15020_v63, %v15019_v47  ;;  %v15022_v40 = vpop.f32.mrb[230].mxu1  ;;  %v17467_v63 = vld [vmem:[%s24884_s5 + $0x308] sm:$0xff]  }
 0x87d   : > { %v15023_v8 = vpop.f32.mrb[231].mxu1 }
 0x87e   : > { %v22963_v53 = vadd.f32 %v15023_v8, %v15022_v40 }
 0x87f   : > { %9028 = vmatmul.mubr.bf16.vlgmr.msra.gmra.mrb[80].mxu1 %v25798_v34 }
 0x880   : > { %15310 = vmatpush3.bf16.msra.mxu1 %v17465_v45  ;;  %9035 = vmatprep.mubr.bf16.mxu1 %v25799_v51  ;;  %v17469_v45 = vld [vmem:[%s24884_s5 + $0x310] sm:$0xff]   ;;  %v25800_v51 = vld [vmem:[#allocation8_spill] sm:$0xff] }
 0x881   : > { %15311 = vmatprep.subr.bf16.mxu1 %v17466_v18  ;;  %v17470_v18 = vld [vmem:[%s24884_s5 + $0x358] sm:$0xff]  }
 0x882   : > { %v15025_v47 = vpop.f32.mrb[232].mxu1 }
 0x883   : > { %v15026_v6 = vpop.f32.mrb[233].mxu1 }
 0x884   : > { %v22973_v9 = vadd.f32 %v15026_v6, %v15025_v47  ;;  %v15028_v8 = vpop.f32.mrb[234].mxu1  ;;  %15312 = vmatpush3.bf16.msra.mxu1 %v17467_v63  ;;  %v17471_v6 = vld [vmem:[%s24884_s5 + $0x318] sm:$0xff]   ;;  %v17472_v63 = vld [vmem:[%s24884_s5 + $0x360] sm:$0xff]  }
 0x885   : > { %v15029_v40 = vpop.f32.mrb[235].mxu1  ;;  %15313 = vmatprep.subr.bf16.mxu1 %v17468_v59 }
 0x886   : > { %v22981_v34 = vadd.f32 %v15029_v40, %v15028_v8  ;;  %v17473_v40 = vld [vmem:[%s24884_s5 + $0x320] sm:$0xff]  }
 0x887   : > { %9036 = vmatmul.mubr.bf16.gmra.mrb[84].mxu1 %v25800_v51  ;;  %v25802_v51 = vld [vmem:[#allocation34_spill] sm:$0xff] }
 0x888   : > { %9043 = vmatprep.mubr.bf16.mxu1 %v25801_v28  ;;  %15314 = vmatpush3.bf16.msra.mxu1 %v17469_v45 }
 0x889   : > { %15315 = vmatprep.subr.bf16.mxu1 %v17470_v18  ;;  %v17474_v18 = vld [vmem:[%s24884_s5 + $0x368] sm:$0xff]  }
 0x88a   : > { %v15031_v59 = vpop.f32.mrb[236].mxu1 }
 0x88b   : > { %v15032_v47 = vpop.f32.mrb[237].mxu1 }
 0x88c   : > { %v22991_v42 = vadd.f32 %v15032_v47, %v15031_v59  ;;  %v15034_v8 = vpop.f32.mrb[238].mxu1  ;;  %15316 = vmatpush3.bf16.msra.mxu1 %v17471_v6  ;;  %v17475_v6 = vld [vmem:[%s24884_s5 + $0x328] sm:$0xff]  }
 0x88d   : > { %v15035_v45 = vpop.f32.mrb[239].mxu1  ;;  %15317 = vmatprep.subr.bf16.mxu1 %v17472_v63  ;;  %v17476_v63 = vld [vmem:[%s24884_s5 + $0x370] sm:$0xff]  }
 0x88e   : > { %v22999_v28 = vadd.f32 %v15035_v45, %v15034_v8  ;;  %v17477_v45 = vld [vmem:[%s24884_s5 + $0x330] sm:$0xff]  }
 0x88f   : > { %9044 = vmatmul.mubr.bf16.gmra.mrb[88].mxu1 %v25802_v51  ;;  %v25804_v51 = vld [vmem:[#allocation68_spill] sm:$0xff] }
 0x890   : > { %9051 = vmatprep.mubr.bf16.mxu1 %v25803_v62  ;;  %15318 = vmatpush3.bf16.msra.mxu1 %v17473_v40 }
 0x891   : > { %15319 = vmatprep.subr.bf16.mxu1 %v17474_v18  ;;  %v17478_v18 = vld [vmem:[%s24884_s5 + $0x378] sm:$0xff]  }
 0x892   : > { %v15037_v59 = vpop.f32.mrb[240].mxu1 }
 0x893   : > { %v15038_v47 = vpop.f32.mrb[241].mxu1 }
 0x894   : > { %v23009_v31 = vadd.f32 %v15038_v47, %v15037_v59  ;;  %v15040_v8 = vpop.f32.mrb[242].mxu1  ;;  %15320 = vmatpush3.bf16.msra.mxu1 %v17475_v6  ;;  %v17479_v6 = vld [vmem:[%s24884_s5 + $0x338] sm:$0xff]  }
 0x895   : > { %v15041_v40 = vpop.f32.mrb[243].mxu1  ;;  %15321 = vmatprep.subr.bf16.mxu1 %v17476_v63  ;;  %v17480_v63 = vld [vmem:[%s24884_s5 + $0x3c0] sm:$0xff]  }
 0x896   : > { %v23017_v62 = vadd.f32 %v15041_v40, %v15040_v8 }
 0x897   : > { %9052 = vmatmul.mubr.bf16.gmra.mrb[92].mxu1 %v25804_v51 }
 0x898   : > { %9059 = vmatprep.mubr.bf16.mxu1 %v25805_v4  ;;  %15322 = vmatpush3.bf16.msra.mxu1 %v17477_v45  ;;  %v25806_v45 = vld [vmem:[#allocation66_spill] sm:$0xff]  ;;  %v25807_v4 = vld [vmem:[#allocation16_spill] sm:$0xff] }
 0x899   : > { %15323 = vmatprep.subr.bf16.mxu1 %v17478_v18 }
 0x89a   : > { %v15043_v59 = vpop.f32.mrb[244].mxu1 }
 0x89b   : > { %v15044_v47 = vpop.f32.mrb[245].mxu1 }
 0x89c   : > { %v23027_v35 = vadd.f32 %v15044_v47, %v15043_v59  ;;  %v15046_v8 = vpop.f32.mrb[246].mxu1  ;;  %15324 = vmatpush3.bf16.msra.mxu1 %v17479_v6  ;;  %v25808_v59 = vld [vmem:[#allocation20_spill] sm:$0xff]  ;;  %v25809_v47 = vld [vmem:[#allocation23_spill] sm:$0xff] }
 0x89d   : > { %v15047_v40 = vpop.f32.mrb[247].mxu1  ;;  %15421 = vmatprep.subr.bf16.mxu1 %v17480_v63 }
 0x89e   : > { %v23029_v51 = vadd.f32 %v15047_v40, %v15046_v8 }
 0x89f   : > { %9060 = vmatmul.mubr.bf16.gmra.mrb[96].mxu1 %v25806_v45 }
 0x8a0   : > { %9067 = vmatprep.mubr.bf16.mxu1 %v25807_v4  ;;  %v25810_v4 = vld [vmem:[#allocation32_spill] sm:$0xff] }
 0x8a2   : > { %v15049_v32 = vpop.f32.mrb[248].mxu1 }
 0x8a3   : > { %v15050_v18 = vpop.f32.mrb[249].mxu1 }
 0x8a4   : > { %v23033_v43 = vadd.f32 %v15050_v18, %v15049_v32  ;;  %v15052_v58 = vpop.f32.mrb[250].mxu1  ;;  %v25811_v32 = vld [vmem:[#allocation35_spill] sm:$0xff] }
 0x8a5   : > { %v15053_v37 = vpop.f32.mrb[251].mxu1 }
 0x8a6   : > { %v23035_v5 = vadd.f32 %v15053_v37, %v15052_v58 }
 0x8a7   : > { %9068 = vmatmul.mubr.bf16.gmra.mrb[100].mxu1 %v25808_v59 }
 0x8a8   : > { %9075 = vmatprep.mubr.bf16.mxu1 %v25809_v47  ;;  %v25812_v47 = vld [vmem:[#allocation36_spill] sm:$0xff] }
 0x8aa   : > { %v15055_v6 = vpop.f32.mrb[252].mxu1 }
 0x8ab   : > { %v15056_v63 = vpop.f32.mrb[253].mxu1 }
 0x8ac   : > { %v23039_v8 = vadd.f32 %v15056_v63, %v15055_v6  ;;  %v15058_v40 = vpop.f32.mrb[254].mxu1  ;;  %v25813_v6 = vld [vmem:[#allocation9_spill] sm:$0xff] }
 0x8ad   : > { %v15059_v45 = vpop.f32.mrb[255].mxu1 }
 0x8ae   : > { %v23041_v16 = vadd.f32 %v15059_v45, %v15058_v40 }
 0x8af   : > { %9076 = vmatmul.mubr.bf16.gmra.mrb[104].mxu1 %v25810_v4 }
 0x8b0   : > { %9083 = vmatprep.mubr.bf16.mxu1 %v25811_v32  ;;  %v25814_v32 = vld [vmem:[#allocation11_spill] sm:$0xff] }
 0x8b2   : > { %v15061_v18 = vpop.f32.mrb[0].mxu1 }
 0x8b3   : > { %v15062_v56 = vpop.f32.mrb[1].mxu1 }
 0x8b4   : > { %v23045_v37 = vadd.f32 %v15062_v56, %v15061_v18  ;;  %v15064_v58 = vpop.f32.mrb[2].mxu1  ;;  %v25815_v56 = vld [vmem:[#allocation12_spill] sm:$0xff] }
 0x8b5   : > { %v15065_v59 = vpop.f32.mrb[3].mxu1 }
 0x8b6   : > { %v23047_v61 = vadd.f32 %v15065_v59, %v15064_v58 }
 0x8b7   : > { %9084 = vmatmul.mubr.bf16.gmra.mrb[108].mxu1 %v25812_v47 }
 0x8b8   : > { %9091 = vmatprep.mubr.bf16.mxu1 %v25813_v6  ;;  %v25816_v6 = vld [vmem:[#allocation87_spill] sm:$0xff] }
 0x8ba   : > { %v15067_v63 = vpop.f32.mrb[4].mxu1 }
 0x8bb   : > { %v15068_v52 = vpop.f32.mrb[5].mxu1 }
 0x8bc   : > { %v23051_v45 = vadd.f32 %v15068_v52, %v15067_v63  ;;  %v15070_v40 = vpop.f32.mrb[6].mxu1  ;;  %v25817_v52 = vld [vmem:[#allocation88_spill] sm:$0xff] }
 0x8bd   : > { %v15071_v4 = vpop.f32.mrb[7].mxu1 }
 0x8be   : > { %v23053_v1 = vadd.f32 %v15071_v4, %v15070_v40 }
 0x8bf   : > { %9092 = vmatmul.mubr.bf16.gmra.mrb[112].mxu1 %v25814_v32 }
 0x8c0   : > { %9099 = vmatprep.mubr.bf16.mxu1 %v25815_v56 }
 0x8c2   : > { %v15073_v18 = vpop.f32.mrb[8].mxu1 }
 0x8c3   : > { %v15074_v15 = vpop.f32.mrb[9].mxu1 }
 0x8c4   : > { %v23057_v59 = vadd.f32 %v15074_v15, %v15073_v18  ;;  %v15076_v58 = vpop.f32.mrb[10].mxu1 }
 0x8c5   : > { %v15077_v47 = vpop.f32.mrb[11].mxu1 }
 0x8c6   : > { %v23059_v17 = vadd.f32 %v15077_v47, %v15076_v58 }
 0x8c7   : > { %9100 = vmatmul.mubr.bf16.gmra.mrb[116].mxu1 %v25816_v6 }
 0x8c8   : > { %9107 = vmatprep.mubr.bf16.mxu1 %v25817_v52 }
 0x8ca   : > { %v15079_v63 = vpop.f32.mrb[12].mxu1 }
 0x8cb   : > { %v15080_v14 = vpop.f32.mrb[13].mxu1 }
 0x8cc   : > { %v23063_v4 = vadd.f32 %v15080_v14, %v15079_v63  ;;  %v15082_v40 = vpop.f32.mrb[14].mxu1 }
 0x8cd   : > { %v15083_v32 = vpop.f32.mrb[15].mxu1 }
 0x8ce   : > { %v23065_v50 = vadd.f32 %v15083_v32, %v15082_v40 }
 0x8cf   : > { %9108 = vmatmul.mubr.bf16.gmra.mrb[120].mxu1 %v22215_v46 }
 0x8d0   : > { %9115 = vmatprep.mubr.bf16.mxu1 %v22234_v60 }
 0x8d2   : > { %v15101_v15 = vpop.f32.mrb[16].mxu1 }
 0x8d3   : > { %v15102_v18 = vpop.f32.mrb[17].mxu1 }
 0x8d4   : > { %v15103_v47 = vadd.f32 %v15102_v18, %v15101_v15  ;;  %v15104_v58 = vpop.f32.mrb[18].mxu1 }
 0x8d5   : > { %v15105_v56 = vpop.f32.mrb[19].mxu1 }
 0x8d6   : > { %v23070_v6 = vadd.f32 %v15103_v47, %v22925_v24  ;;  %v15106_v52 = vadd.f32 %v15105_v56, %v15104_v58 }
 0x8d7   : > { %9116 = vmatmul.mubr.bf16.gmra.mrb[124].mxu1 %v22236_v11 }
 0x8d8   : > { %v23074_v14 = vadd.f32 %v15106_v52, %v22927_v29  ;;  %9123 = vmatprep.mubr.bf16.mxu1 %v22272_v54  ;;  %v25818_v54 = vld [vmem:[#allocation94_spill] sm:$0xff] }
 0x8da   : > { %v15107_v32 = vpop.f32.mrb[20].mxu1 }
 0x8db   : > { %v15108_v63 = vpop.f32.mrb[21].mxu1 }
 0x8dc   : > { %v15109_v40 = vadd.f32 %v15108_v63, %v15107_v32  ;;  %v15110_v60 = vpop.f32.mrb[22].mxu1 }
 0x8dd   : > { %v15111_v46 = vpop.f32.mrb[23].mxu1 }
 0x8de   : > { %v23078_v15 = vadd.f32 %v15109_v40, %v22931_v3  ;;  %v15112_v18 = vadd.f32 %v15111_v46, %v15110_v60  ;;  %v25819_v60 = vld [vmem:[#allocation95_spill] sm:$0xff] }
 0x8df   : > { %9124 = vmatmul.mubr.bf16.gmra.mrb[128].mxu1 %v22274_v21  ;;  %v25820_v21 = vld [vmem:[#allocation98_spill] sm:$0xff] }
 0x8e0   : > { %v23082_v24 = vadd.f32 %v15112_v18, %v22933_v57  ;;  %9131 = vmatprep.mubr.bf16.mxu1 %v22292_v49 }
 0x8e2   : > { %v15113_v29 = vpop.f32.mrb[24].mxu1 }
 0x8e3   : > { %v15114_v56 = vpop.f32.mrb[25].mxu1 }
 0x8e4   : > { %v15115_v52 = vadd.f32 %v15114_v56, %v15113_v29  ;;  %v15116_v47 = vpop.f32.mrb[26].mxu1 }
 0x8e5   : > { %v15117_v58 = vpop.f32.mrb[27].mxu1 }
 0x8e6   : > { %v23086_v32 = vadd.f32 %v15115_v52, %v22937_v48  ;;  %v15118_v63 = vadd.f32 %v15117_v58, %v15116_v47  ;;  %v25821_v52 = vld [vmem:[#allocation100_spill] sm:$0xff] }
 0x8e7   : > { %9132 = vmatmul.mubr.bf16.gmra.mrb[132].mxu1 %v25818_v54  ;;  %v25822_v54 = vld [vmem:[#allocation99_spill] sm:$0xff] }
 0x8e8   : > { %v23090_v46 = vadd.f32 %v15118_v63, %v22939_v12  ;;  %9139 = vmatprep.mubr.bf16.mxu1 %v25819_v60 }
 0x8ea   : > { %v15119_v57 = vpop.f32.mrb[28].mxu1 }
 0x8eb   : > { %v15120_v3 = vpop.f32.mrb[29].mxu1 }
 0x8ec   : > { %v15121_v40 = vadd.f32 %v15120_v3, %v15119_v57  ;;  %v15122_v18 = vpop.f32.mrb[30].mxu1 }
 0x8ed   : > { %v15123_v49 = vpop.f32.mrb[31].mxu1 }
 0x8ee   : > { %v23094_v29 = vadd.f32 %v15121_v40, %v22943_v30  ;;  %v15124_v56 = vadd.f32 %v15123_v49, %v15122_v18  ;;  %v25823_v30 = vld [vmem:[#allocation22_spill] sm:$0xff] }
 0x8ef   : > { %9140 = vmatmul.mubr.bf16.gmra.mrb[136].mxu1 %v25820_v21 }
 0x8f0   : > { %v23098_v48 = vadd.f32 %v15124_v56, %v22945_v0  ;;  %9147 = vmatprep.mubr.bf16.mxu1 %v25821_v52 }
 0x8f2   : > { %v15125_v12 = vpop.f32.mrb[32].mxu1 }
 0x8f3   : > { %v15126_v47 = vpop.f32.mrb[33].mxu1 }
 0x8f4   : > { %v15127_v58 = vadd.f32 %v15126_v47, %v15125_v12  ;;  %v15128_v63 = vpop.f32.mrb[34].mxu1  ;;  %v17481_v12 = vld [vmem:[%s24884_s5 + $0x380] sm:$0xff]  }
 0x8f5   : > { %v15129_v60 = vpop.f32.mrb[35].mxu1 }
 0x8f6   : > { %v23102_v57 = vadd.f32 %v15127_v58, %v22949_v22  ;;  %v15130_v3 = vadd.f32 %v15129_v60, %v15128_v63  ;;  %v17482_v22 = vld [vmem:[%s24884_s5 + $0x3c8] sm:$0xff]   ;;  %v25824_v58 = vld [vmem:[#allocation17_spill] sm:$0xff] }
 0x8f7   : > { %9148 = vmatmul.mubr.bf16.gmra.mrb[140].mxu1 %v25822_v54 }
 0x8f8   : > { %v23106_v49 = vadd.f32 %v15130_v3, %v22951_v44  ;;  %9765 = vmatprep.mubr.bf16.mxu1 %v25823_v30  ;;  %v25825_v3 = vld [vmem:[#allocation40_spill] sm:$0xff]  ;;  %v17483_v30 = vld [vmem:[%s24884_s5 + $0x388] sm:$0xff]  }
 0x8fa   : > { %v15131_v0 = vpop.f32.mrb[36].mxu1 }
 0x8fb   : > { %v15132_v40 = vpop.f32.mrb[37].mxu1 }
 0x8fc   : > { %v15133_v18 = vadd.f32 %v15132_v40, %v15131_v0  ;;  %v15134_v56 = vpop.f32.mrb[38].mxu1  ;;  %v17484_v0 = vld [vmem:[%s24884_s5 + $0x3d0] sm:$0xff]  }
 0x8fd   : > { %v15135_v47 = vpop.f32.mrb[39].mxu1 }
 0x8fe   : > { %v23116_v60 = vadd.f32 %v15133_v18, %v22955_v55  ;;  %v15136_v44 = vadd.f32 %v15135_v47, %v15134_v56  ;;  %v17486_v47 = vld [vmem:[%s24884_s5 + $0x3d8] sm:$0xff]  }
 0x8ff   : > { %9766 = vmatmul.mubr.bf16.vlgmr.msra.gmra.mrb[144].mxu1 %v25824_v58  ;;  %v25826_v58 = vld [vmem:[#allocation38_spill] sm:$0xff] }
 0x900   : > { %v23120_v63 = vadd.f32 %v15136_v44, %v22963_v53  ;;  %15422 = vmatpush3.bf16.msra.mxu1 %v17481_v12  ;;  %9773 = vmatprep.mubr.bf16.mxu1 %v25825_v3  ;;  %v17485_v53 = vld [vmem:[%s24884_s5 + $0x390] sm:$0xff]  }
 0x901   : > { %15423 = vmatprep.subr.bf16.mxu1 %v17482_v22 }
 0x902   : > { %v15137_v55 = vpop.f32.mrb[40].mxu1 }
 0x903   : > { %v15138_v40 = vpop.f32.mrb[41].mxu1 }
 0x904   : > { %v15139_v18 = vadd.f32 %v15138_v40, %v15137_v55  ;;  %v15140_v56 = vpop.f32.mrb[42].mxu1  ;;  %15424 = vmatpush3.bf16.msra.mxu1 %v17483_v30  ;;  %v25827_v30 = vld [vmem:[#allocation53_spill] sm:$0xff] }
 0x905   : > { %v15141_v12 = vpop.f32.mrb[43].mxu1  ;;  %15425 = vmatprep.subr.bf16.mxu1 %v17484_v0  ;;  %v17487_v0 = vld [vmem:[%s24884_s5 + $0x398] sm:$0xff]   ;;  %v17488_v55 = vld [vmem:[%s24884_s5 + $0x3e0] sm:$0xff]  }
 0x906   : > { %v23136_v22 = vadd.f32 %v15139_v18, %v22973_v9  ;;  %v15142_v44 = vadd.f32 %v15141_v12, %v15140_v56 }
 0x907   : > { %9774 = vmatmul.mubr.bf16.gmra.mrb[148].mxu1 %v25826_v58  ;;  %v25828_v58 = vld [vmem:[#allocation50_spill] sm:$0xff] }
 0x908   : > { %v23140_v3 = vadd.f32 %v15142_v44, %v22981_v34  ;;  %9781 = vmatprep.mubr.bf16.mxu1 %v25827_v30  ;;  %15426 = vmatpush3.bf16.msra.mxu1 %v17485_v53  ;;  %v17489_v34 = vld [vmem:[%s24884_s5 + $0x3a0] sm:$0xff]   ;;  %v17490_v53 = vld [vmem:[%s24884_s5 + $0x3e8] sm:$0xff]  }
 0x909   : > { %15427 = vmatprep.subr.bf16.mxu1 %v17486_v47 }
 0x90a   : > { %v15143_v9 = vpop.f32.mrb[44].mxu1 }
 0x90b   : > { %v15144_v40 = vpop.f32.mrb[45].mxu1 }
 0x90c   : > { %v15145_v18 = vadd.f32 %v15144_v40, %v15143_v9  ;;  %v15146_v56 = vpop.f32.mrb[46].mxu1  ;;  %15428 = vmatpush3.bf16.msra.mxu1 %v17487_v0  ;;  %v25829_v0 = vld [vmem:[#allocation7_spill] sm:$0xff] }
 0x90d   : > { %v15147_v12 = vpop.f32.mrb[47].mxu1  ;;  %15429 = vmatprep.subr.bf16.mxu1 %v17488_v55  ;;  %v17491_v55 = vld [vmem:[%s24884_s5 + $0x3a8] sm:$0xff]   ;;  %v17492_v9 = vld [vmem:[%s24884_s5 + $0x3f0] sm:$0xff]  }
 0x90e   : > { %v23156_v47 = vadd.f32 %v15145_v18, %v22991_v42  ;;  %v15148_v44 = vadd.f32 %v15147_v12, %v15146_v56 }
 0x90f   : > { %9782 = vmatmul.mubr.bf16.gmra.mrb[152].mxu1 %v25828_v58  ;;  %v25830_v58 = vld [vmem:[#allocation48_spill] sm:$0xff] }
 0x910   : > { %v23160_v30 = vadd.f32 %v15148_v44, %v22999_v28  ;;  %9789 = vmatprep.mubr.bf16.mxu1 %v25829_v0  ;;  %15430 = vmatpush3.bf16.msra.mxu1 %v17489_v34  ;;  %v17493_v28 = vld [vmem:[%s24884_s5 + $0x3b0] sm:$0xff]   ;;  %v17494_v34 = vld [vmem:[%s24884_s5 + $0x3f8] sm:$0xff]  }
 0x911   : > { %15431 = vmatprep.subr.bf16.mxu1 %v17490_v53 }
 0x912   : > { %v15149_v42 = vpop.f32.mrb[48].mxu1 }
 0x913   : > { %v15150_v40 = vpop.f32.mrb[49].mxu1 }
 0x914   : > { %v15151_v18 = vadd.f32 %v15150_v40, %v15149_v42  ;;  %v15152_v56 = vpop.f32.mrb[50].mxu1  ;;  %15432 = vmatpush3.bf16.msra.mxu1 %v17491_v55  ;;  %v25831_v55 = vld [vmem:[#allocation63_spill] sm:$0xff]  ;;  %v17496_v42 = vld [vmem:[%s24884_s5 + $0x440] sm:$0xff]  }
 0x915   : > { %v15153_v12 = vpop.f32.mrb[51].mxu1  ;;  %15433 = vmatprep.subr.bf16.mxu1 %v17492_v9  ;;  %v17495_v9 = vld [vmem:[%s24884_s5 + $0x3b8] sm:$0xff]  }
 0x916   : > { %v23176_v53 = vadd.f32 %v15151_v18, %v23009_v31  ;;  %v15154_v44 = vadd.f32 %v15153_v12, %v15152_v56 }
 0x917   : > { %9790 = vmatmul.mubr.bf16.gmra.mrb[156].mxu1 %v25830_v58 }
 0x918   : > { %v23180_v0 = vadd.f32 %v15154_v44, %v23017_v62  ;;  %9797 = vmatprep.mubr.bf16.mxu1 %v25831_v55  ;;  %15434 = vmatpush3.bf16.msra.mxu1 %v17493_v28  ;;  %v25832_v44 = vld [vmem:[#allocation67_spill] sm:$0xff] }
 0x919   : > { %15435 = vmatprep.subr.bf16.mxu1 %v17494_v34  ;;  %v25833_v34 = vld [vmem:[#allocation39_spill] sm:$0xff] }
 0x91a   : > { %v15155_v31 = vpop.f32.mrb[52].mxu1 }
 0x91b   : > { %v15156_v40 = vpop.f32.mrb[53].mxu1 }
 0x91c   : > { %v15157_v18 = vadd.f32 %v15156_v40, %v15155_v31  ;;  %v15158_v56 = vpop.f32.mrb[54].mxu1  ;;  %15436 = vmatpush3.bf16.msra.mxu1 %v17495_v9  ;;  %v25834_v40 = vld [vmem:[#allocation37_spill] sm:$0xff] }
 0x91d   : > { %v15159_v12 = vpop.f32.mrb[55].mxu1  ;;  %15533 = vmatprep.subr.bf16.mxu1 %v17496_v42 }
 0x91e   : > { %v23190_v62 = vadd.f32 %v15157_v18, %v23027_v35  ;;  %v15160_v28 = vadd.f32 %v15159_v12, %v15158_v56  ;;  %v25835_v18 = vld [vmem:[#allocation58_spill] sm:$0xff] }
 0x91f   : > { %9798 = vmatmul.mubr.bf16.gmra.mrb[160].mxu1 %v25832_v44 }
 0x920   : > { %v23194_v58 = vadd.f32 %v15160_v28, %v23029_v51  ;;  %9805 = vmatprep.mubr.bf16.mxu1 %v25833_v34 }
 0x922   : > { %v15161_v55 = vpop.f32.mrb[56].mxu1 }
 0x923   : > { %v15162_v54 = vpop.f32.mrb[57].mxu1 }
 0x924   : > { %v15163_v52 = vadd.f32 %v15162_v54, %v15161_v55  ;;  %v15164_v21 = vpop.f32.mrb[58].mxu1  ;;  %v25836_v55 = vld [vmem:[#allocation83_spill] sm:$0xff] }
 0x925   : > { %v15165_v31 = vpop.f32.mrb[59].mxu1 }
 0x926   : > { %v23198_v9 = vadd.f32 %v15163_v52, %v23033_v43  ;;  %v15166_v42 = vadd.f32 %v15165_v31, %v15164_v21  ;;  %v25837_v43 = vld [vmem:[#allocation84_spill] sm:$0xff] }
 0x927   : > { %9806 = vmatmul.mubr.bf16.gmra.mrb[164].mxu1 %v25834_v40 }
 0x928   : > { %v23202_v35 = vadd.f32 %v15166_v42, %v23035_v5  ;;  %9813 = vmatprep.mubr.bf16.mxu1 %v25835_v18 }
 0x92a   : > { %v15167_v51 = vpop.f32.mrb[60].mxu1 }
 0x92b   : > { %v15168_v56 = vpop.f32.mrb[61].mxu1 }
 0x92c   : > { %v15169_v12 = vadd.f32 %v15168_v56, %v15167_v51  ;;  %v15170_v28 = vpop.f32.mrb[62].mxu1  ;;  %v25838_v56 = vld [vmem:[#allocation73_spill] sm:$0xff] }
 0x92d   : > { %v15171_v44 = vpop.f32.mrb[63].mxu1 }
 0x92e   : > { %v23206_v54 = vadd.f32 %v15169_v12, %v23039_v8  ;;  %v15172_v34 = vadd.f32 %v15171_v44, %v15170_v28  ;;  %v25839_v12 = vld [vmem:[#allocation65_spill] sm:$0xff] }
 0x92f   : > { %9814 = vmatmul.mubr.bf16.gmra.mrb[168].mxu1 %v25836_v55 }
 0x930   : > { %v23210_v21 = vadd.f32 %v15172_v34, %v23041_v16  ;;  %9821 = vmatprep.mubr.bf16.mxu1 %v25837_v43 }
 0x932   : > { %v15173_v5 = vpop.f32.mrb[64].mxu1 }
 0x933   : > { %v15174_v52 = vpop.f32.mrb[65].mxu1 }
 0x934   : > { %v15175_v31 = vadd.f32 %v15174_v52, %v15173_v5  ;;  %v15176_v42 = vpop.f32.mrb[66].mxu1  ;;  %v25840_v52 = vld [vmem:[#allocation64_spill] sm:$0xff] }
 0x935   : > { %v15177_v40 = vpop.f32.mrb[67].mxu1 }
 0x936   : > { %v23214_v18 = vadd.f32 %v15175_v31, %v23045_v37  ;;  %v15178_v51 = vadd.f32 %v15177_v40, %v15176_v42  ;;  %v25841_v31 = vld [vmem:[#allocation13_spill] sm:$0xff] }
 0x937   : > { %9822 = vmatmul.mubr.bf16.gmra.mrb[172].mxu1 %v25838_v56 }
 0x938   : > { %v23218_v8 = vadd.f32 %v15178_v51, %v23047_v61  ;;  %9829 = vmatprep.mubr.bf16.mxu1 %v25839_v12 }
 0x93a   : > { %v15179_v16 = vpop.f32.mrb[68].mxu1 }
 0x93b   : > { %v15180_v28 = vpop.f32.mrb[69].mxu1 }
 0x93c   : > { %v15181_v44 = vadd.f32 %v15180_v28, %v15179_v16  ;;  %v15182_v34 = vpop.f32.mrb[70].mxu1  ;;  %v25842_v28 = vld [vmem:[#allocation18_spill] sm:$0xff] }
 0x93d   : > { %v15183_v55 = vpop.f32.mrb[71].mxu1 }
 0x93e   : > { %v23222_v43 = vadd.f32 %v15181_v44, %v23051_v45  ;;  %v15184_v5 = vadd.f32 %v15183_v55, %v15182_v34  ;;  %v25843_v44 = vld [vmem:[#allocation71_spill] sm:$0xff] }
 0x93f   : > { %9830 = vmatmul.mubr.bf16.gmra.mrb[176].mxu1 %v25840_v52 }
 0x940   : > { %v23226_v37 = vadd.f32 %v15184_v5, %v23053_v1  ;;  %9837 = vmatprep.mubr.bf16.mxu1 %v25841_v31 }
 0x942   : > { %v15185_v61 = vpop.f32.mrb[72].mxu1 }
 0x943   : > { %v15186_v42 = vpop.f32.mrb[73].mxu1 }
 0x944   : > { %v15187_v40 = vadd.f32 %v15186_v42, %v15185_v61  ;;  %v15188_v51 = vpop.f32.mrb[74].mxu1 }
 0x945   : > { %v15189_v56 = vpop.f32.mrb[75].mxu1 }
 0x946   : > { %v23230_v12 = vadd.f32 %v15187_v40, %v23057_v59  ;;  %v15190_v16 = vadd.f32 %v15189_v56, %v15188_v51 }
 0x947   : > { %9838 = vmatmul.mubr.bf16.gmra.mrb[180].mxu1 %v25842_v28 }
 0x948   : > { %v23234_v45 = vadd.f32 %v15190_v16, %v23059_v17  ;;  %9845 = vmatprep.mubr.bf16.mxu1 %v25843_v44 }
 0x94a   : > { %v15191_v1 = vpop.f32.mrb[76].mxu1 }
 0x94b   : > { %v15192_v34 = vpop.f32.mrb[77].mxu1 }
 0x94c   : > { %v15193_v55 = vadd.f32 %v15192_v34, %v15191_v1  ;;  %v15194_v5 = vpop.f32.mrb[78].mxu1  ;;  %v25845_v1 = vld [vmem:[#allocation42_spill] sm:$0xff] }
 0x94d   : > { %v15195_v52 = vpop.f32.mrb[79].mxu1 }
 0x94e   : > { %v23238_v31 = vadd.f32 %v15193_v55, %v23063_v4  ;;  %v15196_v61 = vadd.f32 %v15195_v52, %v15194_v5  ;;  %v25844_v4 = vld [vmem:[#allocation86_spill] sm:$0xff] }
 0x94f   : > { %9846 = vmatmul.mubr.bf16.gmra.mrb[184].mxu1 %v25740_v13 }
 0x950   : > { %v23242_v59 = vadd.f32 %v15196_v61, %v23065_v50  ;;  %9853 = vmatprep.mubr.bf16.mxu1 %v25742_v7 }
 0x952   : > { %v15213_v17 = vpop.f32.mrb[80].mxu1 }
 0x953   : > { %v15214_v42 = vpop.f32.mrb[81].mxu1 }
 0x954   : > { %v15215_v40 = vadd.f32 %v15214_v42, %v15213_v17  ;;  %v15216_v51 = vpop.f32.mrb[82].mxu1  ;;  %v25846_v17 = vld [vmem:[#allocation54_spill] sm:$0xff] }
 0x955   : > { %v15217_v56 = vpop.f32.mrb[83].mxu1 }
 0x956   : > { %v15218_v16 = vadd.f32 %v15217_v56, %v15216_v51  ;;  %v9030_v28 = vadd.f32 %v15215_v40, %v23070_v6 }
 0x957   : > { %9854 = vmatmul.mubr.bf16.gmra.mrb[188].mxu1 %v25743_v19 }
 0x958   : > { %9861 = vmatprep.mubr.bf16.mxu1 %v25745_v20  ;;  %v23249_v44 = vadd.f32 %v9030_v28, %v25844_v4  ;;  %v9033_v13 = vadd.f32 %v15218_v16, %v23074_v14 }
 0x95a   : > { %v15219_v50 = vpop.f32.mrb[84].mxu1  ;;  %v23253_v7 = vadd.f32 %v9033_v13, %v25845_v1 }
 0x95b   : > { %v15220_v34 = vpop.f32.mrb[85].mxu1 }
 0x95c   : > { %v15221_v55 = vadd.f32 %v15220_v34, %v15219_v50  ;;  %v15222_v5 = vpop.f32.mrb[86].mxu1 }
 0x95d   : > { %v15223_v52 = vpop.f32.mrb[87].mxu1 }
 0x95e   : > { %v15224_v61 = vadd.f32 %v15223_v52, %v15222_v5  ;;  %v9038_v6 = vadd.f32 %v15221_v55, %v23078_v15 }
 0x95f   : > { %9862 = vmatmul.mubr.bf16.gmra.mrb[192].mxu1 %v25746_v38  ;;  %v6442_v38 = vld [vmem:[%s24888_s9 + $0x228] sm:$0xff] }
 0x960   : > { %9869 = vmatprep.mubr.bf16.mxu1 %v25747_v2  ;;  %v23259_v19 = vadd.f32 %v9038_v6, %v22758_v27  ;;  %v9041_v20 = vadd.f32 %v15224_v61, %v23082_v24  ;;  %v6444_v27 = vld [vmem:[%s24888_s9 + $0x238] sm:$0xff]  ;;  %v25847_v2 = vld [vmem:[#allocation5_spill] sm:$0xff] }
 0x961   : > { %v25848_v24 = vld [vmem:[#allocation45_spill] sm:$0xff]  ;;  %v6732_v55 = vmul.f32 %v6444_v27, %v25847_v2 }
 0x962   : > { %v15225_v14 = vpop.f32.mrb[88].mxu1  ;;  %v23263_v42 = vadd.f32 %v9041_v20, %v25846_v17  ;;  %v25849_v4 = vrot.slane %v25848_v24, 7 }
 0x963   : > { %v15226_v40 = vpop.f32.mrb[89].mxu1 }
 0x964   : > { %v15227_v51 = vadd.f32 %v15226_v40, %v15225_v14  ;;  %v15228_v56 = vpop.f32.mrb[90].mxu1  ;;  %v6592_v50 = vsel %vm1252_vm0, %v25849_v4, %v25847_v2 }
 0x965   : > { %v15229_v16 = vpop.f32.mrb[91].mxu1  ;;  %v6730_v34 = vmul.f32 %v6592_v50, %v6442_v38 }
 0x966   : > { %v15230_v28 = vadd.f32 %v15229_v16, %v15228_v56  ;;  %v9046_v15 = vadd.f32 %v15227_v51, %v23086_v32 }
 0x967   : > { %9870 = vmatmul.mubr.bf16.gmra.mrb[196].mxu1 %v22062_v25  ;;  %v6984_v17 = vpack.c.bf16 %v6732_v55, %v6730_v34 }
 0x968   : > { %9877 = vmatprep.mubr.bf16.mxu1 %v22382_v39  ;;  %v23280_v32 = vadd.f32 %v9046_v15, %v22766_v33  ;;  %v9049_v25 = vadd.f32 %v15230_v28, %v23090_v46  ;;  %v6441_v39 = vld [vmem:[%s24888_s9 + $0x220] sm:$0xff]  ;;  %v6443_v33 = vld [vmem:[%s24888_s9 + $0x230] sm:$0xff]  ;;  %v25851_v46 = vld [vmem:[#allocation46_spill] sm:$0xff] }
 0x969   : > { %v25852_v40 = vrot.slane %v25851_v46, 7  ;;  %v6731_v15 = vmul.f32 %v6443_v33, %v25847_v2  ;;  %v25856_v33 = vld [vmem:[#allocation33_spill] sm:$0xff]  ;;  %v17499_v46 = vld [vmem:[%s24884_s5 + $0x408] sm:$0xff]  }
 0x96a   : > { %v15231_v1 = vpop.f32.mrb[92].mxu1  ;;  %v23285_v5 = vadd.f32 %v9049_v25, %v22770_v41 }
 0x96b   : > { %v15232_v52 = vpop.f32.mrb[93].mxu1  ;;  %v6591_v41 = vsel %vm1252_vm0, %v25852_v40, %v25847_v2  ;;  %v25857_v40 = vld [vmem:[#allocation76_spill] sm:$0xff] }
 0x96c   : > { %v15233_v61 = vadd.f32 %v15232_v52, %v15231_v1  ;;  %v15234_v6 = vpop.f32.mrb[94].mxu1  ;;  %v6729_v28 = vmul.f32 %v6591_v41, %v6441_v39  ;;  %v25854_v52 = vld [vmem:[#allocation70_spill] sm:$0xff] }
 0x96d   : > { %v15235_v20 = vpop.f32.mrb[95].mxu1 }
 0x96e   : > { %v15236_v14 = vadd.f32 %v15235_v20, %v15234_v6  ;;  %v9054_v51 = vadd.f32 %v15233_v61, %v23094_v29  ;;  %v6983_v29 = vpack.c.bf16 %v6731_v15, %v6729_v28  ;;  %v25859_v28 = vld [vmem:[#allocation75_spill] sm:$0xff] }
 0x96f   : > { %9878 = vmatmul.mubr.bf16.gmra.mrb[200].mxu1 %v22142_v10 }
 0x970   : > { %9885 = vmatprep.mubr.bf16.mxu1 %v6984_v17  ;;  %v23301_v56 = vadd.f32 %v9054_v51, %v22774_v23  ;;  %v9057_v16 = vadd.f32 %v15236_v14, %v23098_v48  ;;  %v25853_v23 = vld [vmem:[#allocation49_spill] sm:$0xff] }
 0x971   : > { %v17497_v14 = vld [vmem:[%s24884_s5 + $0x400] sm:$0xff]  }
 0x972   : > { %v15237_v38 = vpop.f32.mrb[96].mxu1  ;;  %v23306_v27 = vadd.f32 %v9057_v16, %v22778_v26  ;;  %v17500_v16 = vld [vmem:[%s24884_s5 + $0x450] sm:$0xff]  }
 0x973   : > { %v15238_v24 = vpop.f32.mrb[97].mxu1 }
 0x974   : > { %v15239_v4 = vadd.f32 %v15238_v24, %v15237_v38  ;;  %v15240_v50 = vpop.f32.mrb[98].mxu1 }
 0x975   : > { %v15241_v25 = vpop.f32.mrb[99].mxu1 }
 0x976   : > { %v15242_v1 = vadd.f32 %v15241_v25, %v15240_v50  ;;  %v9062_v10 = vadd.f32 %v15239_v4, %v23102_v57  ;;  %v17501_v50 = vld [vmem:[%s24884_s5 + $0x410] sm:$0xff]  }
 0x977   : > { %9886 = vmatmul.mubr.bf16.gmra.mrb[204].mxu1 %v6983_v29 }
 0x978   : > { %9926 = vmatprep.mubr.bf16.mxu1 %v21067_v36  ;;  %v23311_v48 = vadd.f32 %v9062_v10, %v25853_v23  ;;  %v9065_v34 = vadd.f32 %v15242_v1, %v23106_v49  ;;  %v17498_v36 = vld [vmem:[%s24884_s5 + $0x448] sm:$0xff]   ;;  %v25855_v49 = vld [vmem:[#allocation15_spill] sm:$0xff] }
 0x979   : > { %v25861_v10 = vld [vmem:[#allocation31_spill] sm:$0xff] }
 0x97a   : > { %v15243_v55 = vpop.f32.mrb[100].mxu1  ;;  %v23315_v26 = vadd.f32 %v9065_v34, %v25854_v52  ;;  %v25862_v23 = vld [vmem:[#allocation51_spill] sm:$0xff]  ;;  %v17503_v34 = vld [vmem:[%s24884_s5 + $0x418] sm:$0xff]  }
 0x97b   : > { %v15244_v61 = vpop.f32.mrb[101].mxu1 }
 0x97c   : > { %v15245_v6 = vadd.f32 %v15244_v61, %v15243_v55  ;;  %v15246_v20 = vpop.f32.mrb[102].mxu1  ;;  %v25863_v55 = vld [vmem:[#allocation81_spill] sm:$0xff] }
 0x97d   : > { %v15247_v57 = vpop.f32.mrb[103].mxu1 }
 0x97e   : > { %v15248_v17 = vadd.f32 %v15247_v57, %v15246_v20  ;;  %v9070_v39 = vadd.f32 %v15245_v6, %v23116_v60  ;;  %v17504_v6 = vld [vmem:[%s24884_s5 + $0x460] sm:$0xff]  }
 0x97f   : > { %9927 = vmatmul.mubr.bf16.vlgmr.msra.gmra.mrb[208].mxu1 %v25855_v49  ;;  %v25865_v20 = vld [vmem:[#allocation77_spill] sm:$0xff] }
 0x980   : > { %15534 = vmatpush3.bf16.msra.mxu1 %v17497_v14  ;;  %9934 = vmatprep.mubr.bf16.mxu1 %v25856_v33  ;;  %v23330_v41 = vadd.f32 %v9070_v39, %v25857_v40  ;;  %v9073_v51 = vadd.f32 %v15248_v17, %v23120_v63  ;;  %v17502_v63 = vld [vmem:[%s24884_s5 + $0x458] sm:$0xff]   ;;  %v17505_v39 = vld [vmem:[%s24884_s5 + $0x420] sm:$0xff]  }
 0x981   : > { %15535 = vmatprep.subr.bf16.mxu1 %v17498_v36  ;;  %v25867_v40 = vld [vmem:[#allocation44_spill] sm:$0xff] }
 0x982   : > { %25858 = vst [vmem:[#allocation24_spill] sm:$0xff] %v23330_v41  ;;  %v15249_v60 = vpop.f32.mrb[104].mxu1  ;;  %v23337_v15 = vadd.f32 %v9073_v51, %v25859_v28  ;;  %v25868_v51 = vld [vmem:[#allocation55_spill] sm:$0xff] }
 0x983   : > { %v15250_v38 = vpop.f32.mrb[105].mxu1 }
 0x984   : > { %25860 = vst [vmem:[#allocation43_spill] sm:$0xff] %v23337_v15  ;;  %v15251_v24 = vadd.f32 %v15250_v38, %v15249_v60  ;;  %v15252_v4 = vpop.f32.mrb[106].mxu1  ;;  %15536 = vmatpush3.bf16.msra.mxu1 %v17499_v46  ;;  %v25869_v60 = vld [vmem:[#allocation27_spill] sm:$0xff] }
 0x985   : > { %v15253_v25 = vpop.f32.mrb[107].mxu1  ;;  %15537 = vmatprep.subr.bf16.mxu1 %v17500_v16  ;;  %v17507_v16 = vld [vmem:[%s24884_s5 + $0x428] sm:$0xff]  }
 0x986   : > { %v15254_v29 = vadd.f32 %v15253_v25, %v15252_v4  ;;  %v9078_v1 = vadd.f32 %v15251_v24, %v23136_v22  ;;  %v17508_v24 = vld [vmem:[%s24884_s5 + $0x470] sm:$0xff]   ;;  %v25871_v4 = vld [vmem:[#allocation101_spill] sm:$0xff] }
 0x987   : > { %9935 = vmatmul.mubr.bf16.gmra.mrb[212].mxu1 %v25861_v10 }
 0x988   : > { %9942 = vmatprep.mubr.bf16.mxu1 %v25862_v23  ;;  %15538 = vmatpush3.bf16.msra.mxu1 %v17501_v50  ;;  %v23352_v52 = vadd.f32 %v9078_v1, %v25863_v55  ;;  %v9081_v61 = vadd.f32 %v15254_v29, %v23140_v3  ;;  %v17506_v3 = vld [vmem:[%s24884_s5 + $0x468] sm:$0xff]   ;;  %v17509_v1 = vld [vmem:[%s24884_s5 + $0x430] sm:$0xff]   ;;  %v25873_v55 = vld [vmem:[#allocation57_spill] sm:$0xff] }
 0x989   : > { %15539 = vmatprep.subr.bf16.mxu1 %v17502_v63 }
 0x98a   : > { %25864 = vst [vmem:[#allocation22_spill] sm:$0xff] %v23352_v52  ;;  %v15255_v22 = vpop.f32.mrb[108].mxu1  ;;  %v23359_v14 = vadd.f32 %v9081_v61, %v25865_v20  ;;  %v25875_v20 = vld [vmem:[#allocation102_spill] sm:$0xff] }
 0x98b   : > { %v15256_v57 = vpop.f32.mrb[109].mxu1 }
 0x98c   : > { %25866 = vst [vmem:[#allocation17_spill] sm:$0xff] %v23359_v14  ;;  %v15257_v36 = vadd.f32 %v15256_v57, %v15255_v22  ;;  %v15258_v17 = vpop.f32.mrb[110].mxu1  ;;  %15540 = vmatpush3.bf16.msra.mxu1 %v17503_v34  ;;  %v17511_v22 = vld [vmem:[%s24884_s5 + $0x438] sm:$0xff]  }
 0x98d   : > { %v15259_v49 = vpop.f32.mrb[111].mxu1  ;;  %15541 = vmatprep.subr.bf16.mxu1 %v17504_v6  ;;  %v25874_v6 = vld [vmem:[#allocation60_spill] sm:$0xff] }
 0x98e   : > { %v15260_v33 = vadd.f32 %v15259_v49, %v15258_v17  ;;  %v9086_v46 = vadd.f32 %v15257_v36, %v23156_v47  ;;  %v25877_v17 = vld [vmem:[#allocation103_spill] sm:$0xff] }
 0x98f   : > { %9943 = vmatmul.mubr.bf16.gmra.mrb[216].mxu1 %v25867_v40  ;;  %v25879_v40 = vld [vmem:[#allocation47_spill] sm:$0xff] }
 0x990   : > { %9950 = vmatprep.mubr.bf16.mxu1 %v25868_v51  ;;  %15542 = vmatpush3.bf16.msra.mxu1 %v17505_v39  ;;  %v23374_v28 = vadd.f32 %v9086_v46, %v25869_v60  ;;  %v9089_v38 = vadd.f32 %v15260_v33, %v23160_v30  ;;  %v17510_v30 = vld [vmem:[%s24884_s5 + $0x478] sm:$0xff]  }
 0x991   : > { %15543 = vmatprep.subr.bf16.mxu1 %v17506_v3  ;;  %v25881_v60 = vld [vmem:[#allocation104_spill] sm:$0xff] }
 0x992   : > { %25870 = vst [vmem:[#allocation40_spill] sm:$0xff] %v23374_v28  ;;  %v15261_v47 = vpop.f32.mrb[112].mxu1  ;;  %v23381_v50 = vadd.f32 %v9089_v38, %v25871_v4 }
 0x993   : > { %v15262_v25 = vpop.f32.mrb[113].mxu1 }
 0x994   : > { %25872 = vst [vmem:[#allocation38_spill] sm:$0xff] %v23381_v50  ;;  %v15263_v63 = vadd.f32 %v15262_v25, %v15261_v47  ;;  %v15264_v29 = vpop.f32.mrb[114].mxu1  ;;  %15544 = vmatpush3.bf16.msra.mxu1 %v17507_v16  ;;  %v25880_v16 = vld [vmem:[#allocation26_spill] sm:$0xff]  ;;  %v25883_v47 = vld [vmem:[#allocation105_spill] sm:$0xff] }
 0x995   : > { %v15265_v10 = vpop.f32.mrb[115].mxu1  ;;  %15545 = vmatprep.subr.bf16.mxu1 %v17508_v24 }
 0x996   : > { %v9094_v23 = vadd.f32 %v15263_v63, %v23176_v53  ;;  %v15266_v34 = vadd.f32 %v15265_v10, %v15264_v29 }
 0x997   : > { %9951 = vmatmul.mubr.bf16.gmra.mrb[220].mxu1 %v25873_v55 }
 0x998   : > { %v9097_v61 = vadd.f32 %v15266_v34, %v23180_v0  ;;  %9958 = vmatprep.mubr.bf16.mxu1 %v25874_v6  ;;  %15546 = vmatpush3.bf16.msra.mxu1 %v17509_v1  ;;  %v23397_v57 = vadd.f32 %v9094_v23, %v25875_v20  ;;  %v25886_v23 = vld [vmem:[#allocation79_spill] sm:$0xff]  ;;  %v25887_v34 = vld [vmem:[#allocation106_spill] sm:$0xff] }
 0x999   : > { %15547 = vmatprep.subr.bf16.mxu1 %v17510_v30  ;;  %v25885_v30 = vld [vmem:[#allocation19_spill] sm:$0xff] }
 0x99a   : > { %25876 = vst [vmem:[#allocation53_spill] sm:$0xff] %v23397_v57  ;;  %v15267_v36 = vpop.f32.mrb[116].mxu1  ;;  %v23400_v39 = vadd.f32 %v9097_v61, %v25877_v17  ;;  %v25889_v6 = vld [vmem:[#allocation107_spill] sm:$0xff] }
 0x99b   : > { %v15268_v53 = vpop.f32.mrb[117].mxu1 }
 0x99c   : > { %25878 = vst [vmem:[#allocation50_spill] sm:$0xff] %v23400_v39  ;;  %v15269_v49 = vadd.f32 %v15268_v53, %v15267_v36  ;;  %v15270_v3 = vpop.f32.mrb[118].mxu1  ;;  %15548 = vmatpush3.bf16.msra.mxu1 %v17511_v22  ;;  %v25952_v39 = vld [vmem:[#allocation93_spill] sm:$0xff] }
 0x99d   : > { %v15271_v0 = vpop.f32.mrb[119].mxu1 }
 0x99e   : > { %v9102_v33 = vadd.f32 %v15269_v49, %v23190_v62  ;;  %v15272_v46 = vadd.f32 %v15271_v0, %v15270_v3  ;;  %v25891_v3 = vld [vmem:[#allocation78_spill] sm:$0xff]  ;;  %v25892_v0 = vld [vmem:[#allocation56_spill] sm:$0xff] }
 0x99f   : > { %9959 = vmatmul.mubr.bf16.gmra.mrb[224].mxu1 %v25879_v40 }
 0x9a0   : > { %v9105_v51 = vadd.f32 %v15272_v46, %v23194_v58  ;;  %9966 = vmatprep.mubr.bf16.mxu1 %v25880_v16  ;;  %v23407_v38 = vadd.f32 %v9102_v33, %v25881_v60  ;;  %v25893_v33 = vld [vmem:[#allocation108_spill] sm:$0xff] }
 0x9a2   : > { %25882 = vst [vmem:[#allocation7_spill] sm:$0xff] %v23407_v38  ;;  %v15273_v24 = vpop.f32.mrb[120].mxu1  ;;  %v23410_v4 = vadd.f32 %v9105_v51, %v25883_v47  ;;  %v25895_v51 = vld [vmem:[#allocation109_spill] sm:$0xff]  ;;  %v25951_v38 = vld [vmem:[#allocation92_spill] sm:$0xff] }
 0x9a3   : > { %v15274_v25 = vpop.f32.mrb[121].mxu1 }
 0x9a4   : > { %25884 = vst [vmem:[#allocation48_spill] sm:$0xff] %v23410_v4  ;;  %v15275_v63 = vadd.f32 %v15274_v25, %v15273_v24  ;;  %v15276_v29 = vpop.f32.mrb[122].mxu1 }
 0x9a5   : > { %v15277_v1 = vpop.f32.mrb[123].mxu1 }
 0x9a6   : > { %v9110_v62 = vadd.f32 %v15275_v63, %v23198_v9  ;;  %v15278_v10 = vadd.f32 %v15277_v1, %v15276_v29  ;;  %v25897_v29 = vld [vmem:[#allocation59_spill] sm:$0xff]  ;;  %v25898_v1 = vld [vmem:[#allocation62_spill] sm:$0xff] }
 0x9a7   : > { %9967 = vmatmul.mubr.bf16.gmra.mrb[228].mxu1 %v25885_v30 }
 0x9a8   : > { %v9113_v58 = vadd.f32 %v15278_v10, %v23202_v35  ;;  %9974 = vmatprep.mubr.bf16.mxu1 %v25886_v23  ;;  %v23417_v55 = vadd.f32 %v9110_v62, %v25887_v34  ;;  %v25899_v62 = vld [vmem:[#allocation110_spill] sm:$0xff] }
 0x9aa   : > { %25888 = vst [vmem:[#allocation63_spill] sm:$0xff] %v23417_v55  ;;  %v15279_v61 = vpop.f32.mrb[124].mxu1  ;;  %v23420_v22 = vadd.f32 %v9113_v58, %v25889_v6  ;;  %v25901_v58 = vld [vmem:[#allocation111_spill] sm:$0xff] }
 0x9ab   : > { %v15280_v20 = vpop.f32.mrb[125].mxu1 }
 0x9ac   : > { %25890 = vst [vmem:[#allocation67_spill] sm:$0xff] %v23420_v22  ;;  %v15281_v36 = vadd.f32 %v15280_v20, %v15279_v61  ;;  %v15282_v17 = vpop.f32.mrb[126].mxu1  ;;  %v25946_v22 = vld [vmem:[#allocation87_spill] sm:$0xff] }
 0x9ad   : > { %v15283_v53 = vpop.f32.mrb[127].mxu1 }
 0x9ae   : > { %v9118_v9 = vadd.f32 %v15281_v36, %v23206_v54  ;;  %v15284_v49 = vadd.f32 %v15283_v53, %v15282_v17  ;;  %v25903_v17 = vld [vmem:[#allocation85_spill] sm:$0xff]  ;;  %v25904_v53 = vld [vmem:[#allocation14_spill] sm:$0xff] }
 0x9af   : > { %9975 = vmatmul.mubr.bf16.gmra.mrb[232].mxu1 %v25891_v3 }
 0x9b0   : > { %v9121_v35 = vadd.f32 %v15284_v49, %v23210_v21  ;;  %9982 = vmatprep.mubr.bf16.mxu1 %v25892_v0  ;;  %v23427_v46 = vadd.f32 %v9118_v9, %v25893_v33  ;;  %v25905_v9 = vld [vmem:[#allocation112_spill] sm:$0xff] }
 0x9b2   : > { %25894 = vst [vmem:[#allocation39_spill] sm:$0xff] %v23427_v46  ;;  %v15285_v40 = vpop.f32.mrb[128].mxu1  ;;  %v23430_v16 = vadd.f32 %v9121_v35, %v25895_v51  ;;  %v25907_v35 = vld [vmem:[#allocation113_spill] sm:$0xff] }
 0x9b3   : > { %v15286_v60 = vpop.f32.mrb[129].mxu1 }
 0x9b4   : > { %25896 = vst [vmem:[#allocation37_spill] sm:$0xff] %v23430_v16  ;;  %v15287_v24 = vadd.f32 %v15286_v60, %v15285_v40  ;;  %v15288_v47 = vpop.f32.mrb[130].mxu1 }
 0x9b5   : > { %v15289_v25 = vpop.f32.mrb[131].mxu1 }
 0x9b6   : > { %v9126_v54 = vadd.f32 %v15287_v24, %v23214_v18  ;;  %v15290_v63 = vadd.f32 %v15289_v25, %v15288_v47  ;;  %v25909_v47 = vld [vmem:[#allocation10_spill] sm:$0xff]  ;;  %v25910_v25 = vld [vmem:[#allocation25_spill] sm:$0xff] }
 0x9b7   : > { %9983 = vmatmul.mubr.bf16.gmra.mrb[236].mxu1 %v25897_v29 }
 0x9b8   : > { %v9129_v21 = vadd.f32 %v15290_v63, %v23218_v8  ;;  %9990 = vmatprep.mubr.bf16.mxu1 %v25898_v1  ;;  %v23437_v10 = vadd.f32 %v9126_v54, %v25899_v62  ;;  %v25911_v54 = vld [vmem:[#allocation114_spill] sm:$0xff] }
 0x9ba   : > { %25900 = vst [vmem:[#allocation58_spill] sm:$0xff] %v23437_v10  ;;  %v15291_v30 = vpop.f32.mrb[132].mxu1  ;;  %v23440_v23 = vadd.f32 %v9129_v21, %v25901_v58  ;;  %v25913_v21 = vld [vmem:[#allocation115_spill] sm:$0xff] }
 0x9bb   : > { %v15292_v34 = vpop.f32.mrb[133].mxu1 }
 0x9bc   : > { %25902 = vst [vmem:[#allocation83_spill] sm:$0xff] %v23440_v23  ;;  %v15293_v61 = vadd.f32 %v15292_v34, %v15291_v30  ;;  %v15294_v6 = vpop.f32.mrb[134].mxu1 }
 0x9bd   : > { %v15295_v20 = vpop.f32.mrb[135].mxu1 }
 0x9be   : > { %v9134_v18 = vadd.f32 %v15293_v61, %v23222_v43  ;;  %v15296_v36 = vadd.f32 %v15295_v20, %v15294_v6  ;;  %v25915_v6 = vld [vmem:[#allocation21_spill] sm:$0xff]  ;;  %v25916_v20 = vld [vmem:[#allocation74_spill] sm:$0xff] }
 0x9bf   : > { %9991 = vmatmul.mubr.bf16.gmra.mrb[240].mxu1 %v25903_v17 }
 0x9c0   : > { %v9137_v8 = vadd.f32 %v15296_v36, %v23226_v37  ;;  %9998 = vmatprep.mubr.bf16.mxu1 %v25904_v53  ;;  %v23447_v49 = vadd.f32 %v9134_v18, %v25905_v9  ;;  %v25917_v18 = vld [vmem:[#allocation116_spill] sm:$0xff] }
 0x9c2   : > { %25906 = vst [vmem:[#allocation84_spill] sm:$0xff] %v23447_v49  ;;  %v15297_v3 = vpop.f32.mrb[136].mxu1  ;;  %v23450_v0 = vadd.f32 %v9137_v8, %v25907_v35  ;;  %v25919_v8 = vld [vmem:[#allocation117_spill] sm:$0xff] }
 0x9c3   : > { %v15298_v33 = vpop.f32.mrb[137].mxu1 }
 0x9c4   : > { %25908 = vst [vmem:[#allocation73_spill] sm:$0xff] %v23450_v0  ;;  %v15299_v40 = vadd.f32 %v15298_v33, %v15297_v3  ;;  %v15300_v51 = vpop.f32.mrb[138].mxu1 }
 0x9c5   : > { %v15301_v60 = vpop.f32.mrb[139].mxu1 }
 0x9c6   : > { %v9142_v43 = vadd.f32 %v15299_v40, %v23230_v12  ;;  %v15302_v24 = vadd.f32 %v15301_v60, %v15300_v51  ;;  %v25921_v40 = vld [vmem:[#allocation72_spill] sm:$0xff]  ;;  %v25922_v51 = vld [vmem:[#allocation29_spill] sm:$0xff] }
 0x9c7   : > { %9999 = vmatmul.mubr.bf16.gmra.mrb[244].mxu1 %v25909_v47 }
 0x9c8   : > { %v9145_v37 = vadd.f32 %v15302_v24, %v23234_v45  ;;  %10006 = vmatprep.mubr.bf16.mxu1 %v25910_v25  ;;  %v23457_v63 = vadd.f32 %v9142_v43, %v25911_v54  ;;  %v25923_v25 = vld [vmem:[#allocation30_spill] sm:$0xff]  ;;  %v25924_v54 = vld [vmem:[#allocation41_spill] sm:$0xff] }
 0x9ca   : > { %25912 = vst [vmem:[#allocation65_spill] sm:$0xff] %v23457_v63  ;;  %v15303_v29 = vpop.f32.mrb[140].mxu1  ;;  %v23460_v1 = vadd.f32 %v9145_v37, %v25913_v21 }
 0x9cb   : > { %v15304_v62 = vpop.f32.mrb[141].mxu1 }
 0x9cc   : > { %25914 = vst [vmem:[#allocation64_spill] sm:$0xff] %v23460_v1  ;;  %v15305_v30 = vadd.f32 %v15304_v62, %v15303_v29  ;;  %v15306_v58 = vpop.f32.mrb[142].mxu1 }
 0x9cd   : > { %v15307_v34 = vpop.f32.mrb[143].mxu1 }
 0x9ce   : > { %v9150_v12 = vadd.f32 %v15305_v30, %v23238_v31  ;;  %v15308_v61 = vadd.f32 %v15307_v34, %v15306_v58 }
 0x9cf   : > { %10007 = vmatmul.mubr.bf16.gmra.mrb[248].mxu1 %v25915_v6 }
 0x9d0   : > { %v9153_v45 = vadd.f32 %v15308_v61, %v23242_v59  ;;  %10014 = vmatprep.mubr.bf16.mxu1 %v25916_v20  ;;  %v23467_v36 = vadd.f32 %v9150_v12, %v25917_v18  ;;  %v25925_v12 = vld [vmem:[#allocation82_spill] sm:$0xff]  ;;  %v25926_v61 = vld [vmem:[#allocation96_spill] sm:$0xff] }
 0x9d2   : > { %25918 = vst [vmem:[#allocation13_spill] sm:$0xff] %v23467_v36  ;;  %v15325_v17 = vpop.f32.mrb[144].mxu1  ;;  %v23470_v53 = vadd.f32 %v9153_v45, %v25919_v8 }
 0x9d3   : > { %v15326_v9 = vpop.f32.mrb[145].mxu1 }
 0x9d4   : > { %25920 = vst [vmem:[#allocation18_spill] sm:$0xff] %v23470_v53  ;;  %v23472_v3 = vadd.f32 %v15326_v9, %v15325_v17  ;;  %v15328_v35 = vpop.f32.mrb[146].mxu1  ;;  %v25927_v9 = vld [vmem:[#allocation97_spill] sm:$0xff] }
 0x9d5   : > { %v15329_v33 = vpop.f32.mrb[147].mxu1 }
 0x9d6   : > { %v23474_v31 = vadd.f32 %v15329_v33, %v15328_v35  ;;  %v25928_v35 = vmov 0.0|0.0  }
 0x9d7   : > { %10015 = vmatmul.mubr.bf16.gmra.mrb[252].mxu1 %v25921_v40 }
 0x9d8   : > { %10022 = vmatprep.mubr.bf16.mxu1 %v25922_v51 }
 0x9da   : > { %v15331_v59 = vpop.f32.mrb[148].mxu1 }
 0x9db   : > { %v15332_v60 = vpop.f32.mrb[149].mxu1 }
 0x9dc   : > { %v23478_v43 = vadd.f32 %v15332_v60, %v15331_v59  ;;  %v15334_v24 = vpop.f32.mrb[150].mxu1 }
 0x9dd   : > { %v15335_v47 = vpop.f32.mrb[151].mxu1 }
 0x9de   : > { %v23480_v37 = vadd.f32 %v15335_v47, %v15334_v24  ;;  %v25929_v47 = vld [vmem:[#allocation52_spill] sm:$0xff] }
 0x9df   : > { %10023 = vmatmul.mubr.bf16.gmra.mrb[0].mxu1 %v25923_v25 }
 0x9e0   : > { %10030 = vmatprep.mubr.bf16.mxu1 %v25924_v54 }
 0x9e2   : > { %v15337_v29 = vpop.f32.mrb[152].mxu1 }
 0x9e3   : > { %v15338_v21 = vpop.f32.mrb[153].mxu1 }
 0x9e4   : > { %v23484_v62 = vadd.f32 %v15338_v21, %v15337_v29  ;;  %v15340_v30 = vpop.f32.mrb[154].mxu1 }
 0x9e5   : > { %v15341_v58 = vpop.f32.mrb[155].mxu1 }
 0x9e6   : > { %v23486_v34 = vadd.f32 %v15341_v58, %v15340_v30 }
 0x9e7   : > { %10031 = vmatmul.mubr.bf16.gmra.mrb[4].mxu1 %v25925_v12  ;;  %v25930_v12 = vld [vmem:[#allocation8_spill] sm:$0xff] }
 0x9e8   : > { %10038 = vmatprep.mubr.bf16.mxu1 %v25926_v61  ;;  %v25931_v61 = vld [vmem:[#allocation69_spill] sm:$0xff] }
 0x9ea   : > { %v15343_v6 = vpop.f32.mrb[156].mxu1 }
 0x9eb   : > { %v15344_v45 = vpop.f32.mrb[157].mxu1 }
 0x9ec   : > { %v23490_v20 = vadd.f32 %v15344_v45, %v15343_v6  ;;  %v15346_v18 = vpop.f32.mrb[158].mxu1 }
 0x9ed   : > { %v15347_v17 = vpop.f32.mrb[159].mxu1 }
 0x9ee   : > { %v23492_v8 = vadd.f32 %v15347_v17, %v15346_v18 }
 0x9ef   : > { %10039 = vmatmul.mubr.bf16.gmra.mrb[8].mxu1 %v25927_v9 }
 0x9f0   : > { %10046 = vmatprep.mubr.bf16.mxu1 %v25928_v35 }
 0x9f2   : > { %v15349_v33 = vpop.f32.mrb[160].mxu1 }
 0x9f3   : > { %v15350_v40 = vpop.f32.mrb[161].mxu1 }
 0x9f4   : > { %v23496_v51 = vadd.f32 %v15350_v40, %v15349_v33  ;;  %v15352_v59 = vpop.f32.mrb[162].mxu1  ;;  %v25932_v40 = vld [vmem:[#allocation34_spill] sm:$0xff] }
 0x9f5   : > { %v15353_v60 = vpop.f32.mrb[163].mxu1 }
 0x9f6   : > { %v23498_v24 = vadd.f32 %v15353_v60, %v15352_v59  ;;  %v25933_v59 = vld [vmem:[#allocation80_spill] sm:$0xff] }
 0x9f7   : > { %10047 = vmatmul.mubr.bf16.gmra.mrb[12].mxu1 %v25928_v35 }
 0x9f8   : > { %10087 = vmatprep.mubr.bf16.mxu1 %v25929_v47 }
 0x9fa   : > { %v15355_v25 = vpop.f32.mrb[164].mxu1 }
 0x9fb   : > { %v15356_v54 = vpop.f32.mrb[165].mxu1 }
 0x9fc   : > { %v23502_v29 = vadd.f32 %v15356_v54, %v15355_v25  ;;  %v15358_v21 = vpop.f32.mrb[166].mxu1 }
 0x9fd   : > { %v15359_v30 = vpop.f32.mrb[167].mxu1 }
 0x9fe   : > { %v23504_v58 = vadd.f32 %v15359_v30, %v15358_v21 }
 0x9ff   : > { %10088 = vmatmul.mubr.bf16.vlgmr.msra.gmra.mrb[16].mxu1 %v25930_v12  ;;  %v25934_v12 = vld [vmem:[#allocation68_spill] sm:$0xff] }
 0xa00   : > { %10095 = vmatprep.mubr.bf16.mxu1 %v25931_v61  ;;  %v25935_v61 = vld [vmem:[#allocation61_spill] sm:$0xff] }
 0xa02   : > { %v15361_v6 = vpop.f32.mrb[168].mxu1 }
 0xa03   : > { %v15362_v45 = vpop.f32.mrb[169].mxu1 }
 0xa04   : > { %v23508_v18 = vadd.f32 %v15362_v45, %v15361_v6  ;;  %v15364_v17 = vpop.f32.mrb[170].mxu1 }
 0xa05   : > { %v15365_v9 = vpop.f32.mrb[171].mxu1 }
 0xa06   : > { %v23510_v33 = vadd.f32 %v15365_v9, %v15364_v17 }
 0xa07   : > { %10096 = vmatmul.mubr.bf16.gmra.mrb[20].mxu1 %v25932_v40 }
 0xa08   : > { %10103 = vmatprep.mubr.bf16.mxu1 %v25933_v59  ;;  %v25936_v59 = vld [vmem:[#allocation66_spill] sm:$0xff] }
 0xa0a   : > { %v15367_v60 = vpop.f32.mrb[172].mxu1 }
 0xa0b   : > { %v15368_v47 = vpop.f32.mrb[173].mxu1 }
 0xa0c   : > { %v23514_v25 = vadd.f32 %v15368_v47, %v15367_v60  ;;  %v15370_v54 = vpop.f32.mrb[174].mxu1  ;;  %v25937_v60 = vld [vmem:[#allocation16_spill] sm:$0xff] }
 0xa0d   : > { %v15371_v21 = vpop.f32.mrb[175].mxu1 }
 0xa0e   : > { %v23516_v30 = vadd.f32 %v15371_v21, %v15370_v54 }
 0xa0f   : > { %10104 = vmatmul.mubr.bf16.gmra.mrb[24].mxu1 %v25934_v12 }
 0xa10   : > { %10111 = vmatprep.mubr.bf16.mxu1 %v25935_v61  ;;  %v25938_v61 = vld [vmem:[#allocation20_spill] sm:$0xff] }
 0xa12   : > { %v15373_v6 = vpop.f32.mrb[176].mxu1 }
 0xa13   : > { %v15374_v45 = vpop.f32.mrb[177].mxu1 }
 0xa14   : > { %v23520_v17 = vadd.f32 %v15374_v45, %v15373_v6  ;;  %v15376_v9 = vpop.f32.mrb[178].mxu1  ;;  %v25939_v6 = vld [vmem:[#allocation23_spill] sm:$0xff] }
 0xa15   : > { %v15377_v40 = vpop.f32.mrb[179].mxu1 }
 0xa16   : > { %v23522_v35 = vadd.f32 %v15377_v40, %v15376_v9 }
 0xa17   : > { %10112 = vmatmul.mubr.bf16.gmra.mrb[28].mxu1 %v25936_v59 }
 0xa18   : > { %10119 = vmatprep.mubr.bf16.mxu1 %v25937_v60  ;;  %v25940_v60 = vld [vmem:[#allocation32_spill] sm:$0xff] }
 0xa1a   : > { %v15379_v47 = vpop.f32.mrb[180].mxu1 }
 0xa1b   : > { %v15380_v53 = vpop.f32.mrb[181].mxu1 }
 0xa1c   : > { %v23526_v54 = vadd.f32 %v15380_v53, %v15379_v47  ;;  %v15382_v21 = vpop.f32.mrb[182].mxu1  ;;  %v25941_v53 = vld [vmem:[#allocation35_spill] sm:$0xff] }
 0xa1d   : > { %v15383_v12 = vpop.f32.mrb[183].mxu1 }
 0xa1e   : > { %v23528_v36 = vadd.f32 %v15383_v12, %v15382_v21 }
 0xa1f   : > { %10120 = vmatmul.mubr.bf16.gmra.mrb[32].mxu1 %v25938_v61 }
 0xa20   : > { %10127 = vmatprep.mubr.bf16.mxu1 %v25939_v6  ;;  %v25942_v6 = vld [vmem:[#allocation36_spill] sm:$0xff] }
 0xa22   : > { %v15385_v45 = vpop.f32.mrb[184].mxu1 }
 0xa23   : > { %v15386_v1 = vpop.f32.mrb[185].mxu1 }
 0xa24   : > { %v23532_v9 = vadd.f32 %v15386_v1, %v15385_v45  ;;  %v15388_v40 = vpop.f32.mrb[186].mxu1  ;;  %v25943_v1 = vld [vmem:[#allocation9_spill] sm:$0xff] }
 0xa25   : > { %v15389_v59 = vpop.f32.mrb[187].mxu1  ;;  %v17512_v45 = vld [vmem:[%s24886_s7 + $0x80] sm:$0xff]  }
 0xa26   : > { %v23534_v63 = vadd.f32 %v15389_v59, %v15388_v40  ;;  %16053 = vmatprep.subr.bf16.mxu1 %v17512_v45 }
 0xa27   : > { %10128 = vmatmul.mubr.bf16.gmra.mrb[36].mxu1 %v25940_v60 }
 0xa28   : > { %10135 = vmatprep.mubr.bf16.mxu1 %v25941_v53  ;;  %16054 = vmatpush3.bf16.msra.mxu1 %v17512_v45  ;;  %v25947_v45 = vld [vmem:[#allocation88_spill] sm:$0xff] }
 0xa2a   : > { %v15391_v47 = vpop.f32.mrb[188].mxu1 }
 0xa2b   : > { %v15392_v0 = vpop.f32.mrb[189].mxu1 }
 0xa2c   : > { %v23538_v21 = vadd.f32 %v15392_v0, %v15391_v47  ;;  %v15394_v12 = vpop.f32.mrb[190].mxu1 }
 0xa2d   : > { %v15395_v61 = vpop.f32.mrb[191].mxu1 }
 0xa2e   : > { %v23540_v49 = vadd.f32 %v15395_v61, %v15394_v12  ;;  %v25944_v12 = vld [vmem:[#allocation11_spill] sm:$0xff]  ;;  %v25945_v61 = vld [vmem:[#allocation12_spill] sm:$0xff] }
 0xa2f   : > { %10136 = vmatmul.mubr.bf16.gmra.mrb[40].mxu1 %v25942_v6 }
 0xa30   : > { %10143 = vmatprep.mubr.bf16.mxu1 %v25943_v1 }
 0xa32   : > { %v15397_v40 = vpop.f32.mrb[192].mxu1 }
 0xa33   : > { %v15398_v59 = vpop.f32.mrb[193].mxu1 }
 0xa34   : > { %v23547_v60 = vadd.f32 %v15398_v59, %v15397_v40  ;;  %v15400_v0 = vpop.f32.mrb[194].mxu1  ;;  %v17513_v40 = vld [vmem:[%s24886_s7 + $0x88] sm:$0xff]  }
 0xa35   : > { %v15401_v53 = vpop.f32.mrb[195].mxu1  ;;  %16055 = vmatprep.subr.bf16.mxu1 %v17513_v40 }
 0xa36   : > { %v23549_v47 = vadd.f32 %v15401_v53, %v15400_v0  ;;  %16056 = vmatpush3.bf16.msra.mxu1 %v17513_v40 }
 0xa37   : > { %10144 = vmatmul.mubr.bf16.gmra.mrb[44].mxu1 %v25944_v12 }
 0xa38   : > { %10151 = vmatprep.mubr.bf16.mxu1 %v25945_v61 }
 0xa3a   : > { %v15403_v6 = vpop.f32.mrb[196].mxu1 }
 0xa3b   : > { %v15404_v1 = vpop.f32.mrb[197].mxu1 }
 0xa3c   : > { %v23553_v23 = vadd.f32 %v15404_v1, %v15403_v6  ;;  %v15406_v10 = vpop.f32.mrb[198].mxu1  ;;  %v17515_v1 = vld [vmem:[%s24886_s7] sm:$0xff]  }
 0xa3d   : > { %v15407_v16 = vpop.f32.mrb[199].mxu1 }
 0xa3e   : > { %v23555_v46 = vadd.f32 %v15407_v16, %v15406_v10  ;;  %v25948_v16 = vld [vmem:[#allocation89_spill] sm:$0xff]  ;;  %v25949_v10 = vld [vmem:[#allocation90_spill] sm:$0xff] }
 0xa3f   : > { %10152 = vmatmul.mubr.bf16.gmra.mrb[48].mxu1 %v25946_v22  ;;  %v17514_v22 = vld [vmem:[%s24886_s7 + $0x40] sm:$0xff]  }
 0xa40   : > { %10159 = vmatprep.mubr.bf16.mxu1 %v25947_v45  ;;  %15645 = vmatprep.subr.bf16.mxu0 %v17514_v22  ;;  %v17517_v22 = vld [vmem:[%s24886_s7 + $0x8] sm:$0xff]  }
 0xa41   : > { %15646 = vmatpush3.bf16.msra.mxu0 %v17515_v1  ;;  %v17518_v1 = vld [vmem:[%s24886_s7 + $0x90] sm:$0xff]  }
 0xa42   : > { %v15409_v59 = vpop.f32.mrb[200].mxu1  ;;  %16057 = vmatprep.subr.bf16.mxu1 %v17518_v1 }
 0xa43   : > { %v15410_v0 = vpop.f32.mrb[201].mxu1  ;;  %16058 = vmatpush3.bf16.msra.mxu1 %v17518_v1 }
 0xa44   : > { %v23562_v53 = vadd.f32 %v15410_v0, %v15409_v59  ;;  %v15412_v12 = vpop.f32.mrb[202].mxu1 }
 0xa45   : > { %v15413_v61 = vpop.f32.mrb[203].mxu1 }
 0xa46   : > { %v23564_v6 = vadd.f32 %v15413_v61, %v15412_v12 }
 0xa47   : > { %10160 = vmatmul.mubr.bf16.gmra.mrb[52].mxu1 %v25948_v16  ;;  %v17516_v16 = vld [vmem:[%s24886_s7 + $0x48] sm:$0xff]  }
 0xa48   : > { %10167 = vmatprep.mubr.bf16.mxu1 %v25949_v10  ;;  %v25950_v10 = vld [vmem:[#allocation91_spill] sm:$0xff]  ;;  %15647 = vmatprep.subr.bf16.mxu0 %v17516_v16 }
 0xa49   : > { %15648 = vmatpush3.bf16.msra.mxu0 %v17517_v22 }
 0xa4a   : > { %v15415_v45 = vpop.f32.mrb[204].mxu1 }
 0xa4b   : > { %v15416_v40 = vpop.f32.mrb[205].mxu1 }
 0xa4c   : > { %v23574_v59 = vadd.f32 %v15416_v40, %v15415_v45  ;;  %v15418_v0 = vpop.f32.mrb[206].mxu1  ;;  %v17519_v45 = vld [vmem:[%s24886_s7 + $0x50] sm:$0xff]  }
 0xa4d   : > { %v15419_v12 = vpop.f32.mrb[207].mxu1  ;;  %15649 = vmatprep.subr.bf16.mxu0 %v17519_v45  ;;  %v17521_v45 = vld [vmem:[%s24886_s7 + $0x58] sm:$0xff]  }
 0xa4e   : > { %v23576_v61 = vadd.f32 %v15419_v12, %v15418_v0 }
 0xa4f   : > { %10168 = vmatmul.mubr.bf16.gmra.mrb[56].mxu1 %v22236_v11  ;;  %v17520_v11 = vld [vmem:[%s24886_s7 + $0x10] sm:$0xff]  }
 0xa50   : > { %10175 = vmatprep.mubr.bf16.mxu1 %v25950_v10  ;;  %15650 = vmatpush3.bf16.msra.mxu0 %v17520_v11 }
 0xa51   : > { %15651 = vmatprep.subr.bf16.mxu0 %v17521_v45 }
 0xa52   : > { %v15437_v40 = vpop.f32.mrb[208].mxu1 }
 0xa53   : > { %v15438_v0 = vpop.f32.mrb[209].mxu1 }
 0xa54   : > { %v15439_v12 = vadd.f32 %v15438_v0, %v15437_v40  ;;  %v15440_v16 = vpop.f32.mrb[210].mxu1 }
 0xa55   : > { %v15441_v10 = vpop.f32.mrb[211].mxu1 }
 0xa56   : > { %v23596_v55 = vadd.f32 %v15439_v12, %v23472_v3  ;;  %v15442_v4 = vadd.f32 %v15441_v10, %v15440_v16  ;;  %v17525_v16 = vld [vmem:[%s24886_s7 + $0x68] sm:$0xff]  }
 0xa57   : > { %10176 = vmatmul.mubr.bf16.gmra.mrb[60].mxu1 %v25951_v38  ;;  %v17522_v38 = vld [vmem:[%s24886_s7 + $0x18] sm:$0xff]  }
 0xa58   : > { %v23600_v22 = vadd.f32 %v15442_v4, %v23474_v31  ;;  %10183 = vmatprep.mubr.bf16.mxu1 %v25952_v39  ;;  %v17523_v39 = vld [vmem:[%s24886_s7 + $0x60] sm:$0xff]   ;;  %v25954_v4 = vld [vmem:[#allocation95_spill] sm:$0xff]  ;;  %15652 = vmatpush3.bf16.msra.mxu0 %v17522_v38  ;;  %v17527_v38 = vld [vmem:[%s24886_s7 + $0x98] sm:$0xff]  }
 0xa59   : > { %15653 = vmatprep.subr.bf16.mxu0 %v17523_v39  ;;  %v17528_v39 = vld [vmem:[%s24886_s7 + $0x70] sm:$0xff]   ;;  %16059 = vmatprep.subr.bf16.mxu1 %v17527_v38 }
 0xa5a   : > { %v15443_v57 = vpop.f32.mrb[212].mxu1  ;;  %16060 = vmatpush3.bf16.msra.mxu1 %v17527_v38 }
 0xa5b   : > { %v15444_v50 = vpop.f32.mrb[213].mxu1 }
 0xa5c   : > { %v15445_v28 = vadd.f32 %v15444_v50, %v15443_v57  ;;  %v15446_v1 = vpop.f32.mrb[214].mxu1  ;;  %v25953_v50 = vld [vmem:[#allocation94_spill] sm:$0xff] }
 0xa5d   : > { %v15447_v40 = vpop.f32.mrb[215].mxu1 }
 0xa5e   : > { %v23607_v3 = vadd.f32 %v15445_v28, %v23478_v43  ;;  %v15448_v11 = vadd.f32 %v15447_v40, %v15446_v1  ;;  %v17524_v28 = vld [vmem:[%s24886_s7 + $0x20] sm:$0xff]   ;;  %v13899_v1 = vld [vmem:[%s24888_s9 + $0x478] sm:$0xff] }
 0xa5f   : > { %10184 = vmatmul.mubr.bf16.gmra.mrb[64].mxu1 %v25953_v50  ;;  %15654 = vmatpush3.bf16.msra.mxu0 %v17524_v28  ;;  %v25955_v50 = vld [vmem:[#allocation98_spill] sm:$0xff]  ;;  %v25957_v28 = vld [vmem:[#allocation28_spill] sm:$0xff] }
 0xa60   : > { %v23617_v57 = vadd.f32 %v15448_v11, %v23480_v37  ;;  %10191 = vmatprep.mubr.bf16.mxu1 %v25954_v4  ;;  %v13897_v37 = vld [vmem:[%s24888_s9 + $0x468] sm:$0xff]  ;;  %15655 = vmatprep.subr.bf16.mxu0 %v17525_v16 }
 0xa61   : > { %v17526_v11 = vld [vmem:[%s24886_s7 + $0x28] sm:$0xff]  }
 0xa62   : > { %v15449_v31 = vpop.f32.mrb[216].mxu1 }
 0xa63   : > { %v15450_v43 = vpop.f32.mrb[217].mxu1  ;;  %15656 = vmatpush3.bf16.msra.mxu0 %v17526_v11 }
 0xa64   : > { %v15451_v0 = vadd.f32 %v15450_v43, %v15449_v31  ;;  %v15452_v12 = vpop.f32.mrb[218].mxu1  ;;  %v6946_v31 = vmul.f32 %v13897_v37, %v25957_v28  ;;  %v6948_v43 = vmul.f32 %v13899_v1, %v25957_v28  ;;  %15657 = vmatprep.subr.bf16.mxu0 %v17528_v39  ;;  %v13898_v37 = vld [vmem:[%s24888_s9 + $0x470] sm:$0xff]  ;;  %v17530_v1 = vld [vmem:[%s24886_s7 + $0x78] sm:$0xff]  }
 0xa65   : > { %v15453_v10 = vpop.f32.mrb[219].mxu1 }
 0xa66   : > { %v23633_v45 = vadd.f32 %v15451_v0, %v23484_v62  ;;  %v15454_v40 = vadd.f32 %v15453_v10, %v15452_v12  ;;  %v25956_v62 = vld [vmem:[#allocation100_spill] sm:$0xff]  ;;  %v17529_v0 = vld [vmem:[%s24886_s7 + $0x30] sm:$0xff]  }
 0xa67   : > { %10192 = vmatmul.mubr.bf16.gmra.mrb[68].mxu1 %v25955_v50  ;;  %15658 = vmatpush3.bf16.msra.mxu0 %v17529_v0  ;;  %v25958_v0 = vld [vmem:[#allocation99_spill] sm:$0xff] }
 0xa68   : > { %v23646_v4 = vadd.f32 %v15454_v40, %v23486_v34  ;;  %10199 = vmatprep.mubr.bf16.mxu1 %v25956_v62  ;;  %v7128_v34 = vpack.c.bf16 %v6948_v43, %v6946_v31  ;;  %v13896_v40 = vld [vmem:[%s24888_s9 + $0x460] sm:$0xff]  ;;  %15659 = vmatprep.subr.bf16.mxu0 %v17530_v1  ;;  %v17531_v62 = vld [vmem:[%s24886_s7 + $0x38] sm:$0xff]  }
 0xa69   : > { %v17532_v31 = vld [vmem:[%s24886_s7 + $0xa0] sm:$0xff]  }
 0xa6a   : > { %v15455_v12 = vpop.f32.mrb[220].mxu1  ;;  %v10450_v43 = vld [vmem:[%s24888_s9] sm:$0xff]  ;;  %16061 = vmatprep.subr.bf16.mxu1 %v17532_v31 }
 0xa6b   : > { %v15456_v16 = vpop.f32.mrb[221].mxu1  ;;  %15660 = vmatpush3.bf16.msra.mxu0 %v17531_v62  ;;  %16062 = vmatpush3.bf16.msra.mxu1 %v17532_v31  ;;  %v17535_v62 = vld [vmem:[%s24886_s7 + $0xb8] sm:$0xff]  }
 0xa6c   : > { %v15457_v10 = vadd.f32 %v15456_v16, %v15455_v12  ;;  %v15458_v50 = vpop.f32.mrb[222].mxu1  ;;  %v6945_v12 = vmul.f32 %v13896_v40, %v25957_v28  ;;  %v10451_v16 = vld [vmem:[%s24888_s9 + $0x10] sm:$0xff] }
 0xa6d   : > { %v15459_v11 = vpop.f32.mrb[223].mxu1 }
 0xa6e   : > { %v23664_v38 = vadd.f32 %v15457_v10, %v23490_v20  ;;  %v15460_v39 = vadd.f32 %v15459_v11, %v15458_v50  ;;  %v6947_v20 = vmul.f32 %v13898_v37, %v25957_v28  ;;  %v10594_v10 = vmul.f32 %v10450_v43, %v25847_v2  ;;  %v17533_v50 = vld [vmem:[%s24886_s7 + $0xa8] sm:$0xff]  }
 0xa6f   : > { %10200 = vmatmul.mubr.bf16.gmra.mrb[72].mxu1 %v25958_v0  ;;  %v10595_v11 = vmul.f32 %v10451_v16, %v25847_v2  ;;  %16063 = vmatprep.subr.bf16.mxu1 %v17533_v50 }
 0xa70   : > { %v23686_v1 = vadd.f32 %v15460_v39, %v23492_v8  ;;  %10207 = vmatprep.mubr.bf16.mxu1 %v7128_v34  ;;  %v7127_v14 = vpack.c.bf16 %v6947_v20, %v6945_v12  ;;  %16064 = vmatpush3.bf16.msra.mxu1 %v17533_v50  ;;  %v17534_v34 = vld [vmem:[%s24886_s7 + $0xb0] sm:$0xff]  }
 0xa71   : > { %v10738_v37 = vpack.c.bf16 %v10595_v11, %v10594_v10  ;;  %16065 = vmatprep.subr.bf16.mxu1 %v17534_v34 }
 0xa72   : > { %v15461_v40 = vpop.f32.mrb[224].mxu1 }
 0xa73   : > { %v15462_v0 = vpop.f32.mrb[225].mxu1  ;;  %11119 = vmatmul.mubr.bf16.vlgmr.msra.gmra.mrb[112].mxu0 %v10738_v37 }
 0xa74   : > { %v15463_v52 = vadd.f32 %v15462_v0, %v15461_v40  ;;  %v15464_v43 = vpop.f32.mrb[226].mxu1  ;;  %16066 = vmatpush3.bf16.msra.mxu1 %v17534_v34 }
 0xa75   : > { %v15465_v15 = vpop.f32.mrb[227].mxu1  ;;  %16067 = vmatprep.subr.bf16.mxu1 %v17535_v62 }
 0xa76   : > { %v23690_v41 = vadd.f32 %v15463_v52, %v23496_v51  ;;  %v15466_v8 = vadd.f32 %v15465_v15, %v15464_v43 }
 0xa77   : > { %10208 = vmatmul.mubr.bf16.gmra.mrb[76].mxu1 %v7127_v14 }
 0xa78   : > { %v23696_v39 = vadd.f32 %v15466_v8, %v23498_v24  ;;  %16068 = vmatpush3.bf16.msra.mxu1 %v17535_v62 }
 0xa7a   : > { %v15467_v31 = vpop.f32.mrb[228].mxu1 }
 0xa7b   : > { %v15468_v12 = vpop.f32.mrb[229].mxu1 }
 0xa7c   : > { %v15469_v52 = vadd.f32 %v15468_v12, %v15467_v31  ;;  %v15470_v15 = vpop.f32.mrb[230].mxu1 }
 0xa7d   : > { %v15471_v51 = vpop.f32.mrb[231].mxu1 }
 0xa7e   : > { %v23702_v20 = vadd.f32 %v15469_v52, %v23502_v29  ;;  %v15472_v16 = vadd.f32 %v15471_v51, %v15470_v15 }
 0xa80   : > { %v23705_v14 = vadd.f32 %v15472_v16, %v23504_v58 }
 0xa82   : > { %v15473_v24 = vpop.f32.mrb[232].mxu1 }
 0xa83   : > { %v15474_v10 = vpop.f32.mrb[233].mxu1 }
 0xa84   : > { %v15475_v50 = vadd.f32 %v15474_v10, %v15473_v24  ;;  %v15476_v11 = vpop.f32.mrb[234].mxu1 }
 0xa85   : > { %v15477_v40 = vpop.f32.mrb[235].mxu1 }
 0xa86   : > { %v23708_v37 = vadd.f32 %v15475_v50, %v23508_v18  ;;  %v15478_v0 = vadd.f32 %v15477_v40, %v15476_v11 }
 0xa88   : > { %v23711_v43 = vadd.f32 %v15478_v0, %v23510_v33 }
 0xa8a   : > { %v15479_v8 = vpop.f32.mrb[236].mxu1 }
 0xa8b   : > { %v15480_v29 = vpop.f32.mrb[237].mxu1 }
 0xa8c   : > { %v15481_v34 = vadd.f32 %v15480_v29, %v15479_v8  ;;  %v15482_v31 = vpop.f32.mrb[238].mxu1 }
 0xa8d   : > { %v15483_v62 = vpop.f32.mrb[239].mxu1 }
 0xa8e   : > { %v23714_v58 = vadd.f32 %v15481_v34, %v23514_v25  ;;  %v15484_v12 = vadd.f32 %v15483_v62, %v15482_v31 }
 0xa90   : > { %v23717_v52 = vadd.f32 %v15484_v12, %v23516_v30 }
 0xa92   : > { %v15485_v15 = vpop.f32.mrb[240].mxu1 }
 0xa93   : > { %v15486_v51 = vpop.f32.mrb[241].mxu1 }
 0xa94   : > { %v15487_v18 = vadd.f32 %v15486_v51, %v15485_v15  ;;  %v15488_v16 = vpop.f32.mrb[242].mxu1 }
 0xa95   : > { %v15489_v24 = vpop.f32.mrb[243].mxu1 }
 0xa96   : > { %v23720_v33 = vadd.f32 %v15487_v18, %v23520_v17  ;;  %v15490_v10 = vadd.f32 %v15489_v24, %v15488_v16 }
 0xa98   : > { %v23723_v50 = vadd.f32 %v15490_v10, %v23522_v35 }
 0xa9a   : > { %v15491_v11 = vpop.f32.mrb[244].mxu1 }
 0xa9b   : > { %v15492_v40 = vpop.f32.mrb[245].mxu1 }
 0xa9c   : > { %v15493_v25 = vadd.f32 %v15492_v40, %v15491_v11  ;;  %v15494_v0 = vpop.f32.mrb[246].mxu1 }
 0xa9d   : > { %v15495_v8 = vpop.f32.mrb[247].mxu1 }
 0xa9e   : > { %v23726_v30 = vadd.f32 %v15493_v25, %v23526_v54  ;;  %v15496_v29 = vadd.f32 %v15495_v8, %v15494_v0 }
 0xaa0   : > { %v23729_v34 = vadd.f32 %v15496_v29, %v23528_v36 }
 0xaa2   : > { %v15497_v31 = vpop.f32.mrb[248].mxu1 }
 0xaa3   : > { %v15498_v62 = vpop.f32.mrb[249].mxu1 }
 0xaa4   : > { %v15499_v17 = vadd.f32 %v15498_v62, %v15497_v31  ;;  %v15500_v12 = vpop.f32.mrb[250].mxu1 }
 0xaa5   : > { %v15501_v15 = vpop.f32.mrb[251].mxu1 }
 0xaa6   : > { %v23732_v35 = vadd.f32 %v15499_v17, %v23532_v9  ;;  %v15502_v51 = vadd.f32 %v15501_v15, %v15500_v12  ;;  %v17536_v17 = vld [vmem:[%s24886_s7 + $0x100] sm:$0xff]  }
 0xaa7   : > { %15781 = vmatprep.subr.bf16.mxu1 %v17536_v17 }
 0xaa8   : > { %v23735_v18 = vadd.f32 %v15502_v51, %v23534_v63 }
 0xaaa   : > { %v15503_v16 = vpop.f32.mrb[252].mxu1 }
 0xaab   : > { %v15504_v24 = vpop.f32.mrb[253].mxu1 }
 0xaac   : > { %v15505_v54 = vadd.f32 %v15504_v24, %v15503_v16  ;;  %v15506_v10 = vpop.f32.mrb[254].mxu1 }
 0xaad   : > { %v15507_v11 = vpop.f32.mrb[255].mxu1 }
 0xaae   : > { %v23738_v36 = vadd.f32 %v15505_v54, %v23538_v21  ;;  %v15508_v40 = vadd.f32 %v15507_v11, %v15506_v10 }
 0xab0   : > { %v23741_v25 = vadd.f32 %v15508_v40, %v23540_v49 }
 0xab2   : > { %v15509_v0 = vpop.f32.mrb[0].mxu1 }
 0xab3   : > { %v15510_v8 = vpop.f32.mrb[1].mxu1 }
 0xab4   : > { %v15511_v9 = vadd.f32 %v15510_v8, %v15509_v0  ;;  %v15512_v29 = vpop.f32.mrb[2].mxu1 }
 0xab5   : > { %v15513_v31 = vpop.f32.mrb[3].mxu1 }
 0xab6   : > { %v23744_v63 = vadd.f32 %v15511_v9, %v23547_v60  ;;  %v15514_v62 = vadd.f32 %v15513_v31, %v15512_v29 }
 0xab8   : > { %v23750_v21 = vadd.f32 %v15514_v62, %v23549_v47 }
 0xaba   : > { %v15515_v12 = vpop.f32.mrb[4].mxu1 }
 0xabb   : > { %v15516_v49 = vpop.f32.mrb[5].mxu1 }
 0xabc   : > { %v15517_v15 = vadd.f32 %v15516_v49, %v15515_v12  ;;  %v15518_v51 = vpop.f32.mrb[6].mxu1 }
 0xabd   : > { %v15519_v16 = vpop.f32.mrb[7].mxu1 }
 0xabe   : > { %v23753_v24 = vadd.f32 %v15517_v15, %v23553_v23  ;;  %v15520_v54 = vadd.f32 %v15519_v16, %v15518_v51  ;;  %v17544_v15 = vld [vmem:[%s24886_s7 + $0x1c0] sm:$0xff]  }
 0xabf   : > { %15917 = vmatprep.subr.bf16.mxu0 %v17544_v15 }
 0xac0   : > { %v23756_v60 = vadd.f32 %v15520_v54, %v23555_v46 }
 0xac2   : > { %v15521_v10 = vpop.f32.mrb[8].mxu1 }
 0xac3   : > { %v15522_v11 = vpop.f32.mrb[9].mxu1 }
 0xac4   : > { %v15523_v40 = vadd.f32 %v15522_v11, %v15521_v10  ;;  %v15524_v0 = vpop.f32.mrb[10].mxu1 }
 0xac5   : > { %v15525_v8 = vpop.f32.mrb[11].mxu1 }
 0xac6   : > { %v23759_v47 = vadd.f32 %v15523_v40, %v23562_v53  ;;  %v15526_v9 = vadd.f32 %v15525_v8, %v15524_v0  ;;  %v17545_v53 = vld [vmem:[%s24886_s7 + $0x180] sm:$0xff]  }
 0xac7   : > { %15918 = vmatpush3.bf16.msra.mxu0 %v17545_v53  ;;  %v23786_v8 = vld [vmem:[%s24885_s6] ss:$0 sm:$0xff] }
 0xac8   : > { %v23762_v29 = vadd.f32 %v15526_v9, %v23564_v6 }
 0xaca   : > { %v15527_v31 = vpop.f32.mrb[12].mxu1 }
 0xacb   : > { %v15528_v62 = vpop.f32.mrb[13].mxu1 }
 0xacc   : > { %v15529_v23 = vadd.f32 %v15528_v62, %v15527_v31  ;;  %v15530_v17 = vpop.f32.mrb[14].mxu1  ;;  %v17551_v62 = vld [vmem:[%s24886_s7 + $0x190] sm:$0xff]  }
 0xacd   : > { %v15531_v12 = vpop.f32.mrb[15].mxu1 }
 0xace   : > { %v23765_v46 = vadd.f32 %v15529_v23, %v23574_v59  ;;  %v15532_v49 = vadd.f32 %v15531_v12, %v15530_v17  ;;  %v17546_v59 = vld [vmem:[%s24886_s7 + $0x1c8] sm:$0xff]   ;;  %v17552_v23 = vld [vmem:[%s24886_s7 + $0x1d8] sm:$0xff]  }
 0xacf   : > { %15919 = vmatprep.subr.bf16.mxu0 %v17546_v59 }
 0xad0   : > { %v23774_v6 = vadd.f32 %v15532_v49, %v23576_v61  ;;  %v17548_v61 = vld [vmem:[%s24886_s7 + $0x188] sm:$0xff]  }
 0xad1   : > { %15920 = vmatpush3.bf16.msra.mxu0 %v17548_v61 }
 0xad2   : > { %v15549_v51 = vpop.f32.mrb[16].mxu1 }
 0xad3   : > { %v15550_v16 = vpop.f32.mrb[17].mxu1 }
 0xad4   : > { %v15551_v54 = vadd.f32 %v15550_v16, %v15549_v51  ;;  %v15552_v10 = vpop.f32.mrb[18].mxu1  ;;  %v17554_v51 = vld [vmem:[%s24886_s7 + $0x198] sm:$0xff]  }
 0xad5   : > { %v15553_v11 = vpop.f32.mrb[19].mxu1 }
 0xad6   : > { %v10090_v40 = vadd.f32 %v15551_v54, %v23596_v55  ;;  %v15554_v0 = vadd.f32 %v15553_v11, %v15552_v10  ;;  %v17550_v55 = vld [vmem:[%s24886_s7 + $0x1d0] sm:$0xff]   ;;  %v17556_v54 = vld [vmem:[%s24886_s7 + $0x1e0] sm:$0xff]  }
 0xad7   : > { %15921 = vmatprep.subr.bf16.mxu0 %v17550_v55 }
 0xad8   : > { %v10216_v9 = vadd.f32 %v10090_v40, %v23249_v44  ;;  %v10093_v31 = vadd.f32 %v15554_v0, %v23600_v22  ;;  %15922 = vmatpush3.bf16.msra.mxu0 %v17551_v62  ;;  %v17557_v40 = vld [vmem:[%s24886_s7 + $0x1a0] sm:$0xff]   ;;  %v17558_v0 = vld [vmem:[%s24886_s7 + $0x1e8] sm:$0xff]  }
 0xad9   : > { %15923 = vmatprep.subr.bf16.mxu0 %v17552_v23  ;;  %v17560_v62 = vld [vmem:[%s24886_s7 + $0x1a8] sm:$0xff]  }
 0xada   : > { %v10302_v17 = vadd.f32 %v23786_v8, %v10216_v9  ;;  %v10217_v12 = vadd.f32 %v10093_v31, %v23253_v7  ;;  %v15555_v44 = vpop.f32.mrb[20].mxu1 }
 0xadb   : > { %v15556_v49 = vpop.f32.mrb[21].mxu1 }
 0xadc   : > { %17840 = vtanh.f32 %v10302_v17  ;;  %v10303_v22 = vadd.f32 %v23786_v8, %v10217_v12  ;;  %v15557_v15 = vadd.f32 %v15556_v49, %v15555_v44  ;;  %v15558_v53 = vpop.f32.mrb[22].mxu1  ;;  %15924 = vmatpush3.bf16.msra.mxu0 %v17554_v51  ;;  %v14237_v17 = vld [vmem:[%s24888_s9 + $0x240] sm:$0xff] }
 0xadd   : > { %v15559_v16 = vpop.f32.mrb[23].mxu1  ;;  %15925 = vmatprep.subr.bf16.mxu0 %v17556_v54 }
 0xade   : > { %17842 = vtanh.f32 %v10303_v22  ;;  %v10098_v7 = vadd.f32 %v15557_v15, %v23607_v3  ;;  %v15560_v10 = vadd.f32 %v15559_v16, %v15558_v53  ;;  %v14238_v22 = vld [vmem:[%s24888_s9 + $0x250] sm:$0xff] }
 0xae0   : > { %v10218_v59 = vadd.f32 %v10098_v7, %v23259_v19  ;;  %v10101_v11 = vadd.f32 %v15560_v10, %v23617_v57  ;;  %15926 = vmatpush3.bf16.msra.mxu0 %v17557_v40  ;;  %v10702_v7 = vmul.f32 %v14237_v17, %v25957_v28  ;;  %v17563_v10 = vld [vmem:[%s24886_s7 + $0x1b0] sm:$0xff]  }
 0xae1   : > { %15927 = vmatprep.subr.bf16.mxu0 %v17558_v0 }
 0xae2   : > { %v10304_v61 = vadd.f32 %v23786_v8, %v10218_v59  ;;  %v10219_v9 = vadd.f32 %v10101_v11, %v23263_v42  ;;  %v15561_v3 = vpop.f32.mrb[24].mxu1  ;;  %v17562_v42 = vld [vmem:[%s24886_s7 + $0x1f0] sm:$0xff]  }
 0xae3   : > { %v15562_v31 = vpop.f32.mrb[25].mxu1 }
 0xae4   : > { %17844 = vtanh.f32 %v10304_v61  ;;  %v10305_v19 = vadd.f32 %v23786_v8, %v10219_v9  ;;  %v15563_v57 = vadd.f32 %v15562_v31, %v15561_v3  ;;  %v15564_v55 = vpop.f32.mrb[26].mxu1  ;;  %15928 = vmatpush3.bf16.msra.mxu0 %v17560_v62  ;;  %v10452_v3 = vld [vmem:[%s24888_s9 + $0x20] sm:$0xff]  ;;  %v10453_v31 = vld [vmem:[%s24888_s9 + $0x30] sm:$0xff] }
 0xae5   : > { %v15565_v23 = vpop.f32.mrb[27].mxu1  ;;  %15929 = vmatprep.subr.bf16.mxu0 %v17562_v42  ;;  %v17566_v42 = vld [vmem:[%s24886_s7 + $0x1b8] sm:$0xff]  }
 0xae6   : > { %v17841_v12 = vpop.eup %17840  ;;  %17846 = vtanh.f32 %v10305_v19  ;;  %v10106_v44 = vadd.f32 %v15563_v57, %v23633_v45  ;;  %v15566_v49 = vadd.f32 %v15565_v23, %v15564_v55 }
 0xae7   : > { %v10632_v15 = vrot.slane %v17841_v12, 1  ;;  %v10524_v53 = vrot.slane %v17841_v12, 7 }
 0xae8   : > { %v17843_v51 = vpop.eup %17842  ;;  %v10220_v16 = vadd.f32 %v10106_v44, %v23280_v32  ;;  %v10109_v54 = vadd.f32 %v15566_v49, %v23646_v4  ;;  %v17564_v32 = vld [vmem:[%s24886_s7 + $0x1f8] sm:$0xff]   ;;  %15930 = vmatpush3.bf16.msra.mxu0 %v17563_v10 }
 0xae9   : > { %v23839_v45 = vpack.c.bf16 %v17843_v51, %v17841_v12  ;;  %v10633_v59 = vrot.slane %v17843_v51, 1  ;;  %v10699_v11 = vsel %vm1469_vm1, %v25957_v28, %v10632_v15  ;;  %v10525_v40 = vrot.slane %v17843_v51, 7  ;;  %15931 = vmatprep.subr.bf16.mxu0 %v17564_v32 }
 0xaea   : > { %v10306_v4 = vadd.f32 %v23786_v8, %v10220_v16  ;;  %v10221_v0 = vadd.f32 %v10109_v54, %v23285_v5  ;;  %v15567_v61 = vpop.f32.mrb[28].mxu1  ;;  %v10703_v9 = vmul.f32 %v14238_v22, %v10699_v11  ;;  %v10591_v19 = vsel %vm1252_vm0, %v25847_v2, %v10524_v53  ;;  %v14239_v16 = vld [vmem:[%s24888_s9 + $0x260] sm:$0xff]  ;;  %v14240_v54 = vld [vmem:[%s24888_s9 + $0x270] sm:$0xff] }
 0xaeb   : > { %v15568_v57 = vpop.f32.mrb[29].mxu1  ;;  %11126 = vmatprep.mubr.bf16.mxu0 %v23839_v45  ;;  %v10698_v5 = vsel %vm1469_vm1, %v10632_v15, %v10633_v59  ;;  %v10590_v55 = vsel %vm1252_vm0, %v10524_v53, %v10525_v40  ;;  %v10596_v49 = vmul.f32 %v10591_v19, %v10452_v3 }
 0xaec   : > { %17848 = vtanh.f32 %v10306_v4  ;;  %v10307_v62 = vadd.f32 %v23786_v8, %v10221_v0  ;;  %v15569_v23 = vadd.f32 %v15568_v57, %v15567_v61  ;;  %v15570_v17 = vpop.f32.mrb[30].mxu1  ;;  %v10810_v44 = vpack.c.bf16 %v10703_v9, %v10702_v7  ;;  %15932 = vmatpush3.bf16.msra.mxu0 %v17566_v42 }
 0xaed   : > { %v15571_v12 = vpop.f32.mrb[31].mxu1  ;;  %v10597_v22 = vmul.f32 %v10590_v55, %v10453_v31  ;;  %v10704_v57 = vmul.f32 %v14239_v16, %v10698_v5 }
 0xaee   : > { %v17845_v51 = vpop.eup %17844  ;;  %17850 = vtanh.f32 %v10307_v62  ;;  %v10114_v15 = vadd.f32 %v15569_v23, %v23664_v38  ;;  %v15572_v53 = vadd.f32 %v15571_v12, %v15570_v17  ;;  %16069 = vmatprep.mubr.bf16.mxu1 %v10810_v44  ;;  %v17538_v44 = vld [vmem:[%s24886_s7 + $0x108] sm:$0xff]  }
 0xaef   : > { %v10634_v10 = vrot.slane %v17845_v51, 1  ;;  %v23874_v11 = vpack.c.bf16 %v10597_v22, %v10596_v49  ;;  %v10526_v7 = vrot.slane %v17845_v51, 7 }
 0xaf0   : > { %v17847_v4 = vpop.eup %17846  ;;  %v10222_v32 = vadd.f32 %v10114_v15, %v23301_v56  ;;  %v10117_v0 = vadd.f32 %v15572_v53, %v23686_v1  ;;  %v10454_v1 = vld [vmem:[%s24888_s9 + $0x40] sm:$0xff] }
 0xaf1   : > { %v10697_v38 = vsel %vm1469_vm1, %v10633_v59, %v10634_v10  ;;  %11127 = vmatmul.mubr.bf16.gmra.mrb[116].mxu0 %v23874_v11  ;;  %v23881_v61 = vpack.c.bf16 %v17847_v4, %v17845_v51  ;;  %v10527_v9 = vrot.slane %v17847_v4, 7  ;;  %v10589_v3 = vsel %vm1252_vm0, %v10525_v40, %v10526_v7  ;;  %v10455_v59 = vld [vmem:[%s24888_s9 + $0x50] sm:$0xff] }
 0xaf2   : > { %v10308_v31 = vadd.f32 %v23786_v8, %v10222_v32  ;;  %v10223_v19 = vadd.f32 %v10117_v0, %v23306_v27  ;;  %v10705_v56 = vmul.f32 %v14240_v54, %v10697_v38  ;;  %v15573_v55 = vpop.f32.mrb[32].mxu1  ;;  %v10635_v23 = vrot.slane %v17847_v4, 1  ;;  %v17537_v27 = vld [vmem:[%s24886_s7 + $0xc0] sm:$0xff]   ;;  %v14242_v4 = vld [vmem:[%s24888_s9 + $0x290] sm:$0xff] }
 0xaf3   : > { %v15574_v62 = vpop.f32.mrb[33].mxu1  ;;  %11134 = vmatprep.mubr.bf16.mxu0 %v23881_v61  ;;  %v10588_v40 = vsel %vm1252_vm0, %v10526_v7, %v10527_v9  ;;  %v10598_v22 = vmul.f32 %v10589_v3, %v10454_v1 }
 0xaf4   : > { %17852 = vtanh.f32 %v10308_v31  ;;  %v10309_v5 = vadd.f32 %v23786_v8, %v10223_v19  ;;  %v23900_v17 = vpack.c.bf16 %v10705_v56, %v10704_v57  ;;  %v15575_v42 = vadd.f32 %v15574_v62, %v15573_v55  ;;  %v15576_v12 = vpop.f32.mrb[34].mxu1  ;;  %v14241_v31 = vld [vmem:[%s24888_s9 + $0x280] sm:$0xff]  ;;  %v17540_v19 = vld [vmem:[%s24886_s7 + $0x110] sm:$0xff]  }
 0xaf5   : > { %v15577_v49 = vpop.f32.mrb[35].mxu1  ;;  %v10599_v51 = vmul.f32 %v10588_v40, %v10455_v59  ;;  %v10696_v15 = vsel %vm1469_vm1, %v10634_v10, %v10635_v23  ;;  %v17539_v10 = vld [vmem:[%s24886_s7 + $0xc8] sm:$0xff]   ;;  %v10456_v40 = vld [vmem:[%s24888_s9 + $0x60] sm:$0xff] }
 0xaf6   : > { %v17849_v53 = vpop.eup %17848  ;;  %17854 = vtanh.f32 %v10309_v5  ;;  %v10122_v16 = vadd.f32 %v15575_v42, %v23690_v41  ;;  %v15578_v54 = vadd.f32 %v15577_v49, %v15576_v12  ;;  %16070 = vmatmul.mubr.bf16.vlgmr.msra.gmra.mrb[80].mxu1 %v23900_v17 }
 0xaf7   : > { %v23909_v7 = vpack.c.bf16 %v10599_v51, %v10598_v22  ;;  %v10636_v32 = vrot.slane %v17849_v53, 1  ;;  %v10528_v0 = vrot.slane %v17849_v53, 7  ;;  %15782 = vmatpush3.bf16.msra.mxu1 %v17537_v27  ;;  %v10457_v27 = vld [vmem:[%s24888_s9 + $0x70] sm:$0xff]  ;;  %v17542_v51 = vld [vmem:[%s24886_s7 + $0x118] sm:$0xff]  }
 0xaf8   : > { %v17851_v38 = vpop.eup %17850  ;;  %v10224_v3 = vadd.f32 %v10122_v16, %v23311_v48  ;;  %v10125_v41 = vadd.f32 %v15578_v54, %v23696_v39  ;;  %15783 = vmatprep.subr.bf16.mxu1 %v17538_v44  ;;  %v17541_v44 = vld [vmem:[%s24886_s7 + $0xd0] sm:$0xff]  }
 0xaf9   : > { %11135 = vmatmul.mubr.bf16.gmra.mrb[120].mxu0 %v23909_v7  ;;  %v23926_v57 = vpack.c.bf16 %v17851_v38, %v17849_v53  ;;  %v10637_v56 = vrot.slane %v17851_v38, 1  ;;  %v10695_v55 = vsel %vm1469_vm1, %v10635_v23, %v10636_v32  ;;  %v10529_v48 = vrot.slane %v17851_v38, 7  ;;  %v14244_v38 = vld [vmem:[%s24888_s9 + $0x2b0] sm:$0xff] }
 0xafa   : > { %v10310_v39 = vadd.f32 %v23786_v8, %v10224_v3  ;;  %v10225_v1 = vadd.f32 %v10125_v41, %v23315_v26  ;;  %v15579_v59 = vpop.f32.mrb[36].mxu1  ;;  %v10707_v62 = vmul.f32 %v14242_v4, %v10695_v55  ;;  %v10587_v5 = vsel %vm1252_vm0, %v10527_v9, %v10528_v0  ;;  %v25960_v55 = vld [vmem:[#allocation24_spill] sm:$0xff] }
 0xafb   : > { %v15580_v42 = vpop.f32.mrb[37].mxu1  ;;  %11142 = vmatprep.mubr.bf16.mxu0 %v23926_v57  ;;  %v10694_v23 = vsel %vm1469_vm1, %v10636_v32, %v10637_v56  ;;  %v10706_v26 = vmul.f32 %v14241_v31, %v10696_v15  ;;  %v10586_v12 = vsel %vm1252_vm0, %v10528_v0, %v10529_v48  ;;  %15784 = vmatpush3.bf16.msra.mxu1 %v17539_v10  ;;  %v14243_v10 = vld [vmem:[%s24888_s9 + $0x2a0] sm:$0xff] }
 0xafc   : > { %17856 = vtanh.f32 %v10310_v39  ;;  %v10311_v49 = vadd.f32 %v23786_v8, %v10225_v1  ;;  %v15581_v22 = vadd.f32 %v15580_v42, %v15579_v59  ;;  %v15582_v9 = vpop.f32.mrb[38].mxu1  ;;  %15785 = vmatprep.subr.bf16.mxu1 %v17540_v19  ;;  %v10600_v16 = vmul.f32 %v10587_v5, %v10456_v40  ;;  %v17547_v59 = vld [vmem:[%s24886_s7 + $0x120] sm:$0xff]   ;;  %v25961_v42 = vld [vmem:[#allocation43_spill] sm:$0xff] }
 0xafd   : > { %v15583_v53 = vpop.f32.mrb[39].mxu1  ;;  %v23952_v15 = vpack.c.bf16 %v10707_v62, %v10706_v26  ;;  %v10601_v54 = vmul.f32 %v10586_v12, %v10457_v27  ;;  %v10708_v12 = vmul.f32 %v14243_v10, %v10694_v23  ;;  %v17549_v23 = vld [vmem:[%s24886_s7 + $0xe0] sm:$0xff]  }
 0xafe   : > { %v17853_v4 = vpop.eup %17852  ;;  %17858 = vtanh.f32 %v10311_v49  ;;  %v10130_v32 = vadd.f32 %v15581_v22, %v23702_v20  ;;  %v15584_v0 = vadd.f32 %v15583_v53, %v15582_v9  ;;  %v17543_v20 = vld [vmem:[%s24886_s7 + $0xd8] sm:$0xff]   ;;  %v10459_v22 = vld [vmem:[%s24888_s9 + $0x90] sm:$0xff] }
 0xaff   : > { %25959 = vst [vmem:[#allocation71_spill] sm:$0xff] %v23952_v15  ;;  %v10638_v3 = vrot.slane %v17853_v4, 1  ;;  %16073 = vmatprep.mubr.bf16.mxu1 %v23952_v15  ;;  %v23962_v41 = vpack.c.bf16 %v10601_v54, %v10600_v16  ;;  %v10530_v31 = vrot.slane %v17853_v4, 7  ;;  %15786 = vmatpush3.bf16.msra.mxu1 %v17541_v44 }
 0xb00   : > { %v23967_v19 = vpop.eup %17854  ;;  %v10226_v39 = vadd.f32 %v10130_v32, %v25960_v55  ;;  %v10133_v1 = vadd.f32 %v15584_v0, %v23705_v14  ;;  %15787 = vmatprep.subr.bf16.mxu1 %v17542_v51  ;;  %v17553_v32 = vld [vmem:[%s24886_s7 + $0x128] sm:$0xff]  }
 0xb01   : > { %v10693_v62 = vsel %vm1469_vm1, %v10637_v56, %v10638_v3  ;;  %11143 = vmatmul.mubr.bf16.gmra.mrb[124].mxu0 %v23962_v41  ;;  %v23978_v40 = vpack.c.bf16 %v23967_v19, %v17853_v4  ;;  %v10531_v27 = vrot.slane %v23967_v19, 7  ;;  %v10585_v5 = vsel %vm1252_vm0, %v10529_v48, %v10530_v31  ;;  %v10458_v56 = vld [vmem:[%s24888_s9 + $0x80] sm:$0xff] }
 0xb02   : > { %v10312_v14 = vadd.f32 %v23786_v8, %v10226_v39  ;;  %v10227_v26 = vadd.f32 %v10133_v1, %v25961_v42  ;;  %v10709_v44 = vmul.f32 %v14244_v38, %v10693_v62  ;;  %v15585_v49 = vpop.f32.mrb[40].mxu1  ;;  %v10639_v51 = vrot.slane %v23967_v19, 1  ;;  %v14246_v1 = vld [vmem:[%s24888_s9 + $0x2d0] sm:$0xff] }
 0xb03   : > { %v15586_v9 = vpop.f32.mrb[41].mxu1  ;;  %11150 = vmatprep.mubr.bf16.mxu0 %v23978_v40  ;;  %v10584_v48 = vsel %vm1252_vm0, %v10530_v31, %v10531_v27  ;;  %15788 = vmatpush3.bf16.msra.mxu1 %v17543_v20  ;;  %v10602_v10 = vmul.f32 %v10585_v5, %v10458_v56 }
 0xb04   : > { %17860 = vtanh.f32 %v10312_v14  ;;  %v10313_v53 = vadd.f32 %v23786_v8, %v10227_v26  ;;  %v23999_v16 = vpack.c.bf16 %v10709_v44, %v10708_v12  ;;  %v15587_v54 = vadd.f32 %v15586_v9, %v15585_v49  ;;  %v15588_v4 = vpop.f32.mrb[42].mxu1  ;;  %15789 = vmatprep.subr.bf16.mxu1 %v17547_v59  ;;  %v25963_v14 = vld [vmem:[#allocation22_spill] sm:$0xff]  ;;  %v14245_v26 = vld [vmem:[%s24888_s9 + $0x2c0] sm:$0xff]  ;;  %v17559_v12 = vld [vmem:[%s24886_s7 + $0x130] sm:$0xff]  }
 0xb05   : > { %v15589_v0 = vpop.f32.mrb[43].mxu1  ;;  %v10603_v38 = vmul.f32 %v10584_v48, %v10459_v22  ;;  %v10692_v31 = vsel %vm1469_vm1, %v10638_v3, %v10639_v51  ;;  %v17555_v3 = vld [vmem:[%s24886_s7 + $0xe8] sm:$0xff]   ;;  %v25964_v9 = vld [vmem:[#allocation17_spill] sm:$0xff] }
 0xb06   : > { %25962 = vst [vmem:[#allocation86_spill] sm:$0xff] %v23999_v16  ;;  %v17857_v20 = vpop.eup %17856  ;;  %17862 = vtanh.f32 %v10313_v53  ;;  %v10138_v19 = vadd.f32 %v15587_v54, %v23708_v37  ;;  %v15590_v55 = vadd.f32 %v15589_v0, %v15588_v4  ;;  %16074 = vmatmul.mubr.bf16.gmra.mrb[84].mxu1 %v23999_v16  ;;  %v10460_v54 = vld [vmem:[%s24888_s9 + $0xa0] sm:$0xff]  ;;  %v10461_v4 = vld [vmem:[%s24888_s9 + $0xb0] sm:$0xff] }
 0xb07   : > { %v24008_v39 = vpack.c.bf16 %v10603_v38, %v10602_v10  ;;  %v10640_v59 = vrot.slane %v17857_v20, 1  ;;  %v10532_v62 = vrot.slane %v17857_v20, 7  ;;  %15790 = vmatpush3.bf16.msra.mxu1 %v17549_v23  ;;  %v10710_v10 = vmul.f32 %v14245_v26, %v10692_v31  ;;  %v14248_v26 = vld [vmem:[%s24888_s9 + $0x2f0] sm:$0xff] }
 0xb08   : > { %v17859_v5 = vpop.eup %17858  ;;  %v10228_v42 = vadd.f32 %v10138_v19, %v25963_v14  ;;  %v10141_v37 = vadd.f32 %v15590_v55, %v23711_v43  ;;  %15791 = vmatprep.subr.bf16.mxu1 %v17553_v32 }
 0xb09   : > { %11151 = vmatmul.mubr.bf16.gmra.mrb[128].mxu0 %v24008_v39  ;;  %v24025_v44 = vpack.c.bf16 %v17859_v5, %v17857_v20  ;;  %v10641_v49 = vrot.slane %v17859_v5, 1  ;;  %v10691_v56 = vsel %vm1469_vm1, %v10639_v51, %v10640_v59  ;;  %v10533_v22 = vrot.slane %v17859_v5, 7  ;;  %v17561_v20 = vld [vmem:[%s24886_s7 + $0xf0] sm:$0xff]  }
 0xb0a   : > { %v10314_v43 = vadd.f32 %v23786_v8, %v10228_v42  ;;  %v10229_v48 = vadd.f32 %v10141_v37, %v25964_v9  ;;  %v15591_v23 = vpop.f32.mrb[44].mxu1  ;;  %v10711_v53 = vmul.f32 %v14246_v1, %v10691_v56  ;;  %v10583_v32 = vsel %vm1252_vm0, %v10531_v27, %v10532_v62  ;;  %v17565_v1 = vld [vmem:[%s24886_s7 + $0x138] sm:$0xff]   ;;  %v14247_v37 = vld [vmem:[%s24888_s9 + $0x2e0] sm:$0xff] }
 0xb0b   : > { %v15592_v0 = vpop.f32.mrb[45].mxu1  ;;  %11158 = vmatprep.mubr.bf16.mxu0 %v24025_v44  ;;  %v10690_v51 = vsel %vm1469_vm1, %v10640_v59, %v10641_v49  ;;  %v10582_v38 = vsel %vm1252_vm0, %v10532_v62, %v10533_v22  ;;  %15792 = vmatpush3.bf16.msra.mxu1 %v17555_v3  ;;  %v10604_v5 = vmul.f32 %v10583_v32, %v10460_v54  ;;  %v24071_v54 = vld [vmem:[%s24886_s7 + $0x140] sm:$0xff]  }
 0xb0c   : > { %17864 = vtanh.f32 %v10314_v43  ;;  %v10315_v19 = vadd.f32 %v23786_v8, %v10229_v48  ;;  %v15593_v55 = vadd.f32 %v15592_v0, %v15591_v23  ;;  %v15594_v27 = vpop.f32.mrb[46].mxu1  ;;  %15793 = vmatprep.subr.bf16.mxu1 %v17559_v12  ;;  %v24051_v31 = vpack.c.bf16 %v10711_v53, %v10710_v10  ;;  %v25966_v48 = vld [vmem:[#allocation40_spill] sm:$0xff] }
 0xb0d   : > { %v15595_v59 = vpop.f32.mrb[47].mxu1  ;;  %v10605_v62 = vmul.f32 %v10582_v38, %v10461_v4 }
 0xb0e   : > { %25965 = vst [vmem:[#allocation42_spill] sm:$0xff] %v24051_v31  ;;  %v17861_v3 = vpop.eup %17860  ;;  %17866 = vtanh.f32 %v10315_v19  ;;  %v10146_v14 = vadd.f32 %v15593_v55, %v23714_v58  ;;  %v15596_v42 = vadd.f32 %v15595_v59, %v15594_v27  ;;  %16077 = vmatprep.mubr.bf16.mxu1 %v24051_v31  ;;  %v17567_v58 = vld [vmem:[%s24886_s7 + $0xf8] sm:$0xff]   ;;  %v10712_v19 = vmul.f32 %v14247_v37, %v10690_v51 }
 0xb0f   : > { %v10642_v12 = vrot.slane %v17861_v3, 1  ;;  %v24061_v56 = vpack.c.bf16 %v10605_v62, %v10604_v5  ;;  %v10534_v43 = vrot.slane %v17861_v3, 7  ;;  %15794 = vmatpush3.bf16.msra.mxu1 %v17561_v20 }
 0xb10   : > { %v17863_v9 = vpop.eup %17862  ;;  %v10230_v23 = vadd.f32 %v10146_v14, %v25966_v48  ;;  %v10149_v53 = vadd.f32 %v15596_v42, %v23717_v52  ;;  %15795 = vmatprep.subr.bf16.mxu1 %v17565_v1  ;;  %v25967_v52 = vld [vmem:[#allocation38_spill] sm:$0xff]  ;;  %v10462_v1 = vld [vmem:[%s24888_s9 + $0xc0] sm:$0xff] }
 0xb11   : > { %v10689_v4 = vsel %vm1469_vm1, %v10641_v49, %v10642_v12  ;;  %11159 = vmatmul.mubr.bf16.gmra.mrb[132].mxu0 %v24061_v56  ;;  %v24076_v32 = vpack.c.bf16 %v17863_v9, %v17861_v3  ;;  %v10535_v0 = vrot.slane %v17863_v9, 7  ;;  %v10581_v10 = vsel %vm1252_vm0, %v10533_v22, %v10534_v43  ;;  %v10463_v49 = vld [vmem:[%s24888_s9 + $0xd0] sm:$0xff] }
 0xb12   : > { %v10316_v38 = vadd.f32 %v23786_v8, %v10230_v23  ;;  %v10231_v20 = vadd.f32 %v10149_v53, %v25967_v52  ;;  %v10713_v55 = vmul.f32 %v14248_v26, %v10689_v4  ;;  %v15597_v27 = vpop.f32.mrb[48].mxu1  ;;  %v10643_v5 = vrot.slane %v17863_v9, 1  ;;  %v14250_v53 = vld [vmem:[%s24888_s9 + $0x310] sm:$0xff]  ;;  %v25969_v52 = vld [vmem:[#allocation53_spill] sm:$0xff] }
 0xb13   : > { %v15598_v59 = vpop.f32.mrb[49].mxu1  ;;  %11166 = vmatprep.mubr.bf16.mxu0 %v24076_v32  ;;  %v10580_v22 = vsel %vm1252_vm0, %v10534_v43, %v10535_v0  ;;  %15796 = vmatpush3.bf16.msra.mxu1 %v17567_v58  ;;  %v10606_v37 = vmul.f32 %v10581_v10, %v10462_v1 }
 0xb14   : > { %17868 = vtanh.f32 %v10316_v38  ;;  %v10317_v51 = vadd.f32 %v23786_v8, %v10231_v20  ;;  %v24092_v62 = vpack.c.bf16 %v10713_v55, %v10712_v19  ;;  %v15599_v3 = vadd.f32 %v15598_v59, %v15597_v27  ;;  %v15600_v14 = vpop.f32.mrb[50].mxu1  ;;  %16101 = vmatprep.subr.bf16.mxu1 %v24071_v54  ;;  %v25970_v59 = vld [vmem:[#allocation50_spill] sm:$0xff] }
 0xb15   : > { %v15601_v42 = vpop.f32.mrb[51].mxu1  ;;  %v10607_v26 = vmul.f32 %v10580_v22, %v10463_v49  ;;  %v10688_v48 = vsel %vm1469_vm1, %v10642_v12, %v10643_v5 }
 0xb16   : > { %25968 = vst [vmem:[#allocation54_spill] sm:$0xff] %v24092_v62  ;;  %v17865_v23 = vpop.eup %17864  ;;  %17870 = vtanh.f32 %v10317_v51  ;;  %v10154_v43 = vadd.f32 %v15599_v3, %v23720_v33  ;;  %v15602_v58 = vadd.f32 %v15601_v42, %v15600_v14  ;;  %16078 = vmatmul.mubr.bf16.gmra.mrb[88].mxu1 %v24092_v62  ;;  %v14249_v33 = vld [vmem:[%s24888_s9 + $0x300] sm:$0xff]  ;;  %v10465_v14 = vld [vmem:[%s24888_s9 + $0xf0] sm:$0xff] }
 0xb17   : > { %v24099_v9 = vpack.c.bf16 %v10607_v26, %v10606_v37  ;;  %v10644_v4 = vrot.slane %v17865_v23, 1  ;;  %v10536_v38 = vrot.slane %v17865_v23, 7  ;;  %v10714_v26 = vmul.f32 %v14249_v33, %v10688_v48  ;;  %v14251_v48 = vld [vmem:[%s24888_s9 + $0x320] sm:$0xff] }
 0xb18   : > { %v17867_v10 = vpop.eup %17866  ;;  %v10232_v20 = vadd.f32 %v10154_v43, %v25969_v52  ;;  %v10157_v12 = vadd.f32 %v15602_v58, %v23723_v50  ;;  %v10464_v50 = vld [vmem:[%s24888_s9 + $0xe0] sm:$0xff] }
 0xb19   : > { %11167 = vmatmul.mubr.bf16.gmra.mrb[136].mxu0 %v24099_v9  ;;  %v24110_v19 = vpack.c.bf16 %v17867_v10, %v17865_v23  ;;  %v10645_v55 = vrot.slane %v17867_v10, 1  ;;  %v10687_v27 = vsel %vm1469_vm1, %v10643_v5, %v10644_v4  ;;  %v10537_v1 = vrot.slane %v17867_v10, 7 }
 0xb1a   : > { %v10366_v49 = vadd.f32 %v23786_v8, %v10232_v20  ;;  %v10233_v22 = vadd.f32 %v10157_v12, %v25970_v59  ;;  %v15603_v51 = vpop.f32.mrb[52].mxu1  ;;  %v10715_v3 = vmul.f32 %v14250_v53, %v10687_v27  ;;  %v10579_v42 = vsel %vm1252_vm0, %v10535_v0, %v10536_v38 }
 0xb1b   : > { %v15604_v37 = vpop.f32.mrb[53].mxu1  ;;  %11174 = vmatprep.mubr.bf16.mxu0 %v24110_v19  ;;  %v10686_v5 = vsel %vm1469_vm1, %v10644_v4, %v10645_v55  ;;  %v10578_v23 = vsel %vm1252_vm0, %v10536_v38, %v10537_v1  ;;  %v10608_v20 = vmul.f32 %v10579_v42, %v10464_v50  ;;  %v14252_v4 = vld [vmem:[%s24888_s9 + $0x330] sm:$0xff] }
 0xb1c   : > { %17872 = vtanh.f32 %v10366_v49  ;;  %v10367_v43 = vadd.f32 %v23786_v8, %v10233_v22  ;;  %v15605_v58 = vadd.f32 %v15604_v37, %v15603_v51  ;;  %v15606_v53 = vpop.f32.mrb[54].mxu1  ;;  %v24130_v52 = vpack.c.bf16 %v10715_v3, %v10714_v26  ;;  %v25972_v51 = vld [vmem:[#allocation7_spill] sm:$0xff] }
 0xb1d   : > { %v15607_v10 = vpop.f32.mrb[55].mxu1  ;;  %v10609_v0 = vmul.f32 %v10578_v23, %v10465_v14  ;;  %v25973_v23 = vld [vmem:[#allocation48_spill] sm:$0xff] }
 0xb1e   : > { %25971 = vst [vmem:[#allocation5_spill] sm:$0xff] %v24130_v52  ;;  %v17869_v12 = vpop.eup %17868  ;;  %17874 = vtanh.f32 %v10367_v43  ;;  %v10162_v27 = vadd.f32 %v15605_v58, %v23726_v30  ;;  %v15608_v59 = vadd.f32 %v15607_v10, %v15606_v53  ;;  %16081 = vmatprep.mubr.bf16.mxu1 %v24130_v52  ;;  %v10716_v58 = vmul.f32 %v14251_v48, %v10686_v5 }
 0xb1f   : > { %v10646_v38 = vrot.slane %v17869_v12, 1  ;;  %v24140_v33 = vpack.c.bf16 %v10609_v0, %v10608_v20  ;;  %v10538_v49 = vrot.slane %v17869_v12, 7 }
 0xb20   : > { %v17871_v22 = vpop.eup %17870  ;;  %v10234_v3 = vadd.f32 %v10162_v27, %v25972_v51  ;;  %v10165_v30 = vadd.f32 %v15608_v59, %v23729_v34  ;;  %v10466_v34 = vld [vmem:[%s24888_s9 + $0x100] sm:$0xff] }
 0xb21   : > { %v10685_v50 = vsel %vm1469_vm1, %v10645_v55, %v10646_v38  ;;  %11175 = vmatmul.mubr.bf16.gmra.mrb[140].mxu0 %v24140_v33  ;;  %v24147_v14 = vpack.c.bf16 %v17871_v22, %v17869_v12  ;;  %v10539_v42 = vrot.slane %v17871_v22, 7  ;;  %v10577_v37 = vsel %vm1252_vm0, %v10537_v1, %v10538_v49  ;;  %v10467_v55 = vld [vmem:[%s24888_s9 + $0x110] sm:$0xff] }
 0xb22   : > { %v10368_v26 = vadd.f32 %v23786_v8, %v10234_v3  ;;  %v10235_v43 = vadd.f32 %v10165_v30, %v25973_v23  ;;  %v10717_v53 = vmul.f32 %v14252_v4, %v10685_v50  ;;  %v15609_v10 = vpop.f32.mrb[56].mxu1  ;;  %v10647_v0 = vrot.slane %v17871_v22, 1  ;;  %v14254_v22 = vld [vmem:[%s24888_s9 + $0x350] sm:$0xff] }
 0xb23   : > { %v15610_v20 = vpop.f32.mrb[57].mxu1  ;;  %11182 = vmatprep.mubr.bf16.mxu0 %v24147_v14  ;;  %v10576_v1 = vsel %vm1252_vm0, %v10538_v49, %v10539_v42  ;;  %v10610_v4 = vmul.f32 %v10577_v37, %v10466_v34 }
 0xb24   : > { %17876 = vtanh.f32 %v10368_v26  ;;  %v10369_v5 = vadd.f32 %v23786_v8, %v10235_v43  ;;  %v24163_v12 = vpack.c.bf16 %v10717_v53, %v10716_v58  ;;  %v15611_v27 = vadd.f32 %v15610_v20, %v15609_v10  ;;  %v15612_v59 = vpop.f32.mrb[58].mxu1  ;;  %v25975_v58 = vld [vmem:[#allocation63_spill] sm:$0xff] }
 0xb25   : > { %v15613_v48 = vpop.f32.mrb[59].mxu1  ;;  %v10611_v51 = vmul.f32 %v10576_v1, %v10467_v55  ;;  %v10684_v3 = vsel %vm1469_vm1, %v10646_v38, %v10647_v0 }
 0xb26   : > { %25974 = vst [vmem:[#allocation45_spill] sm:$0xff] %v24163_v12  ;;  %v17873_v30 = vpop.eup %17872  ;;  %17878 = vtanh.f32 %v10369_v5  ;;  %v10170_v50 = vadd.f32 %v15611_v27, %v23732_v35  ;;  %v15614_v23 = vadd.f32 %v15613_v48, %v15612_v59  ;;  %16082 = vmatmul.mubr.bf16.gmra.mrb[92].mxu1 %v24163_v12  ;;  %v14253_v35 = vld [vmem:[%s24888_s9 + $0x340] sm:$0xff]  ;;  %v25976_v5 = vld [vmem:[#allocation67_spill] sm:$0xff] }
 0xb27   : > { %v24169_v49 = vpack.c.bf16 %v10611_v51, %v10610_v4  ;;  %v10648_v26 = vrot.slane %v17873_v30, 1  ;;  %v10540_v43 = vrot.slane %v17873_v30, 7  ;;  %v10469_v4 = vld [vmem:[%s24888_s9 + $0x130] sm:$0xff] }
 0xb28   : > { %v17875_v37 = vpop.eup %17874  ;;  %v10236_v53 = vadd.f32 %v10170_v50, %v25975_v58  ;;  %v10173_v38 = vadd.f32 %v15614_v23, %v23735_v18  ;;  %v10468_v18 = vld [vmem:[%s24888_s9 + $0x120] sm:$0xff]  ;;  %v10718_v50 = vmul.f32 %v14253_v35, %v10684_v3 }
 0xb29   : > { %11183 = vmatmul.mubr.bf16.gmra.mrb[144].mxu0 %v24169_v49  ;;  %v24180_v10 = vpack.c.bf16 %v17875_v37, %v17873_v30  ;;  %v10649_v34 = vrot.slane %v17875_v37, 1  ;;  %v10683_v55 = vsel %vm1469_vm1, %v10647_v0, %v10648_v26  ;;  %v10541_v20 = vrot.slane %v17875_v37, 7  ;;  %v14255_v3 = vld [vmem:[%s24888_s9 + $0x360] sm:$0xff] }
 0xb2a   : > { %v10370_v1 = vadd.f32 %v23786_v8, %v10236_v53  ;;  %v10237_v27 = vadd.f32 %v10173_v38, %v25976_v5  ;;  %v15615_v59 = vpop.f32.mrb[60].mxu1  ;;  %v10719_v48 = vmul.f32 %v14254_v22, %v10683_v55  ;;  %v10575_v51 = vsel %vm1252_vm0, %v10539_v42, %v10540_v43 }
 0xb2b   : > { %v15616_v30 = vpop.f32.mrb[61].mxu1  ;;  %11190 = vmatprep.mubr.bf16.mxu0 %v24180_v10  ;;  %v10682_v0 = vsel %vm1469_vm1, %v10648_v26, %v10649_v34  ;;  %v10574_v23 = vsel %vm1252_vm0, %v10540_v43, %v10541_v20  ;;  %v10612_v55 = vmul.f32 %v10575_v51, %v10468_v18  ;;  %v14256_v26 = vld [vmem:[%s24888_s9 + $0x370] sm:$0xff] }
 0xb2c   : > { %17880 = vtanh.f32 %v10370_v1  ;;  %v10371_v22 = vadd.f32 %v23786_v8, %v10237_v27  ;;  %v15617_v37 = vadd.f32 %v15616_v30, %v15615_v59  ;;  %v15618_v58 = vpop.f32.mrb[62].mxu1  ;;  %v24200_v38 = vpack.c.bf16 %v10719_v48, %v10718_v50  ;;  %v25978_v59 = vld [vmem:[#allocation39_spill] sm:$0xff] }
 0xb2d   : > { %v15619_v53 = vpop.f32.mrb[63].mxu1  ;;  %v10613_v42 = vmul.f32 %v10574_v23, %v10469_v4  ;;  %v25979_v23 = vld [vmem:[#allocation37_spill] sm:$0xff] }
 0xb2e   : > { %25977 = vst [vmem:[#allocation6_spill] sm:$0xff] %v24200_v38  ;;  %v17877_v5 = vpop.eup %17876  ;;  %17882 = vtanh.f32 %v10371_v22  ;;  %v10178_v12 = vadd.f32 %v15617_v37, %v23738_v36  ;;  %v15620_v52 = vadd.f32 %v15619_v53, %v15618_v58  ;;  %16085 = vmatprep.mubr.bf16.mxu1 %v24200_v38  ;;  %v10720_v37 = vmul.f32 %v14255_v3, %v10682_v0 }
 0xb2f   : > { %v10650_v43 = vrot.slane %v17877_v5, 1  ;;  %v24210_v35 = vpack.c.bf16 %v10613_v42, %v10612_v55  ;;  %v10542_v1 = vrot.slane %v17877_v5, 7 }
 0xb30   : > { %v17879_v27 = vpop.eup %17878  ;;  %v10238_v48 = vadd.f32 %v10178_v12, %v25978_v59  ;;  %v10181_v36 = vadd.f32 %v15620_v52, %v23741_v25  ;;  %v10470_v25 = vld [vmem:[%s24888_s9 + $0x140] sm:$0xff]  ;;  %v10471_v52 = vld [vmem:[%s24888_s9 + $0x150] sm:$0xff] }
 0xb31   : > { %v10681_v18 = vsel %vm1469_vm1, %v10649_v34, %v10650_v43  ;;  %11191 = vmatmul.mubr.bf16.gmra.mrb[148].mxu0 %v24210_v35  ;;  %v24217_v4 = vpack.c.bf16 %v17879_v27, %v17877_v5  ;;  %v10543_v51 = vrot.slane %v17879_v27, 7  ;;  %v10573_v30 = vsel %vm1252_vm0, %v10541_v20, %v10542_v1 }
 0xb32   : > { %v10372_v50 = vadd.f32 %v23786_v8, %v10238_v48  ;;  %v10239_v22 = vadd.f32 %v10181_v36, %v25979_v23  ;;  %v10721_v58 = vmul.f32 %v14256_v26, %v10681_v18  ;;  %v15621_v12 = vpop.f32.mrb[64].mxu1  ;;  %v10651_v53 = vrot.slane %v17879_v27, 1  ;;  %v14258_v27 = vld [vmem:[%s24888_s9 + $0x390] sm:$0xff] }
 0xb33   : > { %v15622_v34 = vpop.f32.mrb[65].mxu1  ;;  %11198 = vmatprep.mubr.bf16.mxu0 %v24217_v4  ;;  %v10572_v20 = vsel %vm1252_vm0, %v10542_v1, %v10543_v51  ;;  %v10614_v26 = vmul.f32 %v10573_v30, %v10470_v25 }
 0xb34   : > { %17884 = vtanh.f32 %v10372_v50  ;;  %v10373_v0 = vadd.f32 %v23786_v8, %v10239_v22  ;;  %v24233_v55 = vpack.c.bf16 %v10721_v58, %v10720_v37  ;;  %v15623_v42 = vadd.f32 %v15622_v34, %v15621_v12  ;;  %v15624_v5 = vpop.f32.mrb[66].mxu1  ;;  %v25981_v37 = vld [vmem:[#allocation58_spill] sm:$0xff] }
 0xb35   : > { %v15625_v3 = vpop.f32.mrb[67].mxu1  ;;  %v10615_v59 = vmul.f32 %v10572_v20, %v10471_v52  ;;  %v10680_v48 = vsel %vm1469_vm1, %v10650_v43, %v10651_v53 }
 0xb36   : > { %25980 = vst [vmem:[#allocation46_spill] sm:$0xff] %v24233_v55  ;;  %v17881_v36 = vpop.eup %17880  ;;  %17886 = vtanh.f32 %v10373_v0  ;;  %v10186_v18 = vadd.f32 %v15623_v42, %v23744_v63  ;;  %v15626_v23 = vadd.f32 %v15625_v3, %v15624_v5  ;;  %16086 = vmatmul.mubr.bf16.gmra.mrb[96].mxu1 %v24233_v55  ;;  %v14257_v63 = vld [vmem:[%s24888_s9 + $0x380] sm:$0xff]  ;;  %v25982_v0 = vld [vmem:[#allocation83_spill] sm:$0xff] }
 0xb37   : > { %v24239_v1 = vpack.c.bf16 %v10615_v59, %v10614_v26  ;;  %v10652_v50 = vrot.slane %v17881_v36, 1  ;;  %v10544_v22 = vrot.slane %v17881_v36, 7  ;;  %v10473_v26 = vld [vmem:[%s24888_s9 + $0x170] sm:$0xff] }
 0xb38   : > { %v17883_v30 = vpop.eup %17882  ;;  %v10240_v58 = vadd.f32 %v10186_v18, %v25981_v37  ;;  %v10189_v43 = vadd.f32 %v15626_v23, %v23750_v21  ;;  %v10472_v21 = vld [vmem:[%s24888_s9 + $0x160] sm:$0xff]  ;;  %v10722_v18 = vmul.f32 %v14257_v63, %v10680_v48 }
 0xb39   : > { %11199 = vmatmul.mubr.bf16.gmra.mrb[152].mxu0 %v24239_v1  ;;  %v24250_v12 = vpack.c.bf16 %v17883_v30, %v17881_v36  ;;  %v10653_v25 = vrot.slane %v17883_v30, 1  ;;  %v10679_v52 = vsel %vm1469_vm1, %v10651_v53, %v10652_v50  ;;  %v10545_v34 = vrot.slane %v17883_v30, 7  ;;  %v14259_v48 = vld [vmem:[%s24888_s9 + $0x3a0] sm:$0xff] }
 0xb3a   : > { %v10374_v20 = vadd.f32 %v23786_v8, %v10240_v58  ;;  %v10241_v42 = vadd.f32 %v10189_v43, %v25982_v0  ;;  %v15627_v5 = vpop.f32.mrb[68].mxu1  ;;  %v10723_v3 = vmul.f32 %v14258_v27, %v10679_v52  ;;  %v10571_v59 = vsel %vm1252_vm0, %v10543_v51, %v10544_v22 }
 0xb3b   : > { %v15628_v36 = vpop.f32.mrb[69].mxu1  ;;  %11206 = vmatprep.mubr.bf16.mxu0 %v24250_v12  ;;  %v10678_v53 = vsel %vm1469_vm1, %v10652_v50, %v10653_v25  ;;  %v10570_v23 = vsel %vm1252_vm0, %v10544_v22, %v10545_v34  ;;  %v10616_v52 = vmul.f32 %v10571_v59, %v10472_v21 }
 0xb3c   : > { %17888 = vtanh.f32 %v10374_v20  ;;  %v10375_v27 = vadd.f32 %v23786_v8, %v10241_v42  ;;  %v15629_v30 = vadd.f32 %v15628_v36, %v15627_v5  ;;  %v15630_v37 = vpop.f32.mrb[70].mxu1  ;;  %v24270_v43 = vpack.c.bf16 %v10723_v3, %v10722_v18  ;;  %v14260_v8 = vld [vmem:[%s24888_s9 + $0x3b0] sm:$0xff]  ;;  %v25984_v42 = vld [vmem:[#allocation84_spill] sm:$0xff]  ;;  %v24294_v36 = vld [vmem:[%s24885_s6] ss:$0 sm:$0xff] }
 0xb3d   : > { %v15631_v58 = vpop.f32.mrb[71].mxu1  ;;  %v10617_v51 = vmul.f32 %v10570_v23, %v10473_v26  ;;  %v25985_v18 = vld [vmem:[#allocation73_spill] sm:$0xff] }
 0xb3e   : > { %25983 = vst [vmem:[#allocation49_spill] sm:$0xff] %v24270_v43  ;;  %v17885_v0 = vpop.eup %17884  ;;  %17890 = vtanh.f32 %v10375_v27  ;;  %v10194_v55 = vadd.f32 %v15629_v30, %v23753_v24  ;;  %v15632_v38 = vadd.f32 %v15631_v58, %v15630_v37  ;;  %16089 = vmatprep.mubr.bf16.mxu1 %v24270_v43  ;;  %v10474_v27 = vld [vmem:[%s24888_s9 + $0x180] sm:$0xff] }
 0xb3f   : > { %v10654_v50 = vrot.slane %v17885_v0, 1  ;;  %v24280_v22 = vpack.c.bf16 %v10617_v51, %v10616_v52  ;;  %v10546_v63 = vrot.slane %v17885_v0, 7 }
 0xb40   : > { %v17887_v20 = vpop.eup %17886  ;;  %v10242_v5 = vadd.f32 %v10194_v55, %v25984_v42  ;;  %v10197_v24 = vadd.f32 %v15632_v38, %v23756_v60  ;;  %v10724_v38 = vmul.f32 %v14259_v48, %v10678_v53 }
 0xb41   : > { %v10677_v3 = vsel %vm1469_vm1, %v10653_v25, %v10654_v50  ;;  %11207 = vmatmul.mubr.bf16.gmra.mrb[156].mxu0 %v24280_v22  ;;  %v24287_v21 = vpack.c.bf16 %v17887_v20, %v17885_v0  ;;  %v10547_v26 = vrot.slane %v17887_v20, 7  ;;  %v10569_v59 = vsel %vm1252_vm0, %v10545_v34, %v10546_v63  ;;  %v10475_v34 = vld [vmem:[%s24888_s9 + $0x190] sm:$0xff] }
 0xb42   : > { %v10376_v55 = vadd.f32 %v24294_v36, %v10242_v5  ;;  %v10243_v60 = vadd.f32 %v10197_v24, %v25985_v18  ;;  %v10725_v23 = vmul.f32 %v14260_v8, %v10677_v3  ;;  %v15633_v25 = vpop.f32.mrb[72].mxu1  ;;  %v10655_v58 = vrot.slane %v17887_v20, 1  ;;  %v14262_v20 = vld [vmem:[%s24888_s9 + $0x3d0] sm:$0xff] }
 0xb43   : > { %v15634_v30 = vpop.f32.mrb[73].mxu1  ;;  %11214 = vmatprep.mubr.bf16.mxu0 %v24287_v21  ;;  %v10568_v37 = vsel %vm1252_vm0, %v10546_v63, %v10547_v26  ;;  %v10618_v8 = vmul.f32 %v10569_v59, %v10474_v27 }
 0xb44   : > { %17892 = vtanh.f32 %v10376_v55  ;;  %v10377_v53 = vadd.f32 %v24294_v36, %v10243_v60  ;;  %v24308_v52 = vpack.c.bf16 %v10725_v23, %v10724_v38  ;;  %v15635_v51 = vadd.f32 %v15634_v30, %v15633_v25  ;;  %v15636_v0 = vpop.f32.mrb[74].mxu1  ;;  %v25987_v23 = vld [vmem:[#allocation65_spill] sm:$0xff] }
 0xb45   : > { %v15637_v48 = vpop.f32.mrb[75].mxu1  ;;  %v10619_v42 = vmul.f32 %v10568_v37, %v10475_v34  ;;  %v10676_v5 = vsel %vm1469_vm1, %v10654_v50, %v10655_v58 }
 0xb46   : > { %25986 = vst [vmem:[#allocation70_spill] sm:$0xff] %v24308_v52  ;;  %v17889_v24 = vpop.eup %17888  ;;  %17894 = vtanh.f32 %v10377_v53  ;;  %v10202_v3 = vadd.f32 %v15635_v51, %v23759_v47  ;;  %v15638_v18 = vadd.f32 %v15637_v48, %v15636_v0  ;;  %16090 = vmatmul.mubr.bf16.gmra.mrb[100].mxu1 %v24308_v52  ;;  %v15661_v59 = vpop.f32.mrb[112].mxu0  ;;  %v14261_v47 = vld [vmem:[%s24888_s9 + $0x3c0] sm:$0xff]  ;;  %v25988_v48 = vld [vmem:[#allocation64_spill] sm:$0xff] }
 0xb47   : > { %v24314_v63 = vpack.c.bf16 %v10619_v42, %v10618_v8  ;;  %v10656_v55 = vrot.slane %v17889_v24, 1  ;;  %v10548_v60 = vrot.slane %v17889_v24, 7  ;;  %v15662_v27 = vpop.f32.mrb[113].mxu0 }
 0xb48   : > { %v17891_v38 = vpop.eup %17890  ;;  %v10244_v25 = vadd.f32 %v10202_v3, %v25987_v23  ;;  %v10205_v50 = vadd.f32 %v15638_v18, %v23762_v29  ;;  %v15664_v51 = vpop.f32.mrb[114].mxu0  ;;  %v10476_v3 = vld [vmem:[%s24888_s9 + $0x1a0] sm:$0xff] }
 0xb49   : > { %11215 = vmatmul.mubr.bf16.gmra.mrb[160].mxu0 %v24314_v63  ;;  %v24325_v34 = vpack.c.bf16 %v17891_v38, %v17889_v24  ;;  %v10657_v30 = vrot.slane %v17891_v38, 1  ;;  %v10675_v37 = vsel %vm1469_vm1, %v10655_v58, %v10656_v55  ;;  %v10549_v53 = vrot.slane %v17891_v38, 7  ;;  %v10477_v24 = vld [vmem:[%s24888_s9 + $0x1b0] sm:$0xff]  ;;  %v15665_v58 = vpop.f32.mrb[115].mxu0 }
 0xb4a   : > { %v10378_v0 = vadd.f32 %v24294_v36, %v10244_v25  ;;  %v10245_v8 = vadd.f32 %v10205_v50, %v25988_v48  ;;  %v15639_v29 = vpop.f32.mrb[76].mxu1  ;;  %v10727_v42 = vmul.f32 %v14262_v20, %v10675_v37  ;;  %v10567_v18 = vsel %vm1252_vm0, %v10547_v26, %v10548_v60 }
 0xb4b   : > { %v15640_v38 = vpop.f32.mrb[77].mxu1  ;;  %11222 = vmatprep.mubr.bf16.mxu0 %v24325_v34  ;;  %v10674_v23 = vsel %vm1469_vm1, %v10656_v55, %v10657_v30  ;;  %v10726_v25 = vmul.f32 %v14261_v47, %v10676_v5  ;;  %v10566_v20 = vsel %vm1252_vm0, %v10548_v60, %v10549_v53  ;;  %v24344_v50 = vadd.f32 %v15662_v27, %v15661_v59  ;;  %v14263_v60 = vld [vmem:[%s24888_s9 + $0x3e0] sm:$0xff]  ;;  %v14264_v59 = vld [vmem:[%s24888_s9 + $0x3f0] sm:$0xff] }
 0xb4c   : > { %17896 = vtanh.f32 %v10378_v0  ;;  %v10379_v37 = vadd.f32 %v24294_v36, %v10245_v8  ;;  %v15641_v48 = vadd.f32 %v15640_v38, %v15639_v29  ;;  %v15642_v52 = vpop.f32.mrb[78].mxu1  ;;  %v10620_v62 = vmul.f32 %v10567_v18, %v10476_v3  ;;  %v25989_v8 = vld [vmem:[#allocation13_spill] sm:$0xff] }
 0xb4d   : > { %v15643_v43 = vpop.f32.mrb[79].mxu1  ;;  %v24347_v26 = vpack.c.bf16 %v10727_v42, %v10726_v25  ;;  %v10621_v31 = vmul.f32 %v10566_v20, %v10477_v24  ;;  %v24349_v16 = vadd.f32 %v15665_v58, %v15664_v51  ;;  %v25990_v24 = vld [vmem:[#allocation18_spill] sm:$0xff]  ;;  %v10728_v58 = vmul.f32 %v14263_v60, %v10674_v23 }
 0xb4e   : > { %v17893_v15 = vpop.eup %17892  ;;  %17898 = vtanh.f32 %v10379_v37  ;;  %v10210_v5 = vadd.f32 %v15641_v48, %v23765_v46  ;;  %v15644_v55 = vadd.f32 %v15643_v43, %v15642_v52  ;;  %v10478_v43 = vld [vmem:[%s24888_s9 + $0x1c0] sm:$0xff] }
 0xb4f   : > { %v10658_v47 = vrot.slane %v17893_v15, 1  ;;  %16093 = vmatprep.mubr.bf16.mxu1 %v24347_v26  ;;  %v24359_v27 = vpack.c.bf16 %v10621_v31, %v10620_v62  ;;  %v10550_v51 = vrot.slane %v17893_v15, 7  ;;  %v10479_v31 = vld [vmem:[%s24888_s9 + $0x1d0] sm:$0xff] }
 0xb50   : > { %v17895_v0 = vpop.eup %17894  ;;  %v10246_v29 = vadd.f32 %v10210_v5, %v25989_v8  ;;  %v10213_v46 = vadd.f32 %v15644_v55, %v23774_v6  ;;  %v14265_v55 = vld [vmem:[%s24888_s9 + $0x400] sm:$0xff] }
 0xb51   : > { %v10673_v52 = vsel %vm1469_vm1, %v10657_v30, %v10658_v47  ;;  %11223 = vmatmul.mubr.bf16.gmra.mrb[164].mxu0 %v24359_v27  ;;  %v24369_v42 = vpack.c.bf16 %v17895_v0, %v17893_v15  ;;  %v10551_v62 = vrot.slane %v17895_v0, 7  ;;  %v10565_v3 = vsel %vm1252_vm0, %v10549_v53, %v10550_v51 }
 0xb52   : > { %v10380_v6 = vadd.f32 %v24294_v36, %v10246_v29  ;;  %v10247_v18 = vadd.f32 %v10213_v46, %v25990_v24  ;;  %v10729_v38 = vmul.f32 %v14264_v59, %v10673_v52  ;;  %v10622_v30 = vmul.f32 %v10565_v3, %v10478_v43  ;;  %v10480_v29 = vld [vmem:[%s24888_s9 + $0x1e0] sm:$0xff]  ;;  %v10481_v46 = vld [vmem:[%s24888_s9 + $0x1f0] sm:$0xff] }
 0xb53   : > { %11230 = vmatprep.mubr.bf16.mxu0 %v24369_v42  ;;  %v10564_v15 = vsel %vm1252_vm0, %v10550_v51, %v10551_v62  ;;  %v10659_v25 = vrot.slane %v17895_v0, 1 }
 0xb54   : > { %17900 = vtanh.f32 %v10380_v6  ;;  %v10381_v20 = vadd.f32 %v24294_v36, %v10247_v18  ;;  %v24382_v37 = vpack.c.bf16 %v10729_v38, %v10728_v58  ;;  %v10623_v48 = vmul.f32 %v10564_v15, %v10479_v31  ;;  %v14266_v36 = vld [vmem:[%s24888_s9 + $0x410] sm:$0xff] }
 0xb55   : > { %v10672_v53 = vsel %vm1469_vm1, %v10658_v47, %v10659_v25 }
 0xb56   : > { %v17897_v5 = vpop.eup %17896  ;;  %17902 = vtanh.f32 %v10381_v20  ;;  %16094 = vmatmul.mubr.bf16.gmra.mrb[104].mxu1 %v24382_v37  ;;  %v24387_v23 = vpack.c.bf16 %v10623_v48, %v10622_v30  ;;  %v10730_v52 = vmul.f32 %v14265_v55, %v10672_v53 }
 0xb57   : > { %v10660_v60 = vrot.slane %v17897_v5, 1  ;;  %v10552_v59 = vrot.slane %v17897_v5, 7 }
 0xb58   : > { %v17899_v51 = vpop.eup %17898 }
 0xb59   : > { %11231 = vmatmul.mubr.bf16.gmra.mrb[168].mxu0 %v24387_v23  ;;  %v24396_v47 = vpack.c.bf16 %v17899_v51, %v17897_v5  ;;  %v10661_v0 = vrot.slane %v17899_v51, 1  ;;  %v10671_v8 = vsel %vm1469_vm1, %v10659_v25, %v10660_v60  ;;  %v10553_v43 = vrot.slane %v17899_v51, 7  ;;  %v14268_v25 = vld [vmem:[%s24888_s9 + $0x430] sm:$0xff] }
 0xb5a   : > { %v10731_v31 = vmul.f32 %v14266_v36, %v10671_v8  ;;  %v10563_v3 = vsel %vm1252_vm0, %v10551_v62, %v10552_v59  ;;  %v14267_v62 = vld [vmem:[%s24888_s9 + $0x420] sm:$0xff] }
 0xb5b   : > { %11238 = vmatprep.mubr.bf16.mxu0 %v24396_v47  ;;  %v10670_v6 = vsel %vm1469_vm1, %v10660_v60, %v10661_v0  ;;  %v10562_v24 = vsel %vm1252_vm0, %v10552_v59, %v10553_v43  ;;  %v10624_v58 = vmul.f32 %v10563_v3, %v10480_v29  ;;  %v10482_v36 = vld [vmem:[%s24888_s9 + $0x200] sm:$0xff]  ;;  %v10483_v60 = vld [vmem:[%s24888_s9 + $0x210] sm:$0xff] }
 0xb5c   : > { %v24413_v18 = vpack.c.bf16 %v10731_v31, %v10730_v52  ;;  %v10625_v38 = vmul.f32 %v10562_v24, %v10481_v46  ;;  %v10732_v8 = vmul.f32 %v14267_v62, %v10670_v6  ;;  %v14270_v29 = vld [vmem:[%s24888_s9 + $0x450] sm:$0xff]  ;;  %v14269_v31 = vld [vmem:[%s24888_s9 + $0x440] sm:$0xff] }
 0xb5e   : > { %v17901_v15 = vpop.eup %17900  ;;  %16097 = vmatprep.mubr.bf16.mxu1 %v24413_v18  ;;  %v24416_v30 = vpack.c.bf16 %v10625_v38, %v10624_v58 }
 0xb5f   : > { %v10662_v20 = vrot.slane %v17901_v15, 1  ;;  %v10554_v48 = vrot.slane %v17901_v15, 7 }
 0xb60   : > { %v24424_v53 = vpop.eup %17902 }
 0xb61   : > { %v10669_v5 = vsel %vm1469_vm1, %v10661_v0, %v10662_v20  ;;  %11239 = vmatmul.mubr.bf16.gmra.mrb[172].mxu0 %v24416_v30  ;;  %v24430_v55 = vpack.c.bf16 %v24424_v53, %v17901_v15  ;;  %v10555_v59 = vrot.slane %v24424_v53, 7  ;;  %v10561_v51 = vsel %vm1252_vm0, %v10553_v43, %v10554_v48 }
 0xb62   : > { %v10733_v0 = vmul.f32 %v14268_v25, %v10669_v5  ;;  %12404 = vmatprep.mubr.bf16.mxu0 %v23881_v61  ;;  %v10663_v46 = vrot.slane %v24424_v53, 1  ;;  %v10626_v3 = vmul.f32 %v10561_v51, %v10482_v36 }
 0xb63   : > { %v10560_v52 = vsel %vm1252_vm0, %v10554_v48, %v10555_v59  ;;  %v17569_v48 = vld [vmem:[%s24886_s7 + $0x148] sm:$0xff]  }
 0xb64   : > { %v24453_v43 = vpack.c.bf16 %v10733_v0, %v10732_v8  ;;  %v10627_v6 = vmul.f32 %v10560_v52, %v10483_v60  ;;  %v10667_v24 = vsel %vm1469_vm1, %v10663_v46, %v25957_v28  ;;  %v10668_v58 = vsel %vm1469_vm1, %v10662_v20, %v10663_v46  ;;  %v17571_v20 = vld [vmem:[%s24886_s7 + $0x158] sm:$0xff]  }
 0xb65   : > { %v10735_v38 = vmul.f32 %v14270_v29, %v10667_v24  ;;  %v10734_v62 = vmul.f32 %v14269_v31, %v10668_v58  ;;  %v25992_v24 = vld [vmem:[#allocation71_spill] sm:$0xff] }
 0xb66   : > { %16098 = vmatmul.mubr.bf16.gmra.mrb[108].mxu1 %v24453_v43  ;;  %v24461_v15 = vpack.c.bf16 %v10627_v6, %v10626_v3 }
 0xb67   : > { %11745 = vmatprep.mubr.bf16.mxu1 %v23839_v45  ;;  %v24464_v25 = vpack.c.bf16 %v10735_v38, %v10734_v62  ;;  %v17570_v45 = vld [vmem:[%s24886_s7 + $0x150] sm:$0xff]   ;;  %v25993_v38 = vld [vmem:[#allocation86_spill] sm:$0xff] }
 0xb69   : > { %12405 = vmatmul.mubr.bf16.vlgmr.msra.gmra.mrb[176].mxu0 %v23909_v7 }
 0xb6a   : > { %12412 = vmatprep.mubr.bf16.mxu0 %v23926_v57 }
 0xb6e   : > { %11746 = vmatmul.mubr.bf16.vlgmr.msra.gmra.mrb[112].mxu1 %v23874_v11  ;;  %v17572_v11 = vld [vmem:[%s24886_s7 + $0x160] sm:$0xff]  }
 0xb6f   : > { %16102 = vmatpush3.bf16.msra.mxu1 %v24071_v54  ;;  %11753 = vmatprep.mubr.bf16.mxu1 %v23881_v61  ;;  %v17573_v61 = vld [vmem:[%s24886_s7 + $0x168] sm:$0xff]  }
 0xb70   : > { %16103 = vmatprep.subr.bf16.mxu1 %v17569_v48 }
 0xb71   : > { %12413 = vmatmul.mubr.bf16.gmra.mrb[180].mxu0 %v23962_v41 }
 0xb72   : > { %12420 = vmatprep.mubr.bf16.mxu0 %v23978_v40 }
 0xb73   : > { %16104 = vmatpush3.bf16.msra.mxu1 %v17569_v48  ;;  %v17579_v48 = vld [vmem:[%s24886_s7 + $0x218] sm:$0xff]  }
 0xb74   : > { %16105 = vmatprep.subr.bf16.mxu1 %v17570_v45 }
 0xb76   : > { %11754 = vmatmul.mubr.bf16.gmra.mrb[116].mxu1 %v23909_v7  ;;  %v17574_v7 = vld [vmem:[%s24886_s7 + $0x170] sm:$0xff]  }
 0xb77   : > { %11761 = vmatprep.mubr.bf16.mxu1 %v23926_v57  ;;  %16106 = vmatpush3.bf16.msra.mxu1 %v17570_v45  ;;  %v17575_v57 = vld [vmem:[%s24886_s7 + $0x178] sm:$0xff]  }
 0xb78   : > { %16107 = vmatprep.subr.bf16.mxu1 %v17571_v20 }
 0xb79   : > { %12421 = vmatmul.mubr.bf16.gmra.mrb[184].mxu0 %v24008_v39 }
 0xb7a   : > { %12428 = vmatprep.mubr.bf16.mxu0 %v24025_v44 }
 0xb7b   : > { %16108 = vmatpush3.bf16.msra.mxu1 %v17571_v20 }
 0xb7c   : > { %16109 = vmatprep.subr.bf16.mxu1 %v17572_v11 }
 0xb7e   : > { %11762 = vmatmul.mubr.bf16.gmra.mrb[120].mxu1 %v23962_v41  ;;  %v24507_v41 = vld [vmem:[%s24886_s7 + $0x200] sm:$0xff]  }
 0xb7f   : > { %11769 = vmatprep.mubr.bf16.mxu1 %v23978_v40  ;;  %16110 = vmatpush3.bf16.msra.mxu1 %v17572_v11 }
 0xb80   : > { %16111 = vmatprep.subr.bf16.mxu1 %v17573_v61 }
 0xb81   : > { %12429 = vmatmul.mubr.bf16.gmra.mrb[188].mxu0 %v24061_v56 }
 0xb82   : > { %12436 = vmatprep.mubr.bf16.mxu0 %v24076_v32 }
 0xb83   : > { %16112 = vmatpush3.bf16.msra.mxu1 %v17573_v61  ;;  %v25994_v61 = vld [vmem:[#allocation42_spill] sm:$0xff] }
 0xb84   : > { %16113 = vmatprep.subr.bf16.mxu1 %v17574_v7 }
 0xb86   : > { %11770 = vmatmul.mubr.bf16.gmra.mrb[124].mxu1 %v24008_v39 }
 0xb87   : > { %11777 = vmatprep.mubr.bf16.mxu1 %v24025_v44  ;;  %16114 = vmatpush3.bf16.msra.mxu1 %v17574_v7 }
 0xb88   : > { %16115 = vmatprep.subr.bf16.mxu1 %v17575_v57 }
 0xb89   : > { %12437 = vmatmul.mubr.bf16.gmra.mrb[192].mxu0 %v24099_v9 }
 0xb8a   : > { %12444 = vmatprep.mubr.bf16.mxu0 %v24110_v19 }
 0xb8b   : > { %16116 = vmatpush3.bf16.msra.mxu1 %v17575_v57  ;;  %v25995_v57 = vld [vmem:[#allocation54_spill] sm:$0xff] }
 0xb8c   : > { %16149 = vmatprep.subr.bf16.mxu1 %v24507_v41 }
 0xb8e   : > { %11778 = vmatmul.mubr.bf16.gmra.mrb[128].mxu1 %v24061_v56 }
 0xb8f   : > { %11785 = vmatprep.mubr.bf16.mxu1 %v24076_v32 }
 0xb91   : > { %12445 = vmatmul.mubr.bf16.gmra.mrb[196].mxu0 %v24140_v33 }
 0xb92   : > { %12452 = vmatprep.mubr.bf16.mxu0 %v24147_v14 }
 0xb96   : > { %11786 = vmatmul.mubr.bf16.gmra.mrb[132].mxu1 %v24099_v9 }
 0xb97   : > { %11793 = vmatprep.mubr.bf16.mxu1 %v24110_v19 }
 0xb99   : > { %12453 = vmatmul.mubr.bf16.gmra.mrb[200].mxu0 %v24169_v49 }
 0xb9a   : > { %12460 = vmatprep.mubr.bf16.mxu0 %v24180_v10 }
 0xb9e   : > { %11794 = vmatmul.mubr.bf16.gmra.mrb[136].mxu1 %v24140_v33 }
 0xb9f   : > { %11801 = vmatprep.mubr.bf16.mxu1 %v24147_v14 }
 0xba1   : > { %12461 = vmatmul.mubr.bf16.gmra.mrb[204].mxu0 %v24210_v35 }
 0xba2   : > { %12468 = vmatprep.mubr.bf16.mxu0 %v24217_v4 }
 0xba6   : > { %11802 = vmatmul.mubr.bf16.gmra.mrb[140].mxu1 %v24169_v49 }
 0xba7   : > { %11809 = vmatprep.mubr.bf16.mxu1 %v24180_v10 }
 0xba9   : > { %12469 = vmatmul.mubr.bf16.gmra.mrb[208].mxu0 %v24239_v1 }
 0xbaa   : > { %12476 = vmatprep.mubr.bf16.mxu0 %v24250_v12 }
 0xbae   : > { %11810 = vmatmul.mubr.bf16.gmra.mrb[144].mxu1 %v24210_v35 }
 0xbaf   : > { %11817 = vmatprep.mubr.bf16.mxu1 %v24217_v4 }
 0xbb1   : > { %12477 = vmatmul.mubr.bf16.gmra.mrb[212].mxu0 %v24280_v22 }
 0xbb2   : > { %12484 = vmatprep.mubr.bf16.mxu0 %v24287_v21 }
 0xbb6   : > { %11818 = vmatmul.mubr.bf16.gmra.mrb[148].mxu1 %v24239_v1 }
 0xbb7   : > { %11825 = vmatprep.mubr.bf16.mxu1 %v24250_v12 }
 0xbb9   : > { %12485 = vmatmul.mubr.bf16.gmra.mrb[216].mxu0 %v24314_v63 }
 0xbba   : > { %12492 = vmatprep.mubr.bf16.mxu0 %v24325_v34 }
 0xbbe   : > { %11826 = vmatmul.mubr.bf16.gmra.mrb[152].mxu1 %v24280_v22 }
 0xbbf   : > { %11833 = vmatprep.mubr.bf16.mxu1 %v24287_v21 }
 0xbc1   : > { %12493 = vmatmul.mubr.bf16.gmra.mrb[220].mxu0 %v24359_v27 }
 0xbc2   : > { %12500 = vmatprep.mubr.bf16.mxu0 %v24369_v42 }
 0xbc4   : > { %v15667_v40 = vpop.f32.mrb[116].mxu0 }
 0xbc5   : > { %v15668_v39 = vpop.f32.mrb[117].mxu0 }
 0xbc6   : > { %v24540_v44 = vadd.f32 %v15668_v39, %v15667_v40  ;;  %v15670_v56 = vpop.f32.mrb[118].mxu0  ;;  %11834 = vmatmul.mubr.bf16.gmra.mrb[156].mxu1 %v24314_v63  ;;  %v10484_v63 = vld [vmem:[%s24888_s9 + $0x220] sm:$0xff] }
 0xbc7   : > { %v15671_v54 = vpop.f32.mrb[119].mxu0  ;;  %11841 = vmatprep.mubr.bf16.mxu1 %v24325_v34  ;;  %v10485_v34 = vld [vmem:[%s24888_s9 + $0x230] sm:$0xff]  ;;  %v17580_v40 = vld [vmem:[%s24886_s7 + $0x220] sm:$0xff]  }
 0xbc8   : > { %v24544_v32 = vadd.f32 %v15671_v54, %v15670_v56  ;;  %v17581_v56 = vld [vmem:[%s24886_s7 + $0x228] sm:$0xff]  }
 0xbc9   : > { %12501 = vmatmul.mubr.bf16.gmra.mrb[224].mxu0 %v24387_v23 }
 0xbca   : > { %12508 = vmatprep.mubr.bf16.mxu0 %v24396_v47 }
 0xbcc   : > { %v15673_v9 = vpop.f32.mrb[120].mxu0 }
 0xbcd   : > { %v15674_v19 = vpop.f32.mrb[121].mxu0 }
 0xbce   : > { %v24548_v33 = vadd.f32 %v15674_v19, %v15673_v9  ;;  %v15676_v14 = vpop.f32.mrb[122].mxu0  ;;  %11842 = vmatmul.mubr.bf16.gmra.mrb[160].mxu1 %v24359_v27  ;;  %v10559_v27 = vsel %vm1252_vm0, %v10555_v59, %v25847_v2 }
 0xbcf   : > { %v15677_v49 = vpop.f32.mrb[123].mxu0  ;;  %11849 = vmatprep.mubr.bf16.mxu1 %v24369_v42  ;;  %v25991_v42 = vmov 0.0|0.0  }
 0xbd0   : > { %v24552_v10 = vadd.f32 %v15677_v49, %v15676_v14  ;;  %v25996_v14 = vld [vmem:[#allocation5_spill] sm:$0xff] }
 0xbd1   : > { %12509 = vmatmul.mubr.bf16.gmra.mrb[228].mxu0 %v24416_v30 }
 0xbd2   : > { %12516 = vmatprep.mubr.bf16.mxu0 %v24430_v55 }
 0xbd4   : > { %v15679_v35 = vpop.f32.mrb[124].mxu0 }
 0xbd5   : > { %v15680_v4 = vpop.f32.mrb[125].mxu0 }
 0xbd6   : > { %v24556_v1 = vadd.f32 %v15680_v4, %v15679_v35  ;;  %v15682_v12 = vpop.f32.mrb[126].mxu0  ;;  %11850 = vmatmul.mubr.bf16.gmra.mrb[164].mxu1 %v24387_v23  ;;  %v10628_v23 = vmul.f32 %v10559_v27, %v10484_v63  ;;  %v25997_v35 = vld [vmem:[#allocation45_spill] sm:$0xff]  ;;  %v17583_v63 = vld [vmem:[%s24886_s7 + $0x238] sm:$0xff]  }
 0xbd7   : > { %v15683_v22 = vpop.f32.mrb[127].mxu0  ;;  %11857 = vmatprep.mubr.bf16.mxu1 %v24396_v47  ;;  %v10629_v47 = vmul.f32 %v10485_v34, %v25847_v2 }
 0xbd8   : > { %v24560_v21 = vadd.f32 %v15683_v22, %v15682_v12  ;;  %v17582_v12 = vld [vmem:[%s24886_s7 + $0x230] sm:$0xff]  }
 0xbd9   : > { %12517 = vmatmul.mubr.bf16.gmra.mrb[232].mxu0 %v24461_v15  ;;  %v10755_v53 = vpack.c.bf16 %v10629_v47, %v10628_v23  ;;  %v25998_v23 = vld [vmem:[#allocation6_spill] sm:$0xff] }
 0xbda   : > { %12524 = vmatprep.mubr.bf16.mxu0 %v25991_v42 }
 0xbdc   : > { %v15685_v5 = vpop.f32.mrb[128].mxu0 }
 0xbdd   : > { %v15686_v36 = vpop.f32.mrb[129].mxu0 }
 0xbde   : > { %v24576_v60 = vadd.f32 %v15686_v36, %v15685_v5  ;;  %v15688_v51 = vpop.f32.mrb[130].mxu0  ;;  %11858 = vmatmul.mubr.bf16.gmra.mrb[168].mxu1 %v24416_v30  ;;  %v25999_v5 = vld [vmem:[#allocation46_spill] sm:$0xff] }
 0xbdf   : > { %v15689_v8 = vpop.f32.mrb[131].mxu0  ;;  %11865 = vmatprep.mubr.bf16.mxu1 %v24430_v55  ;;  %v17577_v55 = vld [vmem:[%s24886_s7 + $0x208] sm:$0xff]  }
 0xbe0   : > { %v24580_v13 = vadd.f32 %v15689_v8, %v15688_v51 }
 0xbe1   : > { %12525 = vmatmul.mubr.bf16.gmra.mrb[236].mxu0 %v10755_v53 }
 0xbe4   : > { %v15691_v59 = vpop.f32.mrb[132].mxu0 }
 0xbe5   : > { %v15692_v0 = vpop.f32.mrb[133].mxu0 }
 0xbe6   : > { %v24582_v29 = vadd.f32 %v15692_v0, %v15691_v59  ;;  %v15694_v46 = vpop.f32.mrb[134].mxu0  ;;  %11866 = vmatmul.mubr.bf16.gmra.mrb[172].mxu1 %v24461_v15  ;;  %v26000_v0 = vld [vmem:[#allocation49_spill] sm:$0xff] }
 0xbe7   : > { %v15695_v2 = vpop.f32.mrb[135].mxu0  ;;  %16117 = vmatprep.mubr.bf16.mxu1 %v23900_v17  ;;  %v17578_v17 = vld [vmem:[%s24886_s7 + $0x210] sm:$0xff]  }
 0xbe8   : > { %v24586_v52 = vadd.f32 %v15695_v2, %v15694_v46  ;;  %v26001_v2 = vld [vmem:[#allocation70_spill] sm:$0xff] }
 0xbec   : > { %v15697_v30 = vpop.f32.mrb[136].mxu0 }
 0xbed   : > { %v15698_v31 = vpop.f32.mrb[137].mxu0 }
 0xbee   : > { %v24591_v3 = vadd.f32 %v15698_v31, %v15697_v30  ;;  %v15700_v6 = vpop.f32.mrb[138].mxu0  ;;  %16118 = vmatmul.mubr.bf16.vlgmr.msra.gmra.mrb[80].mxu1 %v25992_v24 }
 0xbef   : > { %v15701_v58 = vpop.f32.mrb[139].mxu0  ;;  %16150 = vmatpush3.bf16.msra.mxu1 %v24507_v41  ;;  %16121 = vmatprep.mubr.bf16.mxu1 %v25993_v38 }
 0xbf0   : > { %v24596_v15 = vadd.f32 %v15701_v58, %v15700_v6  ;;  %16151 = vmatprep.subr.bf16.mxu1 %v17577_v55 }
 0xbf3   : > { %16152 = vmatpush3.bf16.msra.mxu1 %v17577_v55 }
 0xbf4   : > { %v15703_v62 = vpop.f32.mrb[140].mxu0  ;;  %16153 = vmatprep.subr.bf16.mxu1 %v17578_v17 }
 0xbf5   : > { %v15704_v45 = vpop.f32.mrb[141].mxu0 }
 0xbf6   : > { %v24604_v20 = vadd.f32 %v15704_v45, %v15703_v62  ;;  %v15706_v11 = vpop.f32.mrb[142].mxu0  ;;  %16122 = vmatmul.mubr.bf16.gmra.mrb[84].mxu1 %v25994_v61 }
 0xbf7   : > { %v15707_v7 = vpop.f32.mrb[143].mxu0  ;;  %16125 = vmatprep.mubr.bf16.mxu1 %v25995_v57  ;;  %16154 = vmatpush3.bf16.msra.mxu1 %v17578_v17 }
 0xbf8   : > { %v24608_v41 = vadd.f32 %v15707_v7, %v15706_v11  ;;  %16155 = vmatprep.subr.bf16.mxu1 %v17579_v48 }
 0xbfb   : > { %16156 = vmatpush3.bf16.msra.mxu1 %v17579_v48 }
 0xbfc   : > { %v15709_v39 = vpop.f32.mrb[144].mxu0  ;;  %16157 = vmatprep.subr.bf16.mxu1 %v17580_v40 }
 0xbfd   : > { %v15710_v54 = vpop.f32.mrb[145].mxu0 }
 0xbfe   : > { %v24616_v9 = vadd.f32 %v15710_v54, %v15709_v39  ;;  %v15712_v19 = vpop.f32.mrb[146].mxu0  ;;  %16126 = vmatmul.mubr.bf16.gmra.mrb[88].mxu1 %v25996_v14 }
 0xbff   : > { %v15713_v49 = vpop.f32.mrb[147].mxu0  ;;  %16129 = vmatprep.mubr.bf16.mxu1 %v25997_v35  ;;  %16158 = vmatpush3.bf16.msra.mxu1 %v17580_v40 }
 0xc00   : > { %v24620_v4 = vadd.f32 %v15713_v49, %v15712_v19  ;;  %16159 = vmatprep.subr.bf16.mxu1 %v17581_v56 }
 0xc03   : > { %16160 = vmatpush3.bf16.msra.mxu1 %v17581_v56 }
 0xc04   : > { %v15715_v22 = vpop.f32.mrb[148].mxu0  ;;  %16161 = vmatprep.subr.bf16.mxu1 %v17582_v12 }
 0xc05   : > { %v15716_v34 = vpop.f32.mrb[149].mxu0 }
 0xc06   : > { %v24628_v27 = vadd.f32 %v15716_v34, %v15715_v22  ;;  %v15718_v42 = vpop.f32.mrb[150].mxu0  ;;  %16130 = vmatmul.mubr.bf16.gmra.mrb[92].mxu1 %v25998_v23 }
 0xc07   : > { %v15719_v47 = vpop.f32.mrb[151].mxu0  ;;  %16133 = vmatprep.mubr.bf16.mxu1 %v25999_v5  ;;  %16162 = vmatpush3.bf16.msra.mxu1 %v17582_v12 }
 0xc08   : > { %v24632_v36 = vadd.f32 %v15719_v47, %v15718_v42  ;;  %16163 = vmatprep.subr.bf16.mxu1 %v17583_v63 }
 0xc0b   : > { %16164 = vmatpush3.bf16.msra.mxu1 %v17583_v63 }
 0xc0c   : > { %v15721_v51 = vpop.f32.mrb[152].mxu0 }
 0xc0d   : > { %v15722_v8 = vpop.f32.mrb[153].mxu0 }
 0xc0e   : > { %v24634_v53 = vadd.f32 %v15722_v8, %v15721_v51  ;;  %v15724_v59 = vpop.f32.mrb[154].mxu0  ;;  %16134 = vmatmul.mubr.bf16.gmra.mrb[96].mxu1 %v26000_v0 }
 0xc0f   : > { %v15725_v46 = vpop.f32.mrb[155].mxu0  ;;  %16137 = vmatprep.mubr.bf16.mxu1 %v26001_v2 }
 0xc10   : > { %v24638_v30 = vadd.f32 %v15725_v46, %v15724_v59 }
 0xc14   : > { %v15727_v55 = vpop.f32.mrb[156].mxu0 }
 0xc15   : > { %v15728_v31 = vpop.f32.mrb[157].mxu0 }
 0xc16   : > { %v24640_v6 = vadd.f32 %v15728_v31, %v15727_v55  ;;  %v15730_v58 = vpop.f32.mrb[158].mxu0  ;;  %16138 = vmatmul.mubr.bf16.gmra.mrb[100].mxu1 %v24347_v26 }
 0xc17   : > { %v15731_v17 = vpop.f32.mrb[159].mxu0  ;;  %16141 = vmatprep.mubr.bf16.mxu1 %v24382_v37 }
 0xc18   : > { %v24644_v62 = vadd.f32 %v15731_v17, %v15730_v58 }
 0xc1c   : > { %v15733_v48 = vpop.f32.mrb[160].mxu0 }
 0xc1d   : > { %v15734_v45 = vpop.f32.mrb[161].mxu0 }
 0xc1e   : > { %v24646_v11 = vadd.f32 %v15734_v45, %v15733_v48  ;;  %v15736_v7 = vpop.f32.mrb[162].mxu0  ;;  %16142 = vmatmul.mubr.bf16.gmra.mrb[104].mxu1 %v24413_v18 }
 0xc1f   : > { %v15737_v40 = vpop.f32.mrb[163].mxu0  ;;  %16145 = vmatprep.mubr.bf16.mxu1 %v24453_v43 }
 0xc20   : > { %v24650_v39 = vadd.f32 %v15737_v40, %v15736_v7 }
 0xc24   : > { %v15739_v56 = vpop.f32.mrb[164].mxu0 }
 0xc25   : > { %v15740_v54 = vpop.f32.mrb[165].mxu0 }
 0xc26   : > { %v24652_v19 = vadd.f32 %v15740_v54, %v15739_v56  ;;  %v15742_v49 = vpop.f32.mrb[166].mxu0  ;;  %16146 = vmatmul.mubr.bf16.gmra.mrb[108].mxu1 %v24464_v25 }
 0xc27   : > { %v15743_v12 = vpop.f32.mrb[167].mxu0  ;;  %16165 = vmatprep.mubr.bf16.mxu1 %v25992_v24 }
 0xc28   : > { %v24656_v22 = vadd.f32 %v15743_v12, %v15742_v49 }
 0xc2c   : > { %v15745_v63 = vpop.f32.mrb[168].mxu0 }
 0xc2d   : > { %v15746_v34 = vpop.f32.mrb[169].mxu0 }
 0xc2e   : > { %v24658_v42 = vadd.f32 %v15746_v34, %v15745_v63  ;;  %v15748_v47 = vpop.f32.mrb[170].mxu0  ;;  %16166 = vmatmul.mubr.bf16.vlgmr.msra.gmra.mrb[80].mxu1 %v25993_v38 }
 0xc2f   : > { %v15749_v51 = vpop.f32.mrb[171].mxu0  ;;  %16169 = vmatprep.mubr.bf16.mxu1 %v25994_v61 }
 0xc30   : > { %v24662_v8 = vadd.f32 %v15749_v51, %v15748_v47 }
 0xc34   : > { %v15751_v59 = vpop.f32.mrb[172].mxu0 }
 0xc35   : > { %v15752_v46 = vpop.f32.mrb[173].mxu0 }
 0xc36   : > { %v24664_v55 = vadd.f32 %v15752_v46, %v15751_v59  ;;  %v15754_v31 = vpop.f32.mrb[174].mxu0  ;;  %16170 = vmatmul.mubr.bf16.gmra.mrb[84].mxu1 %v25995_v57 }
 0xc37   : > { %v15755_v24 = vpop.f32.mrb[175].mxu0  ;;  %16173 = vmatprep.mubr.bf16.mxu1 %v25996_v14 }
 0xc38   : > { %v24668_v58 = vadd.f32 %v15755_v24, %v15754_v31 }
 0xc3c   : > { %v15933_v17 = vpop.f32.mrb[176].mxu0 }
 0xc3d   : > { %v15934_v48 = vpop.f32.mrb[177].mxu0 }
 0xc3e   : > { %v15935_v38 = vadd.f32 %v15934_v48, %v15933_v17  ;;  %v15936_v45 = vpop.f32.mrb[178].mxu0  ;;  %16174 = vmatmul.mubr.bf16.gmra.mrb[88].mxu1 %v25997_v35 }
 0xc3f   : > { %v15937_v61 = vpop.f32.mrb[179].mxu0  ;;  %16177 = vmatprep.mubr.bf16.mxu1 %v25998_v23 }
 0xc40   : > { %v15938_v7 = vadd.f32 %v15937_v61, %v15936_v45 }
 0xc41   : > { %v15797_v40 = vpop.f32.mrb[112].mxu1 }
 0xc42   : > { %v15798_v56 = vpop.f32.mrb[113].mxu1 }
 0xc43   : > { %v15799_v54 = vadd.f32 %v15798_v56, %v15797_v40  ;;  %v15800_v49 = vpop.f32.mrb[114].mxu1 }
 0xc44   : > { %v15939_v57 = vpop.f32.mrb[180].mxu0  ;;  %v15801_v12 = vpop.f32.mrb[115].mxu1 }
 0xc45   : > { %v16216_v14 = vadd.f32 %v15799_v54, %v24344_v50  ;;  %v15802_v63 = vadd.f32 %v15801_v12, %v15800_v49  ;;  %v15940_v34 = vpop.f32.mrb[181].mxu0 }
 0xc46   : > { %v15941_v47 = vadd.f32 %v15940_v34, %v15939_v57  ;;  %v15942_v51 = vpop.f32.mrb[182].mxu0  ;;  %16178 = vmatmul.mubr.bf16.gmra.mrb[92].mxu1 %v25999_v5 }
 0xc47   : > { %v16222_v35 = vadd.f32 %v15802_v63, %v24349_v16  ;;  %v15943_v59 = vpop.f32.mrb[183].mxu0  ;;  %16181 = vmatprep.mubr.bf16.mxu1 %v26000_v0  ;;  %v24676_v23 = vadd.f32 %v16216_v14, %v15935_v38 }
 0xc48   : > { %v15944_v46 = vadd.f32 %v15943_v59, %v15942_v51 }
 0xc49   : > { %v15803_v31 = vpop.f32.mrb[116].mxu1  ;;  %v24678_v24 = vadd.f32 %v16222_v35, %v15938_v7 }
 0xc4a   : > { %v15804_v17 = vpop.f32.mrb[117].mxu1 }
 0xc4b   : > { %v15805_v48 = vadd.f32 %v15804_v17, %v15803_v31  ;;  %v15806_v50 = vpop.f32.mrb[118].mxu1 }
 0xc4c   : > { %v15945_v45 = vpop.f32.mrb[184].mxu0  ;;  %v15807_v61 = vpop.f32.mrb[119].mxu1 }
 0xc4d   : > { %v16213_v40 = vadd.f32 %v15805_v48, %v24540_v44  ;;  %v15808_v56 = vadd.f32 %v15807_v61, %v15806_v50  ;;  %v15946_v5 = vpop.f32.mrb[185].mxu0 }
 0xc4e   : > { %v15947_v54 = vadd.f32 %v15946_v5, %v15945_v45  ;;  %v15948_v16 = vpop.f32.mrb[186].mxu0  ;;  %16182 = vmatmul.mubr.bf16.gmra.mrb[96].mxu1 %v26001_v2 }
 0xc4f   : > { %v16219_v0 = vadd.f32 %v15808_v56, %v24544_v32  ;;  %v15949_v38 = vpop.f32.mrb[187].mxu0  ;;  %16185 = vmatprep.mubr.bf16.mxu1 %v24347_v26  ;;  %v24684_v7 = vadd.f32 %v16213_v40, %v15941_v47  ;;  %v14271_v40 = vld [vmem:[%s24888_s9 + $0x460] sm:$0xff] }
 0xc50   : > { %v15950_v49 = vadd.f32 %v15949_v38, %v15948_v16  ;;  %v10736_v38 = vmul.f32 %v14271_v40, %v25957_v28 }
 0xc51   : > { %v15809_v57 = vpop.f32.mrb[120].mxu1  ;;  %v24686_v12 = vadd.f32 %v16219_v0, %v15944_v46 }
 0xc52   : > { %v15810_v14 = vpop.f32.mrb[121].mxu1 }
 0xc53   : > { %v15811_v63 = vadd.f32 %v15810_v14, %v15809_v57  ;;  %v15812_v44 = vpop.f32.mrb[122].mxu1 }
 0xc54   : > { %v15951_v34 = vpop.f32.mrb[188].mxu0  ;;  %v15813_v51 = vpop.f32.mrb[123].mxu1 }
 0xc55   : > { %v16228_v35 = vadd.f32 %v15811_v63, %v24548_v33  ;;  %v15814_v59 = vadd.f32 %v15813_v51, %v15812_v44  ;;  %v15952_v2 = vpop.f32.mrb[189].mxu0 }
 0xc56   : > { %v15953_v31 = vadd.f32 %v15952_v2, %v15951_v34  ;;  %v15954_v32 = vpop.f32.mrb[190].mxu0  ;;  %16186 = vmatmul.mubr.bf16.gmra.mrb[100].mxu1 %v24382_v37  ;;  %v14272_v37 = vld [vmem:[%s24888_s9 + $0x470] sm:$0xff] }
 0xc57   : > { %v16234_v26 = vadd.f32 %v15814_v59, %v24552_v10  ;;  %v15955_v47 = vpop.f32.mrb[191].mxu0  ;;  %16189 = vmatprep.mubr.bf16.mxu1 %v24413_v18  ;;  %v24692_v46 = vadd.f32 %v16228_v35, %v15947_v54 }
 0xc58   : > { %v15956_v17 = vadd.f32 %v15955_v47, %v15954_v32 }
 0xc59   : > { %v15815_v48 = vpop.f32.mrb[124].mxu1  ;;  %v24694_v50 = vadd.f32 %v16234_v26, %v15950_v49  ;;  %v10737_v49 = vmul.f32 %v14272_v37, %v25957_v28 }
 0xc5a   : > { %v15816_v45 = vpop.f32.mrb[125].mxu1 }
 0xc5b   : > { %v15817_v61 = vadd.f32 %v15816_v45, %v15815_v48  ;;  %v15818_v33 = vpop.f32.mrb[126].mxu1  ;;  %v10827_v35 = vpack.c.bf16 %v10737_v49, %v10736_v38 }
 0xc5c   : > { %v15957_v10 = vpop.f32.mrb[192].mxu0  ;;  %v15819_v56 = vpop.f32.mrb[127].mxu1 }
 0xc5d   : > { %v16225_v18 = vadd.f32 %v15817_v61, %v24556_v1  ;;  %v15820_v5 = vadd.f32 %v15819_v56, %v15818_v33  ;;  %v15958_v54 = vpop.f32.mrb[193].mxu0 }
 0xc5e   : > { %v15959_v16 = vadd.f32 %v15958_v54, %v15957_v10  ;;  %v15960_v0 = vpop.f32.mrb[194].mxu0  ;;  %16190 = vmatmul.mubr.bf16.gmra.mrb[104].mxu1 %v24453_v43 }
 0xc5f   : > { %v16231_v57 = vadd.f32 %v15820_v5, %v24560_v21  ;;  %v15961_v14 = vpop.f32.mrb[195].mxu0  ;;  %16193 = vmatprep.mubr.bf16.mxu1 %v24464_v25  ;;  %v24708_v63 = vadd.f32 %v16225_v18, %v15953_v31 }
 0xc60   : > { %v15962_v44 = vadd.f32 %v15961_v14, %v15960_v0 }
 0xc61   : > { %v15821_v34 = vpop.f32.mrb[128].mxu1  ;;  %v24710_v1 = vadd.f32 %v16231_v57, %v15956_v17 }
 0xc62   : > { %v15822_v51 = vpop.f32.mrb[129].mxu1 }
 0xc63   : > { %v15823_v59 = vadd.f32 %v15822_v51, %v15821_v34  ;;  %v15824_v2 = vpop.f32.mrb[130].mxu1 }
 0xc64   : > { %v15963_v43 = vpop.f32.mrb[196].mxu0  ;;  %v15825_v32 = vpop.f32.mrb[131].mxu1 }
 0xc65   : > { %v16240_v26 = vadd.f32 %v15823_v59, %v24576_v60  ;;  %v15826_v28 = vadd.f32 %v15825_v32, %v15824_v2  ;;  %v15964_v47 = vpop.f32.mrb[197].mxu0 }
 0xc66   : > { %v15965_v21 = vadd.f32 %v15964_v47, %v15963_v43  ;;  %v15966_v48 = vpop.f32.mrb[198].mxu0  ;;  %16194 = vmatmul.mubr.bf16.gmra.mrb[108].mxu1 %v10827_v35 }
 0xc67   : > { %v16246_v25 = vadd.f32 %v15826_v28, %v24580_v13  ;;  %v15967_v31 = vpop.f32.mrb[199].mxu0  ;;  %v24714_v45 = vadd.f32 %v16240_v26, %v15959_v16 }
 0xc68   : > { %v15968_v17 = vadd.f32 %v15967_v31, %v15966_v48 }
 0xc69   : > { %v15827_v61 = vpop.f32.mrb[132].mxu1  ;;  %v24716_v33 = vadd.f32 %v16246_v25, %v15962_v44 }
 0xc6a   : > { %v15828_v40 = vpop.f32.mrb[133].mxu1 }
 0xc6b   : > { %v15829_v37 = vadd.f32 %v15828_v40, %v15827_v61  ;;  %v15830_v10 = vpop.f32.mrb[134].mxu1 }
 0xc6c   : > { %v15969_v56 = vpop.f32.mrb[200].mxu0  ;;  %v15831_v18 = vpop.f32.mrb[135].mxu1 }
 0xc6d   : > { %v16237_v60 = vadd.f32 %v15829_v37, %v24582_v29  ;;  %v15832_v5 = vadd.f32 %v15831_v18, %v15830_v10  ;;  %v15970_v54 = vpop.f32.mrb[201].mxu0 }
 0xc6e   : > { %v15971_v0 = vadd.f32 %v15970_v54, %v15969_v56  ;;  %v15972_v38 = vpop.f32.mrb[202].mxu0 }
 0xc6f   : > { %v16243_v13 = vadd.f32 %v15832_v5, %v24586_v52  ;;  %v15973_v49 = vpop.f32.mrb[203].mxu0  ;;  %v24720_v16 = vadd.f32 %v16237_v60, %v15965_v21 }
 0xc70   : > { %v15974_v57 = vadd.f32 %v15973_v49, %v15972_v38 }
 0xc71   : > { %v15833_v14 = vpop.f32.mrb[136].mxu1  ;;  %v24722_v44 = vadd.f32 %v16243_v13, %v15968_v17 }
 0xc72   : > { %v15834_v34 = vpop.f32.mrb[137].mxu1 }
 0xc73   : > { %v15835_v51 = vadd.f32 %v15834_v34, %v15833_v14  ;;  %v15836_v35 = vpop.f32.mrb[138].mxu1 }
 0xc74   : > { %v15975_v59 = vpop.f32.mrb[204].mxu0  ;;  %v15837_v2 = vpop.f32.mrb[139].mxu1 }
 0xc75   : > { %v16252_v29 = vadd.f32 %v15835_v51, %v24591_v3  ;;  %v15838_v43 = vadd.f32 %v15837_v2, %v15836_v35  ;;  %v15976_v32 = vpop.f32.mrb[205].mxu0 }
 0xc76   : > { %v15977_v26 = vadd.f32 %v15976_v32, %v15975_v59  ;;  %v15978_v28 = vpop.f32.mrb[206].mxu0 }
 0xc77   : > { %v16258_v52 = vadd.f32 %v15838_v43, %v24596_v15  ;;  %v15979_v47 = vpop.f32.mrb[207].mxu0  ;;  %v24726_v21 = vadd.f32 %v16252_v29, %v15971_v0 }
 0xc78   : > { %v15980_v48 = vadd.f32 %v15979_v47, %v15978_v28 }
 0xc79   : > { %v15839_v25 = vpop.f32.mrb[140].mxu1  ;;  %v24728_v31 = vadd.f32 %v16258_v52, %v15974_v57 }
 0xc7a   : > { %v15840_v17 = vpop.f32.mrb[141].mxu1 }
 0xc7b   : > { %v15841_v61 = vadd.f32 %v15840_v17, %v15839_v25  ;;  %v15842_v40 = vpop.f32.mrb[142].mxu1 }
 0xc7c   : > { %v15981_v37 = vpop.f32.mrb[208].mxu0  ;;  %v15843_v10 = vpop.f32.mrb[143].mxu1 }
 0xc7d   : > { %v16249_v3 = vadd.f32 %v15841_v61, %v24604_v20  ;;  %v15844_v56 = vadd.f32 %v15843_v10, %v15842_v40  ;;  %v15982_v18 = vpop.f32.mrb[209].mxu0 }
 0xc7e   : > { %v15983_v60 = vadd.f32 %v15982_v18, %v15981_v37  ;;  %v15984_v5 = vpop.f32.mrb[210].mxu0 }
 0xc7f   : > { %v16255_v15 = vadd.f32 %v15844_v56, %v24608_v41  ;;  %v15985_v54 = vpop.f32.mrb[211].mxu0  ;;  %v24732_v0 = vadd.f32 %v16249_v3, %v15977_v26 }
 0xc80   : > { %v15986_v38 = vadd.f32 %v15985_v54, %v15984_v5 }
 0xc81   : > { %v15845_v13 = vpop.f32.mrb[144].mxu1  ;;  %v24734_v49 = vadd.f32 %v16255_v15, %v15980_v48 }
 0xc82   : > { %v15846_v57 = vpop.f32.mrb[145].mxu1 }
 0xc83   : > { %v15847_v14 = vadd.f32 %v15846_v57, %v15845_v13  ;;  %v15848_v34 = vpop.f32.mrb[146].mxu1 }
 0xc84   : > { %v15987_v51 = vpop.f32.mrb[212].mxu0  ;;  %v15849_v35 = vpop.f32.mrb[147].mxu1 }
 0xc85   : > { %v16264_v20 = vadd.f32 %v15847_v14, %v24616_v9  ;;  %v15850_v59 = vadd.f32 %v15849_v35, %v15848_v34  ;;  %v15988_v2 = vpop.f32.mrb[213].mxu0 }
 0xc86   : > { %v15989_v29 = vadd.f32 %v15988_v2, %v15987_v51  ;;  %v15990_v43 = vpop.f32.mrb[214].mxu0 }
 0xc87   : > { %v16270_v41 = vadd.f32 %v15850_v59, %v24620_v4  ;;  %v15991_v32 = vpop.f32.mrb[215].mxu0  ;;  %v24738_v26 = vadd.f32 %v16264_v20, %v15983_v60 }
 0xc88   : > { %v15992_v28 = vadd.f32 %v15991_v32, %v15990_v43 }
 0xc89   : > { %v15851_v52 = vpop.f32.mrb[148].mxu1  ;;  %v24740_v47 = vadd.f32 %v16270_v41, %v15986_v38 }
 0xc8a   : > { %v15852_v48 = vpop.f32.mrb[149].mxu1 }
 0xc8b   : > { %v15853_v25 = vadd.f32 %v15852_v48, %v15851_v52  ;;  %v15854_v17 = vpop.f32.mrb[150].mxu1 }
 0xc8c   : > { %v15993_v61 = vpop.f32.mrb[216].mxu0  ;;  %v15855_v40 = vpop.f32.mrb[151].mxu1 }
 0xc8d   : > { %v16261_v9 = vadd.f32 %v15853_v25, %v24628_v27  ;;  %v15856_v37 = vadd.f32 %v15855_v40, %v15854_v17  ;;  %v15994_v10 = vpop.f32.mrb[217].mxu0 }
 0xc8e   : > { %v15995_v3 = vadd.f32 %v15994_v10, %v15993_v61  ;;  %v15996_v56 = vpop.f32.mrb[218].mxu0 }
 0xc8f   : > { %v16267_v4 = vadd.f32 %v15856_v37, %v24632_v36  ;;  %v15997_v18 = vpop.f32.mrb[219].mxu0  ;;  %v24744_v60 = vadd.f32 %v16261_v9, %v15989_v29 }
 0xc90   : > { %v15998_v5 = vadd.f32 %v15997_v18, %v15996_v56 }
 0xc91   : > { %v15857_v15 = vpop.f32.mrb[152].mxu1  ;;  %v24746_v54 = vadd.f32 %v16267_v4, %v15992_v28 }
 0xc92   : > { %v15858_v38 = vpop.f32.mrb[153].mxu1 }
 0xc93   : > { %v15859_v13 = vadd.f32 %v15858_v38, %v15857_v15  ;;  %v15860_v57 = vpop.f32.mrb[154].mxu1 }
 0xc94   : > { %v15999_v14 = vpop.f32.mrb[220].mxu0  ;;  %v15861_v34 = vpop.f32.mrb[155].mxu1 }
 0xc95   : > { %v16276_v27 = vadd.f32 %v15859_v13, %v24634_v53  ;;  %v15862_v51 = vadd.f32 %v15861_v34, %v15860_v57  ;;  %v16000_v35 = vpop.f32.mrb[221].mxu0 }
 0xc96   : > { %v16001_v20 = vadd.f32 %v16000_v35, %v15999_v14  ;;  %v16002_v59 = vpop.f32.mrb[222].mxu0 }
 0xc97   : > { %v16282_v36 = vadd.f32 %v15862_v51, %v24638_v30  ;;  %v16003_v2 = vpop.f32.mrb[223].mxu0  ;;  %v24750_v29 = vadd.f32 %v16276_v27, %v15995_v3 }
 0xc98   : > { %v16004_v43 = vadd.f32 %v16003_v2, %v16002_v59 }
 0xc99   : > { %v15863_v41 = vpop.f32.mrb[156].mxu1  ;;  %v24752_v32 = vadd.f32 %v16282_v36, %v15998_v5 }
 0xc9a   : > { %v15864_v28 = vpop.f32.mrb[157].mxu1 }
 0xc9b   : > { %v15865_v52 = vadd.f32 %v15864_v28, %v15863_v41  ;;  %v15866_v48 = vpop.f32.mrb[158].mxu1 }
 0xc9c   : > { %v16005_v25 = vpop.f32.mrb[224].mxu0  ;;  %v15867_v17 = vpop.f32.mrb[159].mxu1 }
 0xc9d   : > { %v16273_v53 = vadd.f32 %v15865_v52, %v24640_v6  ;;  %v15868_v61 = vadd.f32 %v15867_v17, %v15866_v48  ;;  %v16006_v40 = vpop.f32.mrb[225].mxu0 }
 0xc9e   : > { %v16007_v9 = vadd.f32 %v16006_v40, %v16005_v25  ;;  %v16008_v37 = vpop.f32.mrb[226].mxu0 }
 0xc9f   : > { %v16279_v30 = vadd.f32 %v15868_v61, %v24644_v62  ;;  %v16009_v10 = vpop.f32.mrb[227].mxu0  ;;  %v24756_v3 = vadd.f32 %v16273_v53, %v16001_v20 }
 0xca0   : > { %v16010_v56 = vadd.f32 %v16009_v10, %v16008_v37 }
 0xca1   : > { %v15869_v4 = vpop.f32.mrb[160].mxu1  ;;  %v24758_v18 = vadd.f32 %v16279_v30, %v16004_v43 }
 0xca2   : > { %v15870_v5 = vpop.f32.mrb[161].mxu1 }
 0xca3   : > { %v15871_v15 = vadd.f32 %v15870_v5, %v15869_v4  ;;  %v15872_v38 = vpop.f32.mrb[162].mxu1 }
 0xca4   : > { %v16011_v13 = vpop.f32.mrb[228].mxu0  ;;  %v15873_v57 = vpop.f32.mrb[163].mxu1 }
 0xca5   : > { %v16288_v6 = vadd.f32 %v15871_v15, %v24646_v11  ;;  %v15874_v14 = vadd.f32 %v15873_v57, %v15872_v38  ;;  %v16012_v34 = vpop.f32.mrb[229].mxu0 }
 0xca6   : > { %v16013_v27 = vadd.f32 %v16012_v34, %v16011_v13  ;;  %v16014_v51 = vpop.f32.mrb[230].mxu0 }
 0xca7   : > { %v16294_v62 = vadd.f32 %v15874_v14, %v24650_v39  ;;  %v16015_v35 = vpop.f32.mrb[231].mxu0  ;;  %v24762_v20 = vadd.f32 %v16288_v6, %v16007_v9 }
 0xca8   : > { %v16016_v59 = vadd.f32 %v16015_v35, %v16014_v51 }
 0xca9   : > { %v15875_v36 = vpop.f32.mrb[164].mxu1  ;;  %v24764_v2 = vadd.f32 %v16294_v62, %v16010_v56 }
 0xcaa   : > { %v15876_v43 = vpop.f32.mrb[165].mxu1 }
 0xcab   : > { %v15877_v41 = vadd.f32 %v15876_v43, %v15875_v36  ;;  %v15878_v28 = vpop.f32.mrb[166].mxu1 }
 0xcac   : > { %v16017_v52 = vpop.f32.mrb[232].mxu0  ;;  %v15879_v48 = vpop.f32.mrb[167].mxu1 }
 0xcad   : > { %v16285_v11 = vadd.f32 %v15877_v41, %v24652_v19  ;;  %v15880_v25 = vadd.f32 %v15879_v48, %v15878_v28  ;;  %v16018_v17 = vpop.f32.mrb[233].mxu0 }
 0xcae   : > { %v16019_v53 = vadd.f32 %v16018_v17, %v16017_v52  ;;  %v16020_v61 = vpop.f32.mrb[234].mxu0 }
 0xcaf   : > { %v16291_v39 = vadd.f32 %v15880_v25, %v24656_v22  ;;  %v16021_v40 = vpop.f32.mrb[235].mxu0  ;;  %v24768_v9 = vadd.f32 %v16285_v11, %v16013_v27 }
 0xcb0   : > { %v16022_v37 = vadd.f32 %v16021_v40, %v16020_v61 }
 0xcb1   : > { %v15881_v30 = vpop.f32.mrb[168].mxu1  ;;  %v24770_v10 = vadd.f32 %v16291_v39, %v16016_v59 }
 0xcb2   : > { %v15882_v56 = vpop.f32.mrb[169].mxu1 }
 0xcb3   : > { %v15883_v4 = vadd.f32 %v15882_v56, %v15881_v30  ;;  %v15884_v5 = vpop.f32.mrb[170].mxu1 }
 0xcb4   : > { %v16023_v15 = vpop.f32.mrb[236].mxu0  ;;  %v15885_v38 = vpop.f32.mrb[171].mxu1 }
 0xcb5   : > { %v16300_v19 = vadd.f32 %v15883_v4, %v24658_v42  ;;  %v15886_v13 = vadd.f32 %v15885_v38, %v15884_v5  ;;  %v16024_v57 = vpop.f32.mrb[237].mxu0 }
 0xcb6   : > { %v16025_v6 = vadd.f32 %v16024_v57, %v16023_v15  ;;  %v16026_v14 = vpop.f32.mrb[238].mxu0 }
 0xcb7   : > { %v16306_v22 = vadd.f32 %v15886_v13, %v24662_v8  ;;  %v16027_v34 = vpop.f32.mrb[239].mxu0  ;;  %v24774_v27 = vadd.f32 %v16300_v19, %v16019_v53  ;;  %v24787_v8 = vld [vmem:[%s24887_s8] ss:$0 sm:$0xff] }
 0xcb8   : > { %v16028_v51 = vadd.f32 %v16027_v34, %v16026_v14 }
 0xcb9   : > { %v15887_v62 = vpop.f32.mrb[172].mxu1  ;;  %v24776_v35 = vadd.f32 %v16306_v22, %v16022_v37 }
 0xcba   : > { %v15888_v59 = vpop.f32.mrb[173].mxu1 }
 0xcbb   : > { %v15889_v36 = vadd.f32 %v15888_v59, %v15887_v62  ;;  %v15890_v43 = vpop.f32.mrb[174].mxu1 }
 0xcbc   : > { %v15891_v41 = vpop.f32.mrb[175].mxu1 }
 0xcbd   : > { %v16297_v28 = vadd.f32 %v15889_v36, %v24664_v55  ;;  %v15892_v42 = vadd.f32 %v15891_v41, %v15890_v43 }
 0xcbf   : > { %v16303_v52 = vadd.f32 %v15892_v42, %v24668_v58  ;;  %v24780_v48 = vadd.f32 %v16297_v28, %v16025_v6 }
 0xcc1   : > { %v24782_v11 = vadd.f32 %v16303_v52, %v16028_v51 }
 0xd01   : > { %v16167_v25 = vpop.f32.mrb[80].mxu1 }
 0xd02   : > { %v16215_v17 = vadd.f32 %v24684_v7, %v16167_v25  ;;  %v12567_v53 = vpop.f32.mrb[81].mxu1 }
 0xd03   : > { %v16218_v61 = vadd.f32 %v24676_v23, %v12567_v53  ;;  %v16168_v39 = vpop.f32.mrb[82].mxu1 }
 0xd04   : > { %v12782_v55 = vadd.f32 %v16215_v17, %v24787_v8  ;;  %v16221_v58 = vadd.f32 %v24686_v12, %v16168_v39  ;;  %v12570_v40 = vpop.f32.mrb[83].mxu1 }
 0xd05   : > { %v12780_v37 = vadd.f32 %v16218_v61, %v24787_v8  ;;  %v16224_v30 = vadd.f32 %v24678_v24, %v12570_v40 }
 0xd06   : > { %v14444_v56 = vmul.f32 -1.442695, %v12782_v55  ;;  %v12783_v4 = vadd.f32 %v16221_v58, %v24787_v8 }
 0xd07   : > { %v14442_v5 = vmul.f32 -1.442695, %v12780_v37  ;;  %v12781_v15 = vadd.f32 %v16224_v30, %v24787_v8 }
 0xd08   : > { %17904 = vpow2.f32 %v14444_v56  ;;  %v14445_v7 = vmul.f32 -1.442695, %v12783_v4 }
 0xd09   : > { %17906 = vpow2.f32 %v14442_v5  ;;  %v14443_v23 = vmul.f32 -1.442695, %v12781_v15  ;;  %v16171_v38 = vpop.f32.mrb[84].mxu1 }
 0xd0a   : > { %17908 = vpow2.f32 %v14445_v7  ;;  %v16227_v19 = vadd.f32 %v24708_v63, %v16171_v38  ;;  %v12583_v12 = vpop.f32.mrb[85].mxu1 }
 0xd0b   : > { %17910 = vpow2.f32 %v14443_v23  ;;  %v16230_v13 = vadd.f32 %v24692_v46, %v12583_v12  ;;  %v16172_v57 = vpop.f32.mrb[86].mxu1 }
 0xd0c   : > { %v12786_v24 = vadd.f32 %v16227_v19, %v24787_v8  ;;  %v16233_v6 = vadd.f32 %v24710_v1, %v16172_v57  ;;  %v12586_v14 = vpop.f32.mrb[87].mxu1 }
 0xd0d   : > { %v12784_v22 = vadd.f32 %v16230_v13, %v24787_v8  ;;  %v16236_v34 = vadd.f32 %v24694_v50, %v12586_v14 }
 0xd0e   : > { %v14448_v51 = vmul.f32 -1.442695, %v12786_v24  ;;  %v12787_v62 = vadd.f32 %v16233_v6, %v24787_v8 }
 0xd0f   : > { %v14446_v59 = vmul.f32 -1.442695, %v12784_v22  ;;  %v12785_v63 = vadd.f32 %v16236_v34, %v24787_v8 }
 0xd10   : > { %17912 = vpow2.f32 %v14448_v51  ;;  %v14449_v36 = vmul.f32 -1.442695, %v12787_v62 }
 0xd11   : > { %17914 = vpow2.f32 %v14446_v59  ;;  %v14447_v46 = vmul.f32 -1.442695, %v12785_v63  ;;  %v16175_v43 = vpop.f32.mrb[88].mxu1 }
 0xd12   : > { %v17905_v41 = vpop.eup %17904  ;;  %17916 = vpow2.f32 %v14449_v36  ;;  %v16239_v1 = vadd.f32 %v24720_v16, %v16175_v43  ;;  %v12599_v28 = vpop.f32.mrb[89].mxu1 }
 0xd13   : > { %v17907_v42 = vpop.eup %17906  ;;  %v12846_v52 = vadd.f32 1.0, %v17905_v41  ;;  %17918 = vpow2.f32 %v14447_v46  ;;  %v16242_v50 = vadd.f32 %v24714_v45, %v12599_v28  ;;  %v16176_v25 = vpop.f32.mrb[90].mxu1 }
 0xd14   : > { %v17909_v17 = vpop.eup %17908  ;;  %v12844_v53 = vadd.f32 1.0, %v17907_v42  ;;  %v12790_v61 = vadd.f32 %v16239_v1, %v24787_v8  ;;  %v16245_v39 = vadd.f32 %v24722_v44, %v16176_v25  ;;  %v12602_v55 = vpop.f32.mrb[91].mxu1 }
 0xd15   : > { %v17911_v58 = vpop.eup %17910  ;;  %17920 = vrcp.f32 %v12846_v52  ;;  %v12847_v40 = vadd.f32 1.0, %v17909_v17  ;;  %v12788_v37 = vadd.f32 %v16242_v50, %v24787_v8  ;;  %v16248_v16 = vadd.f32 %v24716_v33, %v12602_v55 }
 0xd16   : > { %17922 = vrcp.f32 %v12844_v53  ;;  %v12845_v30 = vadd.f32 1.0, %v17911_v58  ;;  %v14452_v56 = vmul.f32 -1.442695, %v12790_v61  ;;  %v12791_v45 = vadd.f32 %v16245_v39, %v24787_v8 }
 0xd17   : > { %17924 = vrcp.f32 %v12847_v40  ;;  %v14450_v4 = vmul.f32 -1.442695, %v12788_v37  ;;  %v12789_v5 = vadd.f32 %v16248_v16, %v24787_v8 }
 0xd18   : > { %17926 = vrcp.f32 %v12845_v30  ;;  %v14453_v15 = vmul.f32 -1.442695, %v12791_v45 }
 0xd19   : > { %17928 = vpow2.f32 %v14452_v56  ;;  %v14451_v44 = vmul.f32 -1.442695, %v12789_v5  ;;  %v16179_v7 = vpop.f32.mrb[92].mxu1 }
 0xd1a   : > { %v17913_v23 = vpop.eup %17912  ;;  %17930 = vpow2.f32 %v14450_v4  ;;  %v16251_v38 = vadd.f32 %v24732_v0, %v16179_v7  ;;  %v12615_v19 = vpop.f32.mrb[93].mxu1 }
 0xd1b   : > { %v17915_v33 = vpop.eup %17914  ;;  %v12850_v12 = vadd.f32 1.0, %v17913_v23  ;;  %17932 = vpow2.f32 %v14453_v15  ;;  %v16254_v13 = vadd.f32 %v24726_v21, %v12615_v19  ;;  %v16180_v57 = vpop.f32.mrb[94].mxu1 }
 0xd1c   : > { %v17917_v24 = vpop.eup %17916  ;;  %v12848_v6 = vadd.f32 1.0, %v17915_v33  ;;  %17934 = vpow2.f32 %v14451_v44  ;;  %v12794_v14 = vadd.f32 %v16251_v38, %v24787_v8  ;;  %v16257_v22 = vadd.f32 %v24734_v49, %v16180_v57  ;;  %v12618_v34 = vpop.f32.mrb[95].mxu1 }
 0xd1d   : > { %v17919_v51 = vpop.eup %17918  ;;  %17936 = vrcp.f32 %v12850_v12  ;;  %v12851_v62 = vadd.f32 1.0, %v17917_v24  ;;  %v12792_v0 = vadd.f32 %v16254_v13, %v24787_v8  ;;  %v16260_v59 = vadd.f32 %v24728_v31, %v12618_v34 }
 0xd1e   : > { %17938 = vrcp.f32 %v12848_v6  ;;  %v12849_v63 = vadd.f32 1.0, %v17919_v51  ;;  %v14456_v21 = vmul.f32 -1.442695, %v12794_v14  ;;  %v12795_v36 = vadd.f32 %v16257_v22, %v24787_v8 }
 0xd1f   : > { %v17921_v46 = vpop.eup %17920  ;;  %17940 = vrcp.f32 %v12851_v62  ;;  %v14454_v43 = vmul.f32 -1.442695, %v12792_v0  ;;  %v12793_v41 = vadd.f32 %v16260_v59, %v24787_v8 }
 0xd20   : > { %v17923_v49 = vpop.eup %17922  ;;  %17942 = vrcp.f32 %v12849_v63  ;;  %v14457_v1 = vmul.f32 -1.442695, %v12795_v36 }
 0xd21   : > { %v17925_v28 = vpop.eup %17924  ;;  %17944 = vpow2.f32 %v14456_v21  ;;  %v14455_v31 = vmul.f32 -1.442695, %v12793_v41  ;;  %v16183_v42 = vpop.f32.mrb[96].mxu1 }
 0xd22   : > { %v17927_v52 = vpop.eup %17926  ;;  %v14550_v50 = vpack.c.bf16 %v17925_v28, %v17921_v46  ;;  %17946 = vpow2.f32 %v14454_v43  ;;  %v16263_v25 = vadd.f32 %v24744_v60, %v16183_v42  ;;  %v12631_v17 = vpop.f32.mrb[97].mxu1 }
 0xd23   : > { %v17929_v53 = vpop.eup %17928  ;;  %v14545_v61 = vpack.c.bf16 %v17927_v52, %v17923_v49  ;;  %17948 = vpow2.f32 %v14457_v1  ;;  %v16266_v39 = vadd.f32 %v24738_v26, %v12631_v17  ;;  %v16184_v55 = vpop.f32.mrb[98].mxu1 }
 0xd24   : > { %v17931_v58 = vpop.eup %17930  ;;  %14622 = vst [vmem:[%s24826_s26 + $0x8] sm:$0xff] %v14550_v50   ;;  %v12854_v40 = vadd.f32 1.0, %v17929_v53  ;;  %17950 = vpow2.f32 %v14455_v31  ;;  %v12990_v37 = vadd.f32 %v16263_v25, %v24787_v8  ;;  %v16269_v16 = vadd.f32 %v24746_v54, %v16184_v55  ;;  %v12634_v30 = vpop.f32.mrb[99].mxu1 }
 0xd25   : > { %v17933_v56 = vpop.eup %17932  ;;  %14546 = vst [vmem:[%s24826_s26] sm:$0xff] %v14545_v61   ;;  %v12852_v45 = vadd.f32 1.0, %v17931_v58  ;;  %v12988_v60 = vadd.f32 %v16266_v39, %v24787_v8  ;;  %v16272_v4 = vadd.f32 %v24740_v47, %v12634_v30 }
 0xd26   : > { %v17935_v5 = vpop.eup %17934  ;;  %17952 = vrcp.f32 %v12854_v40  ;;  %v12855_v26 = vadd.f32 1.0, %v17933_v56  ;;  %v14476_v15 = vmul.f32 -1.442695, %v12990_v37  ;;  %v12991_v44 = vadd.f32 %v16269_v16, %v24787_v8 }
 0xd27   : > { %v17937_v7 = vpop.eup %17936  ;;  %17954 = vrcp.f32 %v12852_v45  ;;  %v12853_v23 = vadd.f32 1.0, %v17935_v5  ;;  %v14474_v38 = vmul.f32 -1.442695, %v12988_v60  ;;  %v12989_v54 = vadd.f32 %v16272_v4, %v24787_v8 }
 0xd28   : > { %v17939_v19 = vpop.eup %17938  ;;  %17956 = vrcp.f32 %v12855_v26  ;;  %v14477_v33 = vmul.f32 -1.442695, %v12991_v44 }
 0xd29   : > { %v17941_v12 = vpop.eup %17940  ;;  %17958 = vrcp.f32 %v12853_v23  ;;  %v14475_v13 = vmul.f32 -1.442695, %v12989_v54  ;;  %v16187_v47 = vpop.f32.mrb[100].mxu1 }
 0xd2a   : > { %v17943_v57 = vpop.eup %17942  ;;  %v14560_v24 = vpack.c.bf16 %v17941_v12, %v17937_v7  ;;  %17960 = vpow2.f32 %v14476_v15  ;;  %v16275_v6 = vadd.f32 %v24756_v3, %v16187_v47  ;;  %v12647_v14 = vpop.f32.mrb[101].mxu1 }
 0xd2b   : > { %v17945_v22 = vpop.eup %17944  ;;  %v14555_v34 = vpack.c.bf16 %v17943_v57, %v17939_v19  ;;  %17962 = vpow2.f32 %v14474_v38  ;;  %v16278_v51 = vadd.f32 %v24750_v29, %v12647_v14  ;;  %v16188_v62 = vpop.f32.mrb[102].mxu1 }
 0xd2c   : > { %v17947_v0 = vpop.eup %17946  ;;  %14624 = vst [vmem:[%s24826_s26 + $0x18] sm:$0xff] %v14560_v24   ;;  %v12858_v59 = vadd.f32 1.0, %v17945_v22  ;;  %17964 = vpow2.f32 %v14477_v33  ;;  %v12994_v63 = vadd.f32 %v16275_v6, %v24787_v8  ;;  %v16281_v21 = vadd.f32 %v24758_v18, %v16188_v62  ;;  %v12650_v36 = vpop.f32.mrb[103].mxu1 }
 0xd2d   : > { %v17949_v46 = vpop.eup %17948  ;;  %14623 = vst [vmem:[%s24826_s26 + $0x10] sm:$0xff] %v14555_v34   ;;  %v12856_v43 = vadd.f32 1.0, %v17947_v0  ;;  %17966 = vpow2.f32 %v14475_v13  ;;  %v12992_v3 = vadd.f32 %v16278_v51, %v24787_v8  ;;  %v16284_v41 = vadd.f32 %v24752_v32, %v12650_v36 }
 0xd2e   : > { %v17951_v49 = vpop.eup %17950  ;;  %17968 = vrcp.f32 %v12858_v59  ;;  %v12859_v29 = vadd.f32 1.0, %v17949_v46  ;;  %v14480_v1 = vmul.f32 -1.442695, %v12994_v63  ;;  %v12995_v28 = vadd.f32 %v16281_v21, %v24787_v8 }
 0xd2f   : > { %17970 = vrcp.f32 %v12856_v43  ;;  %v12857_v31 = vadd.f32 1.0, %v17951_v49  ;;  %v14478_v42 = vmul.f32 -1.442695, %v12992_v3  ;;  %v12993_v18 = vadd.f32 %v16284_v41, %v24787_v8 }
 0xd30   : > { %v17953_v52 = vpop.eup %17952  ;;  %17972 = vrcp.f32 %v12859_v29  ;;  %v14481_v50 = vmul.f32 -1.442695, %v12995_v28 }
 0xd31   : > { %v17955_v25 = vpop.eup %17954  ;;  %17974 = vrcp.f32 %v12857_v31  ;;  %v14479_v17 = vmul.f32 -1.442695, %v12993_v18  ;;  %v16191_v53 = vpop.f32.mrb[104].mxu1 }
 0xd32   : > { %v17957_v61 = vpop.eup %17956  ;;  %17976 = vpow2.f32 %v14480_v1  ;;  %v16287_v32 = vadd.f32 %v24768_v9, %v16191_v53  ;;  %v12663_v39 = vpop.f32.mrb[105].mxu1 }
 0xd33   : > { %v17959_v55 = vpop.eup %17958  ;;  %v14570_v58 = vpack.c.bf16 %v17957_v61, %v17953_v52  ;;  %17978 = vpow2.f32 %v14478_v42  ;;  %v16290_v40 = vadd.f32 %v24762_v20, %v12663_v39  ;;  %v16192_v37 = vpop.f32.mrb[106].mxu1 }
 0xd34   : > { %v17961_v16 = vpop.eup %17960  ;;  %v14565_v30 = vpack.c.bf16 %v17959_v55, %v17955_v25  ;;  %17980 = vpow2.f32 %v14481_v50  ;;  %v12998_v56 = vadd.f32 %v16287_v32, %v24787_v8  ;;  %v16293_v45 = vadd.f32 %v24770_v10, %v16192_v37  ;;  %v12666_v60 = vpop.f32.mrb[107].mxu1 }
 0xd35   : > { %v17963_v4 = vpop.eup %17962  ;;  %14626 = vst [vmem:[%s24826_s26 + $0x28] sm:$0xff] %v14570_v58   ;;  %v13054_v5 = vadd.f32 1.0, %v17961_v16  ;;  %17982 = vpow2.f32 %v14479_v17  ;;  %v12996_v9 = vadd.f32 %v16290_v40, %v24787_v8  ;;  %v16296_v26 = vadd.f32 %v24764_v2, %v12666_v60 }
 0xd36   : > { %v17965_v15 = vpop.eup %17964  ;;  %14625 = vst [vmem:[%s24826_s26 + $0x20] sm:$0xff] %v14565_v30   ;;  %v13052_v20 = vadd.f32 1.0, %v17963_v4  ;;  %v12999_v44 = vadd.f32 %v16293_v45, %v24787_v8  ;;  %v14484_v38 = vmul.f32 -1.442695, %v12998_v56 }
 0xd37   : > { %v17967_v7 = vpop.eup %17966  ;;  %17984 = vrcp.f32 %v13054_v5  ;;  %v13055_v23 = vadd.f32 1.0, %v17965_v15  ;;  %v12997_v10 = vadd.f32 %v16296_v26, %v24787_v8  ;;  %v14482_v33 = vmul.f32 -1.442695, %v12996_v9 }
 0xd38   : > { %v17969_v54 = vpop.eup %17968  ;;  %17986 = vrcp.f32 %v13052_v20  ;;  %v13053_v19 = vadd.f32 1.0, %v17967_v7  ;;  %v14485_v13 = vmul.f32 -1.442695, %v12999_v44 }
 0xd39   : > { %v17971_v12 = vpop.eup %17970  ;;  %17988 = vrcp.f32 %v13055_v23  ;;  %v16195_v47 = vpop.f32.mrb[108].mxu1  ;;  %v14483_v57 = vmul.f32 -1.442695, %v12997_v10 }
 0xd3a   : > { %v17973_v2 = vpop.eup %17972  ;;  %17990 = vrcp.f32 %v13053_v19  ;;  %v16299_v24 = vadd.f32 %v24780_v48, %v16195_v47  ;;  %v12679_v6 = vpop.f32.mrb[109].mxu1 }
 0xd3b   : > { %v17975_v14 = vpop.eup %17974  ;;  %v14580_v22 = vpack.c.bf16 %v17973_v2, %v17969_v54  ;;  %17992 = vpow2.f32 %v14484_v38  ;;  %v16302_v34 = vadd.f32 %v24774_v27, %v12679_v6  ;;  %v16196_v51 = vpop.f32.mrb[110].mxu1 }
 0xd3c   : > { %v17977_v62 = vpop.eup %17976  ;;  %v14575_v0 = vpack.c.bf16 %v17975_v14, %v17971_v12  ;;  %17994 = vpow2.f32 %v14482_v33  ;;  %v13002_v59 = vadd.f32 %v16299_v24, %v24787_v8  ;;  %v16305_v63 = vadd.f32 %v24782_v11, %v16196_v51  ;;  %v12682_v21 = vpop.f32.mrb[111].mxu1 }
 0xd3d   : > { %v17979_v36 = vpop.eup %17978  ;;  %14628 = vst [vmem:[%s24826_s26 + $0x38] sm:$0xff] %v14580_v22   ;;  %v13058_v46 = vadd.f32 1.0, %v17977_v62  ;;  %17996 = vpow2.f32 %v14485_v13  ;;  %v13000_v48 = vadd.f32 %v16302_v34, %v24787_v8  ;;  %v16308_v43 = vadd.f32 %v24776_v35, %v12682_v21 }
 0xd3e   : > { %v17981_v3 = vpop.eup %17980  ;;  %14627 = vst [vmem:[%s24826_s26 + $0x30] sm:$0xff] %v14575_v0   ;;  %v13056_v27 = vadd.f32 1.0, %v17979_v36  ;;  %17998 = vpow2.f32 %v14483_v57  ;;  %v13003_v41 = vadd.f32 %v16305_v63, %v24787_v8  ;;  %v14488_v1 = vmul.f32 -1.442695, %v13002_v59 }
 0xd3f   : > { %v17983_v49 = vpop.eup %17982  ;;  %18000 = vrcp.f32 %v13058_v46  ;;  %v13059_v29 = vadd.f32 1.0, %v17981_v3  ;;  %v13001_v11 = vadd.f32 %v16308_v43, %v24787_v8  ;;  %v14486_v31 = vmul.f32 -1.442695, %v13000_v48 }
 0xd40   : > { %18002 = vrcp.f32 %v13056_v27  ;;  %v13057_v28 = vadd.f32 1.0, %v17983_v49  ;;  %v14489_v18 = vmul.f32 -1.442695, %v13003_v41 }
 0xd41   : > { %v17985_v42 = vpop.eup %17984  ;;  %18004 = vrcp.f32 %v13059_v29  ;;  %v14487_v52 = vmul.f32 -1.442695, %v13001_v11 }
 0xd42   : > { %v17987_v35 = vpop.eup %17986  ;;  %18006 = vrcp.f32 %v13057_v28 }
 0xd43   : > { %v17989_v50 = vpop.eup %17988  ;;  %18008 = vpow2.f32 %v14488_v1 }
 0xd44   : > { %v17991_v25 = vpop.eup %17990  ;;  %v14590_v17 = vpack.c.bf16 %v17989_v50, %v17985_v42  ;;  %18010 = vpow2.f32 %v14486_v31 }
 0xd45   : > { %v17993_v53 = vpop.eup %17992  ;;  %v14585_v61 = vpack.c.bf16 %v17991_v25, %v17987_v35  ;;  %18012 = vpow2.f32 %v14489_v18 }
 0xd46   : > { %v17995_v8 = vpop.eup %17994  ;;  %14630 = vst [vmem:[%s24826_s26 + $0x48] sm:$0xff] %v14590_v17   ;;  %v13062_v32 = vadd.f32 1.0, %v17993_v53  ;;  %18014 = vpow2.f32 %v14487_v52 }
 0xd47   : > { %v17997_v39 = vpop.eup %17996  ;;  %14629 = vst [vmem:[%s24826_s26 + $0x40] sm:$0xff] %v14585_v61   ;;  %v13060_v55 = vadd.f32 1.0, %v17995_v8 }
 0xd48   : > { %v17999_v58 = vpop.eup %17998  ;;  %18016 = vrcp.f32 %v13062_v32  ;;  %v13063_v40 = vadd.f32 1.0, %v17997_v39 }
 0xd49   : > { %v18001_v37 = vpop.eup %18000  ;;  %18018 = vrcp.f32 %v13060_v55  ;;  %v13061_v16 = vadd.f32 1.0, %v17999_v58 }
 0xd4a   : > { %v18003_v30 = vpop.eup %18002  ;;  %18020 = vrcp.f32 %v13063_v40 }
 0xd4b   : > { %v18005_v56 = vpop.eup %18004  ;;  %18022 = vrcp.f32 %v13061_v16 }
 0xd4c   : > { %v18007_v45 = vpop.eup %18006  ;;  %v14600_v60 = vpack.c.bf16 %v18005_v56, %v18001_v37 }
 0xd4d   : > { %v18009_v4 = vpop.eup %18008  ;;  %v14595_v5 = vpack.c.bf16 %v18007_v45, %v18003_v30 }
 0xd4e   : > { %v18011_v9 = vpop.eup %18010  ;;  %14632 = vst [vmem:[%s24826_s26 + $0x58] sm:$0xff] %v14600_v60   ;;  %v13066_v26 = vadd.f32 1.0, %v18009_v4 }
 0xd4f   : > { %v18013_v15 = vpop.eup %18012  ;;  %14631 = vst [vmem:[%s24826_s26 + $0x50] sm:$0xff] %v14595_v5   ;;  %v13064_v20 = vadd.f32 1.0, %v18011_v9 }
 0xd50   : > { %v18015_v44 = vpop.eup %18014  ;;  %18024 = vrcp.f32 %v13066_v26  ;;  %v13067_v7 = vadd.f32 1.0, %v18013_v15 }
 0xd51   : > { %18026 = vrcp.f32 %v13064_v20  ;;  %v13065_v23 = vadd.f32 1.0, %v18015_v44 }
 0xd52   : > { %v18017_v38 = vpop.eup %18016  ;;  %18028 = vrcp.f32 %v13067_v7 }
 0xd53   : > { %v18019_v10 = vpop.eup %18018  ;;  %18030 = vrcp.f32 %v13065_v23 }
 0xd54   : > { %v18021_v54 = vpop.eup %18020 }
 0xd55   : > { %v18023_v19 = vpop.eup %18022  ;;  %v14610_v33 = vpack.c.bf16 %v18021_v54, %v18017_v38 }
 0xd56   : > { %v14605_v12 = vpack.c.bf16 %v18023_v19, %v18019_v10 }
 0xd57   : > { %14634 = vst [vmem:[%s24826_s26 + $0x68] sm:$0xff] %v14610_v33  }
 0xd58   : > { %14633 = vst [vmem:[%s24826_s26 + $0x60] sm:$0xff] %v14605_v12  }
 0xd5a   : > { %v18025_v13 = vpop.eup %18024 }
 0xd5b   : > { %v18027_v47 = vpop.eup %18026 }
 0xd5c   : > { %v18029_v2 = vpop.eup %18028 }
 0xd5d   : > { %v18031_v57 = vpop.eup %18030  ;;  %v14620_v24 = vpack.c.bf16 %v18029_v2, %v18025_v13 }
 0xd5e   : > { %v14615_v6 = vpack.c.bf16 %v18031_v57, %v18027_v47 }
 0xd5f   : > { %14636 = vst [vmem:[%s24826_s26 + $0x78] sm:$0xff] %v14620_v24  }
 0xd60   : > { %14635 = vst [vmem:[%s24826_s26 + $0x70] sm:$0xff] %v14615_v6  }
 0xd61 PF: > { %s20_s13 = sadd.s32 1, %s18039_s13  }
 0xd62   : > { %p17_p4 = scmp.ge.s32.totalorder %s20_s13, 4  }
 0xd64   :  { %19 = sbr.rel (!%p17_p4) target bundleno = 1 (0x1), region = 97 }

</bundles_post_ra>
